<compile_context>
chip_gen: v7x
topology: tpu7x:2x2x1
jax: 0.10.0
libtpu: 0.0.40
codegen_flags: <defaults>
</compile_context>

<pallas_src>
import jax
import jax.numpy as jnp
from jax.experimental import pallas as pl
from jax.experimental.pallas import tpu as pltpu

EPS = 1e-5       # nn.BatchNorm2d default eps
MAX_TR = 512     # max row tile (multiple of 8)


def _vmem_limit():
    try:
        cap = int(pltpu.get_tpu_info().vmem_capacity_bytes)
    except Exception:
        cap = 64 * 1024 * 1024
    # leave headroom: v5e/v6e (128 MiB) -> 96 MiB, v7x (64 MiB) -> 48 MiB
    return max(32 * 1024 * 1024, min(96 * 1024 * 1024, (cap * 3) // 4))


VMEM_LIMIT = _vmem_limit()


# ----------------------------- Pallas kernels -------------------------------------

def _matmul_stats_kernel(x_ref, w_ref, y_ref, s_ref, q_ref):
    """y = x @ w (bf16 MXU, f32 acc), streamed out per row tile, plus per-tile
    column sums / sums-of-squares (row 0 of an 8-row stats block; rows 1-7 zero).

    No conv bias (it cancels exactly under training-mode BN) and no row masking
    (zero-padded rows produce exactly-zero output -> zero stat contribution).
    """
    y = jnp.dot(x_ref[...], w_ref[...], preferred_element_type=jnp.float32)
    y_ref[...] = y
    s_ref[...] = jnp.zeros_like(s_ref)
    q_ref[...] = jnp.zeros_like(q_ref)
    s_ref[0:1, :] = jnp.sum(y, axis=0, keepdims=True)
    q_ref[0:1, :] = jnp.sum(y * y, axis=0, keepdims=True)


def _bn_relu_kernel(y_ref, scale_ref, shift_ref, o_ref):
    """o = ReLU(y * scale + shift), emitted in bf16 (feeds the next layer's patches)."""
    o_ref[...] = jnp.maximum(
        y_ref[...] * scale_ref[...] + shift_ref[...], 0.0).astype(o_ref.dtype)


def _matmul_bias_tanh_kernel(x_ref, w_ref, b_ref, o_ref):
    """Final deconv: full-width MXU matmul, then only the 4 real phase columns get
    bias + tanh and are stored (lane-masked (TR,4) store)."""
    y = jnp.dot(x_ref[...], w_ref[...], preferred_element_type=jnp.float32)
    o_ref[...] = jnp.tanh(y[:, :o_ref.shape[-1]] + b_ref[...])


# ----------------------------- pallas_call wrappers --------------------------------

def _row_tile(rows, ctot):
    """Largest multiple-of-8 row tile <= MAX_TR keeping one f32 out tile <= ~2 MiB."""
    cap = (2 * 1024 * 1024) // (ctot * 4)
    cap = min(MAX_TR, max(8, (cap // 8) * 8))
    rows8 = max(8, ((rows + 7) // 8) * 8)
    return min(cap, rows8)


def _pad_rows(x, tr):
    r = x.shape[0]
    rp = ((r + tr - 1) // tr) * tr
    return x if rp == r else jnp.pad(x, ((0, rp - r), (0, 0)))


def _matmul_stats(patches, w, tr):
    rpad, k = patches.shape
    ctot = w.shape[1]
    nt = rpad // tr
    return pl.pallas_call(
        _matmul_stats_kernel,
        out_shape=(jax.ShapeDtypeStruct((rpad, ctot), jnp.float32),
                   jax.ShapeDtypeStruct((nt * 8, ctot), jnp.float32),
                   jax.ShapeDtypeStruct((nt * 8, ctot), jnp.float32)),
        grid_spec=pltpu.PrefetchScalarGridSpec(
            num_scalar_prefetch=0,
            grid=(nt,),
            in_specs=[pl.BlockSpec((tr, k), lambda t: (t, 0)),
                      pl.BlockSpec((k, ctot), lambda t: (0, 0))],
            out_specs=[pl.BlockSpec((tr, ctot), lambda t: (t, 0)),
                       pl.BlockSpec((8, ctot), lambda t: (t, 0)),
                       pl.BlockSpec((8, ctot), lambda t: (t, 0))]),
        compiler_params=pltpu.CompilerParams(
            dimension_semantics=("parallel",),
            vmem_limit_bytes=VMEM_LIMIT),
    )(patches, w)


def _bn_relu_apply(y, scale, shift, tr):
    rpad, ctot = y.shape
    return pl.pallas_call(
        _bn_relu_kernel,
        out_shape=jax.ShapeDtypeStruct((rpad, ctot), jnp.bfloat16),
        grid_spec=pltpu.PrefetchScalarGridSpec(
            num_scalar_prefetch=0,
            grid=(rpad // tr,),
            in_specs=[pl.BlockSpec((tr, ctot), lambda t: (t, 0)),
                      pl.BlockSpec((1, ctot), lambda t: (0, 0)),
                      pl.BlockSpec((1, ctot), lambda t: (0, 0))],
            out_specs=pl.BlockSpec((tr, ctot), lambda t: (t, 0))),
        compiler_params=pltpu.CompilerParams(
            dimension_semantics=("parallel",),
            vmem_limit_bytes=VMEM_LIMIT),
    )(y, scale, shift)


def _tanh_matmul(patches, w, b):
    tr = _row_tile(patches.shape[0], w.shape[1])
    patches = _pad_rows(patches, tr)
    rpad, k = patches.shape
    ctot = w.shape[1]
    cout = b.shape[1]
    return pl.pallas_call(
        _matmul_bias_tanh_kernel,
        out_shape=jax.ShapeDtypeStruct((rpad, cout), jnp.float32),
        grid_spec=pltpu.PrefetchScalarGridSpec(
            num_scalar_prefetch=0,
            grid=(rpad // tr,),
            in_specs=[pl.BlockSpec((tr, k), lambda t: (t, 0)),
                      pl.BlockSpec((k, ctot), lambda t: (0, 0)),
                      pl.BlockSpec((1, cout), lambda t: (0, 0))],
            out_specs=pl.BlockSpec((tr, cout), lambda t: (t, 0))),
        compiler_params=pltpu.CompilerParams(
            dimension_semantics=("parallel",),
            vmem_limit_bytes=VMEM_LIMIT),
    )(patches, w, b)


# ----------------------------- plain-JAX glue --------------------------------------

def _bn_scale_shift(s_out, q_out, gamma, beta, *, count, nblocks, cout):
    """Fold per-tile partials and phase/spatial blocks into per-channel scale/shift."""
    s = jnp.sum(s_out, axis=0).reshape(nblocks, cout).sum(axis=0)
    q = jnp.sum(q_out, axis=0).reshape(nblocks, cout).sum(axis=0)
    mean = s / count
    var = jnp.maximum(q / count - mean * mean, 0.0)    # biased, training-mode BN
    inv = jax.lax.rsqrt(var + EPS)
    scale = gamma * inv
    shift = beta - mean * scale
    scale = jnp.tile(scale, nblocks).reshape(1, nblocks * cout)
    shift = jnp.tile(shift, nblocks).reshape(1, nblocks * cout)
    return scale, shift


def _deconv_bn_relu(patches, w, gamma, beta, *, nvalid, nblocks, cout):
    """patches (rows, K) bf16 @ w (K, nblocks*cout) bf16 -> BN + ReLU, bf16 out."""
    ctot = w.shape[1]
    tr = _row_tile(patches.shape[0], ctot)
    patches = _pad_rows(patches, tr)
    y, s_out, q_out = _matmul_stats(patches, w, tr)
    scale, shift = _bn_scale_shift(s_out, q_out, gamma, beta,
                                   count=float(nvalid * nblocks),
                                   nblocks=nblocks, cout=cout)
    return _bn_relu_apply(y, scale, shift, tr)


def _windows3x3(x_nhwc):
    """1-pixel zero pad + 9 shifted HxW windows concatenated on channels -> (N*H*W, 9C)."""
    n, h, w, c = x_nhwc.shape
    xp = jnp.pad(x_nhwc, ((0, 0), (1, 1), (1, 1), (0, 0)))
    cols = [xp[:, i:i + h, j:j + w, :] for i in range(3) for j in range(3)]
    return jnp.concatenate(cols, axis=-1).reshape(n * h * w, 9 * c)


def _phase_weight(w):
    """Phase-decomposed weight for ConvTranspose2d(k=5,s=2,p=2,op=1): (9*Cin, 4*Cout).

    Row block (i,j) = 3x3 window offset on the 1-padded input; column block
    p = r*2 + c = output phase (oh%2=r, ow%2=c).  Unused (window, phase) taps are 0.
    """
    cin, cout = w.shape[0], w.shape[1]
    win_rows = []
    for i in range(3):
        for j in range(3):
            phase_cols = []
            for r in range(2):
                for c in range(2):
                    kh, ok_h = (4 - 2 * i, True) if r == 0 else (5 - 2 * i, i >= 1)
                    kw, ok_w = (4 - 2 * j, True) if c == 0 else (5 - 2 * j, j >= 1)
                    blk = (w[:, :, kh, kw] if (ok_h and ok_w)
                           else jnp.zeros((cin, cout), w.dtype))
                    phase_cols.append(blk)
            win_rows.append(jnp.concatenate(phase_cols, axis=1))   # (Cin, 4*Cout)
    return jnp.concatenate(win_rows, axis=0)                       # (9*Cin, 4*Cout)


def prepare_params(p):
    """One-time parameter preprocessing (hoisted out of the forward pass)."""
    pp = {}
    # y_decoder: ConvTranspose2d(10,128,k=7,s=1,p=0) on a 1x1 input == dense 10 -> 49*128
    ydim = p["wy"].shape[0]
    w0 = jnp.transpose(p["wy"], (0, 2, 3, 1)).reshape(ydim, 49 * 128)  # col = s*128+co
    pp["w0"] = jnp.pad(w0, ((0, 16 - ydim), (0, 0))).astype(jnp.bfloat16)   # K 10 -> 16
    pp["g0"] = p["gy"].astype(jnp.float32)
    pp["bt0"] = p["bny"].astype(jnp.float32)
    # decoder[0]: ConvTranspose2d(256,64,5,s=2,p=2,op=1) + BN(64), phase-concat Cout=256
    pp["w1"] = _phase_weight(p["w1"]).astype(jnp.bfloat16)                  # (2304, 256)
    pp["g1"] = p["g1"].astype(jnp.float32)
    pp["bt1"] = p["bn1"].astype(jnp.float32)
    # decoder[3]: ConvTranspose2d(64,1,5,s=2,p=2,op=1): 4 real phase cols, zero-pad to 128
    w2 = _phase_weight(p["w2"])                                             # (576, 4)
    pp["w2"] = jnp.pad(w2, ((0, 0), (0, 128 - w2.shape[1]))).astype(jnp.bfloat16)
    pp["b2"] = jnp.broadcast_to(p["b2"].reshape(1, 1), (1, 4)).astype(jnp.float32)
    # note: conv biases by / b1 are intentionally dropped (cancel under training-mode BN)
    return pp


# ----------------------------- Generator forward -----------------------------------

@jax.jit
def generator_forward(z, y, pp):
    """z: (N,128,7,7) NCHW, y: (N,10,1,1) NCHW -> (N,1,28,28) NCHW."""
    n = z.shape[0]
    ydim = y.shape[1]

    # layer 0: y_decoder deconv(10->128,k7) as a direct dense matmul + BN + ReLU
    y2 = jnp.pad(y.reshape(n, ydim), ((0, 0), (0, 16 - ydim))).astype(jnp.bfloat16)
    h0 = _deconv_bn_relu(y2, pp["w0"], pp["g0"], pp["bt0"],
                         nvalid=n, nblocks=49, cout=128)
    h0 = h0[:n].reshape(n, 7, 7, 128)                            # (N,7,7,128) bf16

    # layer 1: cat([z, h0]) -> phase-decomposed deconv(256->64,s=2) + BN + ReLU
    z_nhwc = jnp.transpose(z, (0, 2, 3, 1)).astype(jnp.bfloat16)
    x1 = jnp.concatenate([z_nhwc, h0], axis=-1)                  # (N,7,7,256) bf16
    p1 = _windows3x3(x1)                                         # (N*49, 2304) bf16
    h1 = _deconv_bn_relu(p1, pp["w1"], pp["g1"], pp["bt1"],
                         nvalid=n * 49, nblocks=4, cout=64)      # (rows, 256) bf16
    h1 = (h1[:n * 49].reshape(n, 7, 7, 2, 2, 64)
          .transpose(0, 1, 3, 2, 4, 5).reshape(n, 14, 14, 64))   # (N,14,14,64)

    # layer 2: final phase-decomposed deconv(64->1,s=2) + tanh (4 real output columns)
    p2 = _windows3x3(h1)                                         # (N*196, 576) bf16
    out2 = _tanh_matmul(p2, pp["w2"], pp["b2"])                  # (rows, 4) f32
    o = (out2[:n * 196].reshape(n, 14, 14, 2, 2)
         .transpose(0, 1, 3, 2, 4).reshape(n, 28, 28))
    return o[:, None, :, :]                                      # (N,1,28,28)


# ----------------------------- pure-JAX reference ----------------------------------

def _conv_transpose_ref(x, w, b, stride, pad, out_pad):
    k = w.shape[2]
    wf = jnp.transpose(w[:, :, ::-1, ::-1], (1, 0, 2, 3))        # (Cout,Cin,kh,kw)
    lo, hi = k - 1 - pad, k - 1 - pad + out_pad
    out = jax.lax.conv_general_dilated(
        x, wf, window_strides=(1, 1), padding=[(lo, hi), (lo, hi)],
        lhs_dilation=(stride, stride), rhs_dilation=(1, 1),
        dimension_numbers=("NCHW", "OIHW", "NCHW"))
    return out + b.reshape(1, -1, 1, 1)


def _bn_relu_ref(x, gamma, beta):
    mean = jnp.mean(x, axis=(0, 2, 3), keepdims=True)
    var = jnp.mean(jnp.square(x - mean), axis=(0, 2, 3), keepdims=True)
    xn = (x - mean) * jax.lax.rsqrt(var + EPS)
    return jnp.maximum(xn * gamma.reshape(1, -1, 1, 1) + beta.reshape(1, -1, 1, 1), 0.0)


@jax.jit
def generator_reference(z, y, p):
    h = _bn_relu_ref(_conv_transpose_ref(y, p["wy"], p["by"], 1, 0, 0), p["gy"], p["bny"])
    x = jnp.concatenate([z, h], axis=1)
    h1 = _bn_relu_ref(_conv_transpose_ref(x, p["w1"], p["b1"], 2, 2, 1), p["g1"], p["bn1"])
    h2 = _conv_transpose_ref(h1, p["w2"], p["b2"], 2, 2, 1)
    return jnp.tanh(h2)


# ----------------------------- params & demo ---------------------------------------

def init_params(key, y_dim=10):
    ks = jax.random.split(key, 10)
    p = {}
    p["wy"] = 0.05 * jax.random.normal(ks[0], (y_dim, 128, 7, 7), jnp.float32)
    p["by"] = 0.05 * jax.random.normal(ks[1], (128,), jnp.float32)
    p["gy"] = 1.0 + 0.1 * jax.random.normal(ks[2], (128,), jnp.float32)
    p["bny"] = 0.1 * jax.random.normal(ks[3], (128,), jnp.float32)
    p["w1"] = 0.05 * jax.random.normal(ks[4], (256, 64, 5, 5), jnp.float32)
    p["b1"] = 0.05 * jax.random.normal(ks[5], (64,), jnp.float32)
    p["g1"] = 1.0 + 0.1 * jax.random.normal(ks[6], (64,), jnp.float32)
    p["bn1"] = 0.1 * jax.random.normal(ks[7], (64,), jnp.float32)
    p["w2"] = 0.05 * jax.random.normal(ks[8], (64, 1, 5, 5), jnp.float32)
    p["b2"] = 0.05 * jax.random.normal(ks[9], (1,), jnp.float32)
    return p


if __name__ == "__main__":
    key = jax.random.PRNGKey(0)
    kz, ky, kp = jax.random.split(key, 3)
    N = 2
    z = jax.random.normal(kz, (N, 128, 7, 7), jnp.float32)
    y = jax.random.normal(ky, (N, 10, 1, 1), jnp.float32)
    params = init_params(kp)

    pp = prepare_params(params)            # one-time weight prep (hoisted)
    out = generator_forward(z, y, pp)
    jax.block_until_ready(out)

    assert out.shape == (N, 1, 28, 28), out.shape
    assert bool(jnp.all(jnp.isfinite(out)))

    ref = generator_reference(z, y, params)       # f32 reference (bf16 MXU tolerance)
    err = float(jnp.max(jnp.abs(out - ref)))
    assert err < 0.08, f"max abs err vs reference: {err}"

    print("KERNEL_OK")
</pallas_src>

<mosaic_0001>
module attributes {stable_mosaic.version = 11 : i64} {
  func.func @_bn_relu_kernel(%arg0: i32, %arg1: memref<8x6272xf32, #tpu.memory_space<vmem>>, %arg2: memref<1x6272xf32, #tpu.memory_space<vmem>>, %arg3: memref<1x6272xf32, #tpu.memory_space<vmem>>, %arg4: memref<8x6272xbf16, #tpu.memory_space<vmem>>) attributes {dimension_semantics = [#tpu.dimension_semantics<parallel>], iteration_bounds = array<i64: 1>, scalar_prefetch = 0 : i64, scratch_operands = 0 : i64, tpu.core_type = #tpu.core_type<tc>, window_params = [{transform_indices = @transform_0, window_bounds = array<i64: 8, 6272>}, {pipeline_mode = #tpu.pipeline_mode<synchronous>, transform_indices = @transform_1, window_bounds = array<i64: 1, 6272>}, {pipeline_mode = #tpu.pipeline_mode<synchronous>, transform_indices = @transform_2, window_bounds = array<i64: 1, 6272>}, {transform_indices = @transform_3, window_bounds = array<i64: 8, 6272>}]} {
    %c0 = arith.constant 0 : index
    %c0_0 = arith.constant 0 : index
    %0 = vector.load %arg1[%c0, %c0_0] : memref<8x6272xf32, #tpu.memory_space<vmem>>, vector<8x6272xf32>
    %c0_1 = arith.constant 0 : index
    %c0_2 = arith.constant 0 : index
    %1 = vector.load %arg2[%c0_1, %c0_2] : memref<1x6272xf32, #tpu.memory_space<vmem>>, vector<1x6272xf32>
    %2 = vector.broadcast %1 : vector<1x6272xf32> to vector<8x6272xf32>
    %3 = arith.mulf %0, %2 : vector<8x6272xf32>
    %c0_3 = arith.constant 0 : index
    %c0_4 = arith.constant 0 : index
    %4 = vector.load %arg3[%c0_3, %c0_4] : memref<1x6272xf32, #tpu.memory_space<vmem>>, vector<1x6272xf32>
    %5 = vector.broadcast %4 : vector<1x6272xf32> to vector<8x6272xf32>
    %6 = arith.addf %3, %5 : vector<8x6272xf32>
    %cst = arith.constant 0.000000e+00 : f32
    %7 = vector.broadcast %cst : f32 to vector<8x6272xf32>
    %8 = arith.maximumf %6, %7 : vector<8x6272xf32>
    %9 = arith.truncf %8 : vector<8x6272xf32> to vector<8x6272xbf16>
    %c0_5 = arith.constant 0 : index
    %c0_6 = arith.constant 0 : index
    %10 = vector.load %arg4[%c0_5, %c0_6] : memref<8x6272xbf16, #tpu.memory_space<vmem>>, vector<8x6272xbf16>
    tpu.vector_store %arg4[%c0_5, %c0_6], %9 {strides = array<i32>} : memref<8x6272xbf16, #tpu.memory_space<vmem>>, vector<8x6272xbf16>,
    return
  }
  func.func @transform_0(%arg0: i32) -> (i32, i32) {
    %c0_i32 = arith.constant 0 : i32
    %c0_i32_0 = arith.constant 0 : i32
    return %arg0, %c0_i32 : i32, i32
  }
  func.func @transform_1(%arg0: i32) -> (i32, i32) {
    %c0_i32 = arith.constant 0 : i32
    %c0_i32_0 = arith.constant 0 : i32
    %c0_i32_1 = arith.constant 0 : i32
    return %c0_i32, %c0_i32_0 : i32, i32
  }
  func.func @transform_2(%arg0: i32) -> (i32, i32) {
    %c0_i32 = arith.constant 0 : i32
    %c0_i32_0 = arith.constant 0 : i32
    %c0_i32_1 = arith.constant 0 : i32
    return %c0_i32, %c0_i32_0 : i32, i32
  }
  func.func @transform_3(%arg0: i32) -> (i32, i32) {
    %c0_i32 = arith.constant 0 : i32
    %c0_i32_0 = arith.constant 0 : i32
    return %arg0, %c0_i32 : i32, i32
  }
}

module attributes {stable_mosaic.version = 11 : i64} {
  func.func @_matmul_stats_kernel(%arg0: i32, %arg1: memref<8x16xbf16, #tpu.memory_space<vmem>>, %arg2: memref<16x6272xbf16, #tpu.memory_space<vmem>>, %arg3: memref<8x6272xf32, #tpu.memory_space<vmem>>, %arg4: memref<8x6272xf32, #tpu.memory_space<vmem>>, %arg5: memref<8x6272xf32, #tpu.memory_space<vmem>>) attributes {dimension_semantics = [#tpu.dimension_semantics<parallel>], iteration_bounds = array<i64: 1>, scalar_prefetch = 0 : i64, scratch_operands = 0 : i64, tpu.core_type = #tpu.core_type<tc>, window_params = [{transform_indices = @transform_0, window_bounds = array<i64: 8, 16>}, {pipeline_mode = #tpu.pipeline_mode<synchronous>, transform_indices = @transform_1, window_bounds = array<i64: 16, 6272>}, {transform_indices = @transform_2, window_bounds = array<i64: 8, 6272>}, {transform_indices = @transform_3, window_bounds = array<i64: 8, 6272>}, {transform_indices = @transform_4, window_bounds = array<i64: 8, 6272>}]} {
    %c0 = arith.constant 0 : index
    %c0_0 = arith.constant 0 : index
    %0 = vector.load %arg1[%c0, %c0_0] : memref<8x16xbf16, #tpu.memory_space<vmem>>, vector<8x16xbf16>
    %c0_1 = arith.constant 0 : index
    %c0_2 = arith.constant 0 : index
    %1 = vector.load %arg2[%c0_1, %c0_2] : memref<16x6272xbf16, #tpu.memory_space<vmem>>, vector<16x6272xbf16>
    %cst = arith.constant dense<0.000000e+00> : vector<8x6272xf32>
    %2 = tpu.matmul %0, %1, %cst {dimension_numbers = #tpu.dot_dimension_numbers<[1], [0], [0], [1], [0, 0, 1, 1], [], []>} : vector<8x16xbf16>, vector<16x6272xbf16>, vector<8x6272xf32> -> vector<8x6272xf32>
    %c0_3 = arith.constant 0 : index
    %c0_4 = arith.constant 0 : index
    %3 = vector.load %arg3[%c0_3, %c0_4] : memref<8x6272xf32, #tpu.memory_space<vmem>>, vector<8x6272xf32>
    tpu.vector_store %arg3[%c0_3, %c0_4], %2 {strides = array<i32>} : memref<8x6272xf32, #tpu.memory_space<vmem>>, vector<8x6272xf32>,
    %cst_5 = arith.constant 0.000000e+00 : f32
    %4 = vector.broadcast %cst_5 : f32 to vector<8x6272xf32>
    %c0_6 = arith.constant 0 : index
    %c0_7 = arith.constant 0 : index
    %5 = vector.load %arg4[%c0_6, %c0_7] : memref<8x6272xf32, #tpu.memory_space<vmem>>, vector<8x6272xf32>
    tpu.vector_store %arg4[%c0_6, %c0_7], %4 {strides = array<i32>} : memref<8x6272xf32, #tpu.memory_space<vmem>>, vector<8x6272xf32>,
    %cst_8 = arith.constant 0.000000e+00 : f32
    %6 = vector.broadcast %cst_8 : f32 to vector<8x6272xf32>
    %c0_9 = arith.constant 0 : index
    %c0_10 = arith.constant 0 : index
    %7 = vector.load %arg5[%c0_9, %c0_10] : memref<8x6272xf32, #tpu.memory_space<vmem>>, vector<8x6272xf32>
    tpu.vector_store %arg5[%c0_9, %c0_10], %6 {strides = array<i32>} : memref<8x6272xf32, #tpu.memory_space<vmem>>, vector<8x6272xf32>,
    %cst_11 = arith.constant dense<0.000000e+00> : vector<6272xf32>
    %8 = vector.multi_reduction <add>, %2, %cst_11 [0] : vector<8x6272xf32> to vector<6272xf32>
    %9 = vector.shape_cast %8 : vector<6272xf32> to vector<1x6272xf32>
    %c0_12 = arith.constant 0 : index
    %c0_13 = arith.constant 0 : index
    %10 = vector.load %arg4[%c0_12, %c0_13] : memref<8x6272xf32, #tpu.memory_space<vmem>>, vector<1x6272xf32>
    tpu.vector_store %arg4[%c0_12, %c0_13], %9 {strides = array<i32>} : memref<8x6272xf32, #tpu.memory_space<vmem>>, vector<1x6272xf32>,
    %11 = arith.mulf %2, %2 : vector<8x6272xf32>
    %cst_14 = arith.constant dense<0.000000e+00> : vector<6272xf32>
    %12 = vector.multi_reduction <add>, %11, %cst_14 [0] : vector<8x6272xf32> to vector<6272xf32>
    %13 = vector.shape_cast %12 : vector<6272xf32> to vector<1x6272xf32>
    %c0_15 = arith.constant 0 : index
    %c0_16 = arith.constant 0 : index
    %14 = vector.load %arg5[%c0_15, %c0_16] : memref<8x6272xf32, #tpu.memory_space<vmem>>, vector<1x6272xf32>
    tpu.vector_store %arg5[%c0_15, %c0_16], %13 {strides = array<i32>} : memref<8x6272xf32, #tpu.memory_space<vmem>>, vector<1x6272xf32>,
    return
  }
  func.func @transform_0(%arg0: i32) -> (i32, i32) {
    %c0_i32 = arith.constant 0 : i32
    %c0_i32_0 = arith.constant 0 : i32
    return %arg0, %c0_i32 : i32, i32
  }
  func.func @transform_1(%arg0: i32) -> (i32, i32) {
    %c0_i32 = arith.constant 0 : i32
    %c0_i32_0 = arith.constant 0 : i32
    %c0_i32_1 = arith.constant 0 : i32
    return %c0_i32, %c0_i32_0 : i32, i32
  }
  func.func @transform_2(%arg0: i32) -> (i32, i32) {
    %c0_i32 = arith.constant 0 : i32
    %c0_i32_0 = arith.constant 0 : i32
    return %arg0, %c0_i32 : i32, i32
  }
  func.func @transform_3(%arg0: i32) -> (i32, i32) {
    %c0_i32 = arith.constant 0 : i32
    %c0_i32_0 = arith.constant 0 : i32
    return %arg0, %c0_i32 : i32, i32
  }
  func.func @transform_4(%arg0: i32) -> (i32, i32) {
    %c0_i32 = arith.constant 0 : i32
    %c0_i32_0 = arith.constant 0 : i32
    return %arg0, %c0_i32 : i32, i32
  }
}

module attributes {stable_mosaic.version = 11 : i64} {
  func.func @_bn_relu_kernel(%arg0: i32, %arg1: memref<104x256xf32, #tpu.memory_space<vmem>>, %arg2: memref<1x256xf32, #tpu.memory_space<vmem>>, %arg3: memref<1x256xf32, #tpu.memory_space<vmem>>, %arg4: memref<104x256xbf16, #tpu.memory_space<vmem>>) attributes {dimension_semantics = [#tpu.dimension_semantics<parallel>], iteration_bounds = array<i64: 1>, scalar_prefetch = 0 : i64, scratch_operands = 0 : i64, tpu.core_type = #tpu.core_type<tc>, window_params = [{transform_indices = @transform_0, window_bounds = array<i64: 104, 256>}, {pipeline_mode = #tpu.pipeline_mode<synchronous>, transform_indices = @transform_1, window_bounds = array<i64: 1, 256>}, {pipeline_mode = #tpu.pipeline_mode<synchronous>, transform_indices = @transform_2, window_bounds = array<i64: 1, 256>}, {transform_indices = @transform_3, window_bounds = array<i64: 104, 256>}]} {
    %c0 = arith.constant 0 : index
    %c0_0 = arith.constant 0 : index
    %0 = vector.load %arg1[%c0, %c0_0] : memref<104x256xf32, #tpu.memory_space<vmem>>, vector<104x256xf32>
    %c0_1 = arith.constant 0 : index
    %c0_2 = arith.constant 0 : index
    %1 = vector.load %arg2[%c0_1, %c0_2] : memref<1x256xf32, #tpu.memory_space<vmem>>, vector<1x256xf32>
    %2 = vector.broadcast %1 : vector<1x256xf32> to vector<104x256xf32>
    %3 = arith.mulf %0, %2 : vector<104x256xf32>
    %c0_3 = arith.constant 0 : index
    %c0_4 = arith.constant 0 : index
    %4 = vector.load %arg3[%c0_3, %c0_4] : memref<1x256xf32, #tpu.memory_space<vmem>>, vector<1x256xf32>
    %5 = vector.broadcast %4 : vector<1x256xf32> to vector<104x256xf32>
    %6 = arith.addf %3, %5 : vector<104x256xf32>
    %cst = arith.constant 0.000000e+00 : f32
    %7 = vector.broadcast %cst : f32 to vector<104x256xf32>
    %8 = arith.maximumf %6, %7 : vector<104x256xf32>
    %9 = arith.truncf %8 : vector<104x256xf32> to vector<104x256xbf16>
    %c0_5 = arith.constant 0 : index
    %c0_6 = arith.constant 0 : index
    %10 = vector.load %arg4[%c0_5, %c0_6] : memref<104x256xbf16, #tpu.memory_space<vmem>>, vector<104x256xbf16>
    tpu.vector_store %arg4[%c0_5, %c0_6], %9 {strides = array<i32>} : memref<104x256xbf16, #tpu.memory_space<vmem>>, vector<104x256xbf16>,
    return
  }
  func.func @transform_0(%arg0: i32) -> (i32, i32) {
    %c0_i32 = arith.constant 0 : i32
    %c0_i32_0 = arith.constant 0 : i32
    return %arg0, %c0_i32 : i32, i32
  }
  func.func @transform_1(%arg0: i32) -> (i32, i32) {
    %c0_i32 = arith.constant 0 : i32
    %c0_i32_0 = arith.constant 0 : i32
    %c0_i32_1 = arith.constant 0 : i32
    return %c0_i32, %c0_i32_0 : i32, i32
  }
  func.func @transform_2(%arg0: i32) -> (i32, i32) {
    %c0_i32 = arith.constant 0 : i32
    %c0_i32_0 = arith.constant 0 : i32
    %c0_i32_1 = arith.constant 0 : i32
    return %c0_i32, %c0_i32_0 : i32, i32
  }
  func.func @transform_3(%arg0: i32) -> (i32, i32) {
    %c0_i32 = arith.constant 0 : i32
    %c0_i32_0 = arith.constant 0 : i32
    return %arg0, %c0_i32 : i32, i32
  }
}

module attributes {stable_mosaic.version = 11 : i64} {
  func.func @_matmul_stats_kernel(%arg0: i32, %arg1: memref<104x2304xbf16, #tpu.memory_space<vmem>>, %arg2: memref<2304x256xbf16, #tpu.memory_space<vmem>>, %arg3: memref<104x256xf32, #tpu.memory_space<vmem>>, %arg4: memref<8x256xf32, #tpu.memory_space<vmem>>, %arg5: memref<8x256xf32, #tpu.memory_space<vmem>>) attributes {dimension_semantics = [#tpu.dimension_semantics<parallel>], iteration_bounds = array<i64: 1>, scalar_prefetch = 0 : i64, scratch_operands = 0 : i64, tpu.core_type = #tpu.core_type<tc>, window_params = [{transform_indices = @transform_0, window_bounds = array<i64: 104, 2304>}, {pipeline_mode = #tpu.pipeline_mode<synchronous>, transform_indices = @transform_1, window_bounds = array<i64: 2304, 256>}, {transform_indices = @transform_2, window_bounds = array<i64: 104, 256>}, {transform_indices = @transform_3, window_bounds = array<i64: 8, 256>}, {transform_indices = @transform_4, window_bounds = array<i64: 8, 256>}]} {
    %c0 = arith.constant 0 : index
    %c0_0 = arith.constant 0 : index
    %0 = vector.load %arg1[%c0, %c0_0] : memref<104x2304xbf16, #tpu.memory_space<vmem>>, vector<104x2304xbf16>
    %c0_1 = arith.constant 0 : index
    %c0_2 = arith.constant 0 : index
    %1 = vector.load %arg2[%c0_1, %c0_2] : memref<2304x256xbf16, #tpu.memory_space<vmem>>, vector<2304x256xbf16>
    %cst = arith.constant dense<0.000000e+00> : vector<104x256xf32>
    %2 = tpu.matmul %0, %1, %cst {dimension_numbers = #tpu.dot_dimension_numbers<[1], [0], [0], [1], [0, 0, 1, 1], [], []>} : vector<104x2304xbf16>, vector<2304x256xbf16>, vector<104x256xf32> -> vector<104x256xf32>
    %c0_3 = arith.constant 0 : index
    %c0_4 = arith.constant 0 : index
    %3 = vector.load %arg3[%c0_3, %c0_4] : memref<104x256xf32, #tpu.memory_space<vmem>>, vector<104x256xf32>
    tpu.vector_store %arg3[%c0_3, %c0_4], %2 {strides = array<i32>} : memref<104x256xf32, #tpu.memory_space<vmem>>, vector<104x256xf32>,
    %cst_5 = arith.constant 0.000000e+00 : f32
    %4 = vector.broadcast %cst_5 : f32 to vector<8x256xf32>
    %c0_6 = arith.constant 0 : index
    %c0_7 = arith.constant 0 : index
    %5 = vector.load %arg4[%c0_6, %c0_7] : memref<8x256xf32, #tpu.memory_space<vmem>>, vector<8x256xf32>
    tpu.vector_store %arg4[%c0_6, %c0_7], %4 {strides = array<i32>} : memref<8x256xf32, #tpu.memory_space<vmem>>, vector<8x256xf32>,
    %cst_8 = arith.constant 0.000000e+00 : f32
    %6 = vector.broadcast %cst_8 : f32 to vector<8x256xf32>
    %c0_9 = arith.constant 0 : index
    %c0_10 = arith.constant 0 : index
    %7 = vector.load %arg5[%c0_9, %c0_10] : memref<8x256xf32, #tpu.memory_space<vmem>>, vector<8x256xf32>
    tpu.vector_store %arg5[%c0_9, %c0_10], %6 {strides = array<i32>} : memref<8x256xf32, #tpu.memory_space<vmem>>, vector<8x256xf32>,
    %cst_11 = arith.constant dense<0.000000e+00> : vector<256xf32>
    %8 = vector.multi_reduction <add>, %2, %cst_11 [0] : vector<104x256xf32> to vector<256xf32>
    %9 = vector.shape_cast %8 : vector<256xf32> to vector<1x256xf32>
    %c0_12 = arith.constant 0 : index
    %c0_13 = arith.constant 0 : index
    %10 = vector.load %arg4[%c0_12, %c0_13] : memref<8x256xf32, #tpu.memory_space<vmem>>, vector<1x256xf32>
    tpu.vector_store %arg4[%c0_12, %c0_13], %9 {strides = array<i32>} : memref<8x256xf32, #tpu.memory_space<vmem>>, vector<1x256xf32>,
    %11 = arith.mulf %2, %2 : vector<104x256xf32>
    %cst_14 = arith.constant dense<0.000000e+00> : vector<256xf32>
    %12 = vector.multi_reduction <add>, %11, %cst_14 [0] : vector<104x256xf32> to vector<256xf32>
    %13 = vector.shape_cast %12 : vector<256xf32> to vector<1x256xf32>
    %c0_15 = arith.constant 0 : index
    %c0_16 = arith.constant 0 : index
    %14 = vector.load %arg5[%c0_15, %c0_16] : memref<8x256xf32, #tpu.memory_space<vmem>>, vector<1x256xf32>
    tpu.vector_store %arg5[%c0_15, %c0_16], %13 {strides = array<i32>} : memref<8x256xf32, #tpu.memory_space<vmem>>, vector<1x256xf32>,
    return
  }
  func.func @transform_0(%arg0: i32) -> (i32, i32) {
    %c0_i32 = arith.constant 0 : i32
    %c0_i32_0 = arith.constant 0 : i32
    return %arg0, %c0_i32 : i32, i32
  }
  func.func @transform_1(%arg0: i32) -> (i32, i32) {
    %c0_i32 = arith.constant 0 : i32
    %c0_i32_0 = arith.constant 0 : i32
    %c0_i32_1 = arith.constant 0 : i32
    return %c0_i32, %c0_i32_0 : i32, i32
  }
  func.func @transform_2(%arg0: i32) -> (i32, i32) {
    %c0_i32 = arith.constant 0 : i32
    %c0_i32_0 = arith.constant 0 : i32
    return %arg0, %c0_i32 : i32, i32
  }
  func.func @transform_3(%arg0: i32) -> (i32, i32) {
    %c0_i32 = arith.constant 0 : i32
    %c0_i32_0 = arith.constant 0 : i32
    return %arg0, %c0_i32 : i32, i32
  }
  func.func @transform_4(%arg0: i32) -> (i32, i32) {
    %c0_i32 = arith.constant 0 : i32
    %c0_i32_0 = arith.constant 0 : i32
    return %arg0, %c0_i32 : i32, i32
  }
}

module attributes {stable_mosaic.version = 11 : i64} {
  func.func @_matmul_bias_tanh_kernel(%arg0: i32, %arg1: memref<392x576xbf16, #tpu.memory_space<vmem>>, %arg2: memref<576x128xbf16, #tpu.memory_space<vmem>>, %arg3: memref<1x4xf32, #tpu.memory_space<vmem>>, %arg4: memref<392x4xf32, #tpu.memory_space<vmem>>) attributes {dimension_semantics = [#tpu.dimension_semantics<parallel>], iteration_bounds = array<i64: 1>, scalar_prefetch = 0 : i64, scratch_operands = 0 : i64, tpu.core_type = #tpu.core_type<tc>, window_params = [{transform_indices = @transform_0, window_bounds = array<i64: 392, 576>}, {pipeline_mode = #tpu.pipeline_mode<synchronous>, transform_indices = @transform_1, window_bounds = array<i64: 576, 128>}, {pipeline_mode = #tpu.pipeline_mode<synchronous>, transform_indices = @transform_2, window_bounds = array<i64: 1, 4>}, {transform_indices = @transform_3, window_bounds = array<i64: 392, 4>}]} {
    %c0 = arith.constant 0 : index
    %c0_0 = arith.constant 0 : index
    %0 = vector.load %arg1[%c0, %c0_0] : memref<392x576xbf16, #tpu.memory_space<vmem>>, vector<392x576xbf16>
    %c0_1 = arith.constant 0 : index
    %c0_2 = arith.constant 0 : index
    %1 = vector.load %arg2[%c0_1, %c0_2] : memref<576x128xbf16, #tpu.memory_space<vmem>>, vector<576x128xbf16>
    %cst = arith.constant dense<0.000000e+00> : vector<392x128xf32>
    %2 = tpu.matmul %0, %1, %cst {dimension_numbers = #tpu.dot_dimension_numbers<[1], [0], [0], [1], [0, 0, 1, 1], [], []>} : vector<392x576xbf16>, vector<576x128xbf16>, vector<392x128xf32> -> vector<392x128xf32>
    %3 = vector.extract_strided_slice %2 {offsets = [0, 0], sizes = [392, 4], strides = [1, 1]} : vector<392x128xf32> to vector<392x4xf32>
    %c0_3 = arith.constant 0 : index
    %c0_4 = arith.constant 0 : index
    %4 = vector.load %arg3[%c0_3, %c0_4] : memref<1x4xf32, #tpu.memory_space<vmem>>, vector<1x4xf32>
    %5 = vector.broadcast %4 : vector<1x4xf32> to vector<392x4xf32>
    %6 = arith.addf %3, %5 : vector<392x4xf32>
    %7 = math.tanh %6 : vector<392x4xf32>
    %c0_5 = arith.constant 0 : index
    %c0_6 = arith.constant 0 : index
    %8 = vector.load %arg4[%c0_5, %c0_6] : memref<392x4xf32, #tpu.memory_space<vmem>>, vector<392x4xf32>
    tpu.vector_store %arg4[%c0_5, %c0_6], %7 {strides = array<i32>} : memref<392x4xf32, #tpu.memory_space<vmem>>, vector<392x4xf32>,
    return
  }
  func.func @transform_0(%arg0: i32) -> (i32, i32) {
    %c0_i32 = arith.constant 0 : i32
    %c0_i32_0 = arith.constant 0 : i32
    return %arg0, %c0_i32 : i32, i32
  }
  func.func @transform_1(%arg0: i32) -> (i32, i32) {
    %c0_i32 = arith.constant 0 : i32
    %c0_i32_0 = arith.constant 0 : i32
    %c0_i32_1 = arith.constant 0 : i32
    return %c0_i32, %c0_i32_0 : i32, i32
  }
  func.func @transform_2(%arg0: i32) -> (i32, i32) {
    %c0_i32 = arith.constant 0 : i32
    %c0_i32_0 = arith.constant 0 : i32
    %c0_i32_1 = arith.constant 0 : i32
    return %c0_i32, %c0_i32_0 : i32, i32
  }
  func.func @transform_3(%arg0: i32) -> (i32, i32) {
    %c0_i32 = arith.constant 0 : i32
    %c0_i32_0 = arith.constant 0 : i32
    return %arg0, %c0_i32 : i32, i32
  }
}

</mosaic_0001>

<bundles_post_ra>
// kernel: generator_forward.6
= control target key start
LH: loop header
LB: loop body
LE: loop exit
PB: predicated region body
PF: predicated region fallthrough
CT: control target
= control target key end

     0   :  { %v77_v0 = vlaneseq  ;;  %s1512_s1 = inlined_call_operand.vmem [shape: f32[1,6272], index: 1, kind: input, shape index: {}]   ;;  %s1513_s2 = inlined_call_operand.vmem [shape: f32[1,6272], index: 2, kind: input, shape index: {}]   ;;  %s1514_s0 = inlined_call_operand.vmem [shape: f32[8,6272], index: 0, kind: input, shape index: {}]   ;;  %s1515_s3 = inlined_call_operand.vmem [shape: bf16[8,6272], index: 3, kind: output, shape index: {}]  }
   0x1   :  { %v63_v2 = vld [vmem:[%s1512_s1] sm:$0xff]  ;;  %v15_v9 = vld [vmem:[%s1514_s0 + $0x8] sm:$0xff]  ;;  %v16_v18 = vld [vmem:[%s1514_s0 + $0x10] sm:$0xff] }
   0x2   :  { %v78_v1 = vshrl.u32 %v77_v0, 7  ;;  %v1032_v3 = vld [vmem:[%s1513_s2] sm:$0xff]  ;;  %v17_v19 = vld [vmem:[%s1514_s0 + $0x18] sm:$0xff]  ;;  %v19_v25 = vld [vmem:[%s1514_s0 + $0x28] sm:$0xff] }
   0x3   :  { %v14_v8 = vld [vmem:[%s1514_s0] sm:$0xff]  ;;  %v20_v38 = vld [vmem:[%s1514_s0 + $0x30] sm:$0xff]  ;;  %v21_v39 = vld [vmem:[%s1514_s0 + $0x38] sm:$0xff] }
   0x4   :  { %v1034_v4 = vsub.s32 0, %v78_v1  ;;  %v1036_v5 = vsub.s32 1, %v78_v1  ;;  %v1038_v6 = vsub.s32 2, %v78_v1  ;;  %v1040_v7 = vsub.s32 3, %v78_v1  ;;  %v18_v24 = vld [vmem:[%s1514_s0 + $0x20] sm:$0xff]  ;;  %v1097_v48 = vld [vmem:[%s1512_s1 + $0x8] sm:$0xff] }
   0x5   :  { %v1048_v10 = vsub.s32 4, %v78_v1  ;;  %v1050_v11 = vsub.s32 5, %v78_v1  ;;  %v1052_v12 = vsub.s32 6, %v78_v1  ;;  %v1054_v13 = vsub.s32 7, %v78_v1  ;;  %v1102_v53 = vld [vmem:[%s1513_s2 + $0x8] sm:$0xff]  ;;  %v22_v58 = vld [vmem:[%s1514_s0 + $0x40] sm:$0xff] }
   0x6   :  { %v80_v14 = vrot.slane %v63_v2, %v1034_v4  ;;  %v84_v15 = vrot.slane %v63_v2, %v1036_v5  ;;  %v388_v16 = vrot.slane %v1032_v3, %v1034_v4  ;;  %v392_v17 = vrot.slane %v1032_v3, %v1036_v5  ;;  %v23_v59 = vld [vmem:[%s1514_s0 + $0x48] sm:$0xff] }
   0x7   :  { %v88_v20 = vrot.slane %v63_v2, %v1038_v6  ;;  %v92_v21 = vrot.slane %v63_v2, %v1040_v7  ;;  %v396_v22 = vrot.slane %v1032_v3, %v1038_v6  ;;  %v400_v23 = vrot.slane %v1032_v3, %v1040_v7 }
   0x8   :  { %v322_v26 = vmul.f32 %v80_v14, %v14_v8  ;;  %v323_v27 = vmul.f32 %v84_v15, %v15_v9  ;;  %v96_v28 = vrot.slane %v63_v2, %v1048_v10  ;;  %v100_v29 = vrot.slane %v63_v2, %v1050_v11 }
   0x9   :  { %v324_v30 = vmul.f32 %v88_v20, %v16_v18  ;;  %v325_v31 = vmul.f32 %v92_v21, %v17_v19  ;;  %v404_v32 = vrot.slane %v1032_v3, %v1048_v10  ;;  %v408_v33 = vrot.slane %v1032_v3, %v1050_v11 }
   0xa   :  { %v630_v34 = vadd.f32 %v388_v16, %v322_v26  ;;  %v631_v35 = vadd.f32 %v392_v17, %v323_v27  ;;  %v326_v36 = vmul.f32 %v96_v28, %v18_v24  ;;  %v327_v37 = vmul.f32 %v100_v29, %v19_v25  ;;  %v25_v16 = vld [vmem:[%s1514_s0 + $0x58] sm:$0xff]  ;;  %v26_v26 = vld [vmem:[%s1514_s0 + $0x60] sm:$0xff]  ;;  %v27_v27 = vld [vmem:[%s1514_s0 + $0x68] sm:$0xff] }
   0xb   :  { %v632_v40 = vadd.f32 %v396_v22, %v324_v30  ;;  %v633_v41 = vadd.f32 %v400_v23, %v325_v31  ;;  %v104_v42 = vrot.slane %v63_v2, %v1052_v12  ;;  %v108_v43 = vrot.slane %v63_v2, %v1054_v13 }
   0xc   :  { %v679_v44 = vmax.f32 %v630_v34, 0.0  ;;  %v680_v45 = vmax.f32 %v631_v35, 0.0  ;;  %v634_v46 = vadd.f32 %v404_v32, %v326_v36  ;;  %v635_v47 = vadd.f32 %v408_v33, %v327_v37 }
   0xd   :  { %v681_v49 = vmax.f32 %v632_v40, 0.0  ;;  %v682_v50 = vmax.f32 %v633_v41, 0.0  ;;  %v328_v51 = vmul.f32 %v104_v42, %v20_v38  ;;  %v329_v52 = vmul.f32 %v108_v43, %v21_v39  ;;  %v28_v40 = vld [vmem:[%s1514_s0 + $0x70] sm:$0xff]  ;;  %v29_v41 = vld [vmem:[%s1514_s0 + $0x78] sm:$0xff] }
   0xe   :  { %v981_v54 = vpack.c.bf16 %v680_v45, %v679_v44  ;;  %v683_v55 = vmax.f32 %v634_v46, 0.0  ;;  %v684_v56 = vmax.f32 %v635_v47, 0.0  ;;  %v412_v57 = vrot.slane %v1032_v3, %v1052_v12  ;;  %v1168_v42 = vld [vmem:[%s1512_s1 + $0x10] sm:$0xff] }
   0xf   :  { %v982_v60 = vpack.c.bf16 %v682_v50, %v681_v49  ;;  %v416_v61 = vrot.slane %v1032_v3, %v1054_v13  ;;  %v112_v62 = vrot.slane %v1097_v48, %v1034_v4  ;;  %v116_v63 = vrot.slane %v1097_v48, %v1036_v5  ;;  %v24_v3 = vld [vmem:[%s1514_s0 + $0x50] sm:$0xff] }
  0x10   :  { %925 = vst [vmem:[%s1515_s3] sm:$0xff] %v981_v54  ;;  %v983_v0 = vpack.c.bf16 %v684_v56, %v683_v55  ;;  %v636_v1 = vadd.f32 %v412_v57, %v328_v51  ;;  %v420_v2 = vrot.slane %v1102_v53, %v1034_v4  ;;  %v424_v8 = vrot.slane %v1102_v53, %v1036_v5  ;;  %v1185_v54 = vld [vmem:[%s1513_s2 + $0x10] sm:$0xff]  ;;  %v31_v57 = vld [vmem:[%s1514_s0 + $0x88] sm:$0xff] }
  0x11   :  { %926 = vst [vmem:[%s1515_s3 + $0x8] sm:$0xff] %v982_v60  ;;  %v637_v9 = vadd.f32 %v416_v61, %v329_v52  ;;  %v330_v14 = vmul.f32 %v112_v62, %v22_v58  ;;  %v331_v15 = vmul.f32 %v116_v63, %v23_v59  ;;  %v120_v17 = vrot.slane %v1097_v48, %v1038_v6  ;;  %v30_v52 = vld [vmem:[%s1514_s0 + $0x80] sm:$0xff] }
  0x12   :  { %927 = vst [vmem:[%s1515_s3 + $0x10] sm:$0xff] %v983_v0  ;;  %v685_v18 = vmax.f32 %v636_v1, 0.0  ;;  %v124_v19 = vrot.slane %v1097_v48, %v1040_v7  ;;  %v428_v20 = vrot.slane %v1102_v53, %v1038_v6  ;;  %v432_v21 = vrot.slane %v1102_v53, %v1040_v7 }
  0x13   :  { %v686_v22 = vmax.f32 %v637_v9, 0.0  ;;  %v638_v23 = vadd.f32 %v420_v2, %v330_v14  ;;  %v639_v24 = vadd.f32 %v424_v8, %v331_v15  ;;  %v332_v25 = vmul.f32 %v120_v17, %v24_v3  ;;  %v33_v14 = vld [vmem:[%s1514_s0 + $0x98] sm:$0xff] }
  0x14   :  { %v333_v28 = vmul.f32 %v124_v19, %v25_v16  ;;  %v128_v29 = vrot.slane %v1097_v48, %v1048_v10  ;;  %v132_v30 = vrot.slane %v1097_v48, %v1050_v11  ;;  %v436_v31 = vrot.slane %v1102_v53, %v1048_v10 }
  0x15   :  { %v984_v32 = vpack.c.bf16 %v686_v22, %v685_v18  ;;  %v687_v33 = vmax.f32 %v638_v23, 0.0  ;;  %v688_v34 = vmax.f32 %v639_v24, 0.0  ;;  %v640_v35 = vadd.f32 %v428_v20, %v332_v25  ;;  %v34_v24 = vld [vmem:[%s1514_s0 + $0xa0] sm:$0xff] }
  0x16   :  { %v641_v36 = vadd.f32 %v432_v21, %v333_v28  ;;  %v334_v37 = vmul.f32 %v128_v29, %v26_v26  ;;  %v335_v38 = vmul.f32 %v132_v30, %v27_v27  ;;  %v440_v39 = vrot.slane %v1102_v53, %v1050_v11  ;;  %v35_v28 = vld [vmem:[%s1514_s0 + $0xa8] sm:$0xff] }
  0x17   :  { %928 = vst [vmem:[%s1515_s3 + $0x18] sm:$0xff] %v984_v32  ;;  %v985_v43 = vpack.c.bf16 %v688_v34, %v687_v33  ;;  %v689_v44 = vmax.f32 %v640_v35, 0.0  ;;  %v136_v45 = vrot.slane %v1097_v48, %v1052_v12  ;;  %v140_v46 = vrot.slane %v1097_v48, %v1054_v13  ;;  %v36_v34 = vld [vmem:[%s1514_s0 + $0xb0] sm:$0xff] }
  0x18   :  { %v690_v47 = vmax.f32 %v641_v36, 0.0  ;;  %v642_v49 = vadd.f32 %v436_v31, %v334_v37  ;;  %v643_v50 = vadd.f32 %v440_v39, %v335_v38  ;;  %v444_v51 = vrot.slane %v1102_v53, %v1052_v12  ;;  %v37_v38 = vld [vmem:[%s1514_s0 + $0xb8] sm:$0xff] }
  0x19   :  { %929 = vst [vmem:[%s1515_s3 + $0x20] sm:$0xff] %v985_v43  ;;  %v336_v48 = vmul.f32 %v136_v45, %v28_v40  ;;  %v337_v55 = vmul.f32 %v140_v46, %v29_v41  ;;  %v448_v56 = vrot.slane %v1102_v53, %v1054_v13  ;;  %v144_v58 = vrot.slane %v1168_v42, %v1034_v4  ;;  %v32_v53 = vld [vmem:[%s1514_s0 + $0x90] sm:$0xff]  ;;  %v1251_v40 = vld [vmem:[%s1512_s1 + $0x18] sm:$0xff] }
  0x1a   :  { %v986_v59 = vpack.c.bf16 %v690_v47, %v689_v44  ;;  %v691_v60 = vmax.f32 %v642_v49, 0.0  ;;  %v692_v61 = vmax.f32 %v643_v50, 0.0  ;;  %v148_v62 = vrot.slane %v1168_v42, %v1036_v5 }
  0x1b   :  { %v644_v63 = vadd.f32 %v444_v51, %v336_v48  ;;  %v645_v0 = vadd.f32 %v448_v56, %v337_v55  ;;  %v338_v1 = vmul.f32 %v144_v58, %v30_v52  ;;  %v452_v2 = vrot.slane %v1185_v54, %v1034_v4  ;;  %v38_v51 = vld [vmem:[%s1514_s0 + $0xc0] sm:$0xff]  ;;  %v1263_v52 = vld [vmem:[%s1513_s2 + $0x18] sm:$0xff]  ;;  %v39_v56 = vld [vmem:[%s1514_s0 + $0xc8] sm:$0xff] }
  0x1c   :  { %930 = vst [vmem:[%s1515_s3 + $0x28] sm:$0xff] %v986_v59  ;;  %v987_v8 = vpack.c.bf16 %v692_v61, %v691_v60  ;;  %v339_v3 = vmul.f32 %v148_v62, %v31_v57  ;;  %v456_v9 = vrot.slane %v1185_v54, %v1036_v5  ;;  %v152_v15 = vrot.slane %v1168_v42, %v1038_v6 }
  0x1d   :  { %v693_v16 = vmax.f32 %v644_v63, 0.0  ;;  %v694_v17 = vmax.f32 %v645_v0, 0.0  ;;  %v646_v18 = vadd.f32 %v452_v2, %v338_v1  ;;  %v156_v19 = vrot.slane %v1168_v42, %v1040_v7 }
  0x1e   :  { %931 = vst [vmem:[%s1515_s3 + $0x30] sm:$0xff] %v987_v8  ;;  %v647_v20 = vadd.f32 %v456_v9, %v339_v3  ;;  %v340_v21 = vmul.f32 %v152_v15, %v32_v53  ;;  %v460_v22 = vrot.slane %v1185_v54, %v1038_v6  ;;  %v464_v23 = vrot.slane %v1185_v54, %v1040_v7  ;;  %v41_v3 = vld [vmem:[%s1514_s0 + $0xd8] sm:$0xff] }
  0x1f   :  { %v988_v25 = vpack.c.bf16 %v694_v17, %v693_v16  ;;  %v695_v26 = vmax.f32 %v646_v18, 0.0  ;;  %v341_v27 = vmul.f32 %v156_v19, %v33_v14  ;;  %v160_v29 = vrot.slane %v1168_v42, %v1048_v10 }
  0x20   :  { %v696_v30 = vmax.f32 %v647_v20, 0.0  ;;  %v648_v31 = vadd.f32 %v460_v22, %v340_v21  ;;  %v164_v32 = vrot.slane %v1168_v42, %v1050_v11  ;;  %v468_v33 = vrot.slane %v1185_v54, %v1048_v10  ;;  %v42_v22 = vld [vmem:[%s1514_s0 + $0xe0] sm:$0xff] }
  0x21   :  { %932 = vst [vmem:[%s1515_s3 + $0x38] sm:$0xff] %v988_v25  ;;  %v649_v35 = vadd.f32 %v464_v23, %v341_v27  ;;  %v342_v36 = vmul.f32 %v160_v29, %v34_v24  ;;  %v472_v37 = vrot.slane %v1185_v54, %v1050_v11  ;;  %v168_v39 = vrot.slane %v1168_v42, %v1052_v12 }
  0x22   :  { %v989_v41 = vpack.c.bf16 %v696_v30, %v695_v26  ;;  %v697_v43 = vmax.f32 %v648_v31, 0.0  ;;  %v343_v44 = vmul.f32 %v164_v32, %v35_v28  ;;  %v172_v45 = vrot.slane %v1168_v42, %v1054_v13  ;;  %v43_v26 = vld [vmem:[%s1514_s0 + $0xe8] sm:$0xff]  ;;  %v44_v32 = vld [vmem:[%s1514_s0 + $0xf0] sm:$0xff] }
  0x23   :  { %v698_v46 = vmax.f32 %v649_v35, 0.0  ;;  %v650_v47 = vadd.f32 %v468_v33, %v342_v36  ;;  %v344_v49 = vmul.f32 %v168_v39, %v36_v34  ;;  %v476_v50 = vrot.slane %v1185_v54, %v1052_v12  ;;  %v45_v36 = vld [vmem:[%s1514_s0 + $0xf8] sm:$0xff] }
  0x24   :  { %933 = vst [vmem:[%s1515_s3 + $0x40] sm:$0xff] %v989_v41  ;;  %v651_v42 = vadd.f32 %v472_v37, %v343_v44  ;;  %v345_v48 = vmul.f32 %v172_v45, %v37_v38  ;;  %v480_v55 = vrot.slane %v1185_v54, %v1054_v13  ;;  %v176_v57 = vrot.slane %v1251_v40, %v1034_v4  ;;  %v40_v54 = vld [vmem:[%s1514_s0 + $0xd0] sm:$0xff]  ;;  %v1329_v38 = vld [vmem:[%s1512_s1 + $0x20] sm:$0xff] }
  0x25   :  { %v990_v58 = vpack.c.bf16 %v698_v46, %v697_v43  ;;  %v699_v59 = vmax.f32 %v650_v47, 0.0  ;;  %v652_v60 = vadd.f32 %v476_v50, %v344_v49  ;;  %v180_v61 = vrot.slane %v1251_v40, %v1036_v5  ;;  %v46_v50 = vld [vmem:[%s1514_s0 + $0x100] sm:$0xff] }
  0x26   :  { %v700_v62 = vmax.f32 %v651_v42, 0.0  ;;  %v653_v63 = vadd.f32 %v480_v55, %v345_v48  ;;  %v346_v0 = vmul.f32 %v176_v57, %v38_v51  ;;  %v484_v1 = vrot.slane %v1263_v52, %v1034_v4  ;;  %v1341_v51 = vld [vmem:[%s1513_s2 + $0x20] sm:$0xff]  ;;  %v47_v55 = vld [vmem:[%s1514_s0 + $0x108] sm:$0xff] }
  0x27   :  { %934 = vst [vmem:[%s1515_s3 + $0x48] sm:$0xff] %v990_v58  ;;  %v701_v2 = vmax.f32 %v652_v60, 0.0  ;;  %v347_v53 = vmul.f32 %v180_v61, %v39_v56  ;;  %v488_v8 = vrot.slane %v1263_v52, %v1036_v5  ;;  %v184_v9 = vrot.slane %v1251_v40, %v1038_v6 }
  0x28   :  { %v991_v14 = vpack.c.bf16 %v700_v62, %v699_v59  ;;  %v702_v15 = vmax.f32 %v653_v63, 0.0  ;;  %v654_v16 = vadd.f32 %v484_v1, %v346_v0  ;;  %v188_v17 = vrot.slane %v1251_v40, %v1040_v7 }
  0x29   :  { %v655_v18 = vadd.f32 %v488_v8, %v347_v53  ;;  %v348_v19 = vmul.f32 %v184_v9, %v40_v54  ;;  %v492_v20 = vrot.slane %v1263_v52, %v1038_v6  ;;  %v496_v21 = vrot.slane %v1263_v52, %v1040_v7  ;;  %v49_v53 = vld [vmem:[%s1514_s0 + $0x118] sm:$0xff] }
  0x2a   :  { %935 = vst [vmem:[%s1515_s3 + $0x50] sm:$0xff] %v991_v14  ;;  %v992_v23 = vpack.c.bf16 %v702_v15, %v701_v2  ;;  %v703_v24 = vmax.f32 %v654_v16, 0.0  ;;  %v349_v25 = vmul.f32 %v188_v17, %v41_v3  ;;  %v192_v27 = vrot.slane %v1251_v40, %v1048_v10 }
  0x2b   :  { %v704_v28 = vmax.f32 %v655_v18, 0.0  ;;  %v656_v29 = vadd.f32 %v492_v20, %v348_v19  ;;  %v196_v30 = vrot.slane %v1251_v40, %v1050_v11  ;;  %v500_v31 = vrot.slane %v1263_v52, %v1048_v10  ;;  %v50_v20 = vld [vmem:[%s1514_s0 + $0x120] sm:$0xff] }
  0x2c   :  { %936 = vst [vmem:[%s1515_s3 + $0x58] sm:$0xff] %v992_v23  ;;  %v657_v33 = vadd.f32 %v496_v21, %v349_v25  ;;  %v350_v34 = vmul.f32 %v192_v27, %v42_v22  ;;  %v504_v35 = vrot.slane %v1263_v52, %v1050_v11  ;;  %v200_v37 = vrot.slane %v1251_v40, %v1052_v12 }
  0x2d   :  { %v993_v39 = vpack.c.bf16 %v704_v28, %v703_v24  ;;  %v705_v41 = vmax.f32 %v656_v29, 0.0  ;;  %v351_v43 = vmul.f32 %v196_v30, %v43_v26  ;;  %v204_v44 = vrot.slane %v1251_v40, %v1054_v13  ;;  %v51_v24 = vld [vmem:[%s1514_s0 + $0x128] sm:$0xff]  ;;  %v52_v30 = vld [vmem:[%s1514_s0 + $0x130] sm:$0xff] }
  0x2e   :  { %v706_v45 = vmax.f32 %v657_v33, 0.0  ;;  %v658_v46 = vadd.f32 %v500_v31, %v350_v34  ;;  %v352_v47 = vmul.f32 %v200_v37, %v44_v32  ;;  %v508_v49 = vrot.slane %v1263_v52, %v1052_v12  ;;  %v53_v34 = vld [vmem:[%s1514_s0 + $0x138] sm:$0xff] }
  0x2f   :  { %937 = vst [vmem:[%s1515_s3 + $0x60] sm:$0xff] %v993_v39  ;;  %v659_v40 = vadd.f32 %v504_v35, %v351_v43  ;;  %v353_v42 = vmul.f32 %v204_v44, %v45_v36  ;;  %v512_v48 = vrot.slane %v1263_v52, %v1054_v13  ;;  %v208_v56 = vrot.slane %v1329_v38, %v1034_v4  ;;  %v48_v52 = vld [vmem:[%s1514_s0 + $0x110] sm:$0xff]  ;;  %v1407_v36 = vld [vmem:[%s1512_s1 + $0x28] sm:$0xff] }
  0x30   :  { %v994_v57 = vpack.c.bf16 %v706_v45, %v705_v41  ;;  %v707_v58 = vmax.f32 %v658_v46, 0.0  ;;  %v660_v59 = vadd.f32 %v508_v49, %v352_v47  ;;  %v212_v60 = vrot.slane %v1329_v38, %v1036_v5  ;;  %v54_v49 = vld [vmem:[%s1514_s0 + $0x140] sm:$0xff] }
  0x31   :  { %v708_v61 = vmax.f32 %v659_v40, 0.0  ;;  %v661_v62 = vadd.f32 %v512_v48, %v353_v42  ;;  %v354_v63 = vmul.f32 %v208_v56, %v46_v50  ;;  %v516_v0 = vrot.slane %v1341_v51, %v1034_v4  ;;  %v1419_v50 = vld [vmem:[%s1513_s2 + $0x28] sm:$0xff] }
  0x32   :  { %938 = vst [vmem:[%s1515_s3 + $0x68] sm:$0xff] %v994_v57  ;;  %v709_v1 = vmax.f32 %v660_v59, 0.0  ;;  %v355_v54 = vmul.f32 %v212_v60, %v47_v55  ;;  %v520_v2 = vrot.slane %v1341_v51, %v1036_v5  ;;  %v216_v8 = vrot.slane %v1329_v38, %v1038_v6  ;;  %v55_v48 = vld [vmem:[%s1514_s0 + $0x148] sm:$0xff] }
  0x33   :  { %v995_v3 = vpack.c.bf16 %v708_v61, %v707_v58  ;;  %v710_v9 = vmax.f32 %v661_v62, 0.0  ;;  %v662_v14 = vadd.f32 %v516_v0, %v354_v63  ;;  %v220_v15 = vrot.slane %v1329_v38, %v1040_v7 }
  0x34   :  { %v663_v16 = vadd.f32 %v520_v2, %v355_v54  ;;  %v356_v17 = vmul.f32 %v216_v8, %v48_v52  ;;  %v524_v18 = vrot.slane %v1341_v51, %v1038_v6  ;;  %v528_v19 = vrot.slane %v1341_v51, %v1040_v7  ;;  %v57_v54 = vld [vmem:[%s1514_s0 + $0x158] sm:$0xff] }
  0x35   :  { %939 = vst [vmem:[%s1515_s3 + $0x70] sm:$0xff] %v995_v3  ;;  %v996_v21 = vpack.c.bf16 %v710_v9, %v709_v1  ;;  %v711_v22 = vmax.f32 %v662_v14, 0.0  ;;  %v357_v23 = vmul.f32 %v220_v15, %v49_v53  ;;  %v224_v25 = vrot.slane %v1329_v38, %v1048_v10 }
  0x36   :  { %v712_v26 = vmax.f32 %v663_v16, 0.0  ;;  %v664_v27 = vadd.f32 %v524_v18, %v356_v17  ;;  %v228_v28 = vrot.slane %v1329_v38, %v1050_v11  ;;  %v532_v29 = vrot.slane %v1341_v51, %v1048_v10  ;;  %v58_v16 = vld [vmem:[%s1514_s0 + $0x160] sm:$0xff] }
  0x37   :  { %940 = vst [vmem:[%s1515_s3 + $0x78] sm:$0xff] %v996_v21  ;;  %v665_v31 = vadd.f32 %v528_v19, %v357_v23  ;;  %v358_v32 = vmul.f32 %v224_v25, %v50_v20  ;;  %v536_v33 = vrot.slane %v1341_v51, %v1050_v11  ;;  %v232_v35 = vrot.slane %v1329_v38, %v1052_v12  ;;  %v59_v20 = vld [vmem:[%s1514_s0 + $0x168] sm:$0xff] }
  0x38   :  { %v997_v37 = vpack.c.bf16 %v712_v26, %v711_v22  ;;  %v713_v39 = vmax.f32 %v664_v27, 0.0  ;;  %v359_v41 = vmul.f32 %v228_v28, %v51_v24  ;;  %v236_v43 = vrot.slane %v1329_v38, %v1054_v13  ;;  %v60_v24 = vld [vmem:[%s1514_s0 + $0x170] sm:$0xff]  ;;  %v61_v28 = vld [vmem:[%s1514_s0 + $0x178] sm:$0xff] }
  0x39   :  { %v714_v44 = vmax.f32 %v665_v31, 0.0  ;;  %v666_v45 = vadd.f32 %v532_v29, %v358_v32  ;;  %v360_v46 = vmul.f32 %v232_v35, %v52_v30  ;;  %v540_v47 = vrot.slane %v1341_v51, %v1052_v12  ;;  %v62_v29 = vld [vmem:[%s1514_s0 + $0x180] sm:$0xff]  ;;  %v954_v30 = vld [vmem:[%s1512_s1 + $0x30] ss:$0 sm:$0xff] }
  0x3a   :  { %941 = vst [vmem:[%s1515_s3 + $0x80] sm:$0xff] %v997_v37  ;;  %v667_v38 = vadd.f32 %v536_v33, %v359_v41  ;;  %v361_v40 = vmul.f32 %v236_v43, %v53_v34  ;;  %v544_v42 = vrot.slane %v1341_v51, %v1054_v13  ;;  %v240_v55 = vrot.slane %v1407_v36, %v1034_v4  ;;  %v56_v51 = vld [vmem:[%s1514_s0 + $0x150] sm:$0xff] }
  0x3b   :  { %v998_v56 = vpack.c.bf16 %v714_v44, %v713_v39  ;;  %v715_v57 = vmax.f32 %v666_v45, 0.0  ;;  %v668_v58 = vadd.f32 %v540_v47, %v360_v46  ;;  %v244_v59 = vrot.slane %v1407_v36, %v1036_v5  ;;  %v955_v41 = vld [vmem:[%s1513_s2 + $0x30] ss:$0 sm:$0xff] }
  0x3c   :  { %v716_v60 = vmax.f32 %v667_v38, 0.0  ;;  %v669_v61 = vadd.f32 %v544_v42, %v361_v40  ;;  %v362_v62 = vmul.f32 %v240_v55, %v54_v49  ;;  %v548_v63 = vrot.slane %v1419_v50, %v1034_v4 }
  0x3d   :  { %942 = vst [vmem:[%s1515_s3 + $0x88] sm:$0xff] %v998_v56  ;;  %v717_v0 = vmax.f32 %v668_v58, 0.0  ;;  %v363_v52 = vmul.f32 %v244_v59, %v55_v48  ;;  %v552_v1 = vrot.slane %v1419_v50, %v1036_v5  ;;  %v248_v4 = vrot.slane %v1407_v36, %v1038_v6 }
  0x3e   :  { %v999_v2 = vpack.c.bf16 %v716_v60, %v715_v57  ;;  %v718_v53 = vmax.f32 %v669_v61, 0.0  ;;  %v670_v8 = vadd.f32 %v548_v63, %v362_v62  ;;  %v252_v3 = vrot.slane %v1407_v36, %v1040_v7 }
  0x3f   :  { %v671_v9 = vadd.f32 %v552_v1, %v363_v52  ;;  %v364_v14 = vmul.f32 %v248_v4, %v56_v51  ;;  %v556_v15 = vrot.slane %v1419_v50, %v1038_v6  ;;  %v560_v5 = vrot.slane %v1419_v50, %v1040_v7 }
  0x40   :  { %943 = vst [vmem:[%s1515_s3 + $0x90] sm:$0xff] %v999_v2  ;;  %v1000_v17 = vpack.c.bf16 %v718_v53, %v717_v0  ;;  %v719_v18 = vmax.f32 %v670_v8, 0.0  ;;  %v365_v19 = vmul.f32 %v252_v3, %v57_v54  ;;  %v256_v6 = vrot.slane %v1407_v36, %v1048_v10 }
  0x41   :  { %v720_v21 = vmax.f32 %v671_v9, 0.0  ;;  %v672_v7 = vadd.f32 %v556_v15, %v364_v14  ;;  %v260_v22 = vrot.slane %v1407_v36, %v1050_v11  ;;  %v564_v23 = vrot.slane %v1419_v50, %v1048_v10 }
  0x42   :  { %944 = vst [vmem:[%s1515_s3 + $0x98] sm:$0xff] %v1000_v17  ;;  %v673_v25 = vadd.f32 %v560_v5, %v365_v19  ;;  %v366_v26 = vmul.f32 %v256_v6, %v58_v16  ;;  %v568_v27 = vrot.slane %v1419_v50, %v1050_v11  ;;  %v264_v10 = vrot.slane %v1407_v36, %v1052_v12 }
  0x43   :  { %v1001_v31 = vpack.c.bf16 %v720_v21, %v719_v18  ;;  %v721_v32 = vmax.f32 %v672_v7, 0.0  ;;  %v367_v33 = vmul.f32 %v260_v22, %v59_v20  ;;  %v268_v11 = vrot.slane %v1407_v36, %v1054_v13 }
  0x44   :  { %v722_v34 = vmax.f32 %v673_v25, 0.0  ;;  %v674_v35 = vadd.f32 %v564_v23, %v366_v26  ;;  %v368_v37 = vmul.f32 %v264_v10, %v60_v24  ;;  %v572_v39 = vrot.slane %v1419_v50, %v1052_v12 }
  0x45   :  { %945 = vst [vmem:[%s1515_s3 + $0xa0] sm:$0xff] %v1001_v31  ;;  %v675_v43 = vadd.f32 %v568_v27, %v367_v33  ;;  %v369_v44 = vmul.f32 %v268_v11, %v61_v28  ;;  %v576_v45 = vrot.slane %v1419_v50, %v1054_v13  ;;  %v370_v36 = vmul.f32 %v954_v30, %v62_v29 }
  0x46   :  { %v1002_v46 = vpack.c.bf16 %v722_v34, %v721_v32  ;;  %v723_v47 = vmax.f32 %v674_v35, 0.0  ;;  %v676_v49 = vadd.f32 %v572_v39, %v368_v37 }
  0x47   :  { %v724_v38 = vmax.f32 %v675_v43, 0.0  ;;  %v677_v40 = vadd.f32 %v576_v45, %v369_v44  ;;  %v678_v12 = vadd.f32 %v955_v41, %v370_v36 }
  0x48   :  { %946 = vst [vmem:[%s1515_s3 + $0xa8] sm:$0xff] %v1002_v46  ;;  %v725_v42 = vmax.f32 %v676_v49, 0.0 }
  0x49   :  { %v1003_v48 = vpack.c.bf16 %v724_v38, %v723_v47  ;;  %v726_v55 = vmax.f32 %v677_v40, 0.0  ;;  %v727_v56 = vmax.f32 %v678_v12, 0.0 }
  0x4b   :  { %947 = vst [vmem:[%s1515_s3 + $0xb0] sm:$0xff] %v1003_v48  ;;  %v1004_v13 = vpack.c.bf16 %v726_v55, %v725_v42  ;;  %v1005_v50 = vpack.c.bf16 %v727_v56, %v727_v56 }
  0x4d   :  { %948 = vst [vmem:[%s1515_s3 + $0xb8] sm:$0xff] %v1004_v13  ;;  %949 = vst [vmem:[%s1515_s3 + $0xc0] sm:$0xf] %v1005_v50 }

// kernel: generator_forward.5
= control target key start
LH: loop header
LB: loop body
LE: loop exit
PB: predicated region body
PF: predicated region fallthrough
CT: control target
= control target key end

     0   :  { %10 = vsyncpa [#allocation3], 0  ;;  %s3131_s15 = smov [#allocation2]   ;;  %s4357_s0 = inlined_call_operand.vmem [shape: bf16[8,16], index: 0, kind: input, shape index: {}]   ;;  %s4358_s1 = inlined_call_operand.hbm [shape: bf16[16,6272], index: 1, kind: input, shape index: {}]   ;;  %s4359_s2 = inlined_call_operand.vmem [shape: f32[8,6272], index: 2, kind: output, shape index: {0}]   ;;  %s4360_s3 = inlined_call_operand.vmem [shape: f32[8,6272], index: 3, kind: output, shape index: {1}]   ;;  %s4361_s4 = inlined_call_operand.vmem [shape: f32[8,6272], index: 4, kind: output, shape index: {2}]  }
   0x1   :  { %s18_s16 = sshll.u32 %s3131_s15, 4  ;;  %s3107_s19 = scalar_lea.hbm %s4358_s1, 6272  ;;  %s19_s16 = int_to_ptr.vmem [resolvable:$true] %s18_s16 }
   0x2   :  { %p3108_p0 = scmp.ne.s32.totalorder %s4358_s1, %s3107_s19  ;;  %p3111_p1 = scmp.lt.u32.totalorder %s3107_s19, %s4358_s1 }
   0x4   :  { %p3113_p2 = pnand %p3111_p1, %p3108_p0 }
   0x6   :  { %3116 = shalt.err (!%p3113_p2)
}
   0x7   :  { %s3117_s24 = scalar_lea.vmem %s19_s16, 6272  ;;  %p3122_p4 = scmp.lt.s32.totalorder %s19_s16, %s19_s16 }
   0x8   :  { %p3118_p3 = scmp.ne.s32.totalorder %s19_s16, %s3117_s24  ;;  %p3123_p5 = scmp.lt.s32.totalorder %s3117_s24, %s3117_s24 }
   0xa   :  { %p3124_p6 = por %p3123_p5, %p3122_p4 }
   0xc   :  { %p3125_p7 = pnand %p3124_p6, %p3118_p3 }
   0xe   :  { %3128 = shalt.err (!%p3125_p7)
}
   0xf   :  { %s3132_s25 = smov 3136   ;;  %s3133_s26 = smov 196  }
  0x10   :  { %24 = dma.hbm_to_vmem [thread:$0]  %s4358_s1, 6272, %s19_s16, [#allocation3], %s3132_s25, %s3132_s25, %s3133_s26  }
  0x11   :  { %3129 = dma.done.wait [#allocation3], 6272  }
  0x12   :  { %3130 = vsyncadd [#allocation3], 4294961024  ;;  %v3134_v0 = vmov 0   ;;  %v3135_v1 = vmov 0.0   ;;  %v3034_v2 = vld [vmem:[#allocation2 + $0x4] ss:$196 sps:$4 sm:$0xff]   ;;  %v1851_v54 = vlaneseq }
  0x13   :  { %362 = vmatprep.mubr.bf16.mxu0 %v3134_v0  ;;  %403 = vmatprep.mubr.bf16.mxu1 %v3134_v0  ;;  %1403 = vst [vmem:[%s4360_s3] sm:$0xff] %v3135_v1  ;;  %1404 = vst [vmem:[%s4360_s3 + $0x8] sm:$0xff] %v3135_v1  ;;  %v3036_v3 = vld [vmem:[#allocation2 + $0xc] ss:$196 sps:$4 sm:$0xff]   ;;  %v3038_v4 = vld [vmem:[#allocation2] ss:$196 sps:$4 sm:$0xff]   ;;  %vm326_vm0 = vcmask 130048  }
  0x14   :  { %1405 = vst [vmem:[%s4360_s3 + $0x10] sm:$0xff] %v3135_v1  ;;  %1406 = vst [vmem:[%s4360_s3 + $0x18] sm:$0xff] %v3135_v1  ;;  %330 = vmatprep.subr.bf16.mxu0 %v3034_v2  ;;  %v3039_v5 = vld [vmem:[#allocation2 + $0x8] ss:$196 sps:$4 sm:$0xff]   ;;  %v3572_v6 = vld [vmem:[%s4357_s0] sm:$0xf]  ;;  %371 = vmatprep.subr.bf16.mxu1 %v3036_v3 }
  0x15   :  { %1407 = vst [vmem:[%s4360_s3 + $0x20] sm:$0xff] %v3135_v1  ;;  %1408 = vst [vmem:[%s4360_s3 + $0x28] sm:$0xff] %v3135_v1  ;;  %v3040_v7 = vld [vmem:[#allocation2 + $0x10] ss:$196 sps:$4 sm:$0xff]   ;;  %331 = vmatpush1.bf16.msra.mxu0 %v3038_v4  ;;  %372 = vmatpush1.bf16.msra.mxu1 %v3039_v5  ;;  %v3043_v9 = vld [vmem:[#allocation2 + $0x18] ss:$196 sps:$4 sm:$0xff]  }
  0x16   :  { %1409 = vst [vmem:[%s4360_s3 + $0x30] sm:$0xff] %v3135_v1  ;;  %1410 = vst [vmem:[%s4360_s3 + $0x38] sm:$0xff] %v3135_v1  ;;  %v3042_v8 = vld [vmem:[#allocation2 + $0x14] ss:$196 sps:$4 sm:$0xff]   ;;  %v3045_v10 = vld [vmem:[#allocation2 + $0x1c] ss:$196 sps:$4 sm:$0xff]  }
  0x17   :  { %1411 = vst [vmem:[%s4360_s3 + $0x40] sm:$0xff] %v3135_v1  ;;  %1412 = vst [vmem:[%s4360_s3 + $0x48] sm:$0xff] %v3135_v1  ;;  %412 = vmatprep.subr.bf16.mxu0 %v3042_v8  ;;  %v3048_v11 = vld [vmem:[#allocation2 + $0x24] ss:$196 sps:$4 sm:$0xff]   ;;  %453 = vmatprep.subr.bf16.mxu1 %v3045_v10  ;;  %v3051_v12 = vld [vmem:[#allocation2 + $0x2c] ss:$196 sps:$4 sm:$0xff]  }
  0x18   :  { %1413 = vst [vmem:[%s4360_s3 + $0x50] sm:$0xff] %v3135_v1  ;;  %1414 = vst [vmem:[%s4360_s3 + $0x58] sm:$0xff] %v3135_v1  ;;  %2972 = vmatmul.mubr.msk.bf16.vlgmr.msra.gmra.mrb[0].mxu0 %vm326_vm0, %v3572_v6  ;;  %2973 = vmatmul.mubr.msk.bf16.vlgmr.msra.gmra.mrb[0].mxu1 %vm326_vm0, %v3572_v6  ;;  %v3046_v13 = vld [vmem:[#allocation2 + $0x20] ss:$196 sps:$4 sm:$0xff]   ;;  %v3049_v14 = vld [vmem:[#allocation2 + $0x28] ss:$196 sps:$4 sm:$0xff]  }
  0x19   :  { %1415 = vst [vmem:[%s4360_s3 + $0x60] sm:$0xff] %v3135_v1  ;;  %1416 = vst [vmem:[%s4360_s3 + $0x68] sm:$0xff] %v3135_v1  ;;  %413 = vmatpush1.bf16.msra.mxu0 %v3040_v7  ;;  %454 = vmatpush1.bf16.msra.mxu1 %v3043_v9  ;;  %v3054_v15 = vld [vmem:[#allocation2 + $0x34] ss:$196 sps:$4 sm:$0xff]   ;;  %v3057_v16 = vld [vmem:[#allocation2 + $0x3c] ss:$196 sps:$4 sm:$0xff]  }
  0x1a   :  { %1417 = vst [vmem:[%s4360_s3 + $0x70] sm:$0xff] %v3135_v1  ;;  %1418 = vst [vmem:[%s4360_s3 + $0x78] sm:$0xff] %v3135_v1  ;;  %444 = vmatprep.mubr.bf16.mxu0 %v3134_v0  ;;  %485 = vmatprep.mubr.bf16.mxu1 %v3134_v0  ;;  %v3052_v17 = vld [vmem:[#allocation2 + $0x30] ss:$196 sps:$4 sm:$0xff]   ;;  %v3055_v18 = vld [vmem:[#allocation2 + $0x38] ss:$196 sps:$4 sm:$0xff]  }
  0x1b   :  { %1419 = vst [vmem:[%s4360_s3 + $0x80] sm:$0xff] %v3135_v1  ;;  %1420 = vst [vmem:[%s4360_s3 + $0x88] sm:$0xff] %v3135_v1  ;;  %494 = vmatprep.subr.bf16.mxu0 %v3048_v11  ;;  %535 = vmatprep.subr.bf16.mxu1 %v3051_v12  ;;  %v3060_v19 = vld [vmem:[#allocation2 + $0x44] ss:$196 sps:$4 sm:$0xff]   ;;  %v3063_v20 = vld [vmem:[#allocation2 + $0x4c] ss:$196 sps:$4 sm:$0xff]  }
  0x1c   :  { %1421 = vst [vmem:[%s4360_s3 + $0x90] sm:$0xff] %v3135_v1  ;;  %1422 = vst [vmem:[%s4360_s3 + $0x98] sm:$0xff] %v3135_v1  ;;  %v3058_v21 = vld [vmem:[#allocation2 + $0x40] ss:$196 sps:$4 sm:$0xff]   ;;  %v3061_v22 = vld [vmem:[#allocation2 + $0x48] ss:$196 sps:$4 sm:$0xff]  }
  0x1d   :  { %1423 = vst [vmem:[%s4360_s3 + $0xa0] sm:$0xff] %v3135_v1  ;;  %1424 = vst [vmem:[%s4360_s3 + $0xa8] sm:$0xff] %v3135_v1  ;;  %v3066_v23 = vld [vmem:[#allocation2 + $0x54] ss:$196 sps:$4 sm:$0xff]   ;;  %v3069_v24 = vld [vmem:[#allocation2 + $0x5c] ss:$196 sps:$4 sm:$0xff]  }
  0x1e   :  { %1425 = vst [vmem:[%s4360_s3 + $0xb0] sm:$0xff] %v3135_v1  ;;  %1426 = vst [vmem:[%s4360_s3 + $0xb8] sm:$0xff] %v3135_v1  ;;  %v3064_v25 = vld [vmem:[#allocation2 + $0x50] ss:$196 sps:$4 sm:$0xff]   ;;  %v3067_v26 = vld [vmem:[#allocation2 + $0x58] ss:$196 sps:$4 sm:$0xff]  }
  0x1f   :  { %1427 = vst [vmem:[%s4360_s3 + $0xc0] sm:$0xff] %v3135_v1  ;;  %1428 = vst [vmem:[%s4360_s3 + $0xc8] sm:$0xff] %v3135_v1  ;;  %v3072_v27 = vld [vmem:[#allocation2 + $0x64] ss:$196 sps:$4 sm:$0xff]   ;;  %v3075_v28 = vld [vmem:[#allocation2 + $0x6c] ss:$196 sps:$4 sm:$0xff]  }
  0x20   :  { %1429 = vst [vmem:[%s4360_s3 + $0xd0] sm:$0xff] %v3135_v1  ;;  %1430 = vst [vmem:[%s4360_s3 + $0xd8] sm:$0xff] %v3135_v1  ;;  %2974 = vmatmul.mubr.msk.bf16.vlgmr.msra.gmra.mrb[4].mxu0 %vm326_vm0, %v3572_v6  ;;  %2975 = vmatmul.mubr.msk.bf16.vlgmr.msra.gmra.mrb[4].mxu1 %vm326_vm0, %v3572_v6  ;;  %v3070_v29 = vld [vmem:[#allocation2 + $0x60] ss:$196 sps:$4 sm:$0xff]   ;;  %v3073_v30 = vld [vmem:[#allocation2 + $0x68] ss:$196 sps:$4 sm:$0xff]  }
  0x21   :  { %1431 = vst [vmem:[%s4360_s3 + $0xe0] sm:$0xff] %v3135_v1  ;;  %1432 = vst [vmem:[%s4360_s3 + $0xe8] sm:$0xff] %v3135_v1  ;;  %495 = vmatpush1.bf16.msra.mxu0 %v3046_v13  ;;  %536 = vmatpush1.bf16.msra.mxu1 %v3049_v14  ;;  %v3078_v31 = vld [vmem:[#allocation2 + $0x74] ss:$196 sps:$4 sm:$0xff]   ;;  %v3081_v32 = vld [vmem:[#allocation2 + $0x7c] ss:$196 sps:$4 sm:$0xff]  }
  0x22   :  { %1433 = vst [vmem:[%s4360_s3 + $0xf0] sm:$0xff] %v3135_v1  ;;  %1434 = vst [vmem:[%s4360_s3 + $0xf8] sm:$0xff] %v3135_v1  ;;  %526 = vmatprep.mubr.bf16.mxu0 %v3134_v0  ;;  %567 = vmatprep.mubr.bf16.mxu1 %v3134_v0  ;;  %v3076_v33 = vld [vmem:[#allocation2 + $0x70] ss:$196 sps:$4 sm:$0xff]   ;;  %v3079_v34 = vld [vmem:[#allocation2 + $0x78] ss:$196 sps:$4 sm:$0xff]  }
  0x23   :  { %1435 = vst [vmem:[%s4360_s3 + $0x100] sm:$0xff] %v3135_v1  ;;  %1436 = vst [vmem:[%s4360_s3 + $0x108] sm:$0xff] %v3135_v1  ;;  %576 = vmatprep.subr.bf16.mxu0 %v3054_v15  ;;  %617 = vmatprep.subr.bf16.mxu1 %v3057_v16  ;;  %v3084_v35 = vld [vmem:[#allocation2 + $0x84] ss:$196 sps:$4 sm:$0xff]   ;;  %v3087_v36 = vld [vmem:[#allocation2 + $0x8c] ss:$196 sps:$4 sm:$0xff]  }
  0x24   :  { %1437 = vst [vmem:[%s4360_s3 + $0x110] sm:$0xff] %v3135_v1  ;;  %1438 = vst [vmem:[%s4360_s3 + $0x118] sm:$0xff] %v3135_v1  ;;  %v3082_v37 = vld [vmem:[#allocation2 + $0x80] ss:$196 sps:$4 sm:$0xff]   ;;  %v3085_v38 = vld [vmem:[#allocation2 + $0x88] ss:$196 sps:$4 sm:$0xff]  }
  0x25   :  { %1439 = vst [vmem:[%s4360_s3 + $0x120] sm:$0xff] %v3135_v1  ;;  %1440 = vst [vmem:[%s4360_s3 + $0x128] sm:$0xff] %v3135_v1  ;;  %v3090_v39 = vld [vmem:[#allocation2 + $0x94] ss:$196 sps:$4 sm:$0xff]   ;;  %v3093_v40 = vld [vmem:[#allocation2 + $0x9c] ss:$196 sps:$4 sm:$0xff]  }
  0x26   :  { %1441 = vst [vmem:[%s4360_s3 + $0x130] sm:$0xff] %v3135_v1  ;;  %1442 = vst [vmem:[%s4360_s3 + $0x138] sm:$0xff] %v3135_v1  ;;  %v3088_v41 = vld [vmem:[#allocation2 + $0x90] ss:$196 sps:$4 sm:$0xff]   ;;  %v3091_v42 = vld [vmem:[#allocation2 + $0x98] ss:$196 sps:$4 sm:$0xff]  }
  0x27   :  { %1443 = vst [vmem:[%s4360_s3 + $0x140] sm:$0xff] %v3135_v1  ;;  %1444 = vst [vmem:[%s4360_s3 + $0x148] sm:$0xff] %v3135_v1  ;;  %v3096_v43 = vld [vmem:[#allocation2 + $0xa4] ss:$196 sps:$4 sm:$0xff]   ;;  %v3099_v44 = vld [vmem:[#allocation2 + $0xac] ss:$196 sps:$4 sm:$0xff]  }
  0x28   :  { %1445 = vst [vmem:[%s4360_s3 + $0x150] sm:$0xff] %v3135_v1  ;;  %1446 = vst [vmem:[%s4360_s3 + $0x158] sm:$0xff] %v3135_v1  ;;  %2976 = vmatmul.mubr.msk.bf16.vlgmr.msra.gmra.mrb[8].mxu0 %vm326_vm0, %v3572_v6  ;;  %2977 = vmatmul.mubr.msk.bf16.vlgmr.msra.gmra.mrb[8].mxu1 %vm326_vm0, %v3572_v6  ;;  %v3094_v45 = vld [vmem:[#allocation2 + $0xa0] ss:$196 sps:$4 sm:$0xff]   ;;  %v3097_v46 = vld [vmem:[#allocation2 + $0xa8] ss:$196 sps:$4 sm:$0xff]  }
  0x29   :  { %1447 = vst [vmem:[%s4360_s3 + $0x160] sm:$0xff] %v3135_v1  ;;  %1448 = vst [vmem:[%s4360_s3 + $0x168] sm:$0xff] %v3135_v1  ;;  %577 = vmatpush1.bf16.msra.mxu0 %v3052_v17  ;;  %618 = vmatpush1.bf16.msra.mxu1 %v3055_v18  ;;  %v3102_v47 = vld [vmem:[#allocation2 + $0xb4] ss:$196 sps:$4 sm:$0xff]   ;;  %v3105_v48 = vld [vmem:[#allocation2 + $0xbc] ss:$196 sps:$4 sm:$0xff]  }
  0x2a   :  { %1449 = vst [vmem:[%s4360_s3 + $0x170] sm:$0xff] %v3135_v1  ;;  %1450 = vst [vmem:[%s4360_s3 + $0x178] sm:$0xff] %v3135_v1  ;;  %608 = vmatprep.mubr.bf16.mxu0 %v3134_v0  ;;  %649 = vmatprep.mubr.bf16.mxu1 %v3134_v0  ;;  %v3100_v49 = vld [vmem:[#allocation2 + $0xb0] ss:$196 sps:$4 sm:$0xff]   ;;  %v3103_v50 = vld [vmem:[#allocation2 + $0xb8] ss:$196 sps:$4 sm:$0xff]  }
  0x2b   :  { %1451 = vst [vmem:[%s4360_s3 + $0x180] sm:$0xff] %v3135_v1  ;;  %1452 = vst [vmem:[%s4361_s4] sm:$0xff] %v3135_v1  ;;  %658 = vmatprep.subr.bf16.mxu0 %v3060_v19  ;;  %699 = vmatprep.subr.bf16.mxu1 %v3063_v20  ;;  %v3106_v51 = vld [vmem:[#allocation2 + $0xc0] ss:$196 sps:$4 sm:$0xff]   ;;  %vm3136_vm1 = vmmov 0   ;;  %v3137_v52 = vmov 1966171168  }
  0x2c   :  { %1453 = vst [vmem:[%s4361_s4 + $0x8] sm:$0xff] %v3135_v1  ;;  %1454 = vst [vmem:[%s4361_s4 + $0x10] sm:$0xff] %v3135_v1  ;;  %v1849_v53 = vunpack.c.l.s4 %v3137_v52  ;;  %v1852_v56 = vshrl.u32 %v1851_v54, 7  ;;  %vm4323_vm2 = vcmp.lt.s32.totalorder %v1851_v54, 128 }
  0x2d   :  { %1455 = vst [vmem:[%s4361_s4 + $0x18] sm:$0xff] %v3135_v1  ;;  %1456 = vst [vmem:[%s4361_s4 + $0x20] sm:$0xff] %v3135_v1 }
  0x2e   :  { %1457 = vst [vmem:[%s4361_s4 + $0x28] sm:$0xff] %v3135_v1  ;;  %1458 = vst [vmem:[%s4361_s4 + $0x30] sm:$0xff] %v3135_v1  ;;  %v1850_v55 = vunpack.c.0.s8 %v1849_v53 }
  0x2f   :  { %1459 = vst [vmem:[%s4361_s4 + $0x38] sm:$0xff] %v3135_v1  ;;  %1460 = vst [vmem:[%s4361_s4 + $0x40] sm:$0xff] %v3135_v1 }
  0x30   :  { %1461 = vst [vmem:[%s4361_s4 + $0x48] sm:$0xff] %v3135_v1  ;;  %1462 = vst [vmem:[%s4361_s4 + $0x50] sm:$0xff] %v3135_v1  ;;  %2978 = vmatmul.mubr.msk.bf16.vlgmr.msra.gmra.mrb[12].mxu0 %vm326_vm0, %v3572_v6  ;;  %2979 = vmatmul.mubr.msk.bf16.vlgmr.msra.gmra.mrb[12].mxu1 %vm326_vm0, %v3572_v6  ;;  %v3649_v59 = vsub.s32 %v1850_v55, %v1852_v56 }
  0x31   :  { %1463 = vst [vmem:[%s4361_s4 + $0x58] sm:$0xff] %v3135_v1  ;;  %1464 = vst [vmem:[%s4361_s4 + $0x60] sm:$0xff] %v3135_v1  ;;  %659 = vmatpush1.bf16.msra.mxu0 %v3058_v21  ;;  %700 = vmatpush1.bf16.msra.mxu1 %v3061_v22 }
  0x32   :  { %1465 = vst [vmem:[%s4361_s4 + $0x68] sm:$0xff] %v3135_v1  ;;  %1466 = vst [vmem:[%s4361_s4 + $0x70] sm:$0xff] %v3135_v1  ;;  %690 = vmatprep.mubr.bf16.mxu0 %v3134_v0  ;;  %731 = vmatprep.mubr.bf16.mxu1 %v3134_v0 }
  0x33   :  { %1467 = vst [vmem:[%s4361_s4 + $0x78] sm:$0xff] %v3135_v1  ;;  %1468 = vst [vmem:[%s4361_s4 + $0x80] sm:$0xff] %v3135_v1  ;;  %740 = vmatprep.subr.bf16.mxu0 %v3066_v23  ;;  %781 = vmatprep.subr.bf16.mxu1 %v3069_v24 }
  0x34   :  { %1469 = vst [vmem:[%s4361_s4 + $0x88] sm:$0xff] %v3135_v1  ;;  %1470 = vst [vmem:[%s4361_s4 + $0x90] sm:$0xff] %v3135_v1 }
  0x35   :  { %1471 = vst [vmem:[%s4361_s4 + $0x98] sm:$0xff] %v3135_v1  ;;  %1472 = vst [vmem:[%s4361_s4 + $0xa0] sm:$0xff] %v3135_v1 }
  0x36   :  { %1473 = vst [vmem:[%s4361_s4 + $0xa8] sm:$0xff] %v3135_v1  ;;  %1474 = vst [vmem:[%s4361_s4 + $0xb0] sm:$0xff] %v3135_v1 }
  0x37   :  { %1475 = vst [vmem:[%s4361_s4 + $0xb8] sm:$0xff] %v3135_v1  ;;  %1476 = vst [vmem:[%s4361_s4 + $0xc0] sm:$0xff] %v3135_v1 }
  0x38   :  { %1477 = vst [vmem:[%s4361_s4 + $0xc8] sm:$0xff] %v3135_v1  ;;  %1478 = vst [vmem:[%s4361_s4 + $0xd0] sm:$0xff] %v3135_v1  ;;  %2980 = vmatmul.mubr.msk.bf16.vlgmr.msra.gmra.mrb[16].mxu0 %vm326_vm0, %v3572_v6  ;;  %2981 = vmatmul.mubr.msk.bf16.vlgmr.msra.gmra.mrb[16].mxu1 %vm326_vm0, %v3572_v6 }
  0x39   :  { %1479 = vst [vmem:[%s4361_s4 + $0xd8] sm:$0xff] %v3135_v1  ;;  %1480 = vst [vmem:[%s4361_s4 + $0xe0] sm:$0xff] %v3135_v1  ;;  %741 = vmatpush1.bf16.msra.mxu0 %v3064_v25  ;;  %782 = vmatpush1.bf16.msra.mxu1 %v3067_v26 }
  0x3a   :  { %1481 = vst [vmem:[%s4361_s4 + $0xe8] sm:$0xff] %v3135_v1  ;;  %1482 = vst [vmem:[%s4361_s4 + $0xf0] sm:$0xff] %v3135_v1  ;;  %772 = vmatprep.mubr.bf16.mxu0 %v3134_v0  ;;  %813 = vmatprep.mubr.bf16.mxu1 %v3134_v0 }
  0x3b   :  { %1483 = vst [vmem:[%s4361_s4 + $0xf8] sm:$0xff] %v3135_v1  ;;  %1484 = vst [vmem:[%s4361_s4 + $0x100] sm:$0xff] %v3135_v1  ;;  %822 = vmatprep.subr.bf16.mxu0 %v3072_v27  ;;  %863 = vmatprep.subr.bf16.mxu1 %v3075_v28 }
  0x3c   :  { %1485 = vst [vmem:[%s4361_s4 + $0x108] sm:$0xff] %v3135_v1  ;;  %1486 = vst [vmem:[%s4361_s4 + $0x110] sm:$0xff] %v3135_v1 }
  0x3d   :  { %1487 = vst [vmem:[%s4361_s4 + $0x118] sm:$0xff] %v3135_v1  ;;  %1488 = vst [vmem:[%s4361_s4 + $0x120] sm:$0xff] %v3135_v1 }
  0x3e   :  { %1489 = vst [vmem:[%s4361_s4 + $0x128] sm:$0xff] %v3135_v1  ;;  %1490 = vst [vmem:[%s4361_s4 + $0x130] sm:$0xff] %v3135_v1 }
  0x3f   :  { %1491 = vst [vmem:[%s4361_s4 + $0x138] sm:$0xff] %v3135_v1  ;;  %1492 = vst [vmem:[%s4361_s4 + $0x140] sm:$0xff] %v3135_v1 }
  0x40   :  { %1493 = vst [vmem:[%s4361_s4 + $0x148] sm:$0xff] %v3135_v1  ;;  %1494 = vst [vmem:[%s4361_s4 + $0x150] sm:$0xff] %v3135_v1  ;;  %2982 = vmatmul.mubr.msk.bf16.vlgmr.msra.gmra.mrb[20].mxu0 %vm326_vm0, %v3572_v6  ;;  %2983 = vmatmul.mubr.msk.bf16.vlgmr.msra.gmra.mrb[20].mxu1 %vm326_vm0, %v3572_v6 }
  0x41   :  { %1495 = vst [vmem:[%s4361_s4 + $0x158] sm:$0xff] %v3135_v1  ;;  %1496 = vst [vmem:[%s4361_s4 + $0x160] sm:$0xff] %v3135_v1  ;;  %823 = vmatpush1.bf16.msra.mxu0 %v3070_v29  ;;  %864 = vmatpush1.bf16.msra.mxu1 %v3073_v30 }
  0x42   :  { %1497 = vst [vmem:[%s4361_s4 + $0x168] sm:$0xff] %v3135_v1  ;;  %1498 = vst [vmem:[%s4361_s4 + $0x170] sm:$0xff] %v3135_v1  ;;  %854 = vmatprep.mubr.bf16.mxu0 %v3134_v0  ;;  %895 = vmatprep.mubr.bf16.mxu1 %v3134_v0 }
  0x43   :  { %1499 = vst [vmem:[%s4361_s4 + $0x178] sm:$0xff] %v3135_v1  ;;  %1500 = vst [vmem:[%s4361_s4 + $0x180] sm:$0xff] %v3135_v1  ;;  %904 = vmatprep.subr.bf16.mxu0 %v3078_v31  ;;  %945 = vmatprep.subr.bf16.mxu1 %v3081_v32 }
  0x48   :  { %2984 = vmatmul.mubr.msk.bf16.vlgmr.msra.gmra.mrb[24].mxu0 %vm326_vm0, %v3572_v6  ;;  %2985 = vmatmul.mubr.msk.bf16.vlgmr.msra.gmra.mrb[24].mxu1 %vm326_vm0, %v3572_v6 }
  0x49   :  { %905 = vmatpush1.bf16.msra.mxu0 %v3076_v33  ;;  %946 = vmatpush1.bf16.msra.mxu1 %v3079_v34 }
  0x4a   :  { %936 = vmatprep.mubr.bf16.mxu0 %v3134_v0  ;;  %977 = vmatprep.mubr.bf16.mxu1 %v3134_v0 }
  0x4b   :  { %986 = vmatprep.subr.bf16.mxu0 %v3084_v35  ;;  %1027 = vmatprep.subr.bf16.mxu1 %v3087_v36 }
  0x50   :  { %2986 = vmatmul.mubr.msk.bf16.vlgmr.msra.gmra.mrb[28].mxu0 %vm326_vm0, %v3572_v6  ;;  %2987 = vmatmul.mubr.msk.bf16.vlgmr.msra.gmra.mrb[28].mxu1 %vm326_vm0, %v3572_v6 }
  0x51   :  { %987 = vmatpush1.bf16.msra.mxu0 %v3082_v37  ;;  %1028 = vmatpush1.bf16.msra.mxu1 %v3085_v38 }
  0x52   :  { %1018 = vmatprep.mubr.bf16.mxu0 %v3134_v0  ;;  %1059 = vmatprep.mubr.bf16.mxu1 %v3134_v0 }
  0x53   :  { %1068 = vmatprep.subr.bf16.mxu0 %v3090_v39  ;;  %1109 = vmatprep.subr.bf16.mxu1 %v3093_v40 }
  0x58   :  { %2988 = vmatmul.mubr.msk.bf16.vlgmr.msra.gmra.mrb[32].mxu0 %vm326_vm0, %v3572_v6  ;;  %2989 = vmatmul.mubr.msk.bf16.vlgmr.msra.gmra.mrb[32].mxu1 %vm326_vm0, %v3572_v6 }
  0x59   :  { %1069 = vmatpush1.bf16.msra.mxu0 %v3088_v41  ;;  %1110 = vmatpush1.bf16.msra.mxu1 %v3091_v42 }
  0x5a   :  { %1100 = vmatprep.mubr.bf16.mxu0 %v3134_v0  ;;  %1141 = vmatprep.mubr.bf16.mxu1 %v3134_v0 }
  0x5b   :  { %1150 = vmatprep.subr.bf16.mxu0 %v3096_v43  ;;  %1191 = vmatprep.subr.bf16.mxu1 %v3099_v44 }
  0x60   :  { %2990 = vmatmul.mubr.msk.bf16.vlgmr.msra.gmra.mrb[36].mxu0 %vm326_vm0, %v3572_v6  ;;  %2991 = vmatmul.mubr.msk.bf16.vlgmr.msra.gmra.mrb[36].mxu1 %vm326_vm0, %v3572_v6 }
  0x61   :  { %1151 = vmatpush1.bf16.msra.mxu0 %v3094_v45  ;;  %1192 = vmatpush1.bf16.msra.mxu1 %v3097_v46 }
  0x62   :  { %1182 = vmatprep.mubr.bf16.mxu0 %v3134_v0  ;;  %1223 = vmatprep.mubr.bf16.mxu1 %v3134_v0 }
  0x63   :  { %1232 = vmatprep.subr.bf16.mxu0 %v3102_v47  ;;  %1273 = vmatprep.subr.bf16.mxu1 %v3105_v48 }
  0x68   :  { %2992 = vmatmul.mubr.msk.bf16.vlgmr.msra.gmra.mrb[40].mxu0 %vm326_vm0, %v3572_v6  ;;  %2993 = vmatmul.mubr.msk.bf16.vlgmr.msra.gmra.mrb[40].mxu1 %vm326_vm0, %v3572_v6 }
  0x69   :  { %1233 = vmatpush1.bf16.msra.mxu0 %v3100_v49  ;;  %1274 = vmatpush1.bf16.msra.mxu1 %v3103_v50 }
  0x6a   :  { %1264 = vmatprep.mubr.bf16.mxu0 %v3134_v0  ;;  %1305 = vmatprep.mubr.bf16.mxu1 %v3134_v0 }
  0x6b   :  { %3021 = vmatprep.subr.bf16.mxu0 %v3135_v1 }
  0x70   :  { %2994 = vmatmul.mubr.msk.bf16.vlgmr.msra.gmra.mrb[44].mxu0 %vm326_vm0, %v3572_v6  ;;  %2995 = vmatmul.mubr.msk.bf16.vlgmr.msra.gmra.mrb[44].mxu1 %vm326_vm0, %v3572_v6 }
  0x71   :  { %3022 = vmatpush3.bf16.msra.mxu0 %v3106_v51  ;;  %3023 = vmatprep.mubr.msk.bf16.mxu0 %vm3136_vm1, %v3135_v1 }
  0x78   :  { %3024 = vmatmul.mubr.msk.bf16.vlgmr.msra.gmra.mrb[48].mxu0 %vm326_vm0, %v3572_v6 }
  0xeb   :  { %v364_v57 = vpop.f32.mrb[0].mxu0  ;;  %v405_v58 = vpop.f32.mrb[0].mxu1 }
  0xec   :  { %1354 = vst [vmem:[%s4359_s2] sm:$0xff] %v364_v57  ;;  %v1501_v60 = vrot.slane %v364_v57, 4  ;;  %v2183_v61 = vmul.f32 %v364_v57, %v364_v57  ;;  %1356 = vst [vmem:[%s4359_s2 + $0x10] sm:$0xff] %v405_v58  ;;  %v1513_v62 = vrot.slane %v405_v58, 4  ;;  %v2185_v63 = vmul.f32 %v405_v58, %v405_v58  ;;  %v366_v0 = vpop.f32.mrb[1].mxu0  ;;  %v407_v1 = vpop.f32.mrb[1].mxu1 }
  0xed   :  { %1355 = vst [vmem:[%s4359_s2 + $0x8] sm:$0xff] %v366_v0  ;;  %v1507_v2 = vrot.slane %v366_v0, 4  ;;  %v2184_v3 = vmul.f32 %v366_v0, %v366_v0  ;;  %1357 = vst [vmem:[%s4359_s2 + $0x18] sm:$0xff] %v407_v1  ;;  %v1519_v4 = vrot.slane %v407_v1, 4  ;;  %v2186_v5 = vmul.f32 %v407_v1, %v407_v1  ;;  %v368_v6 = vpop.f32.mrb[2].mxu0  ;;  %v409_v7 = vpop.f32.mrb[2].mxu1 }
  0xee   :  { %v1502_v8 = vadd.f32 %v1501_v60, %v364_v57  ;;  %v2232_v9 = vrot.slane %v2183_v61, 4  ;;  %v1514_v10 = vadd.f32 %v1513_v62, %v405_v58  ;;  %v2244_v11 = vrot.slane %v2185_v63, 4  ;;  %v369_v12 = vpop.f32.mrb[3].mxu0  ;;  %v410_v13 = vpop.f32.mrb[3].mxu1 }
  0xef   :  { %v1508_v14 = vadd.f32 %v1507_v2, %v366_v0  ;;  %v2238_v15 = vrot.slane %v2184_v3, 4  ;;  %v1520_v16 = vadd.f32 %v1519_v4, %v407_v1  ;;  %v2250_v17 = vrot.slane %v2186_v5, 4 }
  0xf0   :  { %v1503_v18 = vrot.slane %v1502_v8, 2  ;;  %v2233_v19 = vadd.f32 %v2232_v9, %v2183_v61  ;;  %v1515_v20 = vrot.slane %v1514_v10, 2  ;;  %v2245_v21 = vadd.f32 %v2244_v11, %v2185_v63 }
  0xf1   :  { %v1509_v22 = vrot.slane %v1508_v14, 2  ;;  %v2239_v23 = vadd.f32 %v2238_v15, %v2184_v3  ;;  %v1521_v24 = vrot.slane %v1520_v16, 2  ;;  %v2251_v25 = vadd.f32 %v2250_v17, %v2186_v5 }
  0xf2   :  { %v1504_v26 = vadd.f32 %v1503_v18, %v1502_v8  ;;  %v2234_v27 = vrot.slane %v2233_v19, 2  ;;  %v1516_v28 = vadd.f32 %v1515_v20, %v1514_v10  ;;  %v2246_v29 = vrot.slane %v2245_v21, 2 }
  0xf3   :  { %v1510_v30 = vadd.f32 %v1509_v22, %v1508_v14  ;;  %v2240_v31 = vrot.slane %v2239_v23, 2  ;;  %v1522_v32 = vadd.f32 %v1521_v24, %v1520_v16  ;;  %v2252_v33 = vrot.slane %v2251_v25, 2  ;;  %v446_v34 = vpop.f32.mrb[4].mxu0  ;;  %v487_v35 = vpop.f32.mrb[4].mxu1 }
  0xf4   :  { %v1505_v36 = vrot.slane %v1504_v26, 1  ;;  %v2235_v37 = vadd.f32 %v2234_v27, %v2233_v19  ;;  %v1517_v38 = vrot.slane %v1516_v28, 1  ;;  %v2247_v39 = vadd.f32 %v2246_v29, %v2245_v21  ;;  %1358 = vst [vmem:[%s4359_s2 + $0x20] sm:$0xff] %v446_v34  ;;  %1360 = vst [vmem:[%s4359_s2 + $0x30] sm:$0xff] %v487_v35  ;;  %v448_v40 = vpop.f32.mrb[5].mxu0  ;;  %v3669_v41 = vpop.f32.mrb[5].mxu1 }
  0xf5   :  { %v1511_v42 = vrot.slane %v1510_v30, 1  ;;  %v2241_v43 = vadd.f32 %v2240_v31, %v2239_v23  ;;  %v1523_v44 = vrot.slane %v1522_v32, 1  ;;  %v2253_v45 = vadd.f32 %v2252_v33, %v2251_v25  ;;  %1359 = vst [vmem:[%s4359_s2 + $0x28] sm:$0xff] %v448_v40  ;;  %1361 = vst [vmem:[%s4359_s2 + $0x38] sm:$0xff] %v3669_v41  ;;  %v450_v46 = vpop.f32.mrb[6].mxu0  ;;  %v491_v47 = vpop.f32.mrb[6].mxu1 }
  0xf6   :  { %v1506_v48 = vadd.f32 %v1505_v36, %v1504_v26  ;;  %v2236_v49 = vrot.slane %v2235_v37, 1  ;;  %v1518_v50 = vadd.f32 %v1517_v38, %v1516_v28  ;;  %v2248_v51 = vrot.slane %v2247_v39, 1  ;;  %v451_v52 = vpop.f32.mrb[7].mxu0  ;;  %v492_v53 = vpop.f32.mrb[7].mxu1 }
  0xf7   :  { %v1512_v55 = vadd.f32 %v1511_v42, %v1510_v30  ;;  %v2242_v56 = vrot.slane %v2241_v43, 1  ;;  %v1524_v57 = vadd.f32 %v1523_v44, %v1522_v32  ;;  %v2254_v58 = vrot.slane %v2253_v45, 1 }
  0xf8   :  { %v2237_v60 = vadd.f32 %v2236_v49, %v2235_v37  ;;  %v2249_v61 = vadd.f32 %v2248_v51, %v2247_v39  ;;  %v1525_v62 = vrot.slane %v446_v34, 4  ;;  %v2187_v63 = vmul.f32 %v446_v34, %v446_v34 }
  0xf9   :  { %v1844_v0 = vcombine.low %v1506_v48, %v1512_v55  ;;  %v2243_v1 = vadd.f32 %v2242_v56, %v2241_v43  ;;  %v1845_v2 = vcombine.low %v1518_v50, %v1524_v57  ;;  %v2255_v3 = vadd.f32 %v2254_v58, %v2253_v45 }
  0xfa   :  { %v1526_v4 = vadd.f32 %v1525_v62, %v446_v34  ;;  %v2256_v5 = vrot.slane %v2187_v63, 4  ;;  %v1537_v6 = vrot.slane %v487_v35, 4  ;;  %v2189_v7 = vmul.f32 %v487_v35, %v487_v35 }
  0xfb   :  { %v1854_v8 = vrot.slane %v1844_v0, %v3649_v59  ;;  %v2575_v9 = vcombine.low %v2237_v60, %v2243_v1  ;;  %v1861_v10 = vrot.slane %v1845_v2, %v3649_v59  ;;  %v2576_v11 = vcombine.low %v2249_v61, %v2255_v3  ;;  %v3680_v12 = vpop.f32.mrb[8].mxu0  ;;  %v3682_v13 = vpop.f32.mrb[8].mxu1 }
  0xfc   :  { %v1527_v14 = vrot.slane %v1526_v4, 2  ;;  %v2257_v15 = vadd.f32 %v2256_v5, %v2187_v63  ;;  %v1538_v16 = vadd.f32 %v1537_v6, %v487_v35  ;;  %v2268_v17 = vrot.slane %v2189_v7, 4  ;;  %1362 = vst [vmem:[%s4359_s2 + $0x40] sm:$0xff] %v3680_v12  ;;  %1364 = vst [vmem:[%s4359_s2 + $0x50] sm:$0xff] %v3682_v13  ;;  %v3692_v18 = vpop.f32.mrb[9].mxu0  ;;  %v3694_v19 = vpop.f32.mrb[9].mxu1 }
  0xfd   :  { %v2585_v20 = vrot.slane %v2575_v9, %v3649_v59  ;;  %v1876_v21 = vcombine.low %v1854_v8, %v1861_v10  ;;  %v2592_v22 = vrot.slane %v2576_v11, %v3649_v59  ;;  %v1531_v23 = vrot.slane %v448_v40, 4  ;;  %1363 = vst [vmem:[%s4359_s2 + $0x48] sm:$0xff] %v3692_v18  ;;  %1365 = vst [vmem:[%s4359_s2 + $0x58] sm:$0xff] %v3694_v19  ;;  %v532_v24 = vpop.f32.mrb[10].mxu0  ;;  %v573_v25 = vpop.f32.mrb[10].mxu1 }
  0xfe   :  { %v1528_v26 = vadd.f32 %v1527_v14, %v1526_v4  ;;  %v2258_v27 = vrot.slane %v2257_v15, 2  ;;  %v1539_v28 = vrot.slane %v1538_v16, 2  ;;  %v2269_v29 = vadd.f32 %v2268_v17, %v2189_v7  ;;  %v533_v30 = vpop.f32.mrb[11].mxu0  ;;  %v574_v31 = vpop.f32.mrb[11].mxu1 }
  0xff   :  { %v3707_v32 = vrot.slane %v1876_v21, %v3649_v59  ;;  %v2607_v33 = vcombine.low %v2585_v20, %v2592_v22  ;;  %v1532_v34 = vadd.f32 %v1531_v23, %v448_v40  ;;  %v2188_v35 = vmul.f32 %v448_v40, %v448_v40 }
 0x100   :  { %v1529_v36 = vrot.slane %v1528_v26, 1  ;;  %v2259_v37 = vadd.f32 %v2258_v27, %v2257_v15  ;;  %v1540_v38 = vadd.f32 %v1539_v28, %v1538_v16  ;;  %v2270_v39 = vrot.slane %v2269_v29, 2 }
 0x101   :  { %v3710_v42 = vrot.slane %v2607_v33, %v3649_v59  ;;  %v1533_v43 = vrot.slane %v1532_v34, 2  ;;  %v2262_v44 = vrot.slane %v2188_v35, 4  ;;  %v1543_v45 = vrot.slane %v3669_v41, 4 }
 0x102   :  { %v1530_v46 = vadd.f32 %v1529_v36, %v1528_v26  ;;  %v2260_v47 = vrot.slane %v2259_v37, 1  ;;  %v1541_v48 = vrot.slane %v1540_v38, 1  ;;  %v2271_v49 = vadd.f32 %v2270_v39, %v2269_v29 }
 0x103   :  { %v1534_v50 = vadd.f32 %v1533_v43, %v1532_v34  ;;  %v2263_v51 = vadd.f32 %v2262_v44, %v2188_v35  ;;  %v1544_v52 = vadd.f32 %v1543_v45, %v3669_v41  ;;  %v2190_v40 = vmul.f32 %v3669_v41, %v3669_v41  ;;  %v3716_v53 = vpop.f32.mrb[12].mxu0  ;;  %v3718_v55 = vpop.f32.mrb[12].mxu1 }
 0x104   :  { %v3720_v56 = vadd.f32 %v2260_v47, %v2259_v37  ;;  %v3722_v57 = vadd.f32 %v1541_v48, %v1540_v38  ;;  %v2272_v58 = vrot.slane %v2271_v49, 1  ;;  %v1549_v60 = vrot.slane %v3680_v12, 4  ;;  %1366 = vst [vmem:[%s4359_s2 + $0x60] sm:$0xff] %v3716_v53  ;;  %1368 = vst [vmem:[%s4359_s2 + $0x70] sm:$0xff] %v3718_v55  ;;  %v3733_v41 = vpop.f32.mrb[13].mxu0  ;;  %v3735_v61 = vpop.f32.mrb[13].mxu1 }
 0x105   :  { %v1535_v62 = vrot.slane %v1534_v50, 1  ;;  %v2264_v63 = vrot.slane %v2263_v51, 2  ;;  %v1545_v0 = vrot.slane %v1544_v52, 2  ;;  %v2274_v1 = vrot.slane %v2190_v40, 4  ;;  %1367 = vst [vmem:[%s4359_s2 + $0x68] sm:$0xff] %v3733_v41  ;;  %1369 = vst [vmem:[%s4359_s2 + $0x78] sm:$0xff] %v3735_v61 }
 0x106   :  { %v614_v2 = vpop.f32.mrb[14].mxu0  ;;  %v655_v3 = vpop.f32.mrb[14].mxu1  ;;  %v3745_v4 = vadd.f32 %v2272_v58, %v2271_v49  ;;  %v1550_v5 = vadd.f32 %v1549_v60, %v3680_v12  ;;  %v2191_v6 = vmul.f32 %v3680_v12, %v3680_v12  ;;  %v1561_v7 = vrot.slane %v3682_v13, 4 }
 0x107   :  { %v615_v8 = vpop.f32.mrb[15].mxu0  ;;  %v656_v9 = vpop.f32.mrb[15].mxu1  ;;  %v1536_v10 = vadd.f32 %v1535_v62, %v1534_v50  ;;  %v2265_v11 = vadd.f32 %v2264_v63, %v2263_v51  ;;  %v1546_v14 = vadd.f32 %v1545_v0, %v1544_v52  ;;  %v2275_v15 = vadd.f32 %v2274_v1, %v2190_v40 }
 0x108   :  { %v1551_v16 = vrot.slane %v1550_v5, 2  ;;  %v2280_v17 = vrot.slane %v2191_v6, 4  ;;  %v1562_v20 = vadd.f32 %v1561_v7, %v3682_v13  ;;  %v2193_v21 = vmul.f32 %v3682_v13, %v3682_v13 }
 0x109   :  { %v1846_v22 = vcombine.low %v1530_v46, %v1536_v10  ;;  %v2266_v23 = vrot.slane %v2265_v11, 1  ;;  %v1547_v24 = vrot.slane %v1546_v14, 1  ;;  %v2276_v25 = vrot.slane %v2275_v15, 2 }
 0x10a   :  { %v1552_v12 = vadd.f32 %v1551_v16, %v1550_v5  ;;  %v2281_v26 = vadd.f32 %v2280_v17, %v2191_v6  ;;  %v1563_v27 = vrot.slane %v1562_v20, 2  ;;  %v2292_v28 = vrot.slane %v2193_v21, 4 }
 0x10b   :  { %v1868_v29 = vrot.slane %v1846_v22, %v3649_v59  ;;  %v2267_v30 = vadd.f32 %v2266_v23, %v2265_v11  ;;  %v1548_v31 = vadd.f32 %v1547_v24, %v1546_v14  ;;  %v2277_v33 = vadd.f32 %v2276_v25, %v2275_v15  ;;  %v3755_v34 = vpop.f32.mrb[16].mxu0  ;;  %v3757_v35 = vpop.f32.mrb[16].mxu1 }
 0x10c   :  { %v1553_v36 = vrot.slane %v1552_v12, 1  ;;  %v2282_v37 = vrot.slane %v2281_v26, 2  ;;  %v1564_v13 = vadd.f32 %v1563_v27, %v1562_v20  ;;  %v2293_v38 = vadd.f32 %v2292_v28, %v2193_v21  ;;  %1370 = vst [vmem:[%s4359_s2 + $0x80] sm:$0xff] %v3755_v34  ;;  %1372 = vst [vmem:[%s4359_s2 + $0x90] sm:$0xff] %v3757_v35  ;;  %v3767_v39 = vpop.f32.mrb[17].mxu0  ;;  %v3769_v43 = vpop.f32.mrb[17].mxu1 }
 0x10d   :  { %v2577_v44 = vcombine.low %v3720_v56, %v2267_v30  ;;  %v1847_v45 = vcombine.low %v3722_v57, %v1548_v31  ;;  %v2278_v46 = vrot.slane %v2277_v33, 1  ;;  %v1555_v47 = vrot.slane %v3692_v18, 4  ;;  %1371 = vst [vmem:[%s4359_s2 + $0x88] sm:$0xff] %v3767_v39  ;;  %1373 = vst [vmem:[%s4359_s2 + $0x98] sm:$0xff] %v3769_v43  ;;  %v696_v48 = vpop.f32.mrb[18].mxu0  ;;  %v737_v49 = vpop.f32.mrb[18].mxu1 }
 0x10e   :  { %v3782_v50 = vadd.f32 %v1553_v36, %v1552_v12  ;;  %v2283_v51 = vadd.f32 %v2282_v37, %v2281_v26  ;;  %v1565_v52 = vrot.slane %v1564_v13, 1  ;;  %v2294_v40 = vrot.slane %v2293_v38, 2  ;;  %v697_v56 = vpop.f32.mrb[19].mxu0  ;;  %v738_v57 = vpop.f32.mrb[19].mxu1 }
 0x10f   :  { %v2599_v58 = vrot.slane %v2577_v44, %v3649_v59  ;;  %v1875_v60 = vrot.slane %v1847_v45, %v3649_v59  ;;  %v2279_v62 = vadd.f32 %v2278_v46, %v2277_v33  ;;  %v1556_v63 = vadd.f32 %v1555_v47, %v3692_v18 }
 0x110   :  { %v2284_v0 = vrot.slane %v2283_v51, 1  ;;  %v3787_v1 = vadd.f32 %v1565_v52, %v1564_v13  ;;  %v2295_v2 = vadd.f32 %v2294_v40, %v2293_v38  ;;  %v2192_v3 = vmul.f32 %v3692_v18, %v3692_v18 }
 0x111   :  { %v1877_v5 = vcombine.low %v1868_v29, %v1875_v60  ;;  %v2578_v6 = vcombine.low %v3745_v4, %v2279_v62  ;;  %v1557_v7 = vrot.slane %v1556_v63, 2  ;;  %v1567_v8 = vrot.slane %v3694_v19, 4 }
 0x112   :  { %v3793_v9 = vadd.f32 %v2284_v0, %v2283_v51  ;;  %v2296_v10 = vrot.slane %v2295_v2, 1  ;;  %v2286_v11 = vrot.slane %v2192_v3, 4  ;;  %v2194_v14 = vmul.f32 %v3694_v19, %v3694_v19 }
 0x113   :  { %v1891_v15 = vrot.slane %v1877_v5, %v3649_v59  ;;  %v2606_v16 = vrot.slane %v2578_v6, %v3649_v59  ;;  %v1558_v17 = vadd.f32 %v1557_v7, %v1556_v63  ;;  %v1568_v18 = vadd.f32 %v1567_v8, %v3694_v19  ;;  %v3800_v20 = vpop.f32.mrb[20].mxu0  ;;  %v3802_v4 = vpop.f32.mrb[20].mxu1 }
 0x114   :  { %v3804_v21 = vadd.f32 %v2296_v10, %v2295_v2  ;;  %v2287_v22 = vadd.f32 %v2286_v11, %v2192_v3  ;;  %v2298_v23 = vrot.slane %v2194_v14, 4  ;;  %v1573_v24 = vrot.slane %v3716_v53, 4  ;;  %1374 = vst [vmem:[%s4359_s2 + $0xa0] sm:$0xff] %v3800_v20  ;;  %1376 = vst [vmem:[%s4359_s2 + $0xb0] sm:$0xff] %v3802_v4  ;;  %v3815_v19 = vpop.f32.mrb[21].mxu0  ;;  %v3817_v25 = vpop.f32.mrb[21].mxu1 }
 0x115   :  { %v1892_v12 = vcombine.low %v3707_v32, %v1891_v15  ;;  %v2608_v26 = vcombine.low %v2599_v58, %v2606_v16  ;;  %v1559_v27 = vrot.slane %v1558_v17, 1  ;;  %v1569_v28 = vrot.slane %v1568_v18, 2  ;;  %1375 = vst [vmem:[%s4359_s2 + $0xa8] sm:$0xff] %v3815_v19  ;;  %1377 = vst [vmem:[%s4359_s2 + $0xb8] sm:$0xff] %v3817_v25  ;;  %v778_v29 = vpop.f32.mrb[22].mxu0  ;;  %v819_v30 = vpop.f32.mrb[22].mxu1 }
 0x116   :  { %v2288_v31 = vrot.slane %v2287_v22, 2  ;;  %v2299_v33 = vadd.f32 %v2298_v23, %v2194_v14  ;;  %v1574_v36 = vadd.f32 %v1573_v24, %v3716_v53  ;;  %v2195_v32 = vmul.f32 %v3716_v53, %v3716_v53  ;;  %v779_v37 = vpop.f32.mrb[23].mxu0  ;;  %v820_v13 = vpop.f32.mrb[23].mxu1 }
 0x117   :  { %2159 = vst [vmem:[%s4360_s3] ss:$8 sm:$0xf] %v1892_v12  ;;  %2160 = vst [vmem:[%s4360_s3] ss:$8 sm:$0xf0] %v1892_v12  ;;  %v2622_v38 = vrot.slane %v2608_v26, %v3649_v59  ;;  %v1560_v44 = vadd.f32 %v1559_v27, %v1558_v17  ;;  %v1570_v45 = vadd.f32 %v1569_v28, %v1568_v18  ;;  %v1585_v46 = vrot.slane %v3718_v55, 4 }
 0x118   :  { %v2289_v47 = vadd.f32 %v2288_v31, %v2287_v22  ;;  %v2300_v48 = vrot.slane %v2299_v33, 2  ;;  %v1575_v49 = vrot.slane %v1574_v36, 2  ;;  %v2304_v53 = vrot.slane %v2195_v32, 4 }
 0x119   :  { %v2623_v51 = vcombine.low %v3710_v42, %v2622_v38  ;;  %v1893_v52 = vcombine.low %v3782_v50, %v1560_v44  ;;  %v1571_v40 = vrot.slane %v1570_v45, 1  ;;  %v1586_v56 = vadd.f32 %v1585_v46, %v3718_v55 }
 0x11a   :  { %v2290_v57 = vrot.slane %v2289_v47, 1  ;;  %v2301_v58 = vadd.f32 %v2300_v48, %v2299_v33  ;;  %v1576_v60 = vadd.f32 %v1575_v49, %v1574_v36  ;;  %v2305_v62 = vadd.f32 %v2304_v53, %v2195_v32 }
 0x11b   :  { %2890 = vst [vmem:[%s4361_s4] ss:$8 sm:$0xf] %v2623_v51  ;;  %2891 = vst [vmem:[%s4361_s4] ss:$8 sm:$0xf0] %v2623_v51  ;;  %v1903_v63 = vrot.slane %v1893_v52, %v3649_v59  ;;  %v1572_v42 = vadd.f32 %v1571_v40, %v1570_v45  ;;  %v1587_v0 = vrot.slane %v1586_v56, 2  ;;  %v2197_v50 = vmul.f32 %v3718_v55, %v3718_v55  ;;  %v3851_v2 = vpop.f32.mrb[24].mxu0 }
 0x11c   :  { %v3853_v3 = vpop.f32.mrb[24].mxu1  ;;  %v2291_v5 = vadd.f32 %v2290_v57, %v2289_v47  ;;  %v2302_v6 = vrot.slane %v2301_v58, 1  ;;  %v1577_v7 = vrot.slane %v1576_v60, 1  ;;  %v2306_v8 = vrot.slane %v2305_v62, 2  ;;  %1378 = vst [vmem:[%s4359_s2 + $0xc0] sm:$0xff] %v3851_v2  ;;  %v3863_v10 = vpop.f32.mrb[25].mxu0 }
 0x11d   :  { %1380 = vst [vmem:[%s4359_s2 + $0xd0] sm:$0xff] %v3853_v3  ;;  %v3865_v55 = vpop.f32.mrb[25].mxu1  ;;  %v1894_v11 = vcombine.low %v3787_v1, %v1572_v42  ;;  %v1588_v14 = vadd.f32 %v1587_v0, %v1586_v56  ;;  %v2316_v15 = vrot.slane %v2197_v50, 4  ;;  %v1579_v16 = vrot.slane %v3733_v41, 4  ;;  %1379 = vst [vmem:[%s4359_s2 + $0xc8] sm:$0xff] %v3863_v10  ;;  %v860_v17 = vpop.f32.mrb[26].mxu0 }
 0x11e   :  { %1381 = vst [vmem:[%s4359_s2 + $0xd8] sm:$0xff] %v3865_v55  ;;  %v901_v18 = vpop.f32.mrb[26].mxu1  ;;  %v2624_v22 = vcombine.low %v3793_v9, %v2291_v5  ;;  %v2303_v23 = vadd.f32 %v2302_v6, %v2301_v58  ;;  %v3878_v1 = vadd.f32 %v1577_v7, %v1576_v60  ;;  %v2307_v24 = vadd.f32 %v2306_v8, %v2305_v62  ;;  %v861_v12 = vpop.f32.mrb[27].mxu0 }
 0x11f   :  { %v902_v26 = vpop.f32.mrb[27].mxu1  ;;  %v1910_v27 = vrot.slane %v1894_v11, %v3649_v59  ;;  %v1589_v28 = vrot.slane %v1588_v14, 1  ;;  %v2317_v29 = vadd.f32 %v2316_v15, %v2197_v50  ;;  %v1580_v30 = vadd.f32 %v1579_v16, %v3733_v41 }
 0x120   :  { %v2634_v31 = vrot.slane %v2624_v22, %v3649_v59  ;;  %v2625_v33 = vcombine.low %v3804_v21, %v2303_v23  ;;  %v2308_v36 = vrot.slane %v2307_v24, 1  ;;  %v2196_v9 = vmul.f32 %v3733_v41, %v3733_v41 }
 0x121   :  { %v1925_v32 = vcombine.low %v1903_v63, %v1910_v27  ;;  %v3886_v37 = vadd.f32 %v1589_v28, %v1588_v14  ;;  %v2318_v13 = vrot.slane %v2317_v29, 2  ;;  %v1581_v38 = vrot.slane %v1580_v30, 2 }
 0x122   :  { %v2641_v44 = vrot.slane %v2625_v33, %v3649_v59  ;;  %v3889_v45 = vadd.f32 %v2308_v36, %v2307_v24  ;;  %v2310_v46 = vrot.slane %v2196_v9, 4  ;;  %v1591_v47 = vrot.slane %v3735_v61, 4 }
 0x123   :  { %v3893_v48 = vrot.slane %v1925_v32, %v3649_v59  ;;  %v2319_v21 = vadd.f32 %v2318_v13, %v2317_v29  ;;  %v1582_v49 = vadd.f32 %v1581_v38, %v1580_v30  ;;  %v2198_v41 = vmul.f32 %v3735_v61, %v3735_v61  ;;  %v3897_v53 = vpop.f32.mrb[28].mxu0  ;;  %v3899_v51 = vpop.f32.mrb[28].mxu1 }
 0x124   :  { %v2656_v52 = vcombine.low %v2634_v31, %v2641_v44  ;;  %v2311_v40 = vadd.f32 %v2310_v46, %v2196_v9  ;;  %v1592_v56 = vadd.f32 %v1591_v47, %v3735_v61  ;;  %v1597_v57 = vrot.slane %v3755_v34, 4  ;;  %1382 = vst [vmem:[%s4359_s2 + $0xe0] sm:$0xff] %v3897_v53  ;;  %1384 = vst [vmem:[%s4359_s2 + $0xf0] sm:$0xff] %v3899_v51  ;;  %v3911_v58 = vpop.f32.mrb[29].mxu0  ;;  %v3913_v60 = vpop.f32.mrb[29].mxu1 }
 0x125   :  { %v2320_v62 = vrot.slane %v2319_v21, 1  ;;  %v1583_v63 = vrot.slane %v1582_v49, 1  ;;  %v2322_v42 = vrot.slane %v2198_v41, 4  ;;  %v2199_v61 = vmul.f32 %v3755_v34, %v3755_v34  ;;  %1383 = vst [vmem:[%s4359_s2 + $0xe8] sm:$0xff] %v3911_v58  ;;  %1385 = vst [vmem:[%s4359_s2 + $0xf8] sm:$0xff] %v3913_v60  ;;  %v942_v0 = vpop.f32.mrb[30].mxu0 }
 0x126   :  { %v983_v50 = vpop.f32.mrb[30].mxu1  ;;  %v3926_v5 = vrot.slane %v2656_v52, %v3649_v59  ;;  %v2312_v6 = vrot.slane %v2311_v40, 2  ;;  %v1593_v7 = vrot.slane %v1592_v56, 2  ;;  %v1598_v8 = vadd.f32 %v1597_v57, %v3755_v34  ;;  %v943_v11 = vpop.f32.mrb[31].mxu0 }
 0x127   :  { %v984_v14 = vpop.f32.mrb[31].mxu1  ;;  %v2321_v15 = vadd.f32 %v2320_v62, %v2319_v21  ;;  %v1584_v16 = vadd.f32 %v1583_v63, %v1582_v49  ;;  %v2323_v17 = vadd.f32 %v2322_v42, %v2198_v41  ;;  %v2328_v18 = vrot.slane %v2199_v61, 4 }
 0x128   :  { %v2313_v22 = vadd.f32 %v2312_v6, %v2311_v40  ;;  %v1594_v23 = vadd.f32 %v1593_v7, %v1592_v56  ;;  %v1599_v24 = vrot.slane %v1598_v8, 2  ;;  %v1609_v12 = vrot.slane %v3757_v35, 4 }
 0x129   :  { %v1895_v26 = vcombine.low %v3878_v1, %v1584_v16  ;;  %v2324_v27 = vrot.slane %v2323_v17, 2  ;;  %v2329_v28 = vadd.f32 %v2328_v18, %v2199_v61  ;;  %v2201_v29 = vmul.f32 %v3757_v35, %v3757_v35 }
 0x12a   :  { %v2314_v30 = vrot.slane %v2313_v22, 1  ;;  %v1595_v34 = vrot.slane %v1594_v23, 1  ;;  %v1600_v31 = vadd.f32 %v1599_v24, %v1598_v8  ;;  %v1610_v33 = vadd.f32 %v1609_v12, %v3757_v35 }
 0x12b   :  { %v1917_v36 = vrot.slane %v1895_v26, %v3649_v59  ;;  %v2325_v9 = vadd.f32 %v2324_v27, %v2323_v17  ;;  %v2330_v32 = vrot.slane %v2329_v28, 2  ;;  %v2340_v13 = vrot.slane %v2201_v29, 4  ;;  %v3935_v38 = vpop.f32.mrb[32].mxu0  ;;  %v3937_v44 = vpop.f32.mrb[32].mxu1 }
 0x12c   :  { %v2315_v1 = vadd.f32 %v2314_v30, %v2313_v22  ;;  %v1596_v46 = vadd.f32 %v1595_v34, %v1594_v23  ;;  %v1601_v47 = vrot.slane %v1600_v31, 1  ;;  %v1611_v21 = vrot.slane %v1610_v33, 2  ;;  %1386 = vst [vmem:[%s4359_s2 + $0x100] sm:$0xff] %v3935_v38  ;;  %1388 = vst [vmem:[%s4359_s2 + $0x110] sm:$0xff] %v3937_v44  ;;  %v3947_v35 = vpop.f32.mrb[33].mxu0  ;;  %v3949_v49 = vpop.f32.mrb[33].mxu1 }
 0x12d   :  { %v2326_v41 = vrot.slane %v2325_v9, 1  ;;  %v2331_v52 = vadd.f32 %v2330_v32, %v2329_v28  ;;  %v2341_v40 = vadd.f32 %v2340_v13, %v2201_v29  ;;  %v1603_v56 = vrot.slane %v3767_v39, 4  ;;  %1387 = vst [vmem:[%s4359_s2 + $0x108] sm:$0xff] %v3947_v35  ;;  %1389 = vst [vmem:[%s4359_s2 + $0x118] sm:$0xff] %v3949_v49  ;;  %v1024_v57 = vpop.f32.mrb[34].mxu0  ;;  %v1065_v62 = vpop.f32.mrb[34].mxu1 }
 0x12e   :  { %v2626_v63 = vcombine.low %v3889_v45, %v2315_v1  ;;  %v1896_v42 = vcombine.low %v3886_v37, %v1596_v46  ;;  %v3962_v61 = vadd.f32 %v1601_v47, %v1600_v31  ;;  %v1612_v0 = vadd.f32 %v1611_v21, %v1610_v33  ;;  %v1025_v50 = vpop.f32.mrb[35].mxu0  ;;  %v1066_v6 = vpop.f32.mrb[35].mxu1 }
 0x12f   :  { %v2327_v7 = vadd.f32 %v2326_v41, %v2325_v9  ;;  %v2332_v8 = vrot.slane %v2331_v52, 1  ;;  %v2342_v11 = vrot.slane %v2341_v40, 2  ;;  %v1604_v14 = vadd.f32 %v1603_v56, %v3767_v39 }
 0x130   :  { %v2648_v16 = vrot.slane %v2626_v63, %v3649_v59  ;;  %v1924_v17 = vrot.slane %v1896_v42, %v3649_v59  ;;  %v1613_v18 = vrot.slane %v1612_v0, 1  ;;  %v2200_v45 = vmul.f32 %v3767_v39, %v3767_v39 }
 0x131   :  { %v2627_v22 = vcombine.low %v2321_v15, %v2327_v7  ;;  %v3969_v37 = vadd.f32 %v2332_v8, %v2331_v52  ;;  %v2343_v23 = vadd.f32 %v2342_v11, %v2341_v40  ;;  %v1605_v24 = vrot.slane %v1604_v14, 2 }
 0x132   :  { %v1926_v12 = vcombine.low %v1917_v36, %v1924_v17  ;;  %v3971_v26 = vadd.f32 %v1613_v18, %v1612_v0  ;;  %v2334_v27 = vrot.slane %v2200_v45, 4  ;;  %v1615_v28 = vrot.slane %v3769_v43, 4 }
 0x133   :  { %v2655_v29 = vrot.slane %v2627_v22, %v3649_v59  ;;  %v2344_v30 = vrot.slane %v2343_v23, 1  ;;  %v1606_v34 = vadd.f32 %v1605_v24, %v1604_v14  ;;  %v2202_v31 = vmul.f32 %v3769_v43, %v3769_v43  ;;  %v3977_v33 = vpop.f32.mrb[36].mxu0  ;;  %v3979_v39 = vpop.f32.mrb[36].mxu1 }
 0x134   :  { %v1940_v15 = vrot.slane %v1926_v12, %v3649_v59  ;;  %v2335_v9 = vadd.f32 %v2334_v27, %v2200_v45  ;;  %v1616_v36 = vadd.f32 %v1615_v28, %v3769_v43  ;;  %v1621_v32 = vrot.slane %v3800_v20, 4  ;;  %1390 = vst [vmem:[%s4359_s2 + $0x120] sm:$0xff] %v3977_v33  ;;  %1392 = vst [vmem:[%s4359_s2 + $0x130] sm:$0xff] %v3979_v39  ;;  %v3992_v13 = vpop.f32.mrb[37].mxu0  ;;  %v3994_v1 = vpop.f32.mrb[37].mxu1 }
 0x135   :  { %v2657_v46 = vcombine.low %v2648_v16, %v2655_v29  ;;  %v3996_v47 = vadd.f32 %v2344_v30, %v2343_v23  ;;  %v1607_v43 = vrot.slane %v1606_v34, 1  ;;  %v2346_v21 = vrot.slane %v2202_v31, 4  ;;  %1391 = vst [vmem:[%s4359_s2 + $0x128] sm:$0xff] %v3992_v13  ;;  %1393 = vst [vmem:[%s4359_s2 + $0x138] sm:$0xff] %v3994_v1  ;;  %v1106_v41 = vpop.f32.mrb[38].mxu0  ;;  %v1147_v52 = vpop.f32.mrb[38].mxu1 }
 0x136   :  { %v1941_v40 = vcombine.low %v3893_v48, %v1940_v15  ;;  %v2336_v56 = vrot.slane %v2335_v9, 2  ;;  %v1617_v57 = vrot.slane %v1616_v36, 2  ;;  %v1622_v62 = vadd.f32 %v1621_v32, %v3800_v20  ;;  %v1107_v63 = vpop.f32.mrb[39].mxu0  ;;  %v1148_v42 = vpop.f32.mrb[39].mxu1 }
 0x137   :  { %v2671_v0 = vrot.slane %v2657_v46, %v3649_v59  ;;  %v1608_v50 = vadd.f32 %v1607_v43, %v1606_v34  ;;  %v2347_v6 = vadd.f32 %v2346_v21, %v2202_v31  ;;  %v2203_v7 = vmul.f32 %v3800_v20, %v3800_v20 }
 0x138   :  { %2997 = vst [vmem:[%s4360_s3 + $0x40] ss:$8 sm:$0xf] %v1941_v40  ;;  %2998 = vst [vmem:[%s4360_s3 + $0x40] ss:$8 sm:$0xf0] %v1941_v40  ;;  %v2337_v48 = vadd.f32 %v2336_v56, %v2335_v9  ;;  %v1618_v8 = vadd.f32 %v1617_v57, %v1616_v36 }
 0x139   :  { %v1623_v11 = vrot.slane %v1622_v62, 2  ;;  %v1633_v14 = vrot.slane %v3802_v4, 4  ;;  %v2672_v16 = vcombine.low %v3926_v5, %v2671_v0  ;;  %v1942_v17 = vcombine.low %v3962_v61, %v1608_v50 }
 0x13a   :  { %v2348_v18 = vrot.slane %v2347_v6, 2  ;;  %v2352_v45 = vrot.slane %v2203_v7, 4  ;;  %v2338_v20 = vrot.slane %v2337_v48, 1  ;;  %v1619_v22 = vrot.slane %v1618_v8, 1 }
 0x13b   :  { %v1624_v23 = vadd.f32 %v1623_v11, %v1622_v62  ;;  %v1634_v24 = vadd.f32 %v1633_v14, %v3802_v4  ;;  %3008 = vst [vmem:[%s4361_s4 + $0x40] ss:$8 sm:$0xf] %v2672_v16  ;;  %3009 = vst [vmem:[%s4361_s4 + $0x40] ss:$8 sm:$0xf0] %v2672_v16  ;;  %v1952_v12 = vrot.slane %v1942_v17, %v3649_v59 }
 0x13c   :  { %v2349_v5 = vadd.f32 %v2348_v18, %v2347_v6  ;;  %v2353_v27 = vadd.f32 %v2352_v45, %v2203_v7  ;;  %v2205_v61 = vmul.f32 %v3802_v4, %v3802_v4  ;;  %v4030_v28 = vpop.f32.mrb[40].mxu0  ;;  %v4032_v29 = vpop.f32.mrb[40].mxu1  ;;  %v2339_v30 = vadd.f32 %v2338_v20, %v2337_v48 }
 0x13d   :  { %v1620_v34 = vadd.f32 %v1619_v22, %v1618_v8  ;;  %v1625_v31 = vrot.slane %v1624_v23, 1  ;;  %v1635_v15 = vrot.slane %v1634_v24, 2  ;;  %1394 = vst [vmem:[%s4359_s2 + $0x140] sm:$0xff] %v4030_v28  ;;  %1396 = vst [vmem:[%s4359_s2 + $0x150] sm:$0xff] %v4032_v29  ;;  %v4042_v9 = vpop.f32.mrb[41].mxu0  ;;  %v4044_v4 = vpop.f32.mrb[41].mxu1 }
 0x13e   :  { %v2350_v36 = vrot.slane %v2349_v5, 1  ;;  %v2354_v32 = vrot.slane %v2353_v27, 2  ;;  %v2364_v46 = vrot.slane %v2205_v61, 4  ;;  %v1627_v43 = vrot.slane %v3815_v19, 4  ;;  %1395 = vst [vmem:[%s4359_s2 + $0x148] sm:$0xff] %v4042_v9  ;;  %1397 = vst [vmem:[%s4359_s2 + $0x158] sm:$0xff] %v4044_v4 }
 0x13f   :  { %v1188_v21 = vpop.f32.mrb[42].mxu0  ;;  %v1229_v41 = vpop.f32.mrb[42].mxu1  ;;  %v2673_v52 = vcombine.low %v3969_v37, %v2339_v30  ;;  %v1943_v40 = vcombine.low %v3971_v26, %v1620_v34  ;;  %v4057_v56 = vadd.f32 %v1625_v31, %v1624_v23  ;;  %v1636_v57 = vadd.f32 %v1635_v15, %v1634_v24 }
 0x140   :  { %v1189_v62 = vpop.f32.mrb[43].mxu0  ;;  %v1230_v63 = vpop.f32.mrb[43].mxu1  ;;  %v2351_v42 = vadd.f32 %v2350_v36, %v2349_v5  ;;  %v2355_v0 = vadd.f32 %v2354_v32, %v2353_v27  ;;  %v2365_v50 = vadd.f32 %v2364_v46, %v2205_v61  ;;  %v1628_v6 = vadd.f32 %v1627_v43, %v3815_v19 }
 0x141   :  { %v2683_v7 = vrot.slane %v2673_v52, %v3649_v59  ;;  %v1959_v48 = vrot.slane %v1943_v40, %v3649_v59  ;;  %v1637_v8 = vrot.slane %v1636_v57, 1  ;;  %v2204_v37 = vmul.f32 %v3815_v19, %v3815_v19 }
 0x142   :  { %v2674_v26 = vcombine.low %v3996_v47, %v2351_v42  ;;  %v2356_v11 = vrot.slane %v2355_v0, 1  ;;  %v2366_v14 = vrot.slane %v2365_v50, 2  ;;  %v1629_v16 = vrot.slane %v1628_v6, 2 }
 0x143   :  { %v1974_v17 = vcombine.low %v1952_v12, %v1959_v48  ;;  %v4065_v18 = vadd.f32 %v1637_v8, %v1636_v57  ;;  %v2358_v45 = vrot.slane %v2204_v37, 4  ;;  %v1639_v20 = vrot.slane %v3817_v25, 4  ;;  %v4071_v27 = vpop.f32.mrb[44].mxu0  ;;  %v4073_v19 = vpop.f32.mrb[44].mxu1 }
 0x144   :  { %v2690_v22 = vrot.slane %v2674_v26, %v3649_v59  ;;  %v4069_v23 = vadd.f32 %v2356_v11, %v2355_v0  ;;  %v2367_v24 = vadd.f32 %v2366_v14, %v2365_v50  ;;  %v1630_v5 = vadd.f32 %v1629_v16, %v1628_v6  ;;  %1398 = vst [vmem:[%s4359_s2 + $0x160] sm:$0xff] %v4071_v27  ;;  %v4089_v34 = vpop.f32.mrb[45].mxu0  ;;  %v4091_v31 = vpop.f32.mrb[45].mxu1 }
 0x145   :  { %v4076_v47 = vrot.slane %v1974_v17, %v3649_v59  ;;  %v2359_v61 = vadd.f32 %v2358_v45, %v2204_v37  ;;  %v1640_v12 = vadd.f32 %v1639_v20, %v3817_v25  ;;  %v2206_v30 = vmul.f32 %v3817_v25, %v3817_v25  ;;  %1400 = vst [vmem:[%s4359_s2 + $0x170] sm:$0xff] %v4073_v19  ;;  %v1270_v25 = vpop.f32.mrb[46].mxu0  ;;  %v1311_v43 = vpop.f32.mrb[46].mxu1 }
 0x146   :  { %v2705_v15 = vcombine.low %v2683_v7, %v2690_v22  ;;  %v2368_v36 = vrot.slane %v2367_v24, 1  ;;  %v1631_v32 = vrot.slane %v1630_v5, 1  ;;  %v1645_v46 = vrot.slane %v3851_v2, 4  ;;  %1399 = vst [vmem:[%s4359_s2 + $0x168] sm:$0xff] %v4089_v34  ;;  %1401 = vst [vmem:[%s4359_s2 + $0x178] sm:$0xff] %v4091_v31  ;;  %v1271_v57 = vpop.f32.mrb[47].mxu0 }
 0x147   :  { %v2360_v21 = vrot.slane %v2359_v61, 2  ;;  %v1641_v41 = vrot.slane %v1640_v12, 2  ;;  %v2370_v52 = vrot.slane %v2206_v30, 4  ;;  %v2207_v40 = vmul.f32 %v3851_v2, %v3851_v2  ;;  %v1312_v62 = vpop.f32.mrb[47].mxu1 }
 0x148   :  { %v4105_v63 = vrot.slane %v2705_v15, %v3649_v59  ;;  %v2369_v42 = vadd.f32 %v2368_v36, %v2367_v24  ;;  %v1632_v0 = vadd.f32 %v1631_v32, %v1630_v5  ;;  %v1646_v50 = vadd.f32 %v1645_v46, %v3851_v2 }
 0x149   :  { %v2361_v6 = vadd.f32 %v2360_v21, %v2359_v61  ;;  %v1642_v7 = vadd.f32 %v1641_v41, %v1640_v12  ;;  %v2371_v48 = vadd.f32 %v2370_v52, %v2206_v30  ;;  %v2376_v8 = vrot.slane %v2207_v40, 4 }
 0x14a   :  { %v1944_v37 = vcombine.low %v4057_v56, %v1632_v0  ;;  %v1647_v26 = vrot.slane %v1646_v50, 2  ;;  %v1657_v11 = vrot.slane %v3853_v3, 4  ;;  %v2209_v14 = vmul.f32 %v3853_v3, %v3853_v3 }
 0x14b   :  { %v2362_v16 = vrot.slane %v2361_v6, 1  ;;  %v1643_v17 = vrot.slane %v1642_v7, 1  ;;  %v2372_v45 = vrot.slane %v2371_v48, 2  ;;  %v2377_v20 = vadd.f32 %v2376_v8, %v2207_v40  ;;  %v4114_v61 = vpop.f32.mrb[48].mxu0 }
 0x14c   :  { %v1966_v22 = vrot.slane %v1944_v37, %v3649_v59  ;;  %v1648_v24 = vadd.f32 %v1647_v26, %v1646_v50  ;;  %v1658_v2 = vadd.f32 %v1657_v11, %v3853_v3  ;;  %v2388_v5 = vrot.slane %v2209_v14, 4  ;;  %1402 = vst [vmem:[%s4359_s2 + $0x180] sm:$0xff] %v4114_v61  ;;  %v3025_v36 = vpop.f32.mrb[49].mxu0 }
 0x14d   :  { %v2363_v12 = vadd.f32 %v2362_v16, %v2361_v6  ;;  %v1644_v56 = vadd.f32 %v1643_v17, %v1642_v7  ;;  %v2373_v30 = vadd.f32 %v2372_v45, %v2371_v48  ;;  %v2378_v15 = vrot.slane %v2377_v20, 2  ;;  %v1351_v21 = vpop.f32.mrb[50].mxu0 }
 0x14e   :  { %v1649_v32 = vrot.slane %v1648_v24, 1  ;;  %v1659_v46 = vrot.slane %v1658_v2, 2  ;;  %v2389_v25 = vadd.f32 %v2388_v5, %v2209_v14  ;;  %v1651_v43 = vrot.slane %v3863_v10, 4  ;;  %v3026_v57 = vpop.f32.mrb[51].mxu0 }
 0x14f   :  { %v2675_v3 = vcombine.low %v4069_v23, %v2363_v12  ;;  %v1945_v41 = vcombine.low %v4065_v18, %v1644_v56  ;;  %v2374_v52 = vrot.slane %v2373_v30, 1  ;;  %v2379_v40 = vadd.f32 %v2378_v15, %v2377_v20 }
 0x150   :  { %v1650_v62 = vadd.f32 %v1649_v32, %v1648_v24  ;;  %v1660_v0 = vadd.f32 %v1659_v46, %v1658_v2  ;;  %v2390_v50 = vrot.slane %v2389_v25, 2  ;;  %v1652_v6 = vadd.f32 %v1651_v43, %v3863_v10 }
 0x151   :  { %v2697_v7 = vrot.slane %v2675_v3, %v3649_v59  ;;  %v1973_v48 = vrot.slane %v1945_v41, %v3649_v59  ;;  %v2375_v8 = vadd.f32 %v2374_v52, %v2373_v30  ;;  %v2380_v37 = vrot.slane %v2379_v40, 1 }
 0x152   :  { %v1661_v26 = vrot.slane %v1660_v0, 1  ;;  %v2391_v11 = vadd.f32 %v2390_v50, %v2389_v25  ;;  %v1653_v14 = vrot.slane %v1652_v6, 2  ;;  %v2208_v18 = vmul.f32 %v3863_v10, %v3863_v10 }
 0x153   :  { %v1975_v23 = vcombine.low %v1966_v22, %v1973_v48  ;;  %v2676_v16 = vcombine.low %v2369_v42, %v2375_v8  ;;  %v4128_v17 = vadd.f32 %v2380_v37, %v2379_v40  ;;  %v1663_v45 = vrot.slane %v3865_v55, 4 }
 0x154   :  { %v1662_v20 = vadd.f32 %v1661_v26, %v1660_v0  ;;  %v2392_v24 = vrot.slane %v2391_v11, 1  ;;  %v1654_v2 = vadd.f32 %v1653_v14, %v1652_v6  ;;  %v2382_v5 = vrot.slane %v2208_v18, 4 }
 0x155   :  { %v1989_v12 = vrot.slane %v1975_v23, %v3649_v59  ;;  %v2704_v56 = vrot.slane %v2676_v16, %v3649_v59  ;;  %v1664_v30 = vadd.f32 %v1663_v45, %v3865_v55  ;;  %v2210_v15 = vmul.f32 %v3865_v55, %v3865_v55 }
 0x156   :  { %v4136_v10 = vadd.f32 %v2392_v24, %v2391_v11  ;;  %v1655_v42 = vrot.slane %v1654_v2, 1  ;;  %v2383_v22 = vadd.f32 %v2382_v5, %v2208_v18  ;;  %v1669_v36 = vrot.slane %v3897_v53, 4 }
 0x157   :  { %v1990_v32 = vcombine.low %v4076_v47, %v1989_v12  ;;  %v2706_v46 = vcombine.low %v2697_v7, %v2704_v56  ;;  %v1665_v25 = vrot.slane %v1664_v30, 2  ;;  %v2394_v43 = vrot.slane %v2210_v15, 4 }
 0x158   :  { %v1656_v21 = vadd.f32 %v1655_v42, %v1654_v2  ;;  %v2384_v3 = vrot.slane %v2383_v22, 2  ;;  %v1670_v41 = vadd.f32 %v1669_v36, %v3897_v53  ;;  %v2211_v52 = vmul.f32 %v3897_v53, %v3897_v53 }
 0x159   :  { %2999 = vst [vmem:[%s4360_s3 + $0x80] ss:$8 sm:$0xf] %v1990_v32  ;;  %3000 = vst [vmem:[%s4360_s3 + $0x80] ss:$8 sm:$0xf0] %v1990_v32  ;;  %v2720_v55 = vrot.slane %v2706_v46, %v3649_v59  ;;  %v1666_v47 = vadd.f32 %v1665_v25, %v1664_v30  ;;  %v2395_v40 = vadd.f32 %v2394_v43, %v2210_v15 }
 0x15a   :  { %v1681_v57 = vrot.slane %v3899_v51, 4  ;;  %v1991_v0 = vcombine.low %v1650_v62, %v1656_v21  ;;  %v2385_v50 = vadd.f32 %v2384_v3, %v2383_v22  ;;  %v1671_v6 = vrot.slane %v1670_v41, 2 }
 0x15b   :  { %v2400_v7 = vrot.slane %v2211_v52, 4  ;;  %v2721_v53 = vcombine.low %v4105_v63, %v2720_v55  ;;  %v1667_v48 = vrot.slane %v1666_v47, 1  ;;  %v2396_v8 = vrot.slane %v2395_v40, 2 }
 0x15c   :  { %v1682_v37 = vadd.f32 %v1681_v57, %v3899_v51  ;;  %v2001_v26 = vrot.slane %v1991_v0, %v3649_v59  ;;  %v2386_v11 = vrot.slane %v2385_v50, 1  ;;  %v1672_v14 = vadd.f32 %v1671_v6, %v1670_v41 }
 0x15d   :  { %v2401_v18 = vadd.f32 %v2400_v7, %v2211_v52  ;;  %3010 = vst [vmem:[%s4361_s4 + $0x80] ss:$8 sm:$0xf] %v2721_v53  ;;  %3011 = vst [vmem:[%s4361_s4 + $0x80] ss:$8 sm:$0xf0] %v2721_v53  ;;  %v1668_v62 = vadd.f32 %v1667_v48, %v1666_v47  ;;  %v2397_v23 = vadd.f32 %v2396_v8, %v2395_v40 }
 0x15e   :  { %v1683_v63 = vrot.slane %v1682_v37, 2  ;;  %v2213_v16 = vmul.f32 %v3899_v51, %v3899_v51  ;;  %v2387_v45 = vadd.f32 %v2386_v11, %v2385_v50  ;;  %v1673_v24 = vrot.slane %v1672_v14, 1 }
 0x15f   :  { %v2402_v2 = vrot.slane %v2401_v18, 2  ;;  %v1675_v5 = vrot.slane %v3911_v58, 4  ;;  %v1992_v12 = vcombine.low %v1662_v20, %v1668_v62  ;;  %v2398_v56 = vrot.slane %v2397_v23, 1 }
 0x160   :  { %v1684_v30 = vadd.f32 %v1683_v63, %v1682_v37  ;;  %v2412_v15 = vrot.slane %v2213_v16, 4  ;;  %v2722_v42 = vcombine.low %v4128_v17, %v2387_v45  ;;  %v1674_v22 = vadd.f32 %v1673_v24, %v1672_v14 }
 0x161   :  { %v2403_v36 = vadd.f32 %v2402_v2, %v2401_v18  ;;  %v1676_v32 = vadd.f32 %v1675_v5, %v3911_v58  ;;  %v2008_v46 = vrot.slane %v1992_v12, %v3649_v59  ;;  %v2399_v25 = vadd.f32 %v2398_v56, %v2397_v23 }
 0x162   :  { %v1685_v43 = vrot.slane %v1684_v30, 1  ;;  %v2413_v51 = vadd.f32 %v2412_v15, %v2213_v16  ;;  %v2732_v21 = vrot.slane %v2722_v42, %v3649_v59  ;;  %v2212_v20 = vmul.f32 %v3911_v58, %v3911_v58 }
 0x163   :  { %v2404_v3 = vrot.slane %v2403_v36, 1  ;;  %v1677_v41 = vrot.slane %v1676_v32, 2  ;;  %v2023_v52 = vcombine.low %v2001_v26, %v2008_v46  ;;  %v2723_v55 = vcombine.low %v4136_v10, %v2399_v25 }
 0x164   :  { %v1686_v17 = vadd.f32 %v1685_v43, %v1684_v30  ;;  %v2414_v47 = vrot.slane %v2413_v51, 2  ;;  %v2406_v0 = vrot.slane %v2212_v20, 4  ;;  %v1687_v50 = vrot.slane %v3913_v60, 4 }
 0x165   :  { %v2405_v40 = vadd.f32 %v2404_v3, %v2403_v36  ;;  %v1678_v57 = vadd.f32 %v1677_v41, %v1676_v32  ;;  %v4172_v6 = vrot.slane %v2023_v52, %v3649_v59  ;;  %v2739_v7 = vrot.slane %v2723_v55, %v3649_v59 }
 0x166   :  { %v2415_v53 = vadd.f32 %v2414_v47, %v2413_v51  ;;  %v2214_v48 = vmul.f32 %v3913_v60, %v3913_v60  ;;  %v2407_v8 = vadd.f32 %v2406_v0, %v2212_v20  ;;  %v1688_v10 = vadd.f32 %v1687_v50, %v3913_v60 }
 0x167   :  { %v1679_v58 = vrot.slane %v1678_v57, 1  ;;  %v1693_v37 = vrot.slane %v3935_v38, 4  ;;  %v2754_v26 = vcombine.low %v2732_v21, %v2739_v7  ;;  %v2215_v18 = vmul.f32 %v3935_v38, %v3935_v38 }
 0x168   :  { %v2416_v11 = vrot.slane %v2415_v53, 1  ;;  %v2418_v14 = vrot.slane %v2214_v48, 4  ;;  %v2408_v23 = vrot.slane %v2407_v8, 2  ;;  %v1689_v63 = vrot.slane %v1688_v10, 2 }
 0x169   :  { %v1680_v62 = vadd.f32 %v1679_v58, %v1678_v57  ;;  %v1694_v16 = vadd.f32 %v1693_v37, %v3935_v38  ;;  %v4183_v45 = vrot.slane %v2754_v26, %v3649_v59  ;;  %v2424_v5 = vrot.slane %v2215_v18, 4 }
 0x16a   :  { %v2417_v24 = vadd.f32 %v2416_v11, %v2415_v53  ;;  %v2419_v2 = vadd.f32 %v2418_v14, %v2214_v48  ;;  %v2409_v12 = vadd.f32 %v2408_v23, %v2407_v8  ;;  %v1690_v56 = vadd.f32 %v1689_v63, %v1688_v10 }
 0x16b   :  { %v1993_v60 = vcombine.low %v1674_v22, %v1680_v62  ;;  %v1695_v30 = vrot.slane %v1694_v16, 2  ;;  %v2425_v42 = vadd.f32 %v2424_v5, %v2215_v18  ;;  %v1705_v36 = vrot.slane %v3937_v44, 4 }
 0x16c   :  { %v2420_v15 = vrot.slane %v2419_v2, 2  ;;  %v2217_v32 = vmul.f32 %v3937_v44, %v3937_v44  ;;  %v2410_v38 = vrot.slane %v2409_v12, 1  ;;  %v1691_v25 = vrot.slane %v1690_v56, 1 }
 0x16d   :  { %v2015_v46 = vrot.slane %v1993_v60, %v3649_v59  ;;  %v1696_v43 = vadd.f32 %v1695_v30, %v1694_v16  ;;  %v2426_v21 = vrot.slane %v2425_v42, 2  ;;  %v1706_v3 = vadd.f32 %v1705_v36, %v3937_v44 }
 0x16e   :  { %v2421_v51 = vadd.f32 %v2420_v15, %v2419_v2  ;;  %v2436_v22 = vrot.slane %v2217_v32, 4  ;;  %v2411_v41 = vadd.f32 %v2410_v38, %v2409_v12  ;;  %v1692_v20 = vadd.f32 %v1691_v25, %v1690_v56 }
 0x16f   :  { %v1697_v52 = vrot.slane %v1696_v43, 1  ;;  %v1699_v55 = vrot.slane %v3947_v35, 4  ;;  %v2427_v57 = vadd.f32 %v2426_v21, %v2425_v42  ;;  %v1707_v0 = vrot.slane %v1706_v3, 2 }
 0x170   :  { %v2422_v47 = vrot.slane %v2421_v51, 1  ;;  %v2437_v50 = vadd.f32 %v2436_v22, %v2217_v32  ;;  %v2724_v7 = vcombine.low %v2405_v40, %v2411_v41  ;;  %v1994_v53 = vcombine.low %v1686_v17, %v1692_v20 }
 0x171   :  { %v1698_v48 = vadd.f32 %v1697_v52, %v1696_v43  ;;  %v1700_v58 = vadd.f32 %v1699_v55, %v3947_v35  ;;  %v2428_v10 = vrot.slane %v2427_v57, 1  ;;  %v1708_v37 = vadd.f32 %v1707_v0, %v1706_v3 }
 0x172   :  { %v2423_v8 = vadd.f32 %v2422_v47, %v2421_v51  ;;  %v2438_v26 = vrot.slane %v2437_v50, 2  ;;  %v2746_v44 = vrot.slane %v2724_v7, %v3649_v59  ;;  %v2022_v11 = vrot.slane %v1994_v53, %v3649_v59 }
 0x173   :  { %v1701_v14 = vrot.slane %v1700_v58, 2  ;;  %v2216_v18 = vmul.f32 %v3947_v35, %v3947_v35  ;;  %v4196_v23 = vadd.f32 %v2428_v10, %v2427_v57  ;;  %v1709_v40 = vrot.slane %v1708_v37, 1 }
 0x174   :  { %v2725_v62 = vcombine.low %v2417_v24, %v2423_v8  ;;  %v2439_v17 = vadd.f32 %v2438_v26, %v2437_v50  ;;  %v2024_v63 = vcombine.low %v2015_v46, %v2022_v11  ;;  %v1711_v5 = vrot.slane %v3949_v49, 4 }
 0x175   :  { %v1702_v16 = vadd.f32 %v1701_v14, %v1700_v58  ;;  %v2430_v2 = vrot.slane %v2216_v18, 4  ;;  %v1710_v12 = vadd.f32 %v1709_v40, %v1708_v37  ;;  %v2218_v30 = vmul.f32 %v3949_v49, %v3949_v49 }
 0x176   :  { %v2753_v60 = vrot.slane %v2725_v62, %v3649_v59  ;;  %v2440_v56 = vrot.slane %v2439_v17, 1  ;;  %v2038_v15 = vrot.slane %v2024_v63, %v3649_v59  ;;  %v1712_v42 = vadd.f32 %v1711_v5, %v3949_v49 }
 0x177   :  { %v1703_v35 = vrot.slane %v1702_v16, 1  ;;  %v2431_v24 = vadd.f32 %v2430_v2, %v2216_v18  ;;  %v2442_v46 = vrot.slane %v2218_v30, 4  ;;  %v1717_v38 = vrot.slane %v3977_v33, 4 }
 0x178   :  { %v2755_v36 = vcombine.low %v2746_v44, %v2753_v60  ;;  %v2441_v32 = vadd.f32 %v2440_v56, %v2439_v17  ;;  %v2039_v25 = vcombine.low %v4172_v6, %v2038_v15  ;;  %v1713_v21 = vrot.slane %v1712_v42, 2 }
 0x179   :  { %v1704_v43 = vadd.f32 %v1703_v35, %v1702_v16  ;;  %v2432_v51 = vrot.slane %v2431_v24, 2  ;;  %v2443_v22 = vadd.f32 %v2442_v46, %v2218_v30  ;;  %v1718_v41 = vadd.f32 %v1717_v38, %v3977_v33 }
 0x17a   :  { %v2769_v3 = vrot.slane %v2755_v36, %v3649_v59  ;;  %v2219_v20 = vmul.f32 %v3977_v33, %v3977_v33  ;;  %3001 = vst [vmem:[%s4360_s3 + $0xc0] ss:$8 sm:$0xf] %v2039_v25  ;;  %3002 = vst [vmem:[%s4360_s3 + $0xc0] ss:$8 sm:$0xf0] %v2039_v25  ;;  %v1714_v52 = vadd.f32 %v1713_v21, %v1712_v42 }
 0x17b   :  { %v2040_v49 = vcombine.low %v1698_v48, %v1704_v43  ;;  %v2433_v6 = vadd.f32 %v2432_v51, %v2431_v24  ;;  %v1729_v55 = vrot.slane %v3979_v39, 4  ;;  %v2444_v57 = vrot.slane %v2443_v22, 2 }
 0x17c   :  { %v2770_v47 = vcombine.low %v4183_v45, %v2769_v3  ;;  %v1719_v0 = vrot.slane %v1718_v41, 2  ;;  %v2448_v50 = vrot.slane %v2219_v20, 4  ;;  %v1715_v53 = vrot.slane %v1714_v52, 1 }
 0x17d   :  { %v4219_v33 = vrot.slane %v2040_v49, %v3649_v59  ;;  %v2434_v7 = vrot.slane %v2433_v6, 1  ;;  %v1730_v58 = vadd.f32 %v1729_v55, %v3979_v39  ;;  %v2445_v48 = vadd.f32 %v2444_v57, %v2443_v22 }
 0x17e   :  { %3012 = vst [vmem:[%s4361_s4 + $0xc0] ss:$8 sm:$0xf] %v2770_v47  ;;  %3013 = vst [vmem:[%s4361_s4 + $0xc0] ss:$8 sm:$0xf0] %v2770_v47  ;;  %v1720_v45 = vadd.f32 %v1719_v0, %v1718_v41  ;;  %v2449_v8 = vadd.f32 %v2448_v50, %v2219_v20  ;;  %v2221_v10 = vmul.f32 %v3979_v39, %v3979_v39 }
 0x17f   :  { %v2435_v37 = vadd.f32 %v2434_v7, %v2433_v6  ;;  %v1716_v26 = vadd.f32 %v1715_v53, %v1714_v52  ;;  %v1731_v44 = vrot.slane %v1730_v58, 2  ;;  %v1723_v11 = vrot.slane %v3992_v13, 4 }
 0x180   :  { %v2446_v14 = vrot.slane %v2445_v48, 1  ;;  %v1721_v18 = vrot.slane %v1720_v45, 1  ;;  %v2450_v62 = vrot.slane %v2449_v8, 2  ;;  %v2460_v40 = vrot.slane %v2221_v10, 4 }
 0x181   :  { %v2771_v17 = vcombine.low %v4196_v23, %v2435_v37  ;;  %v2041_v63 = vcombine.low %v1710_v12, %v1716_v26  ;;  %v1732_v16 = vadd.f32 %v1731_v44, %v1730_v58  ;;  %v1724_v2 = vadd.f32 %v1723_v11, %v3992_v13 }
 0x182   :  { %v2447_v5 = vadd.f32 %v2446_v14, %v2445_v48  ;;  %v2451_v60 = vadd.f32 %v2450_v62, %v2449_v8  ;;  %v2461_v56 = vadd.f32 %v2460_v40, %v2221_v10  ;;  %v2220_v36 = vmul.f32 %v3992_v13, %v3992_v13 }
 0x183   :  { %v2057_v39 = vrot.slane %v2041_v63, %v3649_v59  ;;  %v1733_v30 = vrot.slane %v1732_v16, 1  ;;  %v1725_v15 = vrot.slane %v1724_v2, 2  ;;  %v4235_v35 = vrot.slane %v2771_v17, %v3649_v59 }
 0x184   :  { %v2772_v24 = vcombine.low %v2441_v32, %v2447_v5  ;;  %v2462_v42 = vrot.slane %v2461_v56, 2  ;;  %v1722_v12 = vadd.f32 %v1721_v18, %v1720_v45  ;;  %v1735_v38 = vrot.slane %v3994_v1, 4 }
 0x185   :  { %v2072_v23 = vcombine.low %v4219_v33, %v2057_v39  ;;  %v1726_v46 = vadd.f32 %v1725_v15, %v1724_v2  ;;  %v2452_v43 = vrot.slane %v2451_v60, 1  ;;  %v2454_v21 = vrot.slane %v2220_v36, 4 }
 0x186   :  { %v2788_v25 = vrot.slane %v2772_v24, %v3649_v59  ;;  %v2463_v51 = vadd.f32 %v2462_v42, %v2461_v56  ;;  %v1734_v3 = vadd.f32 %v1733_v30, %v1732_v16  ;;  %v1736_v41 = vadd.f32 %v1735_v38, %v3994_v1 }
 0x187   :  { %v1727_v22 = vrot.slane %v1726_v46, 1  ;;  %v2222_v32 = vmul.f32 %v3994_v1, %v3994_v1  ;;  %v2455_v49 = vadd.f32 %v2454_v21, %v2220_v36  ;;  %v1741_v6 = vrot.slane %v4030_v28, 4 }
 0x188   :  { %v2803_v13 = vcombine.low %v4235_v35, %v2788_v25  ;;  %v2464_v20 = vrot.slane %v2463_v51, 1  ;;  %v1737_v55 = vrot.slane %v1736_v41, 2  ;;  %v2223_v57 = vmul.f32 %v4030_v28, %v4030_v28 }
 0x189   :  { %v1728_v52 = vadd.f32 %v1727_v22, %v1726_v46  ;;  %v2466_v47 = vrot.slane %v2222_v32, 4  ;;  %v2453_v0 = vadd.f32 %v2452_v43, %v2451_v60  ;;  %v2456_v33 = vrot.slane %v2455_v49, 2 }
 0x18a   :  { %v2465_v50 = vadd.f32 %v2464_v20, %v2463_v51  ;;  %v1742_v7 = vadd.f32 %v1741_v6, %v4030_v28  ;;  %v1738_v58 = vadd.f32 %v1737_v55, %v1736_v41  ;;  %v2472_v48 = vrot.slane %v2223_v57, 4 }
 0x18b   :  { %v2042_v53 = vcombine.low %v1722_v12, %v1728_v52  ;;  %v2467_v1 = vadd.f32 %v2466_v47, %v2222_v32  ;;  %v2457_v45 = vadd.f32 %v2456_v33, %v2455_v49  ;;  %v1753_v10 = vrot.slane %v4032_v29, 4 }
 0x18c   :  { %v1743_v8 = vrot.slane %v1742_v7, 2  ;;  %v2225_v37 = vmul.f32 %v4032_v29, %v4032_v29  ;;  %v1739_v44 = vrot.slane %v1738_v58, 1  ;;  %v2473_v14 = vadd.f32 %v2472_v48, %v2223_v57 }
 0x18d   :  { %v2064_v26 = vrot.slane %v2042_v53, %v3649_v59  ;;  %v2468_v11 = vrot.slane %v2467_v1, 2  ;;  %v2458_v18 = vrot.slane %v2457_v45, 1  ;;  %v1754_v28 = vadd.f32 %v1753_v10, %v4032_v29 }
 0x18e   :  { %v1744_v62 = vadd.f32 %v1743_v8, %v1742_v7  ;;  %v2484_v40 = vrot.slane %v2225_v37, 4  ;;  %v1740_v17 = vadd.f32 %v1739_v44, %v1738_v58  ;;  %v2474_v16 = vrot.slane %v2473_v14, 2 }
 0x18f   :  { %v2469_v63 = vadd.f32 %v2468_v11, %v2467_v1  ;;  %v1747_v2 = vrot.slane %v4042_v9, 4  ;;  %v2459_v5 = vadd.f32 %v2458_v18, %v2457_v45  ;;  %v1755_v56 = vrot.slane %v1754_v28, 2 }
 0x190   :  { %v1745_v60 = vrot.slane %v1744_v62, 1  ;;  %v2485_v39 = vadd.f32 %v2484_v40, %v2225_v37  ;;  %v2043_v30 = vcombine.low %v1734_v3, %v1740_v17  ;;  %v2475_v35 = vadd.f32 %v2474_v16, %v2473_v14 }
 0x191   :  { %v2470_v15 = vrot.slane %v2469_v63, 1  ;;  %v1748_v24 = vadd.f32 %v1747_v2, %v4042_v9  ;;  %v2080_v42 = vrot.slane %v2072_v23, %v3649_v59  ;;  %v2773_v36 = vcombine.low %v2453_v0, %v2459_v5 }
 0x192   :  { %v1756_v12 = vadd.f32 %v1755_v56, %v1754_v28  ;;  %v2486_v29 = vrot.slane %v2485_v39, 2  ;;  %v2071_v46 = vrot.slane %v2043_v30, %v3649_v59  ;;  %v2476_v25 = vrot.slane %v2475_v35, 1 }
 0x193   :  { %v2471_v38 = vadd.f32 %v2470_v15, %v2469_v63  ;;  %v1749_v43 = vrot.slane %v1748_v24, 2  ;;  %v2811_v51 = vrot.slane %v2803_v13, %v3649_v59  ;;  %v1746_v21 = vadd.f32 %v1745_v60, %v1744_v62 }
 0x194   :  { %v1757_v22 = vrot.slane %v1756_v12, 1  ;;  %v2224_v3 = vmul.f32 %v4042_v9, %v4042_v9  ;;  %v2795_v41 = vrot.slane %v2773_v36, %v3649_v59  ;;  %v2073_v32 = vcombine.low %v2064_v26, %v2071_v46 }
 0x195   :  { %v2774_v20 = vcombine.low %v2465_v50, %v2471_v38  ;;  %v1750_v23 = vadd.f32 %v1749_v43, %v1748_v24  ;;  %v4263_v49 = vadd.f32 %v2476_v25, %v2475_v35  ;;  %v2487_v6 = vadd.f32 %v2486_v29, %v2485_v39 }
 0x196   :  { %v2478_v52 = vrot.slane %v2224_v3, 4  ;;  %v1759_v55 = vrot.slane %v4044_v4, 4  ;;  %v2087_v47 = vrot.slane %v2073_v32, %v3649_v59  ;;  %v2226_v0 = vmul.f32 %v4044_v4, %v4044_v4 }
 0x197   :  { %v2802_v13 = vrot.slane %v2774_v20, %v3649_v59  ;;  %v1751_v57 = vrot.slane %v1750_v23, 1  ;;  %v1758_v9 = vadd.f32 %v1757_v22, %v1756_v12  ;;  %v1765_v50 = vrot.slane %v4071_v27, 4 }
 0x198   :  { %v2479_v33 = vadd.f32 %v2478_v52, %v2224_v3  ;;  %v1760_v7 = vadd.f32 %v1759_v55, %v4044_v4  ;;  %v2088_v53 = vcombine.low %v2080_v42, %v2087_v47  ;;  %v2490_v48 = vrot.slane %v2226_v0, 4 }
 0x199   :  { %v2804_v58 = vcombine.low %v2795_v41, %v2802_v13  ;;  %v1752_v1 = vadd.f32 %v1751_v57, %v1750_v23  ;;  %v1766_v10 = vadd.f32 %v1765_v50, %v4071_v27  ;;  %v2227_v37 = vmul.f32 %v4071_v27, %v4071_v27 }
 0x19a   :  { %v2480_v45 = vrot.slane %v2479_v33, 2  ;;  %v1761_v8 = vrot.slane %v1760_v7, 2  ;;  %3003 = vst [vmem:[%s4360_s3 + $0x100] ss:$8 sm:$0xf] %v2088_v53  ;;  %v2491_v44 = vadd.f32 %v2490_v48, %v2226_v0  ;;  %v1777_v11 = vrot.slane %v4073_v19, 4 }
 0x19b   :  { %3004 = vst [vmem:[%s4360_s3 + $0x100] ss:$8 sm:$0xf0] %v2088_v53  ;;  %v2818_v4 = vrot.slane %v2804_v58, %v3649_v59  ;;  %v2089_v26 = vcombine.low %v1746_v21, %v1752_v1  ;;  %v1767_v62 = vrot.slane %v1766_v10, 2  ;;  %v2496_v28 = vrot.slane %v2227_v37, 4 }
 0x19c   :  { %v2481_v14 = vadd.f32 %v2480_v45, %v2479_v33  ;;  %v1762_v18 = vadd.f32 %v1761_v8, %v1760_v7  ;;  %v2488_v27 = vrot.slane %v2487_v6, 1  ;;  %v2492_v17 = vrot.slane %v2491_v44, 2 }
 0x19d   :  { %v2819_v40 = vcombine.low %v2811_v51, %v2818_v4  ;;  %v1778_v63 = vadd.f32 %v1777_v11, %v4073_v19  ;;  %v1768_v5 = vadd.f32 %v1767_v62, %v1766_v10  ;;  %v2497_v60 = vadd.f32 %v2496_v28, %v2227_v37 }
 0x19e   :  { %v2482_v16 = vrot.slane %v2481_v14, 1  ;;  %v1763_v2 = vrot.slane %v1762_v18, 1  ;;  %v2493_v56 = vadd.f32 %v2492_v17, %v2491_v44  ;;  %v2229_v30 = vmul.f32 %v4073_v19, %v4073_v19 }
 0x19f   :  { %3014 = vst [vmem:[%s4361_s4 + $0x100] ss:$8 sm:$0xf] %v2819_v40  ;;  %3015 = vst [vmem:[%s4361_s4 + $0x100] ss:$8 sm:$0xf0] %v2819_v40  ;;  %v2489_v36 = vadd.f32 %v2488_v27, %v2487_v6  ;;  %v4295_v38 = vrot.slane %v2089_v26, %v3649_v59  ;;  %v2228_v20 = vmul.f32 %v4089_v34, %v4089_v34 }
 0x1a0   :  { %v1779_v39 = vrot.slane %v1778_v63, 2  ;;  %v1771_v15 = vrot.slane %v4089_v34, 4  ;;  %v2483_v35 = vadd.f32 %v2482_v16, %v2481_v14  ;;  %v1764_v24 = vadd.f32 %v1763_v2, %v1762_v18 }
 0x1a1   :  { %v2498_v42 = vrot.slane %v2497_v60, 2  ;;  %v2494_v12 = vrot.slane %v2493_v56, 1  ;;  %v2508_v29 = vrot.slane %v2229_v30, 4  ;;  %v1769_v51 = vrot.slane %v1768_v5, 1 }
 0x1a2   :  { %v1772_v46 = vadd.f32 %v1771_v15, %v4089_v34  ;;  %v2820_v25 = vcombine.low %v4263_v49, %v2483_v35  ;;  %v2090_v43 = vcombine.low %v1758_v9, %v1764_v24  ;;  %v1780_v22 = vadd.f32 %v1779_v39, %v1778_v63 }
 0x1a3   :  { %v2495_v21 = vadd.f32 %v2494_v12, %v2493_v56  ;;  %v2509_v19 = vadd.f32 %v2508_v29, %v2229_v30  ;;  %v2499_v32 = vadd.f32 %v2498_v42, %v2497_v60  ;;  %v1770_v47 = vadd.f32 %v1769_v51, %v1768_v5 }
 0x1a4   :  { %v1773_v3 = vrot.slane %v1772_v46, 2  ;;  %v4299_v41 = vrot.slane %v2090_v43, %v3649_v59  ;;  %v4304_v23 = vrot.slane %v2820_v25, %v3649_v59  ;;  %v2502_v13 = vrot.slane %v2228_v20, 4 }
 0x1a5   :  { %v2821_v6 = vcombine.low %v2489_v36, %v2495_v21  ;;  %v2510_v52 = vrot.slane %v2509_v19, 2  ;;  %v1783_v57 = vrot.slane %v4091_v31, 4  ;;  %v1781_v9 = vrot.slane %v1780_v22, 1 }
 0x1a6   :  { %v1774_v55 = vadd.f32 %v1773_v3, %v1772_v46  ;;  %v2121_v49 = vcombine.low %v4295_v38, %v4299_v41  ;;  %v2230_v34 = vmul.f32 %v4091_v31, %v4091_v31  ;;  %v2500_v7 = vrot.slane %v2499_v32, 1 }
 0x1a7   :  { %v2837_v0 = vrot.slane %v2821_v6, %v3649_v59  ;;  %v2503_v50 = vadd.f32 %v2502_v13, %v2228_v20  ;;  %v1784_v53 = vadd.f32 %v1783_v57, %v4091_v31  ;;  %v1789_v58 = vrot.slane %v4114_v61, 4 }
 0x1a8   :  { %v1775_v33 = vrot.slane %v1774_v55, 1  ;;  %v2511_v48 = vadd.f32 %v2510_v52, %v2509_v19  ;;  %v2514_v8 = vrot.slane %v2230_v34, 4  ;;  %v2231_v62 = vmul.f32 %v4114_v61, %v4114_v61 }
 0x1a9   :  { %v2852_v1 = vcombine.low %v4304_v23, %v2837_v0  ;;  %v2504_v10 = vrot.slane %v2503_v50, 2  ;;  %v1785_v37 = vrot.slane %v1784_v53, 2  ;;  %v1790_v4 = vadd.f32 %v1789_v58, %v4114_v61 }
 0x1aa   :  { %v1776_v45 = vadd.f32 %v1775_v33, %v1774_v55  ;;  %v2515_v44 = vadd.f32 %v2514_v8, %v2230_v34  ;;  %v2501_v31 = vadd.f32 %v2500_v7, %v2499_v32  ;;  %v1782_v28 = vadd.f32 %v1781_v9, %v1780_v22 }
 0x1ab   :  { %v2505_v11 = vadd.f32 %v2504_v10, %v2503_v50  ;;  %v1786_v14 = vadd.f32 %v1785_v37, %v1784_v53  ;;  %v1791_v18 = vrot.slane %v1790_v4, 2  ;;  %v2512_v40 = vrot.slane %v2511_v48, 1 }
 0x1ac   :  { %v2091_v26 = vcombine.low %v1770_v47, %v1776_v45  ;;  %v2516_v27 = vrot.slane %v2515_v44, 2  ;;  %v2520_v2 = vrot.slane %v2231_v62, 4  ;;  %v2129_v32 = vrot.slane %v2121_v49, %v3649_v59 }
 0x1ad   :  { %v2506_v17 = vrot.slane %v2505_v11, 1  ;;  %v1787_v63 = vrot.slane %v1786_v14, 1  ;;  %v1792_v16 = vadd.f32 %v1791_v18, %v1790_v4  ;;  %v2513_v15 = vadd.f32 %v2512_v40, %v2511_v48 }
 0x1ae   :  { %v2517_v5 = vadd.f32 %v2516_v27, %v2515_v44  ;;  %v2521_v30 = vadd.f32 %v2520_v2, %v2231_v62  ;;  %v2113_v35 = vrot.slane %v2091_v26, %v3649_v59  ;;  %v2860_v55 = vrot.slane %v2852_v1, %v3649_v59 }
 0x1af   :  { %v2507_v60 = vadd.f32 %v2506_v17, %v2505_v11  ;;  %v1788_v56 = vadd.f32 %v1787_v63, %v1786_v14  ;;  %v1793_v39 = vrot.slane %v1792_v16, 1 }
 0x1b0   :  { %v2518_v24 = vrot.slane %v2517_v5, 1  ;;  %v2522_v12 = vrot.slane %v2521_v30, 2 }
 0x1b1   :  { %v2822_v42 = vcombine.low %v2501_v31, %v2507_v60  ;;  %v2092_v36 = vcombine.low %v1782_v28, %v1788_v56  ;;  %v1794_v61 = vadd.f32 %v1793_v39, %v1792_v16 }
 0x1b2   :  { %v2519_v29 = vadd.f32 %v2518_v24, %v2517_v5  ;;  %v2523_v25 = vadd.f32 %v2522_v12, %v2521_v30 }
 0x1b3   :  { %v2120_v46 = vrot.slane %v2092_v36, %v3649_v59  ;;  %v2144_v38 = vrot.slane %v1794_v61, %v3649_v59  ;;  %v2844_v43 = vrot.slane %v2822_v42, %v3649_v59 }
 0x1b4   :  { %v2823_v51 = vcombine.low %v2513_v15, %v2519_v29  ;;  %v2524_v3 = vrot.slane %v2523_v25, 1 }
 0x1b5   :  { %v2122_v22 = vcombine.low %v2113_v35, %v2120_v46  ;;  %v2151_v19 = vrot.slane %v2144_v38, %v3649_v59 }
 0x1b6   :  { %v2851_v41 = vrot.slane %v2823_v51, %v3649_v59  ;;  %v2525_v54 = vadd.f32 %v2524_v3, %v2523_v25 }
 0x1b7   :  { %v2136_v20 = vrot.slane %v2122_v22, %v3649_v59  ;;  %3007 = vst.msk [vmem:[%s4360_s3 + $0x180] ss:$8 sm:$0x1] %vm4323_vm2, %v2151_v19 }
 0x1b8   :  { %v2853_v23 = vcombine.low %v2844_v43, %v2851_v41  ;;  %v2875_v52 = vrot.slane %v2525_v54, %v3649_v59 }
 0x1b9   :  { %v2137_v6 = vcombine.low %v2129_v32, %v2136_v20 }
 0x1ba   :  { %v2867_v47 = vrot.slane %v2853_v23, %v3649_v59  ;;  %v2882_v49 = vrot.slane %v2875_v52, %v3649_v59 }
 0x1bb   :  { %3005 = vst [vmem:[%s4360_s3 + $0x140] ss:$8 sm:$0xf] %v2137_v6  ;;  %3006 = vst [vmem:[%s4360_s3 + $0x140] ss:$8 sm:$0xf0] %v2137_v6 }
 0x1bc   :  { %v2868_v13 = vcombine.low %v2860_v55, %v2867_v47  ;;  %3018 = vst.msk [vmem:[%s4361_s4 + $0x180] ss:$8 sm:$0x1] %vm4323_vm2, %v2882_v49 }
 0x1be   :  { %3016 = vst [vmem:[%s4361_s4 + $0x140] ss:$8 sm:$0xf] %v2868_v13  ;;  %3017 = vst [vmem:[%s4361_s4 + $0x140] ss:$8 sm:$0xf0] %v2868_v13 }
 0x1bf   :  { %2922 = vsyncpa [#allocation3], 1 }

// kernel: tile.38
= control target key start
LH: loop header
LB: loop body
LE: loop exit
PB: predicated region body
PF: predicated region fallthrough
CT: control target
= control target key end

     0   :  { %s22_s0 = inlined_call_operand.vmem [shape: f32[64], index: 0, kind: input, shape index: {}]   ;;  %s23_s1 = inlined_call_operand.vmem [shape: f32[4,64], index: 1, kind: output, shape index: {}]  }
   0x1   :  { %v4_v0 = vld [vmem:[%s22_s0] ss:$0 sm:$0xff] }
   0x2   :  { %5 = vst [vmem:[%s23_s1] sm:$0xf] %v4_v0 }

// kernel: tile.39
= control target key start
LH: loop header
LB: loop body
LE: loop exit
PB: predicated region body
PF: predicated region fallthrough
CT: control target
= control target key end

     0   :  { %s6_s8 = smov 3  ;;  %vm8_vm0 = vcmask 523264   ;;  %s30_s9 = smov 64   ;;  %vm15_vm1 = vcmask 1048064   ;;  %s50_s0 = inlined_call_operand.vmem [shape: f32[4,64], index: 0, kind: input, shape index: {}]   ;;  %s51_s1 = inlined_call_operand.vmem [shape: f32[1,256], index: 1, kind: output, shape index: {}]  }
   0x1   :  { %v4_v0 = vld [vmem:[%s50_s0] sm:$0xf]  ;;  %s11_s0 = smov 3 }
   0x2   :  { %5 = vst [vmem:[#allocation1] sm:$0xf] %v4_v0 }
   0x9   :  { %v12_v1 = vld [vmem:[#allocation1 + $0x1] ss:$2 sm:%s11_s0]   ;;  %v7_v2 = vld [vmem:[#allocation1] ss:$2 sm:%s6_s8]  }
   0xa   :  { %13 = vrot.lane.b32.xlu0 %v12_v1, %s30_s9  ;;  %9 = vst.msk [vmem:[#allocation0] ss:$8 sm:$0x3] %vm8_vm0, %v7_v2  }
  0x7c   :  { %v14_v3 = vpop.permute.xlu0 %13  }
  0x7d   :  { %16 = vst.msk [vmem:[#allocation0] ss:$8 sm:$0x3] %vm15_vm1, %v14_v3  }
  0x84   :  { %v20_v4 = vld [vmem:[#allocation0] sm:$0x1]  ;;  %v24_v5 = vld [vmem:[#allocation0 + $0x8] sm:$0x1] }
  0x85   :  { %22 = vst [vmem:[%s51_s1] sm:$0x1] %v20_v4  ;;  %28 = vst [vmem:[%s51_s1 + $0x1] sm:$0x1] %v24_v5 }

// kernel: generator_forward.8
= control target key start
LH: loop header
LB: loop body
LE: loop exit
PB: predicated region body
PF: predicated region fallthrough
CT: control target
= control target key end

     0   :  { %v42_v0 = vlaneseq  ;;  %s468_s1 = inlined_call_operand.vmem [shape: f32[1,256], index: 1, kind: input, shape index: {}]   ;;  %s469_s2 = inlined_call_operand.vmem [shape: f32[1,256], index: 2, kind: input, shape index: {}]   ;;  %s470_s0 = inlined_call_operand.vmem [shape: f32[104,256], index: 0, kind: input, shape index: {}]   ;;  %s471_s3 = inlined_call_operand.vmem [shape: bf16[104,256], index: 3, kind: output, shape index: {}]  }
   0x1   :  { %v40_v2 = vld [vmem:[%s468_s1] sm:$0x3]  ;;  %v15_v5 = vld [vmem:[%s470_s0 + $0x8] sm:$0xff]  ;;  %v16_v8 = vld [vmem:[%s470_s0 + $0x10] sm:$0xff] }
   0x2   :  { %v43_v1 = vshrl.u32 %v42_v0, 7  ;;  %v78_v3 = vld [vmem:[%s469_s2] sm:$0x3]  ;;  %v17_v9 = vld [vmem:[%s470_s0 + $0x18] sm:$0xff]  ;;  %v19_v15 = vld [vmem:[%s470_s0 + $0x28] sm:$0xff] }
   0x3   :  { %v14_v4 = vld [vmem:[%s470_s0] sm:$0xff]  ;;  %v20_v16 = vld [vmem:[%s470_s0 + $0x30] sm:$0xff]  ;;  %v21_v17 = vld [vmem:[%s470_s0 + $0x38] sm:$0xff] }
   0x4   :  { %v44_v6 = vsub.s32 0, %v43_v1  ;;  %v48_v7 = vsub.s32 1, %v43_v1  ;;  %v18_v10 = vld [vmem:[%s470_s0 + $0x20] sm:$0xff]  ;;  %v23_v35 = vld [vmem:[%s470_s0 + $0x48] sm:$0xff]  ;;  %v24_v40 = vld [vmem:[%s470_s0 + $0x50] sm:$0xff] }
   0x5   :  { %v22_v34 = vld [vmem:[%s470_s0 + $0x40] sm:$0xff]  ;;  %v25_v41 = vld [vmem:[%s470_s0 + $0x58] sm:$0xff]  ;;  %v27_v47 = vld [vmem:[%s470_s0 + $0x68] sm:$0xff] }
   0x6   :  { %v306_v11 = vrot.slane %v40_v2, %v44_v6  ;;  %v308_v12 = vrot.slane %v40_v2, %v48_v7  ;;  %v310_v13 = vrot.slane %v78_v3, %v44_v6  ;;  %v312_v14 = vrot.slane %v78_v3, %v48_v7  ;;  %v26_v46 = vld [vmem:[%s470_s0 + $0x60] sm:$0xff]  ;;  %v28_v52 = vld [vmem:[%s470_s0 + $0x70] sm:$0xff]  ;;  %v29_v53 = vld [vmem:[%s470_s0 + $0x78] sm:$0xff] }
   0x7   :  { %v30_v2 = vld [vmem:[%s470_s0 + $0x80] sm:$0xff]  ;;  %v31_v7 = vld [vmem:[%s470_s0 + $0x88] sm:$0xff] }
   0x8   :  { %v52_v18 = vmul.f32 %v306_v11, %v14_v4  ;;  %v53_v19 = vmul.f32 %v308_v12, %v15_v5  ;;  %v54_v20 = vmul.f32 %v306_v11, %v16_v8  ;;  %v55_v21 = vmul.f32 %v308_v12, %v17_v9 }
   0x9   :  { %v56_v22 = vmul.f32 %v306_v11, %v18_v10  ;;  %v57_v23 = vmul.f32 %v308_v12, %v19_v15  ;;  %v58_v24 = vmul.f32 %v306_v11, %v20_v16  ;;  %v59_v25 = vmul.f32 %v308_v12, %v21_v17  ;;  %v32_v16 = vld [vmem:[%s470_s0 + $0x90] sm:$0xff]  ;;  %v33_v17 = vld [vmem:[%s470_s0 + $0x98] sm:$0xff] }
   0xa   :  { %v90_v26 = vadd.f32 %v310_v13, %v52_v18  ;;  %v91_v27 = vadd.f32 %v312_v14, %v53_v19  ;;  %v92_v28 = vadd.f32 %v310_v13, %v54_v20  ;;  %v93_v29 = vadd.f32 %v312_v14, %v55_v21 }
   0xb   :  { %v94_v30 = vadd.f32 %v310_v13, %v56_v22  ;;  %v95_v31 = vadd.f32 %v312_v14, %v57_v23  ;;  %v96_v32 = vadd.f32 %v310_v13, %v58_v24  ;;  %v97_v33 = vadd.f32 %v312_v14, %v59_v25  ;;  %v34_v22 = vld [vmem:[%s470_s0 + $0xa0] sm:$0xff]  ;;  %v35_v23 = vld [vmem:[%s470_s0 + $0xa8] sm:$0xff] }
   0xc   :  { %v116_v36 = vmax.f32 %v90_v26, 0.0  ;;  %v117_v37 = vmax.f32 %v91_v27, 0.0  ;;  %v118_v38 = vmax.f32 %v92_v28, 0.0  ;;  %v119_v39 = vmax.f32 %v93_v29, 0.0  ;;  %v36_v28 = vld [vmem:[%s470_s0 + $0xb0] sm:$0xff] }
   0xd   :  { %v120_v42 = vmax.f32 %v94_v30, 0.0  ;;  %v121_v43 = vmax.f32 %v95_v31, 0.0  ;;  %v122_v44 = vmax.f32 %v96_v32, 0.0  ;;  %v123_v45 = vmax.f32 %v97_v33, 0.0  ;;  %v37_v33 = vld [vmem:[%s470_s0 + $0xb8] sm:$0xff] }
   0xe   :  { %v252_v48 = vpack.c.bf16 %v117_v37, %v116_v36  ;;  %v253_v49 = vpack.c.bf16 %v119_v39, %v118_v38  ;;  %v60_v50 = vmul.f32 %v306_v11, %v22_v34  ;;  %v61_v51 = vmul.f32 %v308_v12, %v23_v35  ;;  %v38_v38 = vld [vmem:[%s470_s0 + $0xc0] sm:$0xff] }
   0xf   :  { %v254_v54 = vpack.c.bf16 %v121_v43, %v120_v42  ;;  %v255_v55 = vpack.c.bf16 %v123_v45, %v122_v44  ;;  %v62_v56 = vmul.f32 %v306_v11, %v24_v40  ;;  %v63_v57 = vmul.f32 %v308_v12, %v25_v41 }
  0x10   :  { %222 = vst [vmem:[%s471_s3] sm:$0xff] %v252_v48  ;;  %223 = vst [vmem:[%s471_s3 + $0x8] sm:$0xff] %v253_v49  ;;  %v98_v58 = vadd.f32 %v310_v13, %v60_v50  ;;  %v99_v59 = vadd.f32 %v312_v14, %v61_v51  ;;  %v64_v60 = vmul.f32 %v306_v11, %v26_v46 }
  0x11   :  { %v65_v61 = vmul.f32 %v308_v12, %v27_v47  ;;  %224 = vst [vmem:[%s471_s3 + $0x10] sm:$0xff] %v254_v54  ;;  %225 = vst [vmem:[%s471_s3 + $0x18] sm:$0xff] %v255_v55  ;;  %v100_v62 = vadd.f32 %v310_v13, %v62_v56  ;;  %v101_v63 = vadd.f32 %v312_v14, %v63_v57  ;;  %v39_v47 = vld [vmem:[%s470_s0 + $0xc8] sm:$0xff] }
  0x12   :  { %v66_v0 = vmul.f32 %v306_v11, %v28_v52  ;;  %v67_v1 = vmul.f32 %v308_v12, %v29_v53  ;;  %v124_v3 = vmax.f32 %v98_v58, 0.0  ;;  %v125_v4 = vmax.f32 %v99_v59, 0.0 }
  0x13   :  { %v102_v5 = vadd.f32 %v310_v13, %v64_v60  ;;  %v103_v6 = vadd.f32 %v312_v14, %v65_v61  ;;  %v126_v8 = vmax.f32 %v100_v62, 0.0  ;;  %v127_v9 = vmax.f32 %v101_v63, 0.0 }
  0x14   :  { %v104_v10 = vadd.f32 %v310_v13, %v66_v0  ;;  %v105_v15 = vadd.f32 %v312_v14, %v67_v1  ;;  %v256_v18 = vpack.c.bf16 %v125_v4, %v124_v3  ;;  %v68_v21 = vmul.f32 %v306_v11, %v30_v2 }
  0x15   :  { %v128_v19 = vmax.f32 %v102_v5, 0.0  ;;  %v129_v20 = vmax.f32 %v103_v6, 0.0  ;;  %v257_v24 = vpack.c.bf16 %v127_v9, %v126_v8  ;;  %v69_v27 = vmul.f32 %v308_v12, %v31_v7 }
  0x16   :  { %v130_v25 = vmax.f32 %v104_v10, 0.0  ;;  %v131_v26 = vmax.f32 %v105_v15, 0.0  ;;  %226 = vst [vmem:[%s471_s3 + $0x20] sm:$0xff] %v256_v18  ;;  %v106_v30 = vadd.f32 %v310_v13, %v68_v21  ;;  %v70_v31 = vmul.f32 %v306_v11, %v32_v16 }
  0x17   :  { %v258_v29 = vpack.c.bf16 %v129_v20, %v128_v19  ;;  %v71_v32 = vmul.f32 %v308_v12, %v33_v17  ;;  %227 = vst [vmem:[%s471_s3 + $0x28] sm:$0xff] %v257_v24  ;;  %v107_v35 = vadd.f32 %v312_v14, %v69_v27  ;;  %v72_v36 = vmul.f32 %v306_v11, %v34_v22 }
  0x18   :  { %v259_v34 = vpack.c.bf16 %v131_v26, %v130_v25  ;;  %v73_v37 = vmul.f32 %v308_v12, %v35_v23  ;;  %v132_v39 = vmax.f32 %v106_v30, 0.0  ;;  %v108_v40 = vadd.f32 %v310_v13, %v70_v31 }
  0x19   :  { %228 = vst [vmem:[%s471_s3 + $0x30] sm:$0xff] %v258_v29  ;;  %v109_v41 = vadd.f32 %v312_v14, %v71_v32  ;;  %v74_v42 = vmul.f32 %v306_v11, %v36_v28  ;;  %v133_v43 = vmax.f32 %v107_v35, 0.0  ;;  %v110_v44 = vadd.f32 %v310_v13, %v72_v36 }
  0x1a   :  { %229 = vst [vmem:[%s471_s3 + $0x38] sm:$0xff] %v259_v34  ;;  %v111_v45 = vadd.f32 %v312_v14, %v73_v37  ;;  %v75_v46 = vmul.f32 %v308_v12, %v37_v33  ;;  %v134_v48 = vmax.f32 %v108_v40, 0.0  ;;  %v76_v51 = vmul.f32 %v306_v11, %v38_v38 }
  0x1b   :  { %v135_v49 = vmax.f32 %v109_v41, 0.0  ;;  %v112_v50 = vadd.f32 %v310_v13, %v74_v42  ;;  %v260_v52 = vpack.c.bf16 %v133_v43, %v132_v39  ;;  %v136_v53 = vmax.f32 %v110_v44, 0.0 }
  0x1c   :  { %v137_v54 = vmax.f32 %v111_v45, 0.0  ;;  %v113_v55 = vadd.f32 %v312_v14, %v75_v46  ;;  %v77_v58 = vmul.f32 %v308_v12, %v39_v47  ;;  %v114_v59 = vadd.f32 %v310_v13, %v76_v51 }
  0x1d   :  { %v261_v56 = vpack.c.bf16 %v135_v49, %v134_v48  ;;  %v138_v57 = vmax.f32 %v112_v50, 0.0  ;;  %230 = vst [vmem:[%s471_s3 + $0x40] sm:$0xff] %v260_v52 }
  0x1e   :  { %v262_v60 = vpack.c.bf16 %v137_v54, %v136_v53  ;;  %v139_v61 = vmax.f32 %v113_v55, 0.0  ;;  %v115_v11 = vadd.f32 %v312_v14, %v77_v58  ;;  %v140_v62 = vmax.f32 %v114_v59, 0.0 }
  0x1f   :  { %231 = vst [vmem:[%s471_s3 + $0x48] sm:$0xff] %v261_v56 }
  0x20   :  { %232 = vst [vmem:[%s471_s3 + $0x50] sm:$0xff] %v262_v60  ;;  %v263_v12 = vpack.c.bf16 %v139_v61, %v138_v57  ;;  %v141_v63 = vmax.f32 %v115_v11, 0.0 }
  0x22   :  { %233 = vst [vmem:[%s471_s3 + $0x58] sm:$0xff] %v263_v12  ;;  %v264_v13 = vpack.c.bf16 %v141_v63, %v140_v62 }
  0x24   :  { %234 = vst [vmem:[%s471_s3 + $0x60] sm:$0xff] %v264_v13 }

// kernel: generator_forward.7
= control target key start
LH: loop header
LB: loop body
LE: loop exit
PB: predicated region body
PF: predicated region fallthrough
CT: control target
= control target key end

     0   :  { %s6284_s1 = inlined_call_operand.vmem [shape: bf16[2304,256], index: 1, kind: input, shape index: {}]   ;;  %s6285_s0 = inlined_call_operand.vmem [shape: bf16[104,2304], index: 0, kind: input, shape index: {}]   ;;  %s6286_s3 = inlined_call_operand.vmem [shape: f32[8,256], index: 3, kind: output, shape index: {1}]   ;;  %s6287_s4 = inlined_call_operand.vmem [shape: f32[8,256], index: 4, kind: output, shape index: {2}]   ;;  %s6288_s2 = inlined_call_operand.vmem [shape: f32[104,256], index: 2, kind: output, shape index: {0}]  }
   0x1   :  { %v4223_v0 = vld [vmem:[%s6284_s1 + $0x4] ss:$8 sps:$4 sm:$0xff]   ;;  %v4227_v2 = vld [vmem:[%s6284_s1] ss:$8 sps:$4 sm:$0xff]   ;;  %v4229_v4 = vld [vmem:[%s6284_s1 + $0x14] ss:$8 sps:$4 sm:$0xff]  }
   0x2   :  { %v4225_v1 = vld [vmem:[%s6284_s1 + $0x404] ss:$8 sps:$4 sm:$0xff]   ;;  %2462 = vmatprep.subr.bf16.mxu1 %v4223_v0  ;;  %v4228_v3 = vld [vmem:[%s6284_s1 + $0x400] ss:$8 sps:$4 sm:$0xff]   ;;  %v4231_v5 = vld [vmem:[%s6284_s1 + $0x414] ss:$8 sps:$4 sm:$0xff]  }
   0x3   :  { %2866 = vmatprep.subr.bf16.mxu0 %v4225_v1  ;;  %2463 = vmatpush1.bf16.msra.mxu1 %v4227_v2  ;;  %v4233_v6 = vld [vmem:[%s6284_s1 + $0x10] ss:$8 sps:$4 sm:$0xff]   ;;  %v4235_v8 = vld [vmem:[%s6284_s1 + $0x24] ss:$8 sps:$4 sm:$0xff]   ;;  %v4239_v10 = vld [vmem:[%s6284_s1 + $0x20] ss:$8 sps:$4 sm:$0xff]  }
   0x4   :  { %2867 = vmatpush1.bf16.msra.mxu0 %v4228_v3  ;;  %2464 = vmatprep.subr.bf16.mxu1 %v4229_v4  ;;  %v4234_v7 = vld [vmem:[%s6284_s1 + $0x410] ss:$8 sps:$4 sm:$0xff]   ;;  %v4237_v9 = vld [vmem:[%s6284_s1 + $0x424] ss:$8 sps:$4 sm:$0xff]   ;;  %v4240_v11 = vld [vmem:[%s6284_s1 + $0x420] ss:$8 sps:$4 sm:$0xff]  }
   0x5   :  { %2868 = vmatprep.subr.bf16.mxu0 %v4231_v5  ;;  %v4241_v12 = vld [vmem:[%s6284_s1 + $0x34] ss:$8 sps:$4 sm:$0xff]   ;;  %v4245_v14 = vld [vmem:[%s6284_s1 + $0x30] ss:$8 sps:$4 sm:$0xff]   ;;  %v4247_v16 = vld [vmem:[%s6284_s1 + $0x44] ss:$8 sps:$4 sm:$0xff]  }
   0x6   :  { %v4243_v13 = vld [vmem:[%s6284_s1 + $0x434] ss:$8 sps:$4 sm:$0xff]   ;;  %v4246_v15 = vld [vmem:[%s6284_s1 + $0x430] ss:$8 sps:$4 sm:$0xff]   ;;  %v4249_v17 = vld [vmem:[%s6284_s1 + $0x444] ss:$8 sps:$4 sm:$0xff]  }
   0x7   :  { %2465 = vmatpush1.bf16.msra.mxu1 %v4233_v6  ;;  %v4251_v18 = vld [vmem:[%s6284_s1 + $0x40] ss:$8 sps:$4 sm:$0xff]   ;;  %v4253_v20 = vld [vmem:[%s6284_s1 + $0x54] ss:$8 sps:$4 sm:$0xff]   ;;  %v4257_v22 = vld [vmem:[%s6284_s1 + $0x50] ss:$8 sps:$4 sm:$0xff]  }
   0x8   :  { %2869 = vmatpush1.bf16.msra.mxu0 %v4234_v7  ;;  %2466 = vmatprep.subr.bf16.mxu1 %v4235_v8  ;;  %v4252_v19 = vld [vmem:[%s6284_s1 + $0x440] ss:$8 sps:$4 sm:$0xff]   ;;  %v4255_v21 = vld [vmem:[%s6284_s1 + $0x454] ss:$8 sps:$4 sm:$0xff]   ;;  %v4258_v23 = vld [vmem:[%s6284_s1 + $0x450] ss:$8 sps:$4 sm:$0xff]  }
   0x9   :  { %2870 = vmatprep.subr.bf16.mxu0 %v4237_v9  ;;  %v4259_v24 = vld [vmem:[%s6284_s1 + $0x64] ss:$8 sps:$4 sm:$0xff]   ;;  %v4263_v26 = vld [vmem:[%s6284_s1 + $0x60] ss:$8 sps:$4 sm:$0xff]   ;;  %v4265_v28 = vld [vmem:[%s6284_s1 + $0x74] ss:$8 sps:$4 sm:$0xff]  }
   0xa   :  { %v4261_v25 = vld [vmem:[%s6284_s1 + $0x464] ss:$8 sps:$4 sm:$0xff]   ;;  %v4264_v27 = vld [vmem:[%s6284_s1 + $0x460] ss:$8 sps:$4 sm:$0xff]   ;;  %v4267_v29 = vld [vmem:[%s6284_s1 + $0x474] ss:$8 sps:$4 sm:$0xff]  }
   0xb   :  { %2467 = vmatpush1.bf16.msra.mxu1 %v4239_v10  ;;  %v4269_v30 = vld [vmem:[%s6284_s1 + $0x70] ss:$8 sps:$4 sm:$0xff]   ;;  %v4271_v32 = vld [vmem:[%s6284_s1 + $0x84] ss:$8 sps:$4 sm:$0xff]   ;;  %v4275_v34 = vld [vmem:[%s6284_s1 + $0x80] ss:$8 sps:$4 sm:$0xff]  }
   0xc   :  { %2871 = vmatpush1.bf16.msra.mxu0 %v4240_v11  ;;  %2468 = vmatprep.subr.bf16.mxu1 %v4241_v12  ;;  %v4270_v31 = vld [vmem:[%s6284_s1 + $0x470] ss:$8 sps:$4 sm:$0xff]   ;;  %v4273_v33 = vld [vmem:[%s6284_s1 + $0x484] ss:$8 sps:$4 sm:$0xff]   ;;  %v4276_v35 = vld [vmem:[%s6284_s1 + $0x480] ss:$8 sps:$4 sm:$0xff]  }
   0xd   :  { %2872 = vmatprep.subr.bf16.mxu0 %v4243_v13  ;;  %v4277_v36 = vld [vmem:[%s6284_s1 + $0x94] ss:$8 sps:$4 sm:$0xff]   ;;  %v4281_v38 = vld [vmem:[%s6284_s1 + $0x90] ss:$8 sps:$4 sm:$0xff]   ;;  %v4283_v40 = vld [vmem:[%s6284_s1 + $0xa4] ss:$8 sps:$4 sm:$0xff]  }
   0xe   :  { %v4279_v37 = vld [vmem:[%s6284_s1 + $0x494] ss:$8 sps:$4 sm:$0xff]   ;;  %v4282_v39 = vld [vmem:[%s6284_s1 + $0x490] ss:$8 sps:$4 sm:$0xff]   ;;  %v4285_v41 = vld [vmem:[%s6284_s1 + $0x4a4] ss:$8 sps:$4 sm:$0xff]  }
   0xf   :  { %2469 = vmatpush1.bf16.msra.mxu1 %v4245_v14  ;;  %v4287_v42 = vld [vmem:[%s6284_s1 + $0xa0] ss:$8 sps:$4 sm:$0xff]   ;;  %v4289_v44 = vld [vmem:[%s6284_s1 + $0xb4] ss:$8 sps:$4 sm:$0xff]   ;;  %v4293_v46 = vld [vmem:[%s6284_s1 + $0xb0] ss:$8 sps:$4 sm:$0xff]  }
  0x10   :  { %2873 = vmatpush1.bf16.msra.mxu0 %v4246_v15  ;;  %2470 = vmatprep.subr.bf16.mxu1 %v4247_v16  ;;  %v4288_v43 = vld [vmem:[%s6284_s1 + $0x4a0] ss:$8 sps:$4 sm:$0xff]   ;;  %v4291_v45 = vld [vmem:[%s6284_s1 + $0x4b4] ss:$8 sps:$4 sm:$0xff]   ;;  %v4294_v47 = vld [vmem:[%s6284_s1 + $0x4b0] ss:$8 sps:$4 sm:$0xff]  }
  0x11   :  { %2874 = vmatprep.subr.bf16.mxu0 %v4249_v17  ;;  %v4321_v48 = vld [vmem:[%s6285_s0 + $0x4] ss:$72 sps:$4 sm:$0xff]   ;;  %v4299_v52 = vld [vmem:[%s6284_s1 + $0xc0] ss:$8 sps:$4 sm:$0xff]   ;;  %v4301_v54 = vld [vmem:[%s6284_s1 + $0xd4] ss:$8 sps:$4 sm:$0xff]  }
  0x12   :  { %v4295_v49 = vld [vmem:[%s6284_s1 + $0xc4] ss:$8 sps:$4 sm:$0xff]   ;;  %2494 = vmatprep.mubr.bf16.mxu1 %v4321_v48  ;;  %v4300_v53 = vld [vmem:[%s6284_s1 + $0x4c0] ss:$8 sps:$4 sm:$0xff]   ;;  %v4303_v55 = vld [vmem:[%s6284_s1 + $0x4d4] ss:$8 sps:$4 sm:$0xff]  }
  0x13   :  { %2471 = vmatpush1.bf16.msra.mxu1 %v4251_v18  ;;  %v4297_v50 = vld [vmem:[%s6284_s1 + $0x4c4] ss:$8 sps:$4 sm:$0xff]   ;;  %v4305_v56 = vld [vmem:[%s6284_s1 + $0xd0] ss:$8 sps:$4 sm:$0xff]   ;;  %v4311_v60 = vld [vmem:[%s6284_s1 + $0xe0] ss:$8 sps:$4 sm:$0xff]  }
  0x14   :  { %2875 = vmatpush1.bf16.msra.mxu0 %v4252_v19  ;;  %2472 = vmatprep.subr.bf16.mxu1 %v4253_v20  ;;  %v4327_v51 = vld [vmem:[%s6285_s0 + $0x24] ss:$72 sps:$4 sm:$0xff]   ;;  %v4306_v57 = vld [vmem:[%s6284_s1 + $0x4d0] ss:$8 sps:$4 sm:$0xff]   ;;  %v4312_v61 = vld [vmem:[%s6284_s1 + $0x4e0] ss:$8 sps:$4 sm:$0xff]  }
  0x15   :  { %2876 = vmatprep.subr.bf16.mxu0 %v4255_v21  ;;  %2898 = vmatprep.mubr.bf16.mxu0 %v4327_v51  ;;  %v4307_v58 = vld [vmem:[%s6284_s1 + $0xe4] ss:$8 sps:$4 sm:$0xff]   ;;  %v4313_v62 = vld [vmem:[%s6284_s1 + $0xf4] ss:$8 sps:$4 sm:$0xff]   ;;  %v4317_v0 = vld [vmem:[%s6284_s1 + $0xf0] ss:$8 sps:$4 sm:$0xff]  }
  0x16   :  { %v4309_v59 = vld [vmem:[%s6284_s1 + $0x4e4] ss:$8 sps:$4 sm:$0xff]   ;;  %v4315_v63 = vld [vmem:[%s6284_s1 + $0x4f4] ss:$8 sps:$4 sm:$0xff]   ;;  %v4318_v1 = vld [vmem:[%s6284_s1 + $0x4f0] ss:$8 sps:$4 sm:$0xff]  }
  0x17   :  { %2473 = vmatpush1.bf16.msra.mxu1 %v4257_v22  ;;  %v4324_v2 = vld [vmem:[%s6284_s1 + $0x104] ss:$8 sps:$4 sm:$0xff]   ;;  %v4319_v3 = vld [vmem:[%s6285_s0] ss:$72 sps:$4 sm:$0xff]   ;;  %v4333_v8 = vld [vmem:[%s6284_s1 + $0x114] ss:$8 sps:$4 sm:$0xff]  }
  0x18   :  { %2877 = vmatpush1.bf16.msra.mxu0 %v4258_v23  ;;  %2474 = vmatprep.subr.bf16.mxu1 %v4259_v24  ;;  %v4330_v4 = vld [vmem:[%s6284_s1 + $0x504] ss:$8 sps:$4 sm:$0xff]   ;;  %v4322_v5 = vld [vmem:[%s6284_s1 + $0x100] ss:$8 sps:$4 sm:$0xff]   ;;  %v4336_v9 = vld [vmem:[%s6284_s1 + $0x514] ss:$8 sps:$4 sm:$0xff]  }
  0x19   :  { %2878 = vmatprep.subr.bf16.mxu0 %v4261_v25  ;;  %v4325_v6 = vld [vmem:[%s6285_s0 + $0x20] ss:$72 sps:$4 sm:$0xff]   ;;  %v4349_v10 = vld [vmem:[%s6285_s0 + $0x94] ss:$72 sps:$4 sm:$0xff]   ;;  %v4331_v12 = vld [vmem:[%s6284_s1 + $0x110] ss:$8 sps:$4 sm:$0xff]  }
  0x1a   :  { %v4328_v7 = vld [vmem:[%s6284_s1 + $0x500] ss:$8 sps:$4 sm:$0xff]   ;;  %v4354_v11 = vld [vmem:[%s6285_s0 + $0xb4] ss:$72 sps:$4 sm:$0xff]   ;;  %v4334_v13 = vld [vmem:[%s6284_s1 + $0x510] ss:$8 sps:$4 sm:$0xff]  }
  0x1b   :  { %2475 = vmatpush1.bf16.msra.mxu1 %v4263_v26  ;;  %v4339_v14 = vld [vmem:[%s6284_s1 + $0x124] ss:$8 sps:$4 sm:$0xff]   ;;  %v4337_v16 = vld [vmem:[%s6284_s1 + $0x120] ss:$8 sps:$4 sm:$0xff]   ;;  %v4345_v18 = vld [vmem:[%s6284_s1 + $0x134] ss:$8 sps:$4 sm:$0xff]  }
  0x1c   :  { %2879 = vmatpush1.bf16.msra.mxu0 %v4264_v27  ;;  %2476 = vmatprep.subr.bf16.mxu1 %v4265_v28  ;;  %v4342_v15 = vld [vmem:[%s6284_s1 + $0x524] ss:$8 sps:$4 sm:$0xff]   ;;  %v4340_v17 = vld [vmem:[%s6284_s1 + $0x520] ss:$8 sps:$4 sm:$0xff]   ;;  %v4359_v19 = vld [vmem:[%s6285_s0 + $0x90] ss:$72 sps:$4 sm:$0xff]  }
  0x1d   :  { %2880 = vmatprep.subr.bf16.mxu0 %v4267_v29  ;;  %v4360_v20 = vld [vmem:[%s6285_s0 + $0xb0] ss:$72 sps:$4 sm:$0xff]   ;;  %v4348_v21 = vld [vmem:[%s6284_s1 + $0x534] ss:$8 sps:$4 sm:$0xff]   ;;  %v4367_v22 = vld [vmem:[%s6285_s0 + $0x124] ss:$72 sps:$4 sm:$0xff]  }
  0x1e   :  { %v4372_v23 = vld [vmem:[%s6285_s0 + $0x144] ss:$72 sps:$4 sm:$0xff]   ;;  %v4343_v24 = vld [vmem:[%s6284_s1 + $0x130] ss:$8 sps:$4 sm:$0xff]   ;;  %v4351_v28 = vld [vmem:[%s6284_s1 + $0x140] ss:$8 sps:$4 sm:$0xff]  }
  0x1f   :  { %2477 = vmatpush1.bf16.msra.mxu1 %v4269_v30  ;;  %v4346_v25 = vld [vmem:[%s6284_s1 + $0x530] ss:$8 sps:$4 sm:$0xff]   ;;  %v4353_v26 = vld [vmem:[%s6284_s1 + $0x144] ss:$8 sps:$4 sm:$0xff]   ;;  %v4356_v29 = vld [vmem:[%s6284_s1 + $0x540] ss:$8 sps:$4 sm:$0xff]  }
  0x20   :  { %2881 = vmatpush1.bf16.msra.mxu0 %v4270_v31  ;;  %2478 = vmatprep.subr.bf16.mxu1 %v4271_v32  ;;  %v4358_v27 = vld [vmem:[%s6284_s1 + $0x544] ss:$8 sps:$4 sm:$0xff]   ;;  %v4363_v30 = vld [vmem:[%s6284_s1 + $0x154] ss:$8 sps:$4 sm:$0xff]   ;;  %v4377_v31 = vld [vmem:[%s6285_s0 + $0x120] ss:$72 sps:$4 sm:$0xff]  }
  0x21   :  { %2882 = vmatprep.subr.bf16.mxu0 %v4273_v33  ;;  %v4378_v32 = vld [vmem:[%s6285_s0 + $0x140] ss:$72 sps:$4 sm:$0xff]   ;;  %v4366_v33 = vld [vmem:[%s6284_s1 + $0x554] ss:$8 sps:$4 sm:$0xff]   ;;  %v4379_v48 = vld [vmem:[%s6284_s1 + $0x170] ss:$8 sps:$4 sm:$0xff]  }
  0x22   :  { %v4394_v51 = vld [vmem:[%s6284_s1 + $0x584] ss:$8 sps:$4 sm:$0xff]  }
  0x23   :  { %2479 = vmatpush1.bf16.msra.mxu1 %v4275_v34  ;;  %v4385_v34 = vld [vmem:[%s6285_s0 + $0x1b4] ss:$72 sps:$4 sm:$0xff]  }
  0x24   :  { %2883 = vmatpush1.bf16.msra.mxu0 %v4276_v35  ;;  %2480 = vmatprep.subr.bf16.mxu1 %v4277_v36  ;;  %v4390_v35 = vld [vmem:[%s6285_s0 + $0x1d4] ss:$72 sps:$4 sm:$0xff]   ;;  %v4361_v36 = vld [vmem:[%s6284_s1 + $0x150] ss:$8 sps:$4 sm:$0xff]  }
  0x25   :  { %2884 = vmatprep.subr.bf16.mxu0 %v4279_v37  ;;  %v4364_v37 = vld [vmem:[%s6284_s1 + $0x550] ss:$8 sps:$4 sm:$0xff]  }
  0x27   :  { %2481 = vmatpush1.bf16.msra.mxu1 %v4281_v38  ;;  %v4371_v38 = vld [vmem:[%s6284_s1 + $0x164] ss:$8 sps:$4 sm:$0xff]  }
  0x28   :  { %2885 = vmatpush1.bf16.msra.mxu0 %v4282_v39  ;;  %2482 = vmatprep.subr.bf16.mxu1 %v4283_v40  ;;  %v4376_v39 = vld [vmem:[%s6284_s1 + $0x564] ss:$8 sps:$4 sm:$0xff]   ;;  %v4369_v40 = vld [vmem:[%s6284_s1 + $0x160] ss:$8 sps:$4 sm:$0xff]  }
  0x29   :  { %2886 = vmatprep.subr.bf16.mxu0 %v4285_v41  ;;  %v4374_v41 = vld [vmem:[%s6284_s1 + $0x560] ss:$8 sps:$4 sm:$0xff]  }
  0x2b   :  { %2483 = vmatpush1.bf16.msra.mxu1 %v4287_v42  ;;  %v4381_v42 = vld [vmem:[%s6284_s1 + $0x174] ss:$8 sps:$4 sm:$0xff]  }
  0x2c   :  { %2887 = vmatpush1.bf16.msra.mxu0 %v4288_v43  ;;  %2484 = vmatprep.subr.bf16.mxu1 %v4289_v44  ;;  %v4395_v43 = vld [vmem:[%s6285_s0 + $0x1b0] ss:$72 sps:$4 sm:$0xff]  }
  0x2d   :  { %2888 = vmatprep.subr.bf16.mxu0 %v4291_v45  ;;  %v4396_v44 = vld [vmem:[%s6285_s0 + $0x1d0] ss:$72 sps:$4 sm:$0xff]   ;;  %v4384_v45 = vld [vmem:[%s6284_s1 + $0x574] ss:$8 sps:$4 sm:$0xff]  }
  0x2f   :  { %2485 = vmatpush1.bf16.msra.mxu1 %v4293_v46  ;;  %v4403_v46 = vld [vmem:[%s6285_s0 + $0x244] ss:$72 sps:$4 sm:$0xff]  }
  0x30   :  { %2889 = vmatpush1.bf16.msra.mxu0 %v4294_v47  ;;  %2486 = vmatprep.subr.bf16.mxu1 %v4295_v49  ;;  %v4408_v47 = vld [vmem:[%s6285_s0 + $0x264] ss:$72 sps:$4 sm:$0xff]   ;;  %v4382_v49 = vld [vmem:[%s6284_s1 + $0x570] ss:$8 sps:$4 sm:$0xff]  }
  0x31   :  { %2890 = vmatprep.subr.bf16.mxu0 %v4297_v50  ;;  %v4389_v50 = vld [vmem:[%s6284_s1 + $0x184] ss:$8 sps:$4 sm:$0xff]  }
  0x33   :  { %2487 = vmatpush1.bf16.msra.mxu1 %v4299_v52  ;;  %v4387_v52 = vld [vmem:[%s6284_s1 + $0x180] ss:$8 sps:$4 sm:$0xff]  }
  0x34   :  { %2891 = vmatpush1.bf16.msra.mxu0 %v4300_v53  ;;  %2488 = vmatprep.subr.bf16.mxu1 %v4301_v54  ;;  %v4413_v53 = vld [vmem:[%s6285_s0 + $0x240] ss:$72 sps:$4 sm:$0xff]  }
  0x35   :  { %2892 = vmatprep.subr.bf16.mxu0 %v4303_v55  ;;  %v4414_v54 = vld [vmem:[%s6285_s0 + $0x260] ss:$72 sps:$4 sm:$0xff]  }
  0x36   :  { %v4392_v55 = vld [vmem:[%s6284_s1 + $0x580] ss:$8 sps:$4 sm:$0xff]  }
  0x37   :  { %2489 = vmatpush1.bf16.msra.mxu1 %v4305_v56  ;;  %v4399_v56 = vld [vmem:[%s6284_s1 + $0x194] ss:$8 sps:$4 sm:$0xff]  }
  0x38   :  { %2893 = vmatpush1.bf16.msra.mxu0 %v4306_v57  ;;  %2490 = vmatprep.subr.bf16.mxu1 %v4307_v58  ;;  %v4402_v57 = vld [vmem:[%s6284_s1 + $0x594] ss:$8 sps:$4 sm:$0xff]  }
  0x39   :  { %2894 = vmatprep.subr.bf16.mxu0 %v4309_v59  ;;  %v4421_v58 = vld [vmem:[%s6285_s0 + $0x2d4] ss:$72 sps:$4 sm:$0xff]   ;;  %v4397_v59 = vld [vmem:[%s6284_s1 + $0x190] ss:$8 sps:$4 sm:$0xff]  }
  0x3b   :  { %2491 = vmatpush1.bf16.msra.mxu1 %v4311_v60  ;;  %v4426_v60 = vld [vmem:[%s6285_s0 + $0x2f4] ss:$72 sps:$4 sm:$0xff]  }
  0x3c   :  { %2895 = vmatpush1.bf16.msra.mxu0 %v4312_v61  ;;  %2492 = vmatprep.subr.bf16.mxu1 %v4313_v62  ;;  %v4400_v61 = vld [vmem:[%s6284_s1 + $0x590] ss:$8 sps:$4 sm:$0xff]   ;;  %v4407_v62 = vld [vmem:[%s6284_s1 + $0x1a4] ss:$8 sps:$4 sm:$0xff]  }
  0x3d   :  { %2896 = vmatprep.subr.bf16.mxu0 %v4315_v63  ;;  %v4412_v63 = vld [vmem:[%s6284_s1 + $0x5a4] ss:$8 sps:$4 sm:$0xff]  }
  0x3f   :  { %2493 = vmatpush1.bf16.msra.mxu1 %v4317_v0  ;;  %v4431_v0 = vld [vmem:[%s6285_s0 + $0x2d0] ss:$72 sps:$4 sm:$0xff]  }
  0x40   :  { %2897 = vmatpush1.bf16.msra.mxu0 %v4318_v1  ;;  %2563 = vmatprep.subr.bf16.mxu1 %v4324_v2  ;;  %v4432_v1 = vld [vmem:[%s6285_s0 + $0x2f0] ss:$72 sps:$4 sm:$0xff]   ;;  %v122_v2 = vld [vmem:[%s6285_s0 + $0x360] sm:$0xff] }
  0x41   :  { %2967 = vmatprep.subr.bf16.mxu0 %v4330_v4  ;;  %v4405_v4 = vld [vmem:[%s6284_s1 + $0x1a0] ss:$8 sps:$4 sm:$0xff]  }
  0x42   :  { %2495 = vmatmul.mubr.bf16.vlgmr.msra.gmra.mrb[0].mxu1 %v4319_v3  ;;  %v126_v3 = vld [vmem:[%s6285_s0 + $0x380] sm:$0xff] }
  0x43   :  { %2899 = vmatmul.mubr.bf16.vlgmr.msra.gmra.mrb[0].mxu0 %v4325_v6  ;;  %2564 = vmatpush1.bf16.msra.mxu1 %v4322_v5  ;;  %v4410_v5 = vld [vmem:[%s6284_s1 + $0x5a0] ss:$8 sps:$4 sm:$0xff]   ;;  %v4417_v6 = vld [vmem:[%s6284_s1 + $0x1b4] ss:$8 sps:$4 sm:$0xff]  }
  0x44   :  { %2968 = vmatpush1.bf16.msra.mxu0 %v4328_v7  ;;  %2565 = vmatprep.subr.bf16.mxu1 %v4333_v8  ;;  %v4420_v7 = vld [vmem:[%s6284_s1 + $0x5b4] ss:$8 sps:$4 sm:$0xff]   ;;  %v3664_v8 = vcombine.high %v122_v2, %v122_v2 }
  0x45   :  { %2969 = vmatprep.subr.bf16.mxu0 %v4336_v9  ;;  %2504 = vmatprep.mubr.bf16.mxu1 %v4349_v10  ;;  %v3672_v9 = vcombine.high %v126_v3, %v126_v3  ;;  %v4415_v10 = vld [vmem:[%s6284_s1 + $0x1b0] ss:$8 sps:$4 sm:$0xff]  }
  0x46   :  { %2908 = vmatprep.mubr.bf16.mxu0 %v4354_v11  ;;  %v4418_v11 = vld [vmem:[%s6284_s1 + $0x5b0] ss:$8 sps:$4 sm:$0xff]  }
  0x47   :  { %2566 = vmatpush1.bf16.msra.mxu1 %v4331_v12  ;;  %v4425_v12 = vld [vmem:[%s6284_s1 + $0x1c4] ss:$8 sps:$4 sm:$0xff]  }
  0x48   :  { %2970 = vmatpush1.bf16.msra.mxu0 %v4334_v13  ;;  %2567 = vmatprep.subr.bf16.mxu1 %v4339_v14  ;;  %v4430_v13 = vld [vmem:[%s6284_s1 + $0x5c4] ss:$8 sps:$4 sm:$0xff]   ;;  %v4423_v14 = vld [vmem:[%s6284_s1 + $0x1c0] ss:$8 sps:$4 sm:$0xff]  }
  0x49   :  { %2971 = vmatprep.subr.bf16.mxu0 %v4342_v15  ;;  %v3663_v15 = vcombine.low %v122_v2, %v122_v2  ;;  %v4497_v2 = vld [vmem:[%s6284_s1 + $0x250] ss:$8 sps:$4 sm:$0xff]  }
  0x4a   :  { %2505 = vmatmul.mubr.bf16.gmra.mrb[4].mxu1 %v4359_v19  ;;  %v4438_v19 = vld [vmem:[%s6284_s1 + $0x5d4] ss:$8 sps:$4 sm:$0xff]  }
  0x4b   :  { %2909 = vmatmul.mubr.bf16.gmra.mrb[4].mxu0 %v4360_v20  ;;  %2568 = vmatpush1.bf16.msra.mxu1 %v4337_v16  ;;  %v3671_v16 = vcombine.low %v126_v3, %v126_v3  ;;  %v4457_v20 = vld [vmem:[%s6285_s0 + $0xc] ss:$72 sps:$4 sm:$0xff]   ;;  %v4500_v3 = vld [vmem:[%s6284_s1 + $0x650] ss:$8 sps:$4 sm:$0xff]  }
  0x4c   :  { %2972 = vmatpush1.bf16.msra.mxu0 %v4340_v17  ;;  %2569 = vmatprep.subr.bf16.mxu1 %v4345_v18  ;;  %v4428_v17 = vld [vmem:[%s6284_s1 + $0x5c0] ss:$8 sps:$4 sm:$0xff]   ;;  %v4435_v18 = vld [vmem:[%s6284_s1 + $0x1d4] ss:$8 sps:$4 sm:$0xff]  }
  0x4d   :  { %2973 = vmatprep.subr.bf16.mxu0 %v4348_v21  ;;  %2514 = vmatprep.mubr.bf16.mxu1 %v4367_v22  ;;  %v4463_v21 = vld [vmem:[%s6285_s0 + $0x2c] ss:$72 sps:$4 sm:$0xff]   ;;  %v4433_v22 = vld [vmem:[%s6284_s1 + $0x1d0] ss:$8 sps:$4 sm:$0xff]  }
  0x4e   :  { %2918 = vmatprep.mubr.bf16.mxu0 %v4372_v23  ;;  %v4436_v23 = vld [vmem:[%s6284_s1 + $0x5d0] ss:$8 sps:$4 sm:$0xff]  }
  0x4f   :  { %2570 = vmatpush1.bf16.msra.mxu1 %v4343_v24  ;;  %v4442_v24 = vld [vmem:[%s6284_s1 + $0x1e4] ss:$8 sps:$4 sm:$0xff]  }
  0x50   :  { %2974 = vmatpush1.bf16.msra.mxu0 %v4346_v25  ;;  %2571 = vmatprep.subr.bf16.mxu1 %v4353_v26  ;;  %v4446_v25 = vld [vmem:[%s6284_s1 + $0x5e4] ss:$8 sps:$4 sm:$0xff]   ;;  %v4440_v26 = vld [vmem:[%s6284_s1 + $0x1e0] ss:$8 sps:$4 sm:$0xff]  }
  0x51   :  { %2975 = vmatprep.subr.bf16.mxu0 %v4358_v27  ;;  %v4444_v27 = vld [vmem:[%s6284_s1 + $0x5e0] ss:$8 sps:$4 sm:$0xff]  }
  0x52   :  { %2515 = vmatmul.mubr.bf16.gmra.mrb[8].mxu1 %v4377_v31  ;;  %v4452_v31 = vld [vmem:[%s6284_s1 + $0x5f0] ss:$8 sps:$4 sm:$0xff]  }
  0x53   :  { %2919 = vmatmul.mubr.bf16.gmra.mrb[8].mxu0 %v4378_v32  ;;  %2572 = vmatpush1.bf16.msra.mxu1 %v4351_v28  ;;  %v4451_v28 = vld [vmem:[%s6284_s1 + $0x1f4] ss:$8 sps:$4 sm:$0xff]   ;;  %v4460_v32 = vld [vmem:[%s6284_s1 + $0x204] ss:$8 sps:$4 sm:$0xff]  }
  0x54   :  { %2976 = vmatpush1.bf16.msra.mxu0 %v4356_v29  ;;  %2573 = vmatprep.subr.bf16.mxu1 %v4363_v30  ;;  %v4454_v29 = vld [vmem:[%s6284_s1 + $0x5f4] ss:$8 sps:$4 sm:$0xff]   ;;  %v4449_v30 = vld [vmem:[%s6284_s1 + $0x1f0] ss:$8 sps:$4 sm:$0xff]  }
  0x55   :  { %2977 = vmatprep.subr.bf16.mxu0 %v4366_v33  ;;  %2524 = vmatprep.mubr.bf16.mxu1 %v4385_v34  ;;  %v4466_v33 = vld [vmem:[%s6284_s1 + $0x604] ss:$8 sps:$4 sm:$0xff]   ;;  %v4455_v34 = vld [vmem:[%s6285_s0 + $0x8] ss:$72 sps:$4 sm:$0xff]  }
  0x56   :  { %2928 = vmatprep.mubr.bf16.mxu0 %v4390_v35  ;;  %v4458_v35 = vld [vmem:[%s6284_s1 + $0x200] ss:$8 sps:$4 sm:$0xff]  }
  0x57   :  { %2574 = vmatpush1.bf16.msra.mxu1 %v4361_v36  ;;  %v4461_v36 = vld [vmem:[%s6285_s0 + $0x28] ss:$72 sps:$4 sm:$0xff]  }
  0x58   :  { %2978 = vmatpush1.bf16.msra.mxu0 %v4364_v37  ;;  %2575 = vmatprep.subr.bf16.mxu1 %v4371_v38  ;;  %v4464_v37 = vld [vmem:[%s6284_s1 + $0x600] ss:$8 sps:$4 sm:$0xff]   ;;  %v4469_v38 = vld [vmem:[%s6284_s1 + $0x214] ss:$8 sps:$4 sm:$0xff]  }
  0x59   :  { %2979 = vmatprep.subr.bf16.mxu0 %v4376_v39  ;;  %v4472_v39 = vld [vmem:[%s6284_s1 + $0x614] ss:$8 sps:$4 sm:$0xff]  }
  0x5a   :  { %2525 = vmatmul.mubr.bf16.gmra.mrb[12].mxu1 %v4395_v43  ;;  %v4470_v43 = vld [vmem:[%s6284_s1 + $0x610] ss:$8 sps:$4 sm:$0xff]  }
  0x5b   :  { %2929 = vmatmul.mubr.bf16.gmra.mrb[12].mxu0 %v4396_v44  ;;  %2576 = vmatpush1.bf16.msra.mxu1 %v4369_v40  ;;  %v4485_v40 = vld [vmem:[%s6285_s0 + $0x9c] ss:$72 sps:$4 sm:$0xff]  }
  0x5c   :  { %2980 = vmatpush1.bf16.msra.mxu0 %v4374_v41  ;;  %2577 = vmatprep.subr.bf16.mxu1 %v4381_v42  ;;  %v4490_v41 = vld [vmem:[%s6285_s0 + $0xbc] ss:$72 sps:$4 sm:$0xff]   ;;  %v4467_v42 = vld [vmem:[%s6284_s1 + $0x210] ss:$8 sps:$4 sm:$0xff]  }
  0x5d   :  { %2981 = vmatprep.subr.bf16.mxu0 %v4384_v45  ;;  %2534 = vmatprep.mubr.bf16.mxu1 %v4403_v46  ;;  %v4475_v44 = vld [vmem:[%s6284_s1 + $0x224] ss:$8 sps:$4 sm:$0xff]   ;;  %v4473_v46 = vld [vmem:[%s6284_s1 + $0x220] ss:$8 sps:$4 sm:$0xff]  }
  0x5e   :  { %2938 = vmatprep.mubr.bf16.mxu0 %v4408_v47  ;;  %v4478_v45 = vld [vmem:[%s6284_s1 + $0x624] ss:$8 sps:$4 sm:$0xff]   ;;  %v4495_v47 = vld [vmem:[%s6285_s0 + $0x98] ss:$72 sps:$4 sm:$0xff]  }
  0x5f   :  { %2578 = vmatpush1.bf16.msra.mxu1 %v4379_v48  ;;  %v4496_v48 = vld [vmem:[%s6285_s0 + $0xb8] ss:$72 sps:$4 sm:$0xff]  }
  0x60   :  { %2982 = vmatpush1.bf16.msra.mxu0 %v4382_v49  ;;  %2579 = vmatprep.subr.bf16.mxu1 %v4389_v50  ;;  %v4476_v49 = vld [vmem:[%s6284_s1 + $0x620] ss:$8 sps:$4 sm:$0xff]   ;;  %v4481_v50 = vld [vmem:[%s6284_s1 + $0x234] ss:$8 sps:$4 sm:$0xff]  }
  0x61   :  { %2983 = vmatprep.subr.bf16.mxu0 %v4394_v51  ;;  %v4484_v51 = vld [vmem:[%s6284_s1 + $0x634] ss:$8 sps:$4 sm:$0xff]  }
  0x62   :  { %2535 = vmatmul.mubr.bf16.gmra.mrb[16].mxu1 %v4413_v53  ;;  %v4508_v53 = vld [vmem:[%s6285_s0 + $0x14c] ss:$72 sps:$4 sm:$0xff]  }
  0x63   :  { %2939 = vmatmul.mubr.bf16.gmra.mrb[16].mxu0 %v4414_v54  ;;  %2580 = vmatpush1.bf16.msra.mxu1 %v4387_v52  ;;  %v4503_v52 = vld [vmem:[%s6285_s0 + $0x12c] ss:$72 sps:$4 sm:$0xff]   ;;  %v4479_v54 = vld [vmem:[%s6284_s1 + $0x230] ss:$8 sps:$4 sm:$0xff]  }
  0x64   :  { %2984 = vmatpush1.bf16.msra.mxu0 %v4392_v55  ;;  %2581 = vmatprep.subr.bf16.mxu1 %v4399_v56  ;;  %v4482_v55 = vld [vmem:[%s6284_s1 + $0x630] ss:$8 sps:$4 sm:$0xff]   ;;  %v4489_v56 = vld [vmem:[%s6284_s1 + $0x244] ss:$8 sps:$4 sm:$0xff]  }
  0x65   :  { %2985 = vmatprep.subr.bf16.mxu0 %v4402_v57  ;;  %2544 = vmatprep.mubr.bf16.mxu1 %v4421_v58  ;;  %v4494_v57 = vld [vmem:[%s6284_s1 + $0x644] ss:$8 sps:$4 sm:$0xff]   ;;  %v4487_v58 = vld [vmem:[%s6284_s1 + $0x240] ss:$8 sps:$4 sm:$0xff]  }
  0x66   :  { %2948 = vmatprep.mubr.bf16.mxu0 %v4426_v60  ;;  %v4514_v60 = vld [vmem:[%s6285_s0 + $0x148] ss:$72 sps:$4 sm:$0xff]  }
  0x67   :  { %2582 = vmatpush1.bf16.msra.mxu1 %v4397_v59  ;;  %v4513_v59 = vld [vmem:[%s6285_s0 + $0x128] ss:$72 sps:$4 sm:$0xff]  }
  0x68   :  { %2986 = vmatpush1.bf16.msra.mxu0 %v4400_v61  ;;  %2583 = vmatprep.subr.bf16.mxu1 %v4407_v62  ;;  %v4492_v61 = vld [vmem:[%s6284_s1 + $0x640] ss:$8 sps:$4 sm:$0xff]   ;;  %v4499_v62 = vld [vmem:[%s6284_s1 + $0x254] ss:$8 sps:$4 sm:$0xff]  }
  0x69   :  { %2987 = vmatprep.subr.bf16.mxu0 %v4412_v63  ;;  %v4502_v63 = vld [vmem:[%s6284_s1 + $0x654] ss:$8 sps:$4 sm:$0xff]  }
  0x6a   :  { %2545 = vmatmul.mubr.bf16.gmra.mrb[20].mxu1 %v4431_v0  ;;  %v4521_v0 = vld [vmem:[%s6285_s0 + $0x1bc] ss:$72 sps:$4 sm:$0xff]  }
  0x6b   :  { %2949 = vmatmul.mubr.bf16.gmra.mrb[20].mxu0 %v4432_v1  ;;  %2584 = vmatpush1.bf16.msra.mxu1 %v4405_v4  ;;  %v4526_v1 = vld [vmem:[%s6285_s0 + $0x1dc] ss:$72 sps:$4 sm:$0xff]  }
  0x6c   :  { %2988 = vmatpush1.bf16.msra.mxu0 %v4410_v5  ;;  %2585 = vmatprep.subr.bf16.mxu1 %v4417_v6  ;;  %v4507_v4 = vld [vmem:[%s6284_s1 + $0x264] ss:$8 sps:$4 sm:$0xff]   ;;  %v4505_v6 = vld [vmem:[%s6284_s1 + $0x260] ss:$8 sps:$4 sm:$0xff]  }
  0x6d   :  { %2989 = vmatprep.subr.bf16.mxu0 %v4420_v7  ;;  %2554 = vmatprep.mubr.bf16.mxu1 %v3664_v8  ;;  %v4512_v5 = vld [vmem:[%s6284_s1 + $0x664] ss:$8 sps:$4 sm:$0xff]   ;;  %v4531_v7 = vld [vmem:[%s6285_s0 + $0x1b8] ss:$72 sps:$4 sm:$0xff]  }
  0x6e   :  { %2958 = vmatprep.mubr.bf16.mxu0 %v3672_v9  ;;  %v4532_v8 = vld [vmem:[%s6285_s0 + $0x1d8] ss:$72 sps:$4 sm:$0xff]  }
  0x6f   :  { %2586 = vmatpush1.bf16.msra.mxu1 %v4415_v10  ;;  %v4510_v9 = vld [vmem:[%s6284_s1 + $0x660] ss:$8 sps:$4 sm:$0xff]   ;;  %v4517_v10 = vld [vmem:[%s6284_s1 + $0x274] ss:$8 sps:$4 sm:$0xff]  }
  0x70   :  { %2990 = vmatpush1.bf16.msra.mxu0 %v4418_v11  ;;  %2587 = vmatprep.subr.bf16.mxu1 %v4425_v12  ;;  %v4520_v11 = vld [vmem:[%s6284_s1 + $0x674] ss:$8 sps:$4 sm:$0xff]  }
  0x71   :  { %2991 = vmatprep.subr.bf16.mxu0 %v4430_v13  ;;  %v4539_v12 = vld [vmem:[%s6285_s0 + $0x24c] ss:$72 sps:$4 sm:$0xff]  }
  0x72   :  { %2555 = vmatmul.mubr.bf16.gmra.mrb[24].mxu1 %v3663_v15  ;;  %v4544_v13 = vld [vmem:[%s6285_s0 + $0x26c] ss:$72 sps:$4 sm:$0xff]   ;;  %v4518_v15 = vld [vmem:[%s6284_s1 + $0x670] ss:$8 sps:$4 sm:$0xff]  }
  0x73   :  { %2959 = vmatmul.mubr.bf16.gmra.mrb[24].mxu0 %v3671_v16  ;;  %2588 = vmatpush1.bf16.msra.mxu1 %v4423_v14  ;;  %v4515_v14 = vld [vmem:[%s6284_s1 + $0x270] ss:$8 sps:$4 sm:$0xff]   ;;  %v4525_v16 = vld [vmem:[%s6284_s1 + $0x284] ss:$8 sps:$4 sm:$0xff]  }
  0x74   :  { %2992 = vmatpush1.bf16.msra.mxu0 %v4428_v17  ;;  %2589 = vmatprep.subr.bf16.mxu1 %v4435_v18  ;;  %v4530_v17 = vld [vmem:[%s6284_s1 + $0x684] ss:$8 sps:$4 sm:$0xff]   ;;  %v4523_v18 = vld [vmem:[%s6284_s1 + $0x280] ss:$8 sps:$4 sm:$0xff]  }
  0x75   :  { %2993 = vmatprep.subr.bf16.mxu0 %v4438_v19  ;;  %2595 = vmatprep.mubr.bf16.mxu1 %v4457_v20  ;;  %v4528_v19 = vld [vmem:[%s6284_s1 + $0x680] ss:$8 sps:$4 sm:$0xff]  }
  0x76   :  { %2999 = vmatprep.mubr.bf16.mxu0 %v4463_v21  ;;  %v4549_v20 = vld [vmem:[%s6285_s0 + $0x248] ss:$72 sps:$4 sm:$0xff]  }
  0x77   :  { %2590 = vmatpush1.bf16.msra.mxu1 %v4433_v22  ;;  %v4550_v21 = vld [vmem:[%s6285_s0 + $0x268] ss:$72 sps:$4 sm:$0xff]   ;;  %v4535_v22 = vld [vmem:[%s6284_s1 + $0x294] ss:$8 sps:$4 sm:$0xff]  }
  0x78   :  { %2994 = vmatpush1.bf16.msra.mxu0 %v4436_v23  ;;  %2591 = vmatprep.subr.bf16.mxu1 %v4442_v24  ;;  %v4538_v23 = vld [vmem:[%s6284_s1 + $0x694] ss:$8 sps:$4 sm:$0xff]  }
  0x79   :  { %2995 = vmatprep.subr.bf16.mxu0 %v4446_v25  ;;  %v4557_v24 = vld [vmem:[%s6285_s0 + $0x2dc] ss:$72 sps:$4 sm:$0xff]  }
  0x7a   :  { %v4562_v25 = vld [vmem:[%s6285_s0 + $0x2fc] ss:$72 sps:$4 sm:$0xff]  }
  0x7b   :  { %2592 = vmatpush1.bf16.msra.mxu1 %v4440_v26  ;;  %v4533_v26 = vld [vmem:[%s6284_s1 + $0x290] ss:$8 sps:$4 sm:$0xff]  }
  0x7c   :  { %2996 = vmatpush1.bf16.msra.mxu0 %v4444_v27  ;;  %2593 = vmatprep.subr.bf16.mxu1 %v4451_v28  ;;  %v4536_v27 = vld [vmem:[%s6284_s1 + $0x690] ss:$8 sps:$4 sm:$0xff]   ;;  %v4543_v28 = vld [vmem:[%s6284_s1 + $0x2a4] ss:$8 sps:$4 sm:$0xff]  }
  0x7d   :  { %2997 = vmatprep.subr.bf16.mxu0 %v4454_v29  ;;  %v4548_v29 = vld [vmem:[%s6284_s1 + $0x6a4] ss:$8 sps:$4 sm:$0xff]  }
  0x7f   :  { %2594 = vmatpush1.bf16.msra.mxu1 %v4449_v30  ;;  %v4541_v30 = vld [vmem:[%s6284_s1 + $0x2a0] ss:$8 sps:$4 sm:$0xff]  }
  0x80   :  { %2998 = vmatpush1.bf16.msra.mxu0 %v4452_v31  ;;  %2664 = vmatprep.subr.bf16.mxu1 %v4460_v32  ;;  %v4546_v31 = vld [vmem:[%s6284_s1 + $0x6a0] ss:$8 sps:$4 sm:$0xff]  }
  0x81   :  { %3068 = vmatprep.subr.bf16.mxu0 %v4466_v33  ;;  %v4567_v32 = vld [vmem:[%s6285_s0 + $0x2d8] ss:$72 sps:$4 sm:$0xff]  }
  0x82   :  { %2596 = vmatmul.mubr.bf16.vlgmr.msra.gmra.mrb[0].mxu1 %v4455_v34  ;;  %v4568_v33 = vld [vmem:[%s6285_s0 + $0x2f8] ss:$72 sps:$4 sm:$0xff]   ;;  %v123_v34 = vld [vmem:[%s6285_s0 + $0x368] sm:$0xff] }
  0x83   :  { %3000 = vmatmul.mubr.bf16.vlgmr.msra.gmra.mrb[0].mxu0 %v4461_v36  ;;  %2665 = vmatpush1.bf16.msra.mxu1 %v4458_v35  ;;  %v127_v35 = vld [vmem:[%s6285_s0 + $0x388] sm:$0xff]  ;;  %v4553_v36 = vld [vmem:[%s6284_s1 + $0x2b4] ss:$8 sps:$4 sm:$0xff]  }
  0x84   :  { %3069 = vmatpush1.bf16.msra.mxu0 %v4464_v37  ;;  %2666 = vmatprep.subr.bf16.mxu1 %v4469_v38  ;;  %v4556_v37 = vld [vmem:[%s6284_s1 + $0x6b4] ss:$8 sps:$4 sm:$0xff]   ;;  %v3666_v38 = vcombine.high %v123_v34, %v123_v34 }
  0x85   :  { %3070 = vmatprep.subr.bf16.mxu0 %v4472_v39  ;;  %2605 = vmatprep.mubr.bf16.mxu1 %v4485_v40  ;;  %v3674_v39 = vcombine.high %v127_v35, %v127_v35  ;;  %v4551_v40 = vld [vmem:[%s6284_s1 + $0x2b0] ss:$8 sps:$4 sm:$0xff]  }
  0x86   :  { %3009 = vmatprep.mubr.bf16.mxu0 %v4490_v41  ;;  %v4554_v41 = vld [vmem:[%s6284_s1 + $0x6b0] ss:$8 sps:$4 sm:$0xff]  }
  0x87   :  { %2667 = vmatpush1.bf16.msra.mxu1 %v4467_v42  ;;  %v4561_v42 = vld [vmem:[%s6284_s1 + $0x2c4] ss:$8 sps:$4 sm:$0xff]  }
  0x88   :  { %3071 = vmatpush1.bf16.msra.mxu0 %v4470_v43  ;;  %2668 = vmatprep.subr.bf16.mxu1 %v4475_v44  ;;  %v4566_v43 = vld [vmem:[%s6284_s1 + $0x6c4] ss:$8 sps:$4 sm:$0xff]   ;;  %v4559_v44 = vld [vmem:[%s6284_s1 + $0x2c0] ss:$8 sps:$4 sm:$0xff]  }
  0x89   :  { %3072 = vmatprep.subr.bf16.mxu0 %v4478_v45  ;;  %v3665_v45 = vcombine.low %v123_v34, %v123_v34  ;;  %v4646_v34 = vld [vmem:[%s6284_s1 + $0x364] ss:$8 sps:$4 sm:$0xff]  }
  0x8a   :  { %2606 = vmatmul.mubr.bf16.gmra.mrb[4].mxu1 %v4495_v47  ;;  %v4564_v47 = vld [vmem:[%s6284_s1 + $0x6c0] ss:$8 sps:$4 sm:$0xff]  }
  0x8b   :  { %3010 = vmatmul.mubr.bf16.gmra.mrb[4].mxu0 %v4496_v48  ;;  %2669 = vmatpush1.bf16.msra.mxu1 %v4473_v46  ;;  %v3673_v46 = vcombine.low %v127_v35, %v127_v35  ;;  %v4571_v48 = vld [vmem:[%s6284_s1 + $0x2d4] ss:$8 sps:$4 sm:$0xff]   ;;  %v4650_v35 = vld [vmem:[%s6284_s1 + $0x764] ss:$8 sps:$4 sm:$0xff]  }
  0x8c   :  { %3073 = vmatpush1.bf16.msra.mxu0 %v4476_v49  ;;  %2670 = vmatprep.subr.bf16.mxu1 %v4481_v50  ;;  %v4574_v49 = vld [vmem:[%s6284_s1 + $0x6d4] ss:$8 sps:$4 sm:$0xff]  }
  0x8d   :  { %3074 = vmatprep.subr.bf16.mxu0 %v4484_v51  ;;  %2615 = vmatprep.mubr.bf16.mxu1 %v4503_v52  ;;  %v4593_v50 = vld [vmem:[%s6285_s0 + $0x14] ss:$72 sps:$4 sm:$0xff]   ;;  %v4569_v52 = vld [vmem:[%s6284_s1 + $0x2d0] ss:$8 sps:$4 sm:$0xff]  }
  0x8e   :  { %3019 = vmatprep.mubr.bf16.mxu0 %v4508_v53  ;;  %v4599_v51 = vld [vmem:[%s6285_s0 + $0x34] ss:$72 sps:$4 sm:$0xff]   ;;  %v4572_v53 = vld [vmem:[%s6284_s1 + $0x6d0] ss:$8 sps:$4 sm:$0xff]  }
  0x8f   :  { %2671 = vmatpush1.bf16.msra.mxu1 %v4479_v54  ;;  %v4578_v54 = vld [vmem:[%s6284_s1 + $0x2e4] ss:$8 sps:$4 sm:$0xff]  }
  0x90   :  { %3075 = vmatpush1.bf16.msra.mxu0 %v4482_v55  ;;  %2672 = vmatprep.subr.bf16.mxu1 %v4489_v56  ;;  %v4582_v55 = vld [vmem:[%s6284_s1 + $0x6e4] ss:$8 sps:$4 sm:$0xff]   ;;  %v4576_v56 = vld [vmem:[%s6284_s1 + $0x2e0] ss:$8 sps:$4 sm:$0xff]  }
  0x91   :  { %3076 = vmatprep.subr.bf16.mxu0 %v4494_v57  ;;  %v4580_v57 = vld [vmem:[%s6284_s1 + $0x6e0] ss:$8 sps:$4 sm:$0xff]  }
  0x92   :  { %2616 = vmatmul.mubr.bf16.gmra.mrb[8].mxu1 %v4513_v59  ;;  %v4590_v59 = vld [vmem:[%s6284_s1 + $0x6f4] ss:$8 sps:$4 sm:$0xff]  }
  0x93   :  { %3020 = vmatmul.mubr.bf16.gmra.mrb[8].mxu0 %v4514_v60  ;;  %2673 = vmatpush1.bf16.msra.mxu1 %v4487_v58  ;;  %v4587_v58 = vld [vmem:[%s6284_s1 + $0x2f4] ss:$8 sps:$4 sm:$0xff]   ;;  %v4585_v60 = vld [vmem:[%s6284_s1 + $0x2f0] ss:$8 sps:$4 sm:$0xff]  }
  0x94   :  { %3077 = vmatpush1.bf16.msra.mxu0 %v4492_v61  ;;  %2674 = vmatprep.subr.bf16.mxu1 %v4499_v62  ;;  %v4588_v61 = vld [vmem:[%s6284_s1 + $0x6f0] ss:$8 sps:$4 sm:$0xff]   ;;  %v4596_v62 = vld [vmem:[%s6284_s1 + $0x304] ss:$8 sps:$4 sm:$0xff]  }
  0x95   :  { %3078 = vmatprep.subr.bf16.mxu0 %v4502_v63  ;;  %2625 = vmatprep.mubr.bf16.mxu1 %v4521_v0  ;;  %v4602_v63 = vld [vmem:[%s6284_s1 + $0x704] ss:$8 sps:$4 sm:$0xff]   ;;  %v4591_v0 = vld [vmem:[%s6285_s0 + $0x10] ss:$72 sps:$4 sm:$0xff]  }
  0x96   :  { %3029 = vmatprep.mubr.bf16.mxu0 %v4526_v1  ;;  %v4594_v1 = vld [vmem:[%s6284_s1 + $0x300] ss:$8 sps:$4 sm:$0xff]  }
  0x97   :  { %2675 = vmatpush1.bf16.msra.mxu1 %v4497_v2  ;;  %v4597_v2 = vld [vmem:[%s6285_s0 + $0x30] ss:$72 sps:$4 sm:$0xff]  }
  0x98   :  { %3079 = vmatpush1.bf16.msra.mxu0 %v4500_v3  ;;  %2676 = vmatprep.subr.bf16.mxu1 %v4507_v4  ;;  %v4600_v3 = vld [vmem:[%s6284_s1 + $0x700] ss:$8 sps:$4 sm:$0xff]   ;;  %v4605_v4 = vld [vmem:[%s6284_s1 + $0x314] ss:$8 sps:$4 sm:$0xff]  }
  0x99   :  { %3080 = vmatprep.subr.bf16.mxu0 %v4512_v5  ;;  %v4608_v5 = vld [vmem:[%s6284_s1 + $0x714] ss:$8 sps:$4 sm:$0xff]  }
  0x9a   :  { %2626 = vmatmul.mubr.bf16.gmra.mrb[12].mxu1 %v4531_v7  ;;  %v4623_v7 = vld [vmem:[%s6285_s0 + $0xc4] ss:$72 sps:$4 sm:$0xff]  }
  0x9b   :  { %3030 = vmatmul.mubr.bf16.gmra.mrb[12].mxu0 %v4532_v8  ;;  %2677 = vmatpush1.bf16.msra.mxu1 %v4505_v6  ;;  %v4621_v6 = vld [vmem:[%s6285_s0 + $0xa4] ss:$72 sps:$4 sm:$0xff]   ;;  %v4603_v8 = vld [vmem:[%s6284_s1 + $0x310] ss:$8 sps:$4 sm:$0xff]  }
  0x9c   :  { %3081 = vmatpush1.bf16.msra.mxu0 %v4510_v9  ;;  %2678 = vmatprep.subr.bf16.mxu1 %v4517_v10  ;;  %v4606_v9 = vld [vmem:[%s6284_s1 + $0x710] ss:$8 sps:$4 sm:$0xff]   ;;  %v4611_v10 = vld [vmem:[%s6284_s1 + $0x324] ss:$8 sps:$4 sm:$0xff]  }
  0x9d   :  { %3082 = vmatprep.subr.bf16.mxu0 %v4520_v11  ;;  %2635 = vmatprep.mubr.bf16.mxu1 %v4539_v12  ;;  %v4614_v11 = vld [vmem:[%s6284_s1 + $0x724] ss:$8 sps:$4 sm:$0xff]   ;;  %v4609_v12 = vld [vmem:[%s6284_s1 + $0x320] ss:$8 sps:$4 sm:$0xff]  }
  0x9e   :  { %3039 = vmatprep.mubr.bf16.mxu0 %v4544_v13  ;;  %v4625_v13 = vld [vmem:[%s6285_s0 + $0xa0] ss:$72 sps:$4 sm:$0xff]  }
  0x9f   :  { %2679 = vmatpush1.bf16.msra.mxu1 %v4515_v14  ;;  %v4629_v14 = vld [vmem:[%s6285_s0 + $0xc0] ss:$72 sps:$4 sm:$0xff]  }
  0xa0   :  { %3083 = vmatpush1.bf16.msra.mxu0 %v4518_v15  ;;  %2680 = vmatprep.subr.bf16.mxu1 %v4525_v16  ;;  %v4612_v15 = vld [vmem:[%s6284_s1 + $0x720] ss:$8 sps:$4 sm:$0xff]   ;;  %v4617_v16 = vld [vmem:[%s6284_s1 + $0x334] ss:$8 sps:$4 sm:$0xff]  }
  0xa1   :  { %3084 = vmatprep.subr.bf16.mxu0 %v4530_v17  ;;  %v4620_v17 = vld [vmem:[%s6284_s1 + $0x734] ss:$8 sps:$4 sm:$0xff]  }
  0xa2   :  { %2636 = vmatmul.mubr.bf16.gmra.mrb[16].mxu1 %v4549_v20  ;;  %v4615_v20 = vld [vmem:[%s6284_s1 + $0x330] ss:$8 sps:$4 sm:$0xff]  }
  0xa3   :  { %3040 = vmatmul.mubr.bf16.gmra.mrb[16].mxu0 %v4550_v21  ;;  %2681 = vmatpush1.bf16.msra.mxu1 %v4523_v18  ;;  %v4639_v18 = vld [vmem:[%s6285_s0 + $0x134] ss:$72 sps:$4 sm:$0xff]   ;;  %v4618_v21 = vld [vmem:[%s6284_s1 + $0x730] ss:$8 sps:$4 sm:$0xff]  }
  0xa4   :  { %3085 = vmatpush1.bf16.msra.mxu0 %v4528_v19  ;;  %2682 = vmatprep.subr.bf16.mxu1 %v4535_v22  ;;  %v4641_v19 = vld [vmem:[%s6285_s0 + $0x154] ss:$72 sps:$4 sm:$0xff]   ;;  %v4628_v22 = vld [vmem:[%s6284_s1 + $0x344] ss:$8 sps:$4 sm:$0xff]  }
  0xa5   :  { %3086 = vmatprep.subr.bf16.mxu0 %v4538_v23  ;;  %2645 = vmatprep.mubr.bf16.mxu1 %v4557_v24  ;;  %v4632_v23 = vld [vmem:[%s6284_s1 + $0x744] ss:$8 sps:$4 sm:$0xff]   ;;  %v4626_v24 = vld [vmem:[%s6284_s1 + $0x340] ss:$8 sps:$4 sm:$0xff]  }
  0xa6   :  { %3049 = vmatprep.mubr.bf16.mxu0 %v4562_v25  ;;  %v4643_v25 = vld [vmem:[%s6285_s0 + $0x130] ss:$72 sps:$4 sm:$0xff]  }
  0xa7   :  { %2683 = vmatpush1.bf16.msra.mxu1 %v4533_v26  ;;  %v4647_v26 = vld [vmem:[%s6285_s0 + $0x150] ss:$72 sps:$4 sm:$0xff]  }
  0xa8   :  { %3087 = vmatpush1.bf16.msra.mxu0 %v4536_v27  ;;  %2684 = vmatprep.subr.bf16.mxu1 %v4543_v28  ;;  %v4630_v27 = vld [vmem:[%s6284_s1 + $0x740] ss:$8 sps:$4 sm:$0xff]   ;;  %v4635_v28 = vld [vmem:[%s6284_s1 + $0x354] ss:$8 sps:$4 sm:$0xff]  }
  0xa9   :  { %3088 = vmatprep.subr.bf16.mxu0 %v4548_v29  ;;  %v4638_v29 = vld [vmem:[%s6284_s1 + $0x754] ss:$8 sps:$4 sm:$0xff]  }
  0xaa   :  { %2646 = vmatmul.mubr.bf16.gmra.mrb[20].mxu1 %v4567_v32  ;;  %v4633_v32 = vld [vmem:[%s6284_s1 + $0x350] ss:$8 sps:$4 sm:$0xff]  }
  0xab   :  { %3050 = vmatmul.mubr.bf16.gmra.mrb[20].mxu0 %v4568_v33  ;;  %2685 = vmatpush1.bf16.msra.mxu1 %v4541_v30  ;;  %v4657_v30 = vld [vmem:[%s6285_s0 + $0x1c4] ss:$72 sps:$4 sm:$0xff]   ;;  %v4636_v33 = vld [vmem:[%s6284_s1 + $0x750] ss:$8 sps:$4 sm:$0xff]  }
  0xac   :  { %3089 = vmatpush1.bf16.msra.mxu0 %v4546_v31  ;;  %2686 = vmatprep.subr.bf16.mxu1 %v4553_v36  ;;  %v4659_v31 = vld [vmem:[%s6285_s0 + $0x1e4] ss:$72 sps:$4 sm:$0xff]   ;;  %v4644_v36 = vld [vmem:[%s6284_s1 + $0x360] ss:$8 sps:$4 sm:$0xff]  }
  0xad   :  { %3090 = vmatprep.subr.bf16.mxu0 %v4556_v37  ;;  %2655 = vmatprep.mubr.bf16.mxu1 %v3666_v38  ;;  %v4661_v37 = vld [vmem:[%s6285_s0 + $0x1c0] ss:$72 sps:$4 sm:$0xff]  }
  0xae   :  { %3059 = vmatprep.mubr.bf16.mxu0 %v3674_v39  ;;  %v4665_v38 = vld [vmem:[%s6285_s0 + $0x1e0] ss:$72 sps:$4 sm:$0xff]  }
  0xaf   :  { %2687 = vmatpush1.bf16.msra.mxu1 %v4551_v40  ;;  %v4648_v39 = vld [vmem:[%s6284_s1 + $0x760] ss:$8 sps:$4 sm:$0xff]   ;;  %v4653_v40 = vld [vmem:[%s6284_s1 + $0x374] ss:$8 sps:$4 sm:$0xff]  }
  0xb0   :  { %3091 = vmatpush1.bf16.msra.mxu0 %v4554_v41  ;;  %2688 = vmatprep.subr.bf16.mxu1 %v4561_v42  ;;  %v4656_v41 = vld [vmem:[%s6284_s1 + $0x774] ss:$8 sps:$4 sm:$0xff]  }
  0xb1   :  { %3092 = vmatprep.subr.bf16.mxu0 %v4566_v43  ;;  %v4675_v42 = vld [vmem:[%s6285_s0 + $0x254] ss:$72 sps:$4 sm:$0xff]  }
  0xb2   :  { %2656 = vmatmul.mubr.bf16.gmra.mrb[24].mxu1 %v3665_v45  ;;  %v4677_v43 = vld [vmem:[%s6285_s0 + $0x274] ss:$72 sps:$4 sm:$0xff]   ;;  %v4654_v45 = vld [vmem:[%s6284_s1 + $0x770] ss:$8 sps:$4 sm:$0xff]  }
  0xb3   :  { %3060 = vmatmul.mubr.bf16.gmra.mrb[24].mxu0 %v3673_v46  ;;  %2689 = vmatpush1.bf16.msra.mxu1 %v4559_v44  ;;  %v4651_v44 = vld [vmem:[%s6284_s1 + $0x370] ss:$8 sps:$4 sm:$0xff]   ;;  %v4664_v46 = vld [vmem:[%s6284_s1 + $0x384] ss:$8 sps:$4 sm:$0xff]  }
  0xb4   :  { %3093 = vmatpush1.bf16.msra.mxu0 %v4564_v47  ;;  %2690 = vmatprep.subr.bf16.mxu1 %v4571_v48  ;;  %v4668_v47 = vld [vmem:[%s6284_s1 + $0x784] ss:$8 sps:$4 sm:$0xff]   ;;  %v4662_v48 = vld [vmem:[%s6284_s1 + $0x380] ss:$8 sps:$4 sm:$0xff]  }
  0xb5   :  { %3094 = vmatprep.subr.bf16.mxu0 %v4574_v49  ;;  %2696 = vmatprep.mubr.bf16.mxu1 %v4593_v50  ;;  %v4679_v49 = vld [vmem:[%s6285_s0 + $0x250] ss:$72 sps:$4 sm:$0xff]  }
  0xb6   :  { %3100 = vmatprep.mubr.bf16.mxu0 %v4599_v51  ;;  %v4683_v50 = vld [vmem:[%s6285_s0 + $0x270] ss:$72 sps:$4 sm:$0xff]   ;;  %v4666_v51 = vld [vmem:[%s6284_s1 + $0x780] ss:$8 sps:$4 sm:$0xff]  }
  0xb7   :  { %2691 = vmatpush1.bf16.msra.mxu1 %v4569_v52  ;;  %v4671_v52 = vld [vmem:[%s6284_s1 + $0x394] ss:$8 sps:$4 sm:$0xff]  }
  0xb8   :  { %3095 = vmatpush1.bf16.msra.mxu0 %v4572_v53  ;;  %2692 = vmatprep.subr.bf16.mxu1 %v4578_v54  ;;  %v4674_v53 = vld [vmem:[%s6284_s1 + $0x794] ss:$8 sps:$4 sm:$0xff]   ;;  %v4693_v54 = vld [vmem:[%s6285_s0 + $0x2e4] ss:$72 sps:$4 sm:$0xff]  }
  0xb9   :  { %3096 = vmatprep.subr.bf16.mxu0 %v4582_v55  ;;  %v4669_v55 = vld [vmem:[%s6284_s1 + $0x390] ss:$8 sps:$4 sm:$0xff]  }
  0xbb   :  { %2693 = vmatpush1.bf16.msra.mxu1 %v4576_v56  ;;  %v4695_v56 = vld [vmem:[%s6285_s0 + $0x304] ss:$72 sps:$4 sm:$0xff]  }
  0xbc   :  { %3097 = vmatpush1.bf16.msra.mxu0 %v4580_v57  ;;  %2694 = vmatprep.subr.bf16.mxu1 %v4587_v58  ;;  %v4672_v57 = vld [vmem:[%s6284_s1 + $0x790] ss:$8 sps:$4 sm:$0xff]   ;;  %v4682_v58 = vld [vmem:[%s6284_s1 + $0x3a4] ss:$8 sps:$4 sm:$0xff]  }
  0xbd   :  { %3098 = vmatprep.subr.bf16.mxu0 %v4590_v59  ;;  %v4686_v59 = vld [vmem:[%s6284_s1 + $0x7a4] ss:$8 sps:$4 sm:$0xff]  }
  0xbf   :  { %2695 = vmatpush1.bf16.msra.mxu1 %v4585_v60  ;;  %v4697_v60 = vld [vmem:[%s6285_s0 + $0x2e0] ss:$72 sps:$4 sm:$0xff]  }
  0xc0   :  { %3099 = vmatpush1.bf16.msra.mxu0 %v4588_v61  ;;  %2765 = vmatprep.subr.bf16.mxu1 %v4596_v62  ;;  %v4701_v61 = vld [vmem:[%s6285_s0 + $0x300] ss:$72 sps:$4 sm:$0xff]  }
  0xc1   :  { %3169 = vmatprep.subr.bf16.mxu0 %v4602_v63  ;;  %v4680_v62 = vld [vmem:[%s6284_s1 + $0x3a0] ss:$8 sps:$4 sm:$0xff]   ;;  %v124_v63 = vld [vmem:[%s6285_s0 + $0x370] sm:$0xff] }
  0xc2   :  { %2697 = vmatmul.mubr.bf16.vlgmr.msra.gmra.mrb[0].mxu1 %v4591_v0  ;;  %v128_v0 = vld [vmem:[%s6285_s0 + $0x390] sm:$0xff] }
  0xc3   :  { %3101 = vmatmul.mubr.bf16.vlgmr.msra.gmra.mrb[0].mxu0 %v4597_v2  ;;  %2766 = vmatpush1.bf16.msra.mxu1 %v4594_v1  ;;  %v4684_v1 = vld [vmem:[%s6284_s1 + $0x7a0] ss:$8 sps:$4 sm:$0xff]   ;;  %v4689_v2 = vld [vmem:[%s6284_s1 + $0x3b4] ss:$8 sps:$4 sm:$0xff]  }
  0xc4   :  { %3170 = vmatpush1.bf16.msra.mxu0 %v4600_v3  ;;  %2767 = vmatprep.subr.bf16.mxu1 %v4605_v4  ;;  %v4692_v3 = vld [vmem:[%s6284_s1 + $0x7b4] ss:$8 sps:$4 sm:$0xff]   ;;  %v3668_v4 = vcombine.high %v124_v63, %v124_v63 }
  0xc5   :  { %3171 = vmatprep.subr.bf16.mxu0 %v4608_v5  ;;  %2706 = vmatprep.mubr.bf16.mxu1 %v4621_v6  ;;  %v3676_v5 = vcombine.high %v128_v0, %v128_v0  ;;  %v4687_v6 = vld [vmem:[%s6284_s1 + $0x3b0] ss:$8 sps:$4 sm:$0xff]  }
  0xc6   :  { %3110 = vmatprep.mubr.bf16.mxu0 %v4623_v7  ;;  %v4690_v7 = vld [vmem:[%s6284_s1 + $0x7b0] ss:$8 sps:$4 sm:$0xff]  }
  0xc7   :  { %2768 = vmatpush1.bf16.msra.mxu1 %v4603_v8  ;;  %v4700_v8 = vld [vmem:[%s6284_s1 + $0x3c4] ss:$8 sps:$4 sm:$0xff]  }
  0xc8   :  { %3172 = vmatpush1.bf16.msra.mxu0 %v4606_v9  ;;  %2769 = vmatprep.subr.bf16.mxu1 %v4611_v10  ;;  %v4704_v9 = vld [vmem:[%s6284_s1 + $0x7c4] ss:$8 sps:$4 sm:$0xff]   ;;  %v4698_v10 = vld [vmem:[%s6284_s1 + $0x3c0] ss:$8 sps:$4 sm:$0xff]  }
  0xc9   :  { %3173 = vmatprep.subr.bf16.mxu0 %v4614_v11  ;;  %v3667_v11 = vcombine.low %v124_v63, %v124_v63  ;;  %v4781_v63 = vld [vmem:[%s6284_s1 + $0x880] ss:$8 sps:$4 sm:$0xff]  }
  0xca   :  { %2707 = vmatmul.mubr.bf16.gmra.mrb[4].mxu1 %v4625_v13  ;;  %v4702_v13 = vld [vmem:[%s6284_s1 + $0x7c0] ss:$8 sps:$4 sm:$0xff]  }
  0xcb   :  { %3111 = vmatmul.mubr.bf16.gmra.mrb[4].mxu0 %v4629_v14  ;;  %2770 = vmatpush1.bf16.msra.mxu1 %v4609_v12  ;;  %v3675_v12 = vcombine.low %v128_v0, %v128_v0  ;;  %v4707_v14 = vld [vmem:[%s6284_s1 + $0x3d4] ss:$8 sps:$4 sm:$0xff]  }
  0xcc   :  { %3174 = vmatpush1.bf16.msra.mxu0 %v4612_v15  ;;  %2771 = vmatprep.subr.bf16.mxu1 %v4617_v16  ;;  %v4710_v15 = vld [vmem:[%s6284_s1 + $0x7d4] ss:$8 sps:$4 sm:$0xff]  }
  0xcd   :  { %3175 = vmatprep.subr.bf16.mxu0 %v4620_v17  ;;  %2716 = vmatprep.mubr.bf16.mxu1 %v4639_v18  ;;  %v4729_v16 = vld [vmem:[%s6285_s0 + $0x1c] ss:$72 sps:$4 sm:$0xff]   ;;  %v4705_v18 = vld [vmem:[%s6284_s1 + $0x3d0] ss:$8 sps:$4 sm:$0xff]  }
  0xce   :  { %3120 = vmatprep.mubr.bf16.mxu0 %v4641_v19  ;;  %v4732_v17 = vld [vmem:[%s6285_s0 + $0x3c] ss:$72 sps:$4 sm:$0xff]   ;;  %v4708_v19 = vld [vmem:[%s6284_s1 + $0x7d0] ss:$8 sps:$4 sm:$0xff]  }
  0xcf   :  { %2772 = vmatpush1.bf16.msra.mxu1 %v4615_v20  ;;  %v4716_v20 = vld [vmem:[%s6284_s1 + $0x3e4] ss:$8 sps:$4 sm:$0xff]   ;;  %v4786_v0 = vld [vmem:[%s6284_s1 + $0x894] ss:$8 sps:$4 sm:$0xff]  }
  0xd0   :  { %3176 = vmatpush1.bf16.msra.mxu0 %v4618_v21  ;;  %2773 = vmatprep.subr.bf16.mxu1 %v4628_v22  ;;  %v4720_v21 = vld [vmem:[%s6284_s1 + $0x7e4] ss:$8 sps:$4 sm:$0xff]   ;;  %v4714_v22 = vld [vmem:[%s6284_s1 + $0x3e0] ss:$8 sps:$4 sm:$0xff]  }
  0xd1   :  { %3177 = vmatprep.subr.bf16.mxu0 %v4632_v23  ;;  %v4718_v23 = vld [vmem:[%s6284_s1 + $0x7e0] ss:$8 sps:$4 sm:$0xff]  }
  0xd2   :  { %2717 = vmatmul.mubr.bf16.gmra.mrb[8].mxu1 %v4643_v25  ;;  %v4726_v25 = vld [vmem:[%s6284_s1 + $0x7f4] ss:$8 sps:$4 sm:$0xff]  }
  0xd3   :  { %3121 = vmatmul.mubr.bf16.gmra.mrb[8].mxu0 %v4647_v26  ;;  %2774 = vmatpush1.bf16.msra.mxu1 %v4626_v24  ;;  %v4723_v24 = vld [vmem:[%s6284_s1 + $0x3f4] ss:$8 sps:$4 sm:$0xff]   ;;  %v4721_v26 = vld [vmem:[%s6284_s1 + $0x3f0] ss:$8 sps:$4 sm:$0xff]  }
  0xd4   :  { %3178 = vmatpush1.bf16.msra.mxu0 %v4630_v27  ;;  %2775 = vmatprep.subr.bf16.mxu1 %v4635_v28  ;;  %v4724_v27 = vld [vmem:[%s6284_s1 + $0x7f0] ss:$8 sps:$4 sm:$0xff]   ;;  %v4735_v28 = vld [vmem:[%s6284_s1 + $0x804] ss:$8 sps:$4 sm:$0xff]  }
  0xd5   :  { %3179 = vmatprep.subr.bf16.mxu0 %v4638_v29  ;;  %2726 = vmatprep.mubr.bf16.mxu1 %v4657_v30  ;;  %v4727_v29 = vld [vmem:[%s6285_s0 + $0x18] ss:$72 sps:$4 sm:$0xff]  }
  0xd6   :  { %3130 = vmatprep.mubr.bf16.mxu0 %v4659_v31  ;;  %v4730_v30 = vld [vmem:[%s6285_s0 + $0x38] ss:$72 sps:$4 sm:$0xff]  }
  0xd7   :  { %2776 = vmatpush1.bf16.msra.mxu1 %v4633_v32  ;;  %v4733_v31 = vld [vmem:[%s6284_s1 + $0x800] ss:$8 sps:$4 sm:$0xff]   ;;  %v4738_v32 = vld [vmem:[%s6284_s1 + $0x814] ss:$8 sps:$4 sm:$0xff]  }
  0xd8   :  { %3180 = vmatpush1.bf16.msra.mxu0 %v4636_v33  ;;  %2777 = vmatprep.subr.bf16.mxu1 %v4646_v34  ;;  %v4739_v33 = vld [vmem:[%s6285_s0 + $0xac] ss:$72 sps:$4 sm:$0xff]  }
  0xd9   :  { %3181 = vmatprep.subr.bf16.mxu0 %v4650_v35  ;;  %v4741_v34 = vld [vmem:[%s6285_s0 + $0xcc] ss:$72 sps:$4 sm:$0xff]   ;;  %v4736_v35 = vld [vmem:[%s6284_s1 + $0x810] ss:$8 sps:$4 sm:$0xff]  }
  0xda   :  { %2727 = vmatmul.mubr.bf16.gmra.mrb[12].mxu1 %v4661_v37  ;;  %v4743_v37 = vld [vmem:[%s6285_s0 + $0xa8] ss:$72 sps:$4 sm:$0xff]  }
  0xdb   :  { %3131 = vmatmul.mubr.bf16.gmra.mrb[12].mxu0 %v4665_v38  ;;  %2778 = vmatpush1.bf16.msra.mxu1 %v4644_v36  ;;  %v4747_v36 = vld [vmem:[%s6284_s1 + $0x824] ss:$8 sps:$4 sm:$0xff]   ;;  %v4744_v38 = vld [vmem:[%s6285_s0 + $0xc8] ss:$72 sps:$4 sm:$0xff]  }
  0xdc   :  { %3182 = vmatpush1.bf16.msra.mxu0 %v4648_v39  ;;  %2779 = vmatprep.subr.bf16.mxu1 %v4653_v40  ;;  %v4745_v39 = vld [vmem:[%s6284_s1 + $0x820] ss:$8 sps:$4 sm:$0xff]   ;;  %v4750_v40 = vld [vmem:[%s6284_s1 + $0x834] ss:$8 sps:$4 sm:$0xff]  }
  0xdd   :  { %3183 = vmatprep.subr.bf16.mxu0 %v4656_v41  ;;  %2736 = vmatprep.mubr.bf16.mxu1 %v4675_v42  ;;  %v4751_v41 = vld [vmem:[%s6285_s0 + $0x13c] ss:$72 sps:$4 sm:$0xff]  }
  0xde   :  { %3140 = vmatprep.mubr.bf16.mxu0 %v4677_v43  ;;  %v4753_v42 = vld [vmem:[%s6285_s0 + $0x15c] ss:$72 sps:$4 sm:$0xff]   ;;  %v4748_v43 = vld [vmem:[%s6284_s1 + $0x830] ss:$8 sps:$4 sm:$0xff]  }
  0xdf   :  { %2780 = vmatpush1.bf16.msra.mxu1 %v4651_v44  ;;  %v4759_v44 = vld [vmem:[%s6284_s1 + $0x844] ss:$8 sps:$4 sm:$0xff]  }
  0xe0   :  { %3184 = vmatpush1.bf16.msra.mxu0 %v4654_v45  ;;  %2781 = vmatprep.subr.bf16.mxu1 %v4664_v46  ;;  %v4755_v45 = vld [vmem:[%s6285_s0 + $0x138] ss:$72 sps:$4 sm:$0xff]  }
  0xe1   :  { %3185 = vmatprep.subr.bf16.mxu0 %v4668_v47  ;;  %v4756_v46 = vld [vmem:[%s6285_s0 + $0x158] ss:$72 sps:$4 sm:$0xff]  }
  0xe2   :  { %2737 = vmatmul.mubr.bf16.gmra.mrb[16].mxu1 %v4679_v49  ;;  %v4757_v47 = vld [vmem:[%s6284_s1 + $0x840] ss:$8 sps:$4 sm:$0xff]   ;;  %v4763_v49 = vld [vmem:[%s6285_s0 + $0x1cc] ss:$72 sps:$4 sm:$0xff]  }
  0xe3   :  { %3141 = vmatmul.mubr.bf16.gmra.mrb[16].mxu0 %v4683_v50  ;;  %2782 = vmatpush1.bf16.msra.mxu1 %v4662_v48  ;;  %v4762_v48 = vld [vmem:[%s6284_s1 + $0x854] ss:$8 sps:$4 sm:$0xff]  }
  0xe4   :  { %3186 = vmatpush1.bf16.msra.mxu0 %v4666_v51  ;;  %2783 = vmatprep.subr.bf16.mxu1 %v4671_v52  ;;  %v4765_v50 = vld [vmem:[%s6285_s0 + $0x1ec] ss:$72 sps:$4 sm:$0xff]   ;;  %v4760_v51 = vld [vmem:[%s6284_s1 + $0x850] ss:$8 sps:$4 sm:$0xff]  }
  0xe5   :  { %3187 = vmatprep.subr.bf16.mxu0 %v4674_v53  ;;  %2746 = vmatprep.mubr.bf16.mxu1 %v4693_v54  ;;  %v4771_v52 = vld [vmem:[%s6284_s1 + $0x864] ss:$8 sps:$4 sm:$0xff]   ;;  %v4767_v53 = vld [vmem:[%s6285_s0 + $0x1c8] ss:$72 sps:$4 sm:$0xff]  }
  0xe6   :  { %3150 = vmatprep.mubr.bf16.mxu0 %v4695_v56  ;;  %v4768_v54 = vld [vmem:[%s6285_s0 + $0x1e8] ss:$72 sps:$4 sm:$0xff]   ;;  %v4774_v56 = vld [vmem:[%s6284_s1 + $0x874] ss:$8 sps:$4 sm:$0xff]  }
  0xe7   :  { %2784 = vmatpush1.bf16.msra.mxu1 %v4669_v55  ;;  %v4769_v55 = vld [vmem:[%s6284_s1 + $0x860] ss:$8 sps:$4 sm:$0xff]  }
  0xe8   :  { %3188 = vmatpush1.bf16.msra.mxu0 %v4672_v57  ;;  %2785 = vmatprep.subr.bf16.mxu1 %v4682_v58  ;;  %v4775_v57 = vld [vmem:[%s6285_s0 + $0x25c] ss:$72 sps:$4 sm:$0xff]  }
  0xe9   :  { %3189 = vmatprep.subr.bf16.mxu0 %v4686_v59  ;;  %v4777_v58 = vld [vmem:[%s6285_s0 + $0x27c] ss:$72 sps:$4 sm:$0xff]   ;;  %v4772_v59 = vld [vmem:[%s6284_s1 + $0x870] ss:$8 sps:$4 sm:$0xff]  }
  0xea   :  { %2747 = vmatmul.mubr.bf16.gmra.mrb[20].mxu1 %v4697_v60  ;;  %v4783_v60 = vld [vmem:[%s6284_s1 + $0x884] ss:$8 sps:$4 sm:$0xff]  }
  0xeb   :  { %3151 = vmatmul.mubr.bf16.gmra.mrb[20].mxu0 %v4701_v61  ;;  %2786 = vmatpush1.bf16.msra.mxu1 %v4680_v62  ;;  %v4779_v61 = vld [vmem:[%s6285_s0 + $0x258] ss:$72 sps:$4 sm:$0xff]  }
  0xec   :  { %3190 = vmatpush1.bf16.msra.mxu0 %v4684_v1  ;;  %2787 = vmatprep.subr.bf16.mxu1 %v4689_v2  ;;  %v4780_v62 = vld [vmem:[%s6285_s0 + $0x278] ss:$72 sps:$4 sm:$0xff]   ;;  %v4787_v1 = vld [vmem:[%s6285_s0 + $0x2ec] ss:$72 sps:$4 sm:$0xff]  }
  0xed   :  { %3191 = vmatprep.subr.bf16.mxu0 %v4692_v3  ;;  %2756 = vmatprep.mubr.bf16.mxu1 %v3668_v4  ;;  %v4789_v2 = vld [vmem:[%s6285_s0 + $0x30c] ss:$72 sps:$4 sm:$0xff]   ;;  %v4784_v3 = vld [vmem:[%s6284_s1 + $0x890] ss:$8 sps:$4 sm:$0xff]  }
  0xee   :  { %3160 = vmatprep.mubr.bf16.mxu0 %v3676_v5  ;;  %v4795_v4 = vld [vmem:[%s6284_s1 + $0x8a4] ss:$8 sps:$4 sm:$0xff]   ;;  %v4791_v5 = vld [vmem:[%s6285_s0 + $0x2e8] ss:$72 sps:$4 sm:$0xff]  }
  0xef   :  { %2788 = vmatpush1.bf16.msra.mxu1 %v4687_v6  ;;  %v4792_v6 = vld [vmem:[%s6285_s0 + $0x308] ss:$72 sps:$4 sm:$0xff]  }
  0xf0   :  { %3192 = vmatpush1.bf16.msra.mxu0 %v4690_v7  ;;  %2789 = vmatprep.subr.bf16.mxu1 %v4700_v8  ;;  %v125_v7 = vld [vmem:[%s6285_s0 + $0x378] sm:$0xff] }
  0xf1   :  { %3193 = vmatprep.subr.bf16.mxu0 %v4704_v9  ;;  %v129_v8 = vld [vmem:[%s6285_s0 + $0x398] sm:$0xff]  ;;  %v4793_v9 = vld [vmem:[%s6284_s1 + $0x8a0] ss:$8 sps:$4 sm:$0xff]  }
  0xf2   :  { %2757 = vmatmul.mubr.bf16.gmra.mrb[24].mxu1 %v3667_v11  ;;  %v3670_v11 = vcombine.high %v125_v7, %v125_v7 }
  0xf3   :  { %3161 = vmatmul.mubr.bf16.gmra.mrb[24].mxu0 %v3675_v12  ;;  %2790 = vmatpush1.bf16.msra.mxu1 %v4698_v10  ;;  %v4798_v10 = vld [vmem:[%s6284_s1 + $0x8b4] ss:$8 sps:$4 sm:$0xff]   ;;  %v3678_v12 = vcombine.high %v129_v8, %v129_v8 }
  0xf4   :  { %3194 = vmatpush1.bf16.msra.mxu0 %v4702_v13  ;;  %2791 = vmatprep.subr.bf16.mxu1 %v4707_v14  ;;  %v4796_v13 = vld [vmem:[%s6284_s1 + $0x8b0] ss:$8 sps:$4 sm:$0xff]   ;;  %v4805_v14 = vld [vmem:[%s6284_s1 + $0x8c4] ss:$8 sps:$4 sm:$0xff]  }
  0xf5   :  { %3195 = vmatprep.subr.bf16.mxu0 %v4710_v15  ;;  %2797 = vmatprep.mubr.bf16.mxu1 %v4729_v16  ;;  %v3669_v15 = vcombine.low %v125_v7, %v125_v7  ;;  %v3677_v16 = vcombine.low %v129_v8, %v129_v8 }
  0xf6   :  { %3201 = vmatprep.mubr.bf16.mxu0 %v4732_v17  ;;  %v4803_v17 = vld [vmem:[%s6284_s1 + $0x8c0] ss:$8 sps:$4 sm:$0xff]  }
  0xf7   :  { %2792 = vmatpush1.bf16.msra.mxu1 %v4705_v18  ;;  %v4808_v18 = vld [vmem:[%s6284_s1 + $0x8d4] ss:$8 sps:$4 sm:$0xff]  }
  0xf8   :  { %3196 = vmatpush1.bf16.msra.mxu0 %v4708_v19  ;;  %2793 = vmatprep.subr.bf16.mxu1 %v4716_v20  ;;  %v4817_v19 = vld [vmem:[%s6285_s0 + $0x44] ss:$72 sps:$4 sm:$0xff]  }
  0xf9   :  { %3197 = vmatprep.subr.bf16.mxu0 %v4720_v21  ;;  %v4820_v20 = vld [vmem:[%s6285_s0 + $0x284] ss:$72 sps:$4 sm:$0xff]   ;;  %v4806_v21 = vld [vmem:[%s6284_s1 + $0x8d0] ss:$8 sps:$4 sm:$0xff]  }
  0xfb   :  { %2794 = vmatpush1.bf16.msra.mxu1 %v4714_v22  ;;  %v4811_v22 = vld [vmem:[%s6284_s1 + $0x8e4] ss:$8 sps:$4 sm:$0xff]  }
  0xfc   :  { %3198 = vmatpush1.bf16.msra.mxu0 %v4718_v23  ;;  %2795 = vmatprep.subr.bf16.mxu1 %v4723_v24  ;;  %v4809_v23 = vld [vmem:[%s6284_s1 + $0x8e0] ss:$8 sps:$4 sm:$0xff]   ;;  %v4814_v24 = vld [vmem:[%s6284_s1 + $0x8f4] ss:$8 sps:$4 sm:$0xff]  }
  0xfd   :  { %3199 = vmatprep.subr.bf16.mxu0 %v4726_v25  ;;  %v4812_v25 = vld [vmem:[%s6284_s1 + $0x8f0] ss:$8 sps:$4 sm:$0xff]  }
  0xff   :  { %2796 = vmatpush1.bf16.msra.mxu1 %v4721_v26  ;;  %v4815_v26 = vld [vmem:[%s6285_s0 + $0x40] ss:$72 sps:$4 sm:$0xff]  }
 0x100   :  { %3200 = vmatpush1.bf16.msra.mxu0 %v4724_v27  ;;  %3969 = vmatprep.subr.bf16.mxu1 %v4735_v28  ;;  %v4818_v27 = vld [vmem:[%s6285_s0 + $0x280] ss:$72 sps:$4 sm:$0xff]  }
 0x101   :  { %3270 = vmatprep.subr.bf16.mxu0 %v4735_v28  ;;  %v4821_v28 = vld [vmem:[%s6285_s0 + $0xd4] ss:$72 sps:$4 sm:$0xff]  }
 0x102   :  { %2798 = vmatmul.mubr.bf16.vlgmr.msra.gmra.mrb[0].mxu1 %v4727_v29  ;;  %v4823_v29 = vld [vmem:[%s6285_s0 + $0x314] ss:$72 sps:$4 sm:$0xff]  }
 0x103   :  { %3202 = vmatmul.mubr.bf16.vlgmr.msra.gmra.mrb[0].mxu0 %v4730_v30  ;;  %3985 = vmatpush1.bf16.msra.mxu1 %v4733_v31  ;;  %v130_v30 = vld [vmem:[%s6285_s0 + $0x3a0] sm:$0xff] }
 0x104   :  { %3271 = vmatpush1.bf16.msra.mxu0 %v4733_v31  ;;  %3970 = vmatprep.subr.bf16.mxu1 %v4738_v32  ;;  %v4825_v31 = vld [vmem:[%s6285_s0 + $0xd0] ss:$72 sps:$4 sm:$0xff]  }
 0x105   :  { %3272 = vmatprep.subr.bf16.mxu0 %v4738_v32  ;;  %2807 = vmatprep.mubr.bf16.mxu1 %v4739_v33  ;;  %v4826_v32 = vld [vmem:[%s6285_s0 + $0x310] ss:$72 sps:$4 sm:$0xff]   ;;  %v4827_v33 = vld [vmem:[%s6285_s0 + $0x164] ss:$72 sps:$4 sm:$0xff]  }
 0x106   :  { %3211 = vmatprep.mubr.bf16.mxu0 %v4741_v34  ;;  %v3680_v34 = vcombine.high %v130_v30, %v130_v30 }
 0x107   :  { %3986 = vmatpush1.bf16.msra.mxu1 %v4736_v35 }
 0x108   :  { %3273 = vmatpush1.bf16.msra.mxu0 %v4736_v35  ;;  %3971 = vmatprep.subr.bf16.mxu1 %v4747_v36  ;;  %v4830_v35 = vld [vmem:[%s6285_s0 + $0x160] ss:$72 sps:$4 sm:$0xff]  }
 0x109   :  { %3274 = vmatprep.subr.bf16.mxu0 %v4747_v36  ;;  %v3679_v36 = vcombine.low %v130_v30, %v130_v30 }
 0x10a   :  { %2808 = vmatmul.mubr.bf16.gmra.mrb[4].mxu1 %v4743_v37  ;;  %v4832_v37 = vld [vmem:[%s6285_s0 + $0x1f4] ss:$72 sps:$4 sm:$0xff]  }
 0x10b   :  { %3212 = vmatmul.mubr.bf16.gmra.mrb[4].mxu0 %v4744_v38  ;;  %3987 = vmatpush1.bf16.msra.mxu1 %v4745_v39  ;;  %v4834_v38 = vld [vmem:[%s6285_s0 + $0x1f0] ss:$72 sps:$4 sm:$0xff]  }
 0x10c   :  { %3275 = vmatpush1.bf16.msra.mxu0 %v4745_v39  ;;  %3972 = vmatprep.subr.bf16.mxu1 %v4750_v40  ;;  %v4835_v39 = vmov 0.0  }
 0x10d   :  { %3276 = vmatprep.subr.bf16.mxu0 %v4750_v40  ;;  %2817 = vmatprep.mubr.bf16.mxu1 %v4751_v41  ;;  %3397 = vst [vmem:[%s6286_s3] sm:$0xff] %v4835_v39  ;;  %3398 = vst [vmem:[%s6286_s3 + $0x8] sm:$0xff] %v4835_v39 }
 0x10e   :  { %3221 = vmatprep.mubr.bf16.mxu0 %v4753_v42  ;;  %3399 = vst [vmem:[%s6287_s4] sm:$0xff] %v4835_v39  ;;  %3400 = vst [vmem:[%s6287_s4 + $0x8] sm:$0xff] %v4835_v39 }
 0x10f   :  { %3988 = vmatpush1.bf16.msra.mxu1 %v4748_v43 }
 0x110   :  { %3277 = vmatpush1.bf16.msra.mxu0 %v4748_v43  ;;  %3973 = vmatprep.subr.bf16.mxu1 %v4759_v44 }
 0x111   :  { %3278 = vmatprep.subr.bf16.mxu0 %v4759_v44 }
 0x112   :  { %2818 = vmatmul.mubr.bf16.gmra.mrb[8].mxu1 %v4755_v45 }
 0x113   :  { %3222 = vmatmul.mubr.bf16.gmra.mrb[8].mxu0 %v4756_v46  ;;  %3989 = vmatpush1.bf16.msra.mxu1 %v4757_v47 }
 0x114   :  { %3279 = vmatpush1.bf16.msra.mxu0 %v4757_v47  ;;  %3974 = vmatprep.subr.bf16.mxu1 %v4762_v48 }
 0x115   :  { %3280 = vmatprep.subr.bf16.mxu0 %v4762_v48  ;;  %2827 = vmatprep.mubr.bf16.mxu1 %v4763_v49 }
 0x116   :  { %3231 = vmatprep.mubr.bf16.mxu0 %v4765_v50 }
 0x117   :  { %3990 = vmatpush1.bf16.msra.mxu1 %v4760_v51 }
 0x118   :  { %3281 = vmatpush1.bf16.msra.mxu0 %v4760_v51  ;;  %3975 = vmatprep.subr.bf16.mxu1 %v4771_v52 }
 0x119   :  { %3282 = vmatprep.subr.bf16.mxu0 %v4771_v52 }
 0x11a   :  { %2828 = vmatmul.mubr.bf16.gmra.mrb[12].mxu1 %v4767_v53 }
 0x11b   :  { %3232 = vmatmul.mubr.bf16.gmra.mrb[12].mxu0 %v4768_v54  ;;  %3991 = vmatpush1.bf16.msra.mxu1 %v4769_v55 }
 0x11c   :  { %3283 = vmatpush1.bf16.msra.mxu0 %v4769_v55  ;;  %3976 = vmatprep.subr.bf16.mxu1 %v4774_v56 }
 0x11d   :  { %3284 = vmatprep.subr.bf16.mxu0 %v4774_v56  ;;  %2837 = vmatprep.mubr.bf16.mxu1 %v4775_v57 }
 0x11e   :  { %3241 = vmatprep.mubr.bf16.mxu0 %v4777_v58 }
 0x11f   :  { %3992 = vmatpush1.bf16.msra.mxu1 %v4772_v59 }
 0x120   :  { %3285 = vmatpush1.bf16.msra.mxu0 %v4772_v59  ;;  %3977 = vmatprep.subr.bf16.mxu1 %v4783_v60 }
 0x121   :  { %3286 = vmatprep.subr.bf16.mxu0 %v4783_v60 }
 0x122   :  { %2838 = vmatmul.mubr.bf16.gmra.mrb[16].mxu1 %v4779_v61 }
 0x123   :  { %3242 = vmatmul.mubr.bf16.gmra.mrb[16].mxu0 %v4780_v62  ;;  %3993 = vmatpush1.bf16.msra.mxu1 %v4781_v63 }
 0x124   :  { %3287 = vmatpush1.bf16.msra.mxu0 %v4781_v63  ;;  %3978 = vmatprep.subr.bf16.mxu1 %v4786_v0 }
 0x125   :  { %3288 = vmatprep.subr.bf16.mxu0 %v4786_v0  ;;  %2847 = vmatprep.mubr.bf16.mxu1 %v4787_v1 }
 0x126   :  { %3251 = vmatprep.mubr.bf16.mxu0 %v4789_v2 }
 0x127   :  { %3994 = vmatpush1.bf16.msra.mxu1 %v4784_v3 }
 0x128   :  { %3289 = vmatpush1.bf16.msra.mxu0 %v4784_v3  ;;  %3979 = vmatprep.subr.bf16.mxu1 %v4795_v4 }
 0x129   :  { %3290 = vmatprep.subr.bf16.mxu0 %v4795_v4 }
 0x12a   :  { %2848 = vmatmul.mubr.bf16.gmra.mrb[20].mxu1 %v4791_v5 }
 0x12b   :  { %3252 = vmatmul.mubr.bf16.gmra.mrb[20].mxu0 %v4792_v6  ;;  %3995 = vmatpush1.bf16.msra.mxu1 %v4793_v9 }
 0x12c   :  { %3291 = vmatpush1.bf16.msra.mxu0 %v4793_v9  ;;  %3980 = vmatprep.subr.bf16.mxu1 %v4798_v10 }
 0x12d   :  { %3292 = vmatprep.subr.bf16.mxu0 %v4798_v10  ;;  %2857 = vmatprep.mubr.bf16.mxu1 %v3670_v11 }
 0x12e   :  { %3261 = vmatprep.mubr.bf16.mxu0 %v3678_v12 }
 0x12f   :  { %3996 = vmatpush1.bf16.msra.mxu1 %v4796_v13 }
 0x130   :  { %3293 = vmatpush1.bf16.msra.mxu0 %v4796_v13  ;;  %3981 = vmatprep.subr.bf16.mxu1 %v4805_v14 }
 0x131   :  { %3294 = vmatprep.subr.bf16.mxu0 %v4805_v14 }
 0x132   :  { %2858 = vmatmul.mubr.bf16.gmra.mrb[24].mxu1 %v3669_v15 }
 0x133   :  { %3262 = vmatmul.mubr.bf16.gmra.mrb[24].mxu0 %v3677_v16  ;;  %3997 = vmatpush1.bf16.msra.mxu1 %v4803_v17 }
 0x134   :  { %3295 = vmatpush1.bf16.msra.mxu0 %v4803_v17  ;;  %3982 = vmatprep.subr.bf16.mxu1 %v4808_v18 }
 0x135   :  { %3296 = vmatprep.subr.bf16.mxu0 %v4808_v18  ;;  %3302 = vmatprep.mubr.bf16.mxu0 %v4817_v19 }
 0x136   :  { %3342 = vmatprep.mubr.bf16.mxu1 %v4820_v20 }
 0x137   :  { %3998 = vmatpush1.bf16.msra.mxu1 %v4806_v21 }
 0x138   :  { %3297 = vmatpush1.bf16.msra.mxu0 %v4806_v21  ;;  %3983 = vmatprep.subr.bf16.mxu1 %v4811_v22 }
 0x139   :  { %3298 = vmatprep.subr.bf16.mxu0 %v4811_v22 }
 0x13b   :  { %3999 = vmatpush1.bf16.msra.mxu1 %v4809_v23 }
 0x13c   :  { %3299 = vmatpush1.bf16.msra.mxu0 %v4809_v23  ;;  %3984 = vmatprep.subr.bf16.mxu1 %v4814_v24 }
 0x13d   :  { %3300 = vmatprep.subr.bf16.mxu0 %v4814_v24 }
 0x13f   :  { %4000 = vmatpush1.bf16.msra.mxu1 %v4812_v25 }
 0x140   :  { %3301 = vmatpush1.bf16.msra.mxu0 %v4812_v25 }
 0x142   :  { %3343 = vmatmul.mubr.bf16.vlgmr.msra.gmra.mrb[28].mxu1 %v4818_v27 }
 0x143   :  { %3303 = vmatmul.mubr.bf16.vlgmr.msra.gmra.mrb[0].mxu0 %v4815_v26  ;;  %3352 = vmatprep.mubr.bf16.mxu1 %v4823_v29 }
 0x144   :  { %3312 = vmatprep.mubr.bf16.mxu0 %v4821_v28 }
 0x14a   :  { %3353 = vmatmul.mubr.bf16.gmra.mrb[32].mxu1 %v4826_v32 }
 0x14b   :  { %3313 = vmatmul.mubr.bf16.gmra.mrb[4].mxu0 %v4825_v31  ;;  %3362 = vmatprep.mubr.bf16.mxu1 %v3680_v34 }
 0x14c   :  { %3322 = vmatprep.mubr.bf16.mxu0 %v4827_v33 }
 0x152   :  { %3363 = vmatmul.mubr.bf16.gmra.mrb[36].mxu1 %v3679_v36 }
 0x153   :  { %3323 = vmatmul.mubr.bf16.gmra.mrb[8].mxu0 %v4830_v35 }
 0x154   :  { %3332 = vmatprep.mubr.bf16.mxu0 %v4832_v37 }
 0x15b   :  { %3333 = vmatmul.mubr.bf16.gmra.mrb[12].mxu0 %v4834_v38 }
 0x1d5   :  { %v2799_v40 = vpop.f32.mrb[0].mxu1 }
 0x1d6   :  { %v2801_v41 = vpop.f32.mrb[1].mxu1 }
 0x1d7   :  { %v2803_v42 = vpop.f32.mrb[2].mxu1 }
 0x1d8   :  { %v6089_v43 = vpop.f32.mrb[3].mxu1 }
 0x1dd   :  { %v6091_v44 = vpop.f32.mrb[4].mxu1 }
 0x1de   :  { %v6093_v45 = vpop.f32.mrb[5].mxu1 }
 0x1df   :  { %v6095_v46 = vpop.f32.mrb[6].mxu1 }
 0x1e0   :  { %v6097_v47 = vpop.f32.mrb[7].mxu1 }
 0x1e5   :  { %v6099_v48 = vpop.f32.mrb[8].mxu1 }
 0x1e6   :  { %v6101_v49 = vpop.f32.mrb[9].mxu1 }
 0x1e7   :  { %v6103_v50 = vpop.f32.mrb[10].mxu1 }
 0x1e8   :  { %v6105_v51 = vpop.f32.mrb[11].mxu1 }
 0x1ed   :  { %v6107_v52 = vpop.f32.mrb[12].mxu1 }
 0x1ee   :  { %v6109_v53 = vpop.f32.mrb[13].mxu1 }
 0x1ef   :  { %v6111_v54 = vpop.f32.mrb[14].mxu1 }
 0x1f0   :  { %v6113_v55 = vpop.f32.mrb[15].mxu1 }
 0x1f5   :  { %v2839_v56 = vpop.f32.mrb[16].mxu1 }
 0x1f6   :  { %v3243_v57 = vpop.f32.mrb[16].mxu0  ;;  %v2841_v59 = vpop.f32.mrb[17].mxu1 }
 0x1f7   :  { %v4017_v58 = vadd.f32 %v3243_v57, %v2839_v56  ;;  %v3245_v60 = vpop.f32.mrb[17].mxu0  ;;  %v2843_v62 = vpop.f32.mrb[18].mxu1 }
 0x1f8   :  { %v4019_v61 = vadd.f32 %v3245_v60, %v2841_v59  ;;  %v3247_v63 = vpop.f32.mrb[18].mxu0  ;;  %v2845_v1 = vpop.f32.mrb[19].mxu1 }
 0x1f9   :  { %v4021_v0 = vadd.f32 %v3247_v63, %v2843_v62  ;;  %v3249_v2 = vpop.f32.mrb[19].mxu0 }
 0x1fa   :  { %v4023_v3 = vadd.f32 %v3249_v2, %v2845_v1 }
 0x1fd   :  { %v2849_v4 = vpop.f32.mrb[20].mxu1 }
 0x1fe   :  { %v3253_v5 = vpop.f32.mrb[20].mxu0  ;;  %v2851_v7 = vpop.f32.mrb[21].mxu1 }
 0x1ff   :  { %v4025_v6 = vadd.f32 %v3253_v5, %v2849_v4  ;;  %v3255_v8 = vpop.f32.mrb[21].mxu0  ;;  %v2853_v10 = vpop.f32.mrb[22].mxu1 }
 0x200   :  { %v4027_v9 = vadd.f32 %v3255_v8, %v2851_v7  ;;  %v3257_v11 = vpop.f32.mrb[22].mxu0  ;;  %v2855_v13 = vpop.f32.mrb[23].mxu1 }
 0x201   :  { %v6115_v12 = vadd.f32 %v3257_v11, %v2853_v10  ;;  %v3259_v14 = vpop.f32.mrb[23].mxu0 }
 0x202   :  { %v6117_v15 = vadd.f32 %v3259_v14, %v2855_v13 }
 0x205   :  { %v2859_v16 = vpop.f32.mrb[24].mxu1 }
 0x206   :  { %v3263_v17 = vpop.f32.mrb[24].mxu0  ;;  %v2861_v19 = vpop.f32.mrb[25].mxu1 }
 0x207   :  { %v6119_v18 = vadd.f32 %v3263_v17, %v2859_v16  ;;  %v3265_v20 = vpop.f32.mrb[25].mxu0  ;;  %v2863_v22 = vpop.f32.mrb[26].mxu1 }
 0x208   :  { %v6121_v21 = vadd.f32 %v3265_v20, %v2861_v19  ;;  %v3267_v23 = vpop.f32.mrb[26].mxu0  ;;  %v2864_v24 = vpop.f32.mrb[27].mxu1 }
 0x209   :  { %v3268_v25 = vpop.f32.mrb[27].mxu0 }
 0x215   :  { %v3344_v27 = vpop.f32.mrb[28].mxu1 }
 0x216   :  { %v3304_v26 = vpop.f32.mrb[0].mxu0  ;;  %v6123_v29 = vadd.f32 %v4017_v58, %v3344_v27  ;;  %v3346_v31 = vpop.f32.mrb[29].mxu1 }
 0x217   :  { %v4001_v28 = vadd.f32 %v3304_v26, %v2799_v40  ;;  %v3306_v30 = vpop.f32.mrb[1].mxu0  ;;  %v6125_v33 = vadd.f32 %v4019_v61, %v3346_v31  ;;  %v3348_v35 = vpop.f32.mrb[30].mxu1 }
 0x218   :  { %v4002_v32 = vadd.f32 %v3306_v30, %v2801_v41  ;;  %v3308_v34 = vpop.f32.mrb[2].mxu0  ;;  %3387 = vst [vmem:[%s6288_s2 + $0x80] sm:$0xff] %v6123_v29  ;;  %v6134_v37 = vadd.f32 %v4021_v0, %v3348_v35  ;;  %v3350_v39 = vpop.f32.mrb[31].mxu1 }
 0x219   :  { %3371 = vst [vmem:[%s6288_s2] sm:$0xff] %v4001_v28  ;;  %v4003_v36 = vadd.f32 %v3308_v34, %v2803_v42  ;;  %v3310_v38 = vpop.f32.mrb[3].mxu0  ;;  %3388 = vst [vmem:[%s6288_s2 + $0x88] sm:$0xff] %v6125_v33  ;;  %v6144_v41 = vadd.f32 %v4023_v3, %v3350_v39  ;;  %v3461_v56 = vmul.f32 %v4001_v28, %v4001_v28 }
 0x21a   :  { %3372 = vst [vmem:[%s6288_s2 + $0x8] sm:$0xff] %v4002_v32  ;;  %v4004_v40 = vadd.f32 %v3310_v38, %v6089_v43  ;;  %3389 = vst [vmem:[%s6288_s2 + $0x90] sm:$0xff] %v6134_v37  ;;  %v3462_v58 = vmul.f32 %v4002_v32, %v4002_v32 }
 0x21b   :  { %3373 = vst [vmem:[%s6288_s2 + $0x10] sm:$0xff] %v4003_v36  ;;  %v3401_v42 = vadd.f32 %v4003_v36, %v4001_v28  ;;  %v3463_v57 = vmul.f32 %v4003_v36, %v4003_v36  ;;  %3390 = vst [vmem:[%s6288_s2 + $0x98] sm:$0xff] %v6144_v41 }
 0x21c   :  { %3374 = vst [vmem:[%s6288_s2 + $0x18] sm:$0xff] %v4004_v40  ;;  %v3419_v43 = vadd.f32 %v4004_v40, %v4002_v32  ;;  %v3464_v59 = vmul.f32 %v4004_v40, %v4004_v40 }
 0x21d   :  { %v3487_v60 = vadd.f32 %v3463_v57, %v3461_v56  ;;  %v3354_v63 = vpop.f32.mrb[32].mxu1 }
 0x21e   :  { %v3505_v61 = vadd.f32 %v3464_v59, %v3462_v58  ;;  %v3314_v62 = vpop.f32.mrb[4].mxu0  ;;  %v6161_v1 = vadd.f32 %v4025_v6, %v3354_v63  ;;  %v3356_v3 = vpop.f32.mrb[33].mxu1 }
 0x21f   :  { %v4005_v0 = vadd.f32 %v3314_v62, %v6091_v44  ;;  %v3316_v2 = vpop.f32.mrb[5].mxu0  ;;  %v6164_v5 = vadd.f32 %v4027_v9, %v3356_v3  ;;  %v3358_v8 = vpop.f32.mrb[34].mxu1 }
 0x220   :  { %v4006_v4 = vadd.f32 %v3316_v2, %v6093_v45  ;;  %v3318_v7 = vpop.f32.mrb[6].mxu0  ;;  %3391 = vst [vmem:[%s6288_s2 + $0xa0] sm:$0xff] %v6161_v1  ;;  %v3360_v13 = vpop.f32.mrb[35].mxu1  ;;  %v6182_v14 = vadd.f32 %v6115_v12, %v3358_v8 }
 0x221   :  { %3375 = vst [vmem:[%s6288_s2 + $0x20] sm:$0xff] %v4005_v0  ;;  %v3402_v10 = vadd.f32 %v4005_v0, %v3401_v42  ;;  %v3465_v11 = vmul.f32 %v4005_v0, %v4005_v0  ;;  %v4007_v44 = vadd.f32 %v3318_v7, %v6095_v46  ;;  %v3320_v6 = vpop.f32.mrb[7].mxu0  ;;  %3392 = vst [vmem:[%s6288_s2 + $0xa8] sm:$0xff] %v6164_v5 }
 0x222   :  { %3376 = vst [vmem:[%s6288_s2 + $0x28] sm:$0xff] %v4006_v4  ;;  %v3420_v45 = vadd.f32 %v4006_v4, %v3419_v43  ;;  %v3466_v9 = vmul.f32 %v4006_v4, %v4006_v4  ;;  %v4008_v19 = vadd.f32 %v3320_v6, %v6097_v47  ;;  %3393 = vst [vmem:[%s6288_s2 + $0xb0] sm:$0xff] %v6182_v14 }
 0x223   :  { %v3488_v16 = vadd.f32 %v3487_v60, %v3465_v11  ;;  %3377 = vst [vmem:[%s6288_s2 + $0x30] sm:$0xff] %v4007_v44  ;;  %v3403_v46 = vadd.f32 %v4007_v44, %v3402_v10  ;;  %v3467_v17 = vmul.f32 %v4007_v44, %v4007_v44  ;;  %v6193_v22 = vadd.f32 %v6117_v15, %v3360_v13 }
 0x224   :  { %v3506_v20 = vadd.f32 %v3505_v61, %v3466_v9  ;;  %3378 = vst [vmem:[%s6288_s2 + $0x38] sm:$0xff] %v4008_v19  ;;  %v3421_v23 = vadd.f32 %v4008_v19, %v3420_v45  ;;  %v3468_v24 = vmul.f32 %v4008_v19, %v4008_v19  ;;  %v3477_v45 = vmul.f32 %v6123_v29, %v6123_v29 }
 0x225   :  { %v3489_v12 = vadd.f32 %v3488_v16, %v3467_v17  ;;  %3394 = vst [vmem:[%s6288_s2 + $0xb8] sm:$0xff] %v6193_v22  ;;  %v3364_v25 = vpop.f32.mrb[36].mxu1  ;;  %v3478_v16 = vmul.f32 %v6125_v33, %v6125_v33  ;;  %v3479_v19 = vmul.f32 %v6134_v37, %v6134_v37 }
 0x226   :  { %v3324_v47 = vpop.f32.mrb[8].mxu0  ;;  %v3507_v26 = vadd.f32 %v3506_v20, %v3468_v24  ;;  %v6204_v15 = vadd.f32 %v6119_v18, %v3364_v25  ;;  %v3366_v30 = vpop.f32.mrb[37].mxu1 }
 0x227   :  { %v4009_v27 = vadd.f32 %v3324_v47, %v6099_v48  ;;  %v3326_v28 = vpop.f32.mrb[9].mxu0  ;;  %v6208_v32 = vadd.f32 %v6121_v21, %v3366_v30  ;;  %v3368_v35 = vpop.f32.mrb[38].mxu1 }
 0x228   :  { %v4010_v31 = vadd.f32 %v3326_v28, %v6101_v49  ;;  %v3328_v34 = vpop.f32.mrb[10].mxu0  ;;  %3395 = vst [vmem:[%s6288_s2 + $0xc0] sm:$0xff] %v6204_v15  ;;  %v3369_v49 = vpop.f32.mrb[39].mxu1 }
 0x229   :  { %3379 = vst [vmem:[%s6288_s2 + $0x40] sm:$0xff] %v4009_v27  ;;  %v3404_v36 = vadd.f32 %v4009_v27, %v3403_v46  ;;  %v3469_v38 = vmul.f32 %v4009_v27, %v4009_v27  ;;  %v4011_v48 = vadd.f32 %v3328_v34, %v6103_v50  ;;  %v3330_v18 = vpop.f32.mrb[11].mxu0  ;;  %3396 = vst [vmem:[%s6288_s2 + $0xc8] sm:$0xff] %v6208_v32 }
 0x22a   :  { %3380 = vst [vmem:[%s6288_s2 + $0x48] sm:$0xff] %v4010_v31  ;;  %v3422_v21 = vadd.f32 %v4010_v31, %v3421_v23  ;;  %v3470_v39 = vmul.f32 %v4010_v31, %v4010_v31  ;;  %v4012_v40 = vadd.f32 %v3330_v18, %v6105_v51  ;;  %v3480_v23 = vmul.f32 %v6144_v41, %v6144_v41 }
 0x22b   :  { %v3490_v56 = vadd.f32 %v3489_v12, %v3469_v38  ;;  %3381 = vst [vmem:[%s6288_s2 + $0x50] sm:$0xff] %v4011_v48  ;;  %v3405_v50 = vadd.f32 %v4011_v48, %v3404_v36  ;;  %v3471_v42 = vmul.f32 %v4011_v48, %v4011_v48 }
 0x22c   :  { %v3508_v57 = vadd.f32 %v3507_v26, %v3470_v39  ;;  %3382 = vst [vmem:[%s6288_s2 + $0x58] sm:$0xff] %v4012_v40  ;;  %v3423_v58 = vadd.f32 %v4012_v40, %v3422_v21  ;;  %v3472_v43 = vmul.f32 %v4012_v40, %v4012_v40 }
 0x22d   :  { %v3491_v59 = vadd.f32 %v3490_v56, %v3471_v42 }
 0x22e   :  { %v3509_v60 = vadd.f32 %v3508_v57, %v3472_v43  ;;  %v3334_v61 = vpop.f32.mrb[12].mxu0  ;;  %v3443_v57 = vlaneseq }
 0x22f   :  { %v4013_v62 = vadd.f32 %v3334_v61, %v6107_v52  ;;  %v3336_v51 = vpop.f32.mrb[13].mxu0 }
 0x230   :  { %v4014_v63 = vadd.f32 %v3336_v51, %v6109_v53  ;;  %v3338_v0 = vpop.f32.mrb[14].mxu0  ;;  %vm3457_vm0 = vcmp.lt.s32.totalorder %v3443_v57, 256 }
 0x231   :  { %3383 = vst [vmem:[%s6288_s2 + $0x60] sm:$0xff] %v4013_v62  ;;  %v3406_v2 = vadd.f32 %v4013_v62, %v3405_v50  ;;  %v3473_v3 = vmul.f32 %v4013_v62, %v4013_v62  ;;  %v4015_v4 = vadd.f32 %v3338_v0, %v6111_v54  ;;  %v3340_v7 = vpop.f32.mrb[15].mxu0  ;;  %v4836_v50 = vmov 1966171168  }
 0x232   :  { %3384 = vst [vmem:[%s6288_s2 + $0x68] sm:$0xff] %v4014_v63  ;;  %v3424_v8 = vadd.f32 %v4014_v63, %v3423_v58  ;;  %v3474_v10 = vmul.f32 %v4014_v63, %v4014_v63  ;;  %v4016_v52 = vadd.f32 %v3340_v7, %v6113_v55  ;;  %v3441_v42 = vunpack.c.l.s4 %v4836_v50 }
 0x233   :  { %v3492_v11 = vadd.f32 %v3491_v59, %v3473_v3  ;;  %3385 = vst [vmem:[%s6288_s2 + $0x70] sm:$0xff] %v4015_v4  ;;  %v3407_v53 = vadd.f32 %v4015_v4, %v3406_v2  ;;  %v3475_v44 = vmul.f32 %v4015_v4, %v4015_v4  ;;  %v3444_v63 = vshrl.u32 %v3443_v57, 7 }
 0x234   :  { %v3510_v6 = vadd.f32 %v3509_v60, %v3474_v10  ;;  %3386 = vst [vmem:[%s6288_s2 + $0x78] sm:$0xff] %v4016_v52  ;;  %v3425_v54 = vadd.f32 %v4016_v52, %v3424_v8  ;;  %v3476_v13 = vmul.f32 %v4016_v52, %v4016_v52 }
 0x235   :  { %v3408_v9 = vadd.f32 %v6123_v29, %v3407_v53  ;;  %v3493_v55 = vadd.f32 %v3492_v11, %v3475_v44  ;;  %v3481_v29 = vmul.f32 %v6161_v1, %v6161_v1 }
 0x236   :  { %v3426_v46 = vadd.f32 %v6125_v33, %v3425_v54  ;;  %v3511_v17 = vadd.f32 %v3510_v6, %v3476_v13  ;;  %v3482_v33 = vmul.f32 %v6164_v5, %v6164_v5 }
 0x237   :  { %v3409_v20 = vadd.f32 %v6134_v37, %v3408_v9  ;;  %v3494_v12 = vadd.f32 %v3493_v55, %v3477_v45  ;;  %v3483_v37 = vmul.f32 %v6182_v14, %v6182_v14 }
 0x238   :  { %v3427_v24 = vadd.f32 %v6144_v41, %v3426_v46  ;;  %v3512_v47 = vadd.f32 %v3511_v17, %v3478_v16  ;;  %v3484_v41 = vmul.f32 %v6193_v22, %v6193_v22 }
 0x239   :  { %v3410_v25 = vadd.f32 %v6161_v1, %v3409_v20  ;;  %v3495_v26 = vadd.f32 %v3494_v12, %v3479_v19  ;;  %v3485_v1 = vmul.f32 %v6204_v15, %v6204_v15 }
 0x23a   :  { %v3428_v27 = vadd.f32 %v6164_v5, %v3427_v24  ;;  %v3513_v28 = vadd.f32 %v3512_v47, %v3480_v23  ;;  %v3486_v5 = vmul.f32 %v6208_v32, %v6208_v32 }
 0x23b   :  { %v3411_v30 = vadd.f32 %v6182_v14, %v3410_v25  ;;  %v3496_v31 = vadd.f32 %v3495_v26, %v3481_v29 }
 0x23c   :  { %v3429_v34 = vadd.f32 %v6193_v22, %v3428_v27  ;;  %v3514_v35 = vadd.f32 %v3513_v28, %v3482_v33 }
 0x23d   :  { %v3412_v36 = vadd.f32 %v6204_v15, %v3411_v30  ;;  %v3497_v38 = vadd.f32 %v3496_v31, %v3483_v37 }
 0x23e   :  { %v3430_v48 = vadd.f32 %v6208_v32, %v3429_v34  ;;  %v3515_v18 = vadd.f32 %v3514_v35, %v3484_v41  ;;  %v3442_v32 = vunpack.c.0.s8 %v3441_v42 }
 0x23f   :  { %v3413_v14 = vrot.slane %v3412_v36, 4  ;;  %v3498_v49 = vadd.f32 %v3497_v38, %v3485_v1 }
 0x240   :  { %v3431_v21 = vrot.slane %v3430_v48, 4  ;;  %v3516_v39 = vadd.f32 %v3515_v18, %v3486_v5  ;;  %v3445_v11 = vsub.s32 %v3442_v32, %v3444_v63 }
 0x241   :  { %v3414_v40 = vadd.f32 %v3413_v14, %v3412_v36  ;;  %v3499_v56 = vrot.slane %v3498_v49, 4 }
 0x242   :  { %v3432_v22 = vadd.f32 %v3431_v21, %v3430_v48  ;;  %v3517_v58 = vrot.slane %v3516_v39, 4 }
 0x243   :  { %v3415_v43 = vrot.slane %v3414_v40, 2  ;;  %v3500_v15 = vadd.f32 %v3499_v56, %v3498_v49 }
 0x244   :  { %v3433_v59 = vrot.slane %v3432_v22, 2  ;;  %v3518_v60 = vadd.f32 %v3517_v58, %v3516_v39 }
 0x245   :  { %v3416_v61 = vadd.f32 %v3415_v43, %v3414_v40  ;;  %v3501_v62 = vrot.slane %v3500_v15, 2 }
 0x246   :  { %v3434_v51 = vadd.f32 %v3433_v59, %v3432_v22  ;;  %v3519_v0 = vrot.slane %v3518_v60, 2 }
 0x247   :  { %v3417_v2 = vrot.slane %v3416_v61, 1  ;;  %v3502_v3 = vadd.f32 %v3501_v62, %v3500_v15 }
 0x248   :  { %v3435_v4 = vrot.slane %v3434_v51, 1  ;;  %v3520_v7 = vadd.f32 %v3519_v0, %v3518_v60 }
 0x249   :  { %v3418_v8 = vadd.f32 %v3417_v2, %v3416_v61  ;;  %v3503_v10 = vrot.slane %v3502_v3, 1 }
 0x24a   :  { %v3436_v52 = vadd.f32 %v3435_v4, %v3434_v51  ;;  %v3521_v53 = vrot.slane %v3520_v7, 1 }
 0x24b   :  { %v3504_v44 = vadd.f32 %v3503_v10, %v3502_v3 }
 0x24c   :  { %v3439_v6 = vcombine.low %v3418_v8, %v3436_v52  ;;  %v3522_v54 = vadd.f32 %v3521_v53, %v3520_v7 }
 0x24e   :  { %v3446_v13 = vrot.slane %v3439_v6, %v3445_v11  ;;  %v3525_v45 = vcombine.low %v3504_v44, %v3522_v54 }
 0x250   :  { %v3453_v9 = vrot.slane %v3446_v13, %v3445_v11  ;;  %v3532_v55 = vrot.slane %v3525_v45, %v3445_v11 }
 0x252   :  { %3459 = vst.msk [vmem:[%s6286_s3] ss:$8 sm:$0x3] %vm3457_vm0, %v3453_v9  ;;  %v3539_v16 = vrot.slane %v3532_v55, %v3445_v11 }
 0x254   :  { %3541 = vst.msk [vmem:[%s6287_s4] ss:$8 sm:$0x3] %vm3457_vm0, %v3539_v16 }

// kernel: generator_forward.9
= control target key start
LH: loop header
LB: loop body
LE: loop exit
PB: predicated region body
PF: predicated region fallthrough
CT: control target
= control target key end

     0   :  { %v2664_v0 = vmov 0   ;;  %v2665_v24 = vmov 0.0   ;;  %vm2666_vm0 = vmmov 0   ;;  %vm1067_vm1 = vcmask 523264   ;;  %s3688_s1 = inlined_call_operand.vmem [shape: bf16[576,128], index: 1, kind: input, shape index: {}]   ;;  %s3689_s0 = inlined_call_operand.vmem [shape: bf16[392,576], index: 0, kind: input, shape index: {}]   ;;  %s3690_s2 = inlined_call_operand.vmem [shape: f32[1,4], index: 2, kind: input, shape index: {}]   ;;  %s3691_s3 = inlined_call_operand.vmem [shape: f32[392,4], index: 3, kind: output, shape index: {}]  }
   0x1   :  { %1143 = vmatprep.subr.bf16.mxu0 %v2664_v0  ;;  %2322 = vmatprep.subr.bf16.mxu1 %v2664_v0  ;;  %v2357_v1 = vld [vmem:[%s3688_s1] sm:$0xff]   ;;  %v2358_v2 = vld [vmem:[%s3688_s1 + $0x8] sm:$0xff]   ;;  %v2359_v3 = vld [vmem:[%s3688_s1 + $0x10] sm:$0xff]   ;;  %vm1944_vm2 = vcmask 31744  }
   0x2   :  { %1144 = vmatpush1.bf16.msra.mxu0 %v2357_v1  ;;  %2338 = vmatpush1.bf16.msra.mxu1 %v2357_v1  ;;  %v2360_v4 = vld [vmem:[%s3688_s1 + $0x18] sm:$0xff]   ;;  %v2361_v5 = vld [vmem:[%s3688_s1 + $0x20] sm:$0xff]   ;;  %v2362_v7 = vld [vmem:[%s3688_s1 + $0x28] sm:$0xff]  }
   0x3   :  { %1145 = vmatprep.subr.bf16.mxu0 %v2664_v0  ;;  %2323 = vmatprep.subr.bf16.mxu1 %v2664_v0  ;;  %v2375_v6 = vld [vmem:[%s3689_s0 + $0x4] ss:$20 sps:$4 sm:$0xff]   ;;  %v2378_v8 = vld [vmem:[%s3689_s0 + $0x20c] ss:$20 sps:$4 sm:$0xff]   ;;  %v2363_v9 = vld [vmem:[%s3688_s1 + $0x30] sm:$0xff]  }
   0x4   :  { %1175 = vmatprep.mubr.bf16.mxu0 %v2375_v6  ;;  %1279 = vmatprep.mubr.bf16.mxu1 %v2378_v8  ;;  %v2364_v10 = vld [vmem:[%s3688_s1 + $0x38] sm:$0xff]   ;;  %v2365_v11 = vld [vmem:[%s3688_s1 + $0x40] sm:$0xff]   ;;  %v2366_v12 = vld [vmem:[%s3688_s1 + $0x48] sm:$0xff]  }
   0x5   :  { %v2367_v13 = vld [vmem:[%s3688_s1 + $0x50] sm:$0xff]   ;;  %v2368_v14 = vld [vmem:[%s3688_s1 + $0x58] sm:$0xff]   ;;  %v2369_v15 = vld [vmem:[%s3688_s1 + $0x60] sm:$0xff]  }
   0x6   :  { %1146 = vmatpush1.bf16.msra.mxu0 %v2358_v2  ;;  %2339 = vmatpush1.bf16.msra.mxu1 %v2358_v2  ;;  %v2370_v16 = vld [vmem:[%s3688_s1 + $0x68] sm:$0xff]   ;;  %v2371_v17 = vld [vmem:[%s3688_s1 + $0x70] sm:$0xff]   ;;  %v2372_v18 = vld [vmem:[%s3688_s1 + $0x78] sm:$0xff]  }
   0x7   :  { %1147 = vmatprep.subr.bf16.mxu0 %v2664_v0  ;;  %2324 = vmatprep.subr.bf16.mxu1 %v2664_v0  ;;  %v2373_v19 = vld [vmem:[%s3689_s0] ss:$20 sps:$4 sm:$0xff]   ;;  %v2376_v20 = vld [vmem:[%s3689_s0 + $0x208] ss:$20 sps:$4 sm:$0xff]   ;;  %v2386_v29 = vld [vmem:[%s3689_s0 + $0x230] ss:$20 sps:$4 sm:$0xff]  }
   0x8   :  { %v2379_v21 = vld [vmem:[%s3688_s1 + $0x100] sm:$0xff]   ;;  %v2382_v23 = vld [vmem:[%s3689_s0 + $0x234] ss:$20 sps:$4 sm:$0xff]   ;;  %v2390_v31 = vld [vmem:[%s3689_s0 + $0x25c] ss:$20 sps:$4 sm:$0xff]  }
   0x9   :  { %v2380_v22 = vld [vmem:[%s3689_s0 + $0x2c] ss:$20 sps:$4 sm:$0xff]   ;;  %v2385_v28 = vld [vmem:[%s3689_s0 + $0x28] ss:$20 sps:$4 sm:$0xff]   ;;  %v2394_v32 = vld [vmem:[%s3688_s1 + $0x90] sm:$0xff]  }
   0xa   :  { %1148 = vmatpush1.bf16.msra.mxu0 %v2359_v3  ;;  %2340 = vmatpush1.bf16.msra.mxu1 %v2359_v3  ;;  %v2384_v25 = vld [vmem:[%s3688_s1 + $0x80] sm:$0xff]   ;;  %v2402_v26 = vld [vmem:[%s3688_s1 + $0x108] sm:$0xff]   ;;  %v2425_v33 = vld [vmem:[%s3688_s1 + $0x110] sm:$0xff]  }
   0xb   :  { %1149 = vmatprep.subr.bf16.mxu0 %v2664_v0  ;;  %2325 = vmatprep.subr.bf16.mxu1 %v2664_v0  ;;  %v2387_v27 = vld [vmem:[%s3688_s1 + $0x88] sm:$0xff]   ;;  %v2401_v34 = vld [vmem:[%s3688_s1 + $0x98] sm:$0xff]   ;;  %v2392_v36 = vld [vmem:[%s3689_s0 + $0x50] ss:$20 sps:$4 sm:$0xff]  }
   0xc   :  { %v2388_v30 = vld [vmem:[%s3689_s0 + $0x54] ss:$20 sps:$4 sm:$0xff]   ;;  %v2453_v35 = vld [vmem:[%s3688_s1 + $0x118] sm:$0xff]   ;;  %v2407_v40 = vld [vmem:[%s3688_s1 + $0xa0] sm:$0xff]  }
   0xd   :  { %v2393_v37 = vld [vmem:[%s3689_s0 + $0x258] ss:$20 sps:$4 sm:$0xff]   ;;  %v2395_v38 = vld [vmem:[%s3689_s0 + $0x7c] ss:$20 sps:$4 sm:$0xff]   ;;  %v2400_v42 = vld [vmem:[%s3689_s0 + $0x280] ss:$20 sps:$4 sm:$0xff]  }
   0xe   :  { %1150 = vmatpush1.bf16.msra.mxu0 %v2360_v4  ;;  %2341 = vmatpush1.bf16.msra.mxu1 %v2360_v4  ;;  %v2397_v39 = vld [vmem:[%s3689_s0 + $0x284] ss:$20 sps:$4 sm:$0xff]   ;;  %v2410_v43 = vld [vmem:[%s3688_s1 + $0xa8] sm:$0xff]   ;;  %v2417_v46 = vld [vmem:[%s3688_s1 + $0xb0] sm:$0xff]  }
   0xf   :  { %1151 = vmatprep.subr.bf16.mxu0 %v2664_v0  ;;  %2326 = vmatprep.subr.bf16.mxu1 %v2664_v0  ;;  %v2399_v41 = vld [vmem:[%s3689_s0 + $0x78] ss:$20 sps:$4 sm:$0xff]   ;;  %v2408_v48 = vld [vmem:[%s3689_s0 + $0xa0] ss:$20 sps:$4 sm:$0xff]   ;;  %v2409_v49 = vld [vmem:[%s3689_s0 + $0x2a8] ss:$20 sps:$4 sm:$0xff]  }
  0x10   :  { %v2403_v44 = vld [vmem:[%s3689_s0 + $0xa4] ss:$20 sps:$4 sm:$0xff]   ;;  %v2405_v45 = vld [vmem:[%s3689_s0 + $0x2ac] ss:$20 sps:$4 sm:$0xff]   ;;  %v2413_v51 = vld [vmem:[%s3689_s0 + $0x2d4] ss:$20 sps:$4 sm:$0xff]  }
  0x11   :  { %v2424_v47 = vld [vmem:[%s3688_s1 + $0xb8] sm:$0xff]   ;;  %v2411_v50 = vld [vmem:[%s3689_s0 + $0xcc] ss:$20 sps:$4 sm:$0xff]   ;;  %v2416_v55 = vld [vmem:[%s3689_s0 + $0x2d0] ss:$20 sps:$4 sm:$0xff]  }
  0x12   :  { %1152 = vmatpush1.bf16.msra.mxu0 %v2361_v5  ;;  %2342 = vmatpush1.bf16.msra.mxu1 %v2361_v5  ;;  %v2430_v52 = vld [vmem:[%s3688_s1 + $0xc0] sm:$0xff]   ;;  %v2433_v53 = vld [vmem:[%s3688_s1 + $0xc8] sm:$0xff]   ;;  %v2420_v57 = vld [vmem:[%s3689_s0 + $0x2fc] ss:$20 sps:$4 sm:$0xff]  }
  0x13   :  { %1153 = vmatprep.subr.bf16.mxu0 %v2664_v0  ;;  %2327 = vmatprep.subr.bf16.mxu1 %v2664_v0  ;;  %v2415_v54 = vld [vmem:[%s3689_s0 + $0xc8] ss:$20 sps:$4 sm:$0xff]   ;;  %v2440_v58 = vld [vmem:[%s3688_s1 + $0xd0] sm:$0xff]   ;;  %v2423_v61 = vld [vmem:[%s3689_s0 + $0x2f8] ss:$20 sps:$4 sm:$0xff]  }
  0x14   :  { %v2418_v56 = vld [vmem:[%s3689_s0 + $0xf4] ss:$20 sps:$4 sm:$0xff]   ;;  %v2447_v59 = vld [vmem:[%s3688_s1 + $0xd8] sm:$0xff]   ;;  %v2422_v60 = vld [vmem:[%s3689_s0 + $0xf0] ss:$20 sps:$4 sm:$0xff]  }
  0x15   :  { %v2426_v62 = vld [vmem:[%s3689_s0 + $0x11c] ss:$20 sps:$4 sm:$0xff]   ;;  %v2428_v63 = vld [vmem:[%s3689_s0 + $0x324] ss:$20 sps:$4 sm:$0xff]   ;;  %v2456_v2 = vld [vmem:[%s3688_s1 + $0xe8] sm:$0xff]  }
  0x16   :  { %1154 = vmatpush1.bf16.msra.mxu0 %v2362_v7  ;;  %2343 = vmatpush1.bf16.msra.mxu1 %v2362_v7  ;;  %v2452_v1 = vld [vmem:[%s3688_s1 + $0xe0] sm:$0xff]   ;;  %v2431_v3 = vld [vmem:[%s3689_s0 + $0x118] ss:$20 sps:$4 sm:$0xff]   ;;  %v2462_v7 = vld [vmem:[%s3688_s1 + $0xf0] sm:$0xff]  }
  0x17   :  { %1155 = vmatprep.subr.bf16.mxu0 %v2664_v0  ;;  %2328 = vmatprep.subr.bf16.mxu1 %v2664_v0  ;;  %v2432_v4 = vld [vmem:[%s3689_s0 + $0x320] ss:$20 sps:$4 sm:$0xff]   ;;  %v2434_v5 = vld [vmem:[%s3689_s0 + $0x144] ss:$20 sps:$4 sm:$0xff]  }
  0x18   :  { %v2436_v6 = vld [vmem:[%s3689_s0 + $0x34c] ss:$20 sps:$4 sm:$0xff]   ;;  %v2463_v8 = vld [vmem:[%s3688_s1 + $0xf8] sm:$0xff]  }
  0x1a   :  { %1156 = vmatpush1.bf16.msra.mxu0 %v2363_v9  ;;  %2344 = vmatpush1.bf16.msra.mxu1 %v2363_v9  ;;  %v2438_v9 = vld [vmem:[%s3689_s0 + $0x140] ss:$20 sps:$4 sm:$0xff]  }
  0x1b   :  { %1157 = vmatprep.subr.bf16.mxu0 %v2664_v0  ;;  %2329 = vmatprep.subr.bf16.mxu1 %v2664_v0 }
  0x1e   :  { %1158 = vmatpush1.bf16.msra.mxu0 %v2364_v10  ;;  %2345 = vmatpush1.bf16.msra.mxu1 %v2364_v10  ;;  %v2439_v10 = vld [vmem:[%s3689_s0 + $0x348] ss:$20 sps:$4 sm:$0xff]  }
  0x1f   :  { %1159 = vmatprep.subr.bf16.mxu0 %v2664_v0  ;;  %2330 = vmatprep.subr.bf16.mxu1 %v2664_v0 }
  0x22   :  { %1160 = vmatpush1.bf16.msra.mxu0 %v2365_v11  ;;  %2346 = vmatpush1.bf16.msra.mxu1 %v2365_v11  ;;  %v2441_v11 = vld [vmem:[%s3689_s0 + $0x16c] ss:$20 sps:$4 sm:$0xff]  }
  0x23   :  { %1161 = vmatprep.subr.bf16.mxu0 %v2664_v0  ;;  %2331 = vmatprep.subr.bf16.mxu1 %v2664_v0 }
  0x26   :  { %1162 = vmatpush1.bf16.msra.mxu0 %v2366_v12  ;;  %2347 = vmatpush1.bf16.msra.mxu1 %v2366_v12  ;;  %v2443_v12 = vld [vmem:[%s3689_s0 + $0x374] ss:$20 sps:$4 sm:$0xff]  }
  0x27   :  { %1163 = vmatprep.subr.bf16.mxu0 %v2664_v0  ;;  %2332 = vmatprep.subr.bf16.mxu1 %v2664_v0 }
  0x2a   :  { %1164 = vmatpush1.bf16.msra.mxu0 %v2367_v13  ;;  %2348 = vmatpush1.bf16.msra.mxu1 %v2367_v13  ;;  %v2446_v13 = vld [vmem:[%s3689_s0 + $0x370] ss:$20 sps:$4 sm:$0xff]  }
  0x2b   :  { %1165 = vmatprep.subr.bf16.mxu0 %v2664_v0  ;;  %2333 = vmatprep.subr.bf16.mxu1 %v2664_v0 }
  0x2e   :  { %1166 = vmatpush1.bf16.msra.mxu0 %v2368_v14  ;;  %2349 = vmatpush1.bf16.msra.mxu1 %v2368_v14  ;;  %v2448_v14 = vld [vmem:[%s3689_s0 + $0x194] ss:$20 sps:$4 sm:$0xff]  }
  0x2f   :  { %1167 = vmatprep.subr.bf16.mxu0 %v2664_v0  ;;  %2334 = vmatprep.subr.bf16.mxu1 %v2664_v0 }
  0x32   :  { %1168 = vmatpush1.bf16.msra.mxu0 %v2369_v15  ;;  %2350 = vmatpush1.bf16.msra.mxu1 %v2369_v15  ;;  %v2450_v15 = vld [vmem:[%s3689_s0 + $0x39c] ss:$20 sps:$4 sm:$0xff]  }
  0x33   :  { %1169 = vmatprep.subr.bf16.mxu0 %v2664_v0  ;;  %2335 = vmatprep.subr.bf16.mxu1 %v2664_v0 }
  0x36   :  { %1170 = vmatpush1.bf16.msra.mxu0 %v2370_v16  ;;  %2351 = vmatpush1.bf16.msra.mxu1 %v2370_v16  ;;  %v159_v16 = vld [vmem:[%s3689_s0 + $0x3c0] sm:$0xff] }
  0x37   :  { %1171 = vmatprep.subr.bf16.mxu0 %v2664_v0  ;;  %2336 = vmatprep.subr.bf16.mxu1 %v2664_v0 }
  0x3a   :  { %1172 = vmatpush1.bf16.msra.mxu0 %v2371_v17  ;;  %2352 = vmatpush1.bf16.msra.mxu1 %v2371_v17  ;;  %v2454_v17 = vld [vmem:[%s3689_s0 + $0x190] ss:$20 sps:$4 sm:$0xff]  }
  0x3b   :  { %1173 = vmatprep.subr.bf16.mxu0 %v2664_v0  ;;  %2337 = vmatprep.subr.bf16.mxu1 %v2664_v0 }
  0x3e   :  { %1174 = vmatpush1.bf16.msra.mxu0 %v2372_v18  ;;  %2353 = vmatpush1.bf16.msra.mxu1 %v2372_v18  ;;  %v2455_v18 = vld [vmem:[%s3689_s0 + $0x398] ss:$20 sps:$4 sm:$0xff]  }
  0x3f   :  { %2214 = vmatprep.subr.bf16.mxu0 %v2665_v24  ;;  %1375 = vmatprep.subr.bf16.mxu1 %v2664_v0 }
  0x41   :  { %1176 = vmatmul.mubr.bf16.vlgmr.msra.gmra.mrb[0].mxu0 %v2373_v19  ;;  %1280 = vmatmul.mubr.bf16.vlgmr.msra.gmra.mrb[0].mxu1 %v2376_v20  ;;  %v2457_v19 = vld [vmem:[%s3689_s0 + $0x1bc] ss:$20 sps:$4 sm:$0xff]   ;;  %v2119_v20 = vcombine.high %v159_v16, %v159_v16 }
  0x42   :  { %2215 = vmatpush3.bf16.msra.mxu0 %v2379_v21  ;;  %1183 = vmatprep.mubr.bf16.mxu0 %v2380_v22  ;;  %v2460_v21 = vld [vmem:[%s3689_s0 + $0x1b8] ss:$20 sps:$4 sm:$0xff]   ;;  %v2118_v22 = vcombine.low %v159_v16, %v159_v16 }
  0x43   :  { %1287 = vmatprep.mubr.bf16.mxu1 %v2382_v23  ;;  %1376 = vmatpush1.bf16.msra.mxu1 %v2384_v25  ;;  %v2464_v23 = vld [vmem:[%s3689_s0 + $0x1e4] ss:$20 sps:$4 sm:$0xff]   ;;  %v2468_v25 = vld [vmem:[%s3689_s0 + $0xc] ss:$20 sps:$4 sm:$0xff]  }
  0x44   :  { %1377 = vmatprep.subr.bf16.mxu1 %v2664_v0  ;;  %2216 = vmatprep.subr.bf16.mxu0 %v2665_v24 }
  0x46   :  { %2217 = vmatpush3.bf16.msra.mxu0 %v2402_v26  ;;  %v2466_v26 = vld [vmem:[%s3689_s0 + $0x8] ss:$20 sps:$4 sm:$0xff]  }
  0x47   :  { %1378 = vmatpush1.bf16.msra.mxu1 %v2387_v27  ;;  %2218 = vmatprep.subr.bf16.mxu0 %v2665_v24  ;;  %v2469_v27 = vld [vmem:[%s3689_s0 + $0x1e0] ss:$20 sps:$4 sm:$0xff]  }
  0x48   :  { %1379 = vmatprep.subr.bf16.mxu1 %v2664_v0 }
  0x49   :  { %1184 = vmatmul.mubr.bf16.gmra.mrb[4].mxu0 %v2385_v28  ;;  %1288 = vmatmul.mubr.bf16.gmra.mrb[4].mxu1 %v2386_v29  ;;  %v2470_v28 = vld [vmem:[%s3689_s0 + $0x34] ss:$20 sps:$4 sm:$0xff]   ;;  %v2472_v29 = vld [vmem:[%s3689_s0 + $0x30] ss:$20 sps:$4 sm:$0xff]  }
  0x4a   :  { %1191 = vmatprep.mubr.bf16.mxu0 %v2388_v30  ;;  %1295 = vmatprep.mubr.bf16.mxu1 %v2390_v31  ;;  %v2473_v30 = vld [vmem:[%s3689_s0 + $0x10] ss:$20 sps:$4 sm:$0xff]  }
  0x4b   :  { %1380 = vmatpush1.bf16.msra.mxu1 %v2394_v32  ;;  %2219 = vmatpush3.bf16.msra.mxu0 %v2425_v33  ;;  %v2474_v31 = vld [vmem:[%s3689_s0 + $0x5c] ss:$20 sps:$4 sm:$0xff]   ;;  %v2476_v32 = vld [vmem:[%s3689_s0 + $0x58] ss:$20 sps:$4 sm:$0xff]  }
  0x4c   :  { %1381 = vmatprep.subr.bf16.mxu1 %v2664_v0  ;;  %2220 = vmatprep.subr.bf16.mxu0 %v2665_v24  ;;  %v2477_v33 = vld [vmem:[%s3689_s0 + $0x38] ss:$20 sps:$4 sm:$0xff]  }
  0x4f   :  { %1382 = vmatpush1.bf16.msra.mxu1 %v2401_v34  ;;  %2221 = vmatpush3.bf16.msra.mxu0 %v2453_v35  ;;  %v2478_v34 = vld [vmem:[%s3689_s0 + $0x84] ss:$20 sps:$4 sm:$0xff]   ;;  %v2480_v35 = vld [vmem:[%s3689_s0 + $0x80] ss:$20 sps:$4 sm:$0xff]  }
  0x50   :  { %1383 = vmatprep.subr.bf16.mxu1 %v2664_v0 }
  0x51   :  { %1192 = vmatmul.mubr.bf16.gmra.mrb[8].mxu0 %v2392_v36  ;;  %1296 = vmatmul.mubr.bf16.gmra.mrb[8].mxu1 %v2393_v37  ;;  %v2481_v36 = vld [vmem:[%s3689_s0 + $0x60] ss:$20 sps:$4 sm:$0xff]  }
  0x52   :  { %1199 = vmatprep.mubr.bf16.mxu0 %v2395_v38  ;;  %1303 = vmatprep.mubr.bf16.mxu1 %v2397_v39  ;;  %v2482_v37 = vld [vmem:[%s3689_s0 + $0xac] ss:$20 sps:$4 sm:$0xff]   ;;  %v2484_v38 = vld [vmem:[%s3689_s0 + $0xa8] ss:$20 sps:$4 sm:$0xff]  }
  0x53   :  { %1384 = vmatpush1.bf16.msra.mxu1 %v2407_v40  ;;  %v2485_v39 = vld [vmem:[%s3689_s0 + $0x88] ss:$20 sps:$4 sm:$0xff]  }
  0x54   :  { %1385 = vmatprep.subr.bf16.mxu1 %v2664_v0  ;;  %v2486_v40 = vld [vmem:[%s3689_s0 + $0xd4] ss:$20 sps:$4 sm:$0xff]  }
  0x57   :  { %1386 = vmatpush1.bf16.msra.mxu1 %v2410_v43  ;;  %v2490_v43 = vld [vmem:[%s3689_s0 + $0xfc] ss:$20 sps:$4 sm:$0xff]  }
  0x58   :  { %1387 = vmatprep.subr.bf16.mxu1 %v2664_v0 }
  0x59   :  { %1200 = vmatmul.mubr.bf16.gmra.mrb[12].mxu0 %v2399_v41  ;;  %1304 = vmatmul.mubr.bf16.gmra.mrb[12].mxu1 %v2400_v42  ;;  %v2488_v41 = vld [vmem:[%s3689_s0 + $0xd0] ss:$20 sps:$4 sm:$0xff]  }
  0x5a   :  { %1207 = vmatprep.mubr.bf16.mxu0 %v2403_v44  ;;  %1311 = vmatprep.mubr.bf16.mxu1 %v2405_v45  ;;  %v2489_v42 = vld [vmem:[%s3689_s0 + $0xb0] ss:$20 sps:$4 sm:$0xff]   ;;  %v2492_v44 = vld [vmem:[%s3689_s0 + $0xf8] ss:$20 sps:$4 sm:$0xff]  }
  0x5b   :  { %1388 = vmatpush1.bf16.msra.mxu1 %v2417_v46  ;;  %v2493_v45 = vld [vmem:[%s3689_s0 + $0xd8] ss:$20 sps:$4 sm:$0xff]  }
  0x5c   :  { %1389 = vmatprep.subr.bf16.mxu1 %v2664_v0  ;;  %v2494_v46 = vld [vmem:[%s3689_s0 + $0x124] ss:$20 sps:$4 sm:$0xff]  }
  0x5f   :  { %1390 = vmatpush1.bf16.msra.mxu1 %v2424_v47  ;;  %v2496_v47 = vld [vmem:[%s3689_s0 + $0x120] ss:$20 sps:$4 sm:$0xff]  }
  0x60   :  { %1391 = vmatprep.subr.bf16.mxu1 %v2664_v0 }
  0x61   :  { %1208 = vmatmul.mubr.bf16.gmra.mrb[16].mxu0 %v2408_v48  ;;  %1312 = vmatmul.mubr.bf16.gmra.mrb[16].mxu1 %v2409_v49  ;;  %v2497_v48 = vld [vmem:[%s3689_s0 + $0x100] ss:$20 sps:$4 sm:$0xff]  }
  0x62   :  { %1215 = vmatprep.mubr.bf16.mxu0 %v2411_v50  ;;  %1319 = vmatprep.mubr.bf16.mxu1 %v2413_v51  ;;  %v2498_v49 = vld [vmem:[%s3689_s0 + $0x14c] ss:$20 sps:$4 sm:$0xff]   ;;  %v2500_v50 = vld [vmem:[%s3689_s0 + $0x148] ss:$20 sps:$4 sm:$0xff]  }
  0x63   :  { %1392 = vmatpush1.bf16.msra.mxu1 %v2430_v52  ;;  %v2501_v51 = vld [vmem:[%s3689_s0 + $0x128] ss:$20 sps:$4 sm:$0xff]  }
  0x64   :  { %1393 = vmatprep.subr.bf16.mxu1 %v2664_v0  ;;  %v2502_v52 = vld [vmem:[%s3689_s0 + $0x174] ss:$20 sps:$4 sm:$0xff]  }
  0x67   :  { %1394 = vmatpush1.bf16.msra.mxu1 %v2433_v53  ;;  %v2504_v53 = vld [vmem:[%s3689_s0 + $0x170] ss:$20 sps:$4 sm:$0xff]  }
  0x68   :  { %1395 = vmatprep.subr.bf16.mxu1 %v2664_v0 }
  0x69   :  { %1216 = vmatmul.mubr.bf16.gmra.mrb[20].mxu0 %v2415_v54  ;;  %1320 = vmatmul.mubr.bf16.gmra.mrb[20].mxu1 %v2416_v55  ;;  %v2505_v54 = vld [vmem:[%s3689_s0 + $0x150] ss:$20 sps:$4 sm:$0xff]  }
  0x6a   :  { %1223 = vmatprep.mubr.bf16.mxu0 %v2418_v56  ;;  %1327 = vmatprep.mubr.bf16.mxu1 %v2420_v57  ;;  %v2506_v55 = vld [vmem:[%s3689_s0 + $0x19c] ss:$20 sps:$4 sm:$0xff]   ;;  %v2508_v56 = vld [vmem:[%s3689_s0 + $0x198] ss:$20 sps:$4 sm:$0xff]  }
  0x6b   :  { %1396 = vmatpush1.bf16.msra.mxu1 %v2440_v58  ;;  %v2509_v57 = vld [vmem:[%s3689_s0 + $0x178] ss:$20 sps:$4 sm:$0xff]  }
  0x6c   :  { %1397 = vmatprep.subr.bf16.mxu1 %v2664_v0  ;;  %v2510_v58 = vld [vmem:[%s3689_s0 + $0x1c4] ss:$20 sps:$4 sm:$0xff]  }
  0x6f   :  { %1398 = vmatpush1.bf16.msra.mxu1 %v2447_v59  ;;  %v2512_v59 = vld [vmem:[%s3689_s0 + $0x1c0] ss:$20 sps:$4 sm:$0xff]  }
  0x70   :  { %1399 = vmatprep.subr.bf16.mxu1 %v2664_v0 }
  0x71   :  { %1224 = vmatmul.mubr.bf16.gmra.mrb[24].mxu0 %v2422_v60  ;;  %1328 = vmatmul.mubr.bf16.gmra.mrb[24].mxu1 %v2423_v61  ;;  %v2513_v60 = vld [vmem:[%s3689_s0 + $0x1a0] ss:$20 sps:$4 sm:$0xff]  }
  0x72   :  { %1231 = vmatprep.mubr.bf16.mxu0 %v2426_v62  ;;  %1335 = vmatprep.mubr.bf16.mxu1 %v2428_v63  ;;  %v2514_v61 = vld [vmem:[%s3689_s0 + $0x1ec] ss:$20 sps:$4 sm:$0xff]   ;;  %v2516_v62 = vld [vmem:[%s3689_s0 + $0x1e8] ss:$20 sps:$4 sm:$0xff]  }
  0x73   :  { %1400 = vmatpush1.bf16.msra.mxu1 %v2452_v1  ;;  %v2517_v63 = vld [vmem:[%s3689_s0 + $0x1c8] ss:$20 sps:$4 sm:$0xff]  }
  0x74   :  { %1401 = vmatprep.subr.bf16.mxu1 %v2664_v0  ;;  %v2518_v1 = vld [vmem:[%s3689_s0 + $0x214] ss:$20 sps:$4 sm:$0xff]  }
  0x77   :  { %1402 = vmatpush1.bf16.msra.mxu1 %v2456_v2  ;;  %v2520_v2 = vld [vmem:[%s3689_s0 + $0x210] ss:$20 sps:$4 sm:$0xff]  }
  0x78   :  { %1403 = vmatprep.subr.bf16.mxu1 %v2664_v0 }
  0x79   :  { %1232 = vmatmul.mubr.bf16.gmra.mrb[28].mxu0 %v2431_v3  ;;  %1336 = vmatmul.mubr.bf16.gmra.mrb[28].mxu1 %v2432_v4  ;;  %v2521_v3 = vld [vmem:[%s3689_s0 + $0x1f0] ss:$20 sps:$4 sm:$0xff]  }
  0x7a   :  { %1239 = vmatprep.mubr.bf16.mxu0 %v2434_v5  ;;  %1343 = vmatprep.mubr.bf16.mxu1 %v2436_v6  ;;  %v2522_v4 = vld [vmem:[%s3689_s0 + $0x23c] ss:$20 sps:$4 sm:$0xff]   ;;  %v2524_v5 = vld [vmem:[%s3689_s0 + $0x238] ss:$20 sps:$4 sm:$0xff]  }
  0x7b   :  { %1404 = vmatpush1.bf16.msra.mxu1 %v2462_v7  ;;  %v2525_v6 = vld [vmem:[%s3689_s0 + $0x218] ss:$20 sps:$4 sm:$0xff]  }
  0x7c   :  { %1405 = vmatprep.subr.bf16.mxu1 %v2664_v0  ;;  %v2445_v0 = vld [vmem:[%s3689_s0 + $0x168] ss:$20 sps:$4 sm:$0xff]   ;;  %v2526_v7 = vld [vmem:[%s3689_s0 + $0x264] ss:$20 sps:$4 sm:$0xff]  }
  0x7f   :  { %1406 = vmatpush1.bf16.msra.mxu1 %v2463_v8 }
  0x81   :  { %1240 = vmatmul.mubr.bf16.gmra.mrb[32].mxu0 %v2438_v9  ;;  %1344 = vmatmul.mubr.bf16.gmra.mrb[32].mxu1 %v2439_v10 }
  0x82   :  { %1247 = vmatprep.mubr.bf16.mxu0 %v2441_v11  ;;  %1351 = vmatprep.mubr.bf16.mxu1 %v2443_v12  ;;  %v2528_v12 = vld [vmem:[%s3689_s0 + $0x260] ss:$20 sps:$4 sm:$0xff]  }
  0x89   :  { %1248 = vmatmul.mubr.bf16.gmra.mrb[36].mxu0 %v2445_v0  ;;  %1352 = vmatmul.mubr.bf16.gmra.mrb[36].mxu1 %v2446_v13  ;;  %v2529_v0 = vld [vmem:[%s3689_s0 + $0x240] ss:$20 sps:$4 sm:$0xff]  }
  0x8a   :  { %1255 = vmatprep.mubr.bf16.mxu0 %v2448_v14  ;;  %1359 = vmatprep.mubr.bf16.mxu1 %v2450_v15  ;;  %v2530_v15 = vld [vmem:[%s3689_s0 + $0x28c] ss:$20 sps:$4 sm:$0xff]  }
  0x91   :  { %1256 = vmatmul.mubr.bf16.gmra.mrb[40].mxu0 %v2454_v17  ;;  %1360 = vmatmul.mubr.bf16.gmra.mrb[40].mxu1 %v2455_v18 }
  0x92   :  { %1263 = vmatprep.mubr.bf16.mxu0 %v2457_v19  ;;  %1367 = vmatprep.mubr.bf16.mxu1 %v2119_v20 }
  0x99   :  { %1264 = vmatmul.mubr.bf16.gmra.mrb[44].mxu0 %v2460_v21  ;;  %1368 = vmatmul.mubr.bf16.gmra.mrb[44].mxu1 %v2118_v22  ;;  %v2532_v22 = vld [vmem:[%s3689_s0 + $0x288] ss:$20 sps:$4 sm:$0xff]  }
  0x9a   :  { %1271 = vmatprep.mubr.bf16.mxu0 %v2464_v23  ;;  %1407 = vmatprep.mubr.bf16.mxu1 %v2468_v25  ;;  %v2533_v23 = vld [vmem:[%s3689_s0 + $0x268] ss:$20 sps:$4 sm:$0xff]  }
  0xa1   :  { %1272 = vmatmul.mubr.bf16.gmra.mrb[48].mxu0 %v2469_v27  ;;  %1408 = vmatmul.mubr.bf16.vlgmr.msra.gmra.mrb[48].mxu1 %v2466_v26  ;;  %v2534_v27 = vld [vmem:[%s3689_s0 + $0x2b4] ss:$20 sps:$4 sm:$0xff]  }
  0xa2   :  { %1415 = vmatprep.mubr.bf16.mxu1 %v2470_v28  ;;  %2222 = vmatprep.mubr.msk.bf16.mxu0 %vm2666_vm0, %v2665_v24 }
  0xa9   :  { %1416 = vmatmul.mubr.bf16.gmra.mrb[52].mxu1 %v2472_v29  ;;  %2223 = vmatmul.mubr.msk.bf16.vlgmr.msra.gmra.mrb[52].mxu0 %vm1067_vm1, %v2473_v30 }
  0xaa   :  { %1423 = vmatprep.mubr.bf16.mxu1 %v2474_v31  ;;  %2226 = vmatprep.mubr.msk.bf16.mxu0 %vm2666_vm0, %v2665_v24 }
  0xb1   :  { %1424 = vmatmul.mubr.bf16.gmra.mrb[56].mxu1 %v2476_v32  ;;  %2227 = vmatmul.mubr.msk.bf16.gmra.mrb[56].mxu0 %vm1067_vm1, %v2477_v33 }
  0xb2   :  { %1431 = vmatprep.mubr.bf16.mxu1 %v2478_v34  ;;  %2230 = vmatprep.mubr.msk.bf16.mxu0 %vm2666_vm0, %v2665_v24  ;;  %v2536_v34 = vld [vmem:[%s3689_s0 + $0x2b0] ss:$20 sps:$4 sm:$0xff]  }
  0xb9   :  { %1432 = vmatmul.mubr.bf16.gmra.mrb[60].mxu1 %v2480_v35  ;;  %2231 = vmatmul.mubr.msk.bf16.gmra.mrb[60].mxu0 %vm1067_vm1, %v2481_v36  ;;  %v2537_v35 = vld [vmem:[%s3689_s0 + $0x290] ss:$20 sps:$4 sm:$0xff]  }
  0xba   :  { %1439 = vmatprep.mubr.bf16.mxu1 %v2482_v37  ;;  %2234 = vmatprep.mubr.msk.bf16.mxu0 %vm2666_vm0, %v2665_v24 }
  0xc1   :  { %1440 = vmatmul.mubr.bf16.gmra.mrb[64].mxu1 %v2484_v38  ;;  %2235 = vmatmul.mubr.msk.bf16.gmra.mrb[64].mxu0 %vm1067_vm1, %v2485_v39  ;;  %v2538_v38 = vld [vmem:[%s3689_s0 + $0x2dc] ss:$20 sps:$4 sm:$0xff]  }
  0xc2   :  { %1447 = vmatprep.mubr.bf16.mxu1 %v2486_v40  ;;  %2238 = vmatprep.mubr.msk.bf16.mxu0 %vm2666_vm0, %v2665_v24 }
  0xc9   :  { %1448 = vmatmul.mubr.bf16.gmra.mrb[68].mxu1 %v2488_v41  ;;  %2239 = vmatmul.mubr.msk.bf16.gmra.mrb[68].mxu0 %vm1067_vm1, %v2489_v42 }
  0xca   :  { %1455 = vmatprep.mubr.bf16.mxu1 %v2490_v43  ;;  %2242 = vmatprep.mubr.msk.bf16.mxu0 %vm2666_vm0, %v2665_v24 }
  0xd1   :  { %1456 = vmatmul.mubr.bf16.gmra.mrb[72].mxu1 %v2492_v44  ;;  %2243 = vmatmul.mubr.msk.bf16.gmra.mrb[72].mxu0 %vm1067_vm1, %v2493_v45  ;;  %v2540_v45 = vld [vmem:[%s3689_s0 + $0x2d8] ss:$20 sps:$4 sm:$0xff]  }
  0xd2   :  { %1463 = vmatprep.mubr.bf16.mxu1 %v2494_v46  ;;  %2246 = vmatprep.mubr.msk.bf16.mxu0 %vm2666_vm0, %v2665_v24  ;;  %v2541_v46 = vld [vmem:[%s3689_s0 + $0x2b8] ss:$20 sps:$4 sm:$0xff]  }
  0xd9   :  { %1464 = vmatmul.mubr.bf16.gmra.mrb[76].mxu1 %v2496_v47  ;;  %2247 = vmatmul.mubr.msk.bf16.gmra.mrb[76].mxu0 %vm1067_vm1, %v2497_v48 }
  0xda   :  { %1471 = vmatprep.mubr.bf16.mxu1 %v2498_v49  ;;  %2250 = vmatprep.mubr.msk.bf16.mxu0 %vm2666_vm0, %v2665_v24  ;;  %v2542_v49 = vld [vmem:[%s3689_s0 + $0x304] ss:$20 sps:$4 sm:$0xff]  }
  0xe1   :  { %1472 = vmatmul.mubr.bf16.gmra.mrb[80].mxu1 %v2500_v50  ;;  %2251 = vmatmul.mubr.msk.bf16.gmra.mrb[80].mxu0 %vm1067_vm1, %v2501_v51 }
  0xe2   :  { %1479 = vmatprep.mubr.bf16.mxu1 %v2502_v52  ;;  %2254 = vmatprep.mubr.msk.bf16.mxu0 %vm2666_vm0, %v2665_v24 }
  0xe9   :  { %1480 = vmatmul.mubr.bf16.gmra.mrb[84].mxu1 %v2504_v53  ;;  %2255 = vmatmul.mubr.msk.bf16.gmra.mrb[84].mxu0 %vm1067_vm1, %v2505_v54 }
  0xea   :  { %1487 = vmatprep.mubr.bf16.mxu1 %v2506_v55  ;;  %2258 = vmatprep.mubr.msk.bf16.mxu0 %vm2666_vm0, %v2665_v24 }
  0xf1   :  { %1488 = vmatmul.mubr.bf16.gmra.mrb[88].mxu1 %v2508_v56  ;;  %2259 = vmatmul.mubr.msk.bf16.gmra.mrb[88].mxu0 %vm1067_vm1, %v2509_v57  ;;  %v2544_v56 = vld [vmem:[%s3689_s0 + $0x300] ss:$20 sps:$4 sm:$0xff]  }
  0xf2   :  { %1495 = vmatprep.mubr.bf16.mxu1 %v2510_v58  ;;  %2262 = vmatprep.mubr.msk.bf16.mxu0 %vm2666_vm0, %v2665_v24  ;;  %v2545_v57 = vld [vmem:[%s3689_s0 + $0x2e0] ss:$20 sps:$4 sm:$0xff]  }
  0xf9   :  { %1496 = vmatmul.mubr.bf16.gmra.mrb[92].mxu1 %v2512_v59  ;;  %2263 = vmatmul.mubr.msk.bf16.gmra.mrb[92].mxu0 %vm1067_vm1, %v2513_v60  ;;  %v2546_v60 = vld [vmem:[%s3689_s0 + $0x32c] ss:$20 sps:$4 sm:$0xff]  }
  0xfa   :  { %1503 = vmatprep.mubr.bf16.mxu1 %v2514_v61  ;;  %2266 = vmatprep.mubr.msk.bf16.mxu0 %vm2666_vm0, %v2665_v24 }
 0x101   :  { %1504 = vmatmul.mubr.bf16.gmra.mrb[96].mxu1 %v2516_v62  ;;  %2267 = vmatmul.mubr.msk.bf16.gmra.mrb[96].mxu0 %vm1067_vm1, %v2517_v63 }
 0x102   :  { %1511 = vmatprep.mubr.bf16.mxu1 %v2518_v1  ;;  %2270 = vmatprep.mubr.msk.bf16.mxu0 %vm2666_vm0, %v2665_v24 }
 0x109   :  { %1512 = vmatmul.mubr.bf16.gmra.mrb[100].mxu1 %v2520_v2  ;;  %2271 = vmatmul.mubr.msk.bf16.gmra.mrb[100].mxu0 %vm1067_vm1, %v2521_v3 }
 0x10a   :  { %1519 = vmatprep.mubr.bf16.mxu1 %v2522_v4  ;;  %2274 = vmatprep.mubr.msk.bf16.mxu0 %vm2666_vm0, %v2665_v24  ;;  %v2548_v4 = vld [vmem:[%s3689_s0 + $0x328] ss:$20 sps:$4 sm:$0xff]  }
 0x111   :  { %1520 = vmatmul.mubr.bf16.gmra.mrb[104].mxu1 %v2524_v5  ;;  %2275 = vmatmul.mubr.msk.bf16.gmra.mrb[104].mxu0 %vm1067_vm1, %v2525_v6  ;;  %v2549_v5 = vld [vmem:[%s3689_s0 + $0x308] ss:$20 sps:$4 sm:$0xff]  }
 0x112   :  { %1527 = vmatprep.mubr.bf16.mxu1 %v2526_v7  ;;  %2278 = vmatprep.mubr.msk.bf16.mxu0 %vm2666_vm0, %v2665_v24 }
 0x114   :  { %v3173_v8 = vpop.f32.mrb[0].mxu0  ;;  %v3175_v9 = vpop.f32.mrb[0].mxu1 }
 0x115   :  { %v1179_v10 = vpop.f32.mrb[1].mxu0  ;;  %v1283_v11 = vpop.f32.mrb[1].mxu1 }
 0x116   :  { %v3183_v13 = vpop.f32.mrb[2].mxu0  ;;  %v3185_v14 = vpop.f32.mrb[2].mxu1  ;;  %v2550_v10 = vld [vmem:[%s3689_s0 + $0x354] ss:$20 sps:$4 sm:$0xff]  }
 0x117   :  { %v1182_v16 = vpop.f32.mrb[3].mxu0  ;;  %v1286_v17 = vpop.f32.mrb[3].mxu1 }
 0x119   :  { %1528 = vmatmul.mubr.bf16.gmra.mrb[108].mxu1 %v2528_v12  ;;  %2279 = vmatmul.mubr.msk.bf16.gmra.mrb[108].mxu0 %vm1067_vm1, %v2529_v0 }
 0x11a   :  { %1535 = vmatprep.mubr.bf16.mxu1 %v2530_v15  ;;  %2282 = vmatprep.mubr.msk.bf16.mxu0 %vm2666_vm0, %v2665_v24 }
 0x11c   :  { %v3193_v18 = vpop.f32.mrb[4].mxu0  ;;  %v3195_v19 = vpop.f32.mrb[4].mxu1 }
 0x11d   :  { %v1187_v20 = vpop.f32.mrb[5].mxu0  ;;  %v1291_v21 = vpop.f32.mrb[5].mxu1 }
 0x11e   :  { %v3203_v25 = vpop.f32.mrb[6].mxu0  ;;  %v3205_v26 = vpop.f32.mrb[6].mxu1  ;;  %v2552_v20 = vld [vmem:[%s3689_s0 + $0x350] ss:$20 sps:$4 sm:$0xff]  }
 0x11f   :  { %v1190_v28 = vpop.f32.mrb[7].mxu0  ;;  %v1294_v29 = vpop.f32.mrb[7].mxu1  ;;  %v2553_v21 = vld [vmem:[%s3689_s0 + $0x330] ss:$20 sps:$4 sm:$0xff]  }
 0x121   :  { %1536 = vmatmul.mubr.bf16.gmra.mrb[112].mxu1 %v2532_v22  ;;  %2283 = vmatmul.mubr.msk.bf16.gmra.mrb[112].mxu0 %vm1067_vm1, %v2533_v23 }
 0x122   :  { %1543 = vmatprep.mubr.bf16.mxu1 %v2534_v27  ;;  %2286 = vmatprep.mubr.msk.bf16.mxu0 %vm2666_vm0, %v2665_v24  ;;  %v2554_v27 = vld [vmem:[%s3689_s0 + $0x37c] ss:$20 sps:$4 sm:$0xff]  }
 0x124   :  { %v3213_v30 = vpop.f32.mrb[8].mxu0  ;;  %v3215_v31 = vpop.f32.mrb[8].mxu1 }
 0x125   :  { %v1195_v32 = vpop.f32.mrb[9].mxu0  ;;  %v1299_v33 = vpop.f32.mrb[9].mxu1 }
 0x126   :  { %v3223_v36 = vpop.f32.mrb[10].mxu0  ;;  %v3225_v37 = vpop.f32.mrb[10].mxu1 }
 0x127   :  { %v1198_v39 = vpop.f32.mrb[11].mxu0  ;;  %v1302_v40 = vpop.f32.mrb[11].mxu1 }
 0x128   :  { %v2557_v39 = vld [vmem:[%s3689_s0 + $0x358] ss:$20 sps:$4 sm:$0xff]  }
 0x129   :  { %1544 = vmatmul.mubr.bf16.gmra.mrb[116].mxu1 %v2536_v34  ;;  %2287 = vmatmul.mubr.msk.bf16.gmra.mrb[116].mxu0 %vm1067_vm1, %v2537_v35 }
 0x12a   :  { %1551 = vmatprep.mubr.bf16.mxu1 %v2538_v38  ;;  %2290 = vmatprep.mubr.msk.bf16.mxu0 %vm2666_vm0, %v2665_v24  ;;  %v2556_v38 = vld [vmem:[%s3689_s0 + $0x378] ss:$20 sps:$4 sm:$0xff]  }
 0x12c   :  { %v3233_v41 = vpop.f32.mrb[12].mxu0  ;;  %v3235_v42 = vpop.f32.mrb[12].mxu1 }
 0x12d   :  { %v1203_v43 = vpop.f32.mrb[13].mxu0  ;;  %v1307_v44 = vpop.f32.mrb[13].mxu1 }
 0x12e   :  { %v3243_v47 = vpop.f32.mrb[14].mxu0  ;;  %v3245_v48 = vpop.f32.mrb[14].mxu1  ;;  %v2558_v44 = vld [vmem:[%s3689_s0 + $0x3a4] ss:$20 sps:$4 sm:$0xff]  }
 0x12f   :  { %v1206_v50 = vpop.f32.mrb[15].mxu0  ;;  %v1310_v51 = vpop.f32.mrb[15].mxu1 }
 0x131   :  { %1552 = vmatmul.mubr.bf16.gmra.mrb[120].mxu1 %v2540_v45  ;;  %2291 = vmatmul.mubr.msk.bf16.gmra.mrb[120].mxu0 %vm1067_vm1, %v2541_v46 }
 0x132   :  { %1559 = vmatprep.mubr.bf16.mxu1 %v2542_v49  ;;  %2294 = vmatprep.mubr.msk.bf16.mxu0 %vm2666_vm0, %v2665_v24  ;;  %v160_v49 = vld [vmem:[%s3689_s0 + $0x3c8] sm:$0xff] }
 0x134   :  { %v3253_v52 = vpop.f32.mrb[16].mxu0  ;;  %v3255_v53 = vpop.f32.mrb[16].mxu1 }
 0x135   :  { %v1211_v54 = vpop.f32.mrb[17].mxu0  ;;  %v1315_v55 = vpop.f32.mrb[17].mxu1 }
 0x136   :  { %v3263_v58 = vpop.f32.mrb[18].mxu0  ;;  %v3265_v59 = vpop.f32.mrb[18].mxu1 }
 0x137   :  { %v1214_v61 = vpop.f32.mrb[19].mxu0  ;;  %v1318_v62 = vpop.f32.mrb[19].mxu1 }
 0x138   :  { %v2121_v62 = vcombine.high %v160_v49, %v160_v49 }
 0x139   :  { %1560 = vmatmul.mubr.bf16.gmra.mrb[124].mxu1 %v2544_v56  ;;  %2295 = vmatmul.mubr.msk.bf16.gmra.mrb[124].mxu0 %vm1067_vm1, %v2545_v57  ;;  %v2560_v56 = vld [vmem:[%s3689_s0 + $0x3a0] ss:$20 sps:$4 sm:$0xff]  }
 0x13a   :  { %1567 = vmatprep.mubr.bf16.mxu1 %v2546_v60  ;;  %2298 = vmatprep.mubr.msk.bf16.mxu0 %vm2666_vm0, %v2665_v24  ;;  %v2561_v57 = vld [vmem:[%s3689_s0 + $0x380] ss:$20 sps:$4 sm:$0xff]  }
 0x13c   :  { %v3273_v63 = vpop.f32.mrb[20].mxu0  ;;  %v3275_v1 = vpop.f32.mrb[20].mxu1 }
 0x13d   :  { %v1219_v2 = vpop.f32.mrb[21].mxu0  ;;  %v1323_v3 = vpop.f32.mrb[21].mxu1 }
 0x13e   :  { %v3283_v6 = vpop.f32.mrb[22].mxu0  ;;  %v3285_v7 = vpop.f32.mrb[22].mxu1 }
 0x13f   :  { %v1222_v11 = vpop.f32.mrb[23].mxu0  ;;  %v1326_v12 = vpop.f32.mrb[23].mxu1 }
 0x140   :  { %v2120_v12 = vcombine.low %v160_v49, %v160_v49 }
 0x141   :  { %1568 = vmatmul.mubr.bf16.gmra.mrb[128].mxu1 %v2548_v4  ;;  %2299 = vmatmul.mubr.msk.bf16.gmra.mrb[128].mxu0 %vm1067_vm1, %v2549_v5 }
 0x142   :  { %1575 = vmatprep.mubr.bf16.mxu1 %v2550_v10  ;;  %2302 = vmatprep.mubr.msk.bf16.mxu0 %vm2666_vm0, %v2665_v24 }
 0x144   :  { %v3293_v0 = vpop.f32.mrb[24].mxu0  ;;  %v3295_v15 = vpop.f32.mrb[24].mxu1 }
 0x145   :  { %v1227_v16 = vpop.f32.mrb[25].mxu0  ;;  %v1331_v17 = vpop.f32.mrb[25].mxu1 }
 0x146   :  { %v3303_v22 = vpop.f32.mrb[26].mxu0  ;;  %v3305_v23 = vpop.f32.mrb[26].mxu1  ;;  %v2564_v16 = vld [vmem:[%s3689_s0 + $0x3a8] ss:$20 sps:$4 sm:$0xff]  }
 0x147   :  { %v1230_v28 = vpop.f32.mrb[27].mxu0  ;;  %v1334_v29 = vpop.f32.mrb[27].mxu1 }
 0x149   :  { %1576 = vmatmul.mubr.bf16.gmra.mrb[132].mxu1 %v2552_v20  ;;  %2303 = vmatmul.mubr.msk.bf16.gmra.mrb[132].mxu0 %vm1067_vm1, %v2553_v21 }
 0x14a   :  { %1583 = vmatprep.mubr.bf16.mxu1 %v2554_v27  ;;  %2306 = vmatprep.mubr.msk.bf16.mxu0 %vm2666_vm0, %v2665_v24 }
 0x14c   :  { %v3313_v32 = vpop.f32.mrb[28].mxu0  ;;  %v3315_v33 = vpop.f32.mrb[28].mxu1 }
 0x14d   :  { %v1235_v34 = vpop.f32.mrb[29].mxu0  ;;  %v1339_v35 = vpop.f32.mrb[29].mxu1 }
 0x14e   :  { %v3323_v40 = vpop.f32.mrb[30].mxu0  ;;  %v3325_v43 = vpop.f32.mrb[30].mxu1 }
 0x14f   :  { %v1238_v45 = vpop.f32.mrb[31].mxu0  ;;  %v1342_v46 = vpop.f32.mrb[31].mxu1 }
 0x151   :  { %1584 = vmatmul.mubr.bf16.gmra.mrb[136].mxu1 %v2556_v38  ;;  %2307 = vmatmul.mubr.msk.bf16.gmra.mrb[136].mxu0 %vm1067_vm1, %v2557_v39  ;;  %v2565_v38 = vld [vmem:[%s3689_s0 + $0x3d0] ss:$0 sps:$4 sm:$0xff]  }
 0x152   :  { %1591 = vmatprep.mubr.bf16.mxu1 %v2558_v44  ;;  %2310 = vmatprep.mubr.msk.bf16.mxu0 %vm2666_vm0, %v2665_v24 }
 0x154   :  { %v3336_v50 = vpop.f32.mrb[32].mxu0  ;;  %v3338_v51 = vpop.f32.mrb[32].mxu1 }
 0x155   :  { %v1243_v54 = vpop.f32.mrb[33].mxu0  ;;  %v1347_v55 = vpop.f32.mrb[33].mxu1 }
 0x156   :  { %v3346_v60 = vpop.f32.mrb[34].mxu0  ;;  %v3348_v61 = vpop.f32.mrb[34].mxu1 }
 0x157   :  { %v1246_v2 = vpop.f32.mrb[35].mxu0  ;;  %v1350_v3 = vpop.f32.mrb[35].mxu1 }
 0x159   :  { %1592 = vmatmul.mubr.bf16.gmra.mrb[140].mxu1 %v2560_v56  ;;  %2311 = vmatmul.mubr.msk.bf16.gmra.mrb[140].mxu0 %vm1067_vm1, %v2561_v57 }
 0x15a   :  { %1599 = vmatprep.mubr.bf16.mxu1 %v2121_v62  ;;  %2314 = vmatprep.mubr.msk.bf16.mxu0 %vm2666_vm0, %v2665_v24 }
 0x15c   :  { %v3353_v4 = vpop.f32.mrb[36].mxu0  ;;  %v3355_v5 = vpop.f32.mrb[36].mxu1 }
 0x15d   :  { %v1251_v10 = vpop.f32.mrb[37].mxu0  ;;  %v1355_v11 = vpop.f32.mrb[37].mxu1 }
 0x15e   :  { %v3360_v17 = vpop.f32.mrb[38].mxu0  ;;  %v3362_v20 = vpop.f32.mrb[38].mxu1 }
 0x15f   :  { %v1254_v21 = vpop.f32.mrb[39].mxu0  ;;  %v1358_v27 = vpop.f32.mrb[39].mxu1 }
 0x161   :  { %1600 = vmatmul.mubr.bf16.gmra.mrb[144].mxu1 %v2120_v12  ;;  %2315 = vmatmul.mubr.msk.bf16.gmra.mrb[144].mxu0 %vm1067_vm1, %v2564_v16 }
 0x162   :  { %2318 = vmatprep.mubr.msk.bf16.mxu0 %vm2666_vm0, %v2665_v24 }
 0x164   :  { %v3367_v28 = vpop.f32.mrb[40].mxu0  ;;  %v3369_v29 = vpop.f32.mrb[40].mxu1 }
 0x165   :  { %v1259_v34 = vpop.f32.mrb[41].mxu0  ;;  %v1363_v35 = vpop.f32.mrb[41].mxu1 }
 0x166   :  { %v3374_v39 = vpop.f32.mrb[42].mxu0  ;;  %v3376_v44 = vpop.f32.mrb[42].mxu1 }
 0x167   :  { %3692 = vst [vmem:[#allocation2_spill] sm:$0xff] %v3376_v44  ;;  %v1262_v45 = vpop.f32.mrb[43].mxu0  ;;  %v1366_v46 = vpop.f32.mrb[43].mxu1 }
 0x169   :  { %2319 = vmatmul.mubr.msk.bf16.gmra.mrb[148].mxu0 %vm1067_vm1, %v2565_v38 }
 0x16c   :  { %v3379_v49 = vpop.f32.mrb[44].mxu0  ;;  %v3381_v24 = vpop.f32.mrb[44].mxu1 }
 0x16d   :  { %3693 = vst [vmem:[#allocation3_spill] sm:$0xff] %v3381_v24  ;;  %v1267_v54 = vpop.f32.mrb[45].mxu0  ;;  %v1371_v55 = vpop.f32.mrb[45].mxu1 }
 0x16e   :  { %v3383_v56 = vpop.f32.mrb[46].mxu0  ;;  %v1372_v57 = vpop.f32.mrb[46].mxu1  ;;  %v3394_v54 = vld [vmem:[%s3690_s2] ss:$0 sm:$0xff] }
 0x16f   :  { %v1270_v62 = vpop.f32.mrb[47].mxu0  ;;  %v1373_v2 = vpop.f32.mrb[47].mxu1 }
 0x174   :  { %v3385_v3 = vpop.f32.mrb[48].mxu0  ;;  %v1409_v10 = vpop.f32.mrb[48].mxu1 }
 0x175   :  { %v1410_v11 = vadd.f32 %v1409_v10, %v3173_v8  ;;  %v1275_v12 = vpop.f32.mrb[49].mxu0  ;;  %v1411_v16 = vpop.f32.mrb[49].mxu1 }
 0x176   :  { %v3388_v21 = vpop.f32.mrb[50].mxu0  ;;  %v1412_v27 = vpop.f32.mrb[50].mxu1 }
 0x177   :  { %v1413_v34 = vadd.f32 %v1412_v27, %v3183_v13  ;;  %v1278_v35 = vpop.f32.mrb[51].mxu0  ;;  %v1414_v38 = vpop.f32.mrb[51].mxu1 }
 0x17c   :  { %v1417_v45 = vpop.f32.mrb[52].mxu1  ;;  %v1641_v46 = vpop.f32.mrb[52].mxu0 }
 0x17d   :  { %v1418_v55 = vadd.f32 %v1417_v45, %v3193_v18  ;;  %v1642_v57 = vadd.f32 %v1641_v46, %v1410_v11  ;;  %v1419_v8 = vpop.f32.mrb[53].mxu1  ;;  %v2224_v62 = vpop.f32.mrb[53].mxu0 }
 0x17e   :  { %v1420_v2 = vpop.f32.mrb[54].mxu1  ;;  %v1644_v10 = vpop.f32.mrb[54].mxu0 }
 0x17f   :  { %v1846_v12 = vadd.f32 %v3394_v54, %v1642_v57  ;;  %v1421_v13 = vadd.f32 %v1420_v2, %v3203_v25  ;;  %v1645_v16 = vadd.f32 %v1644_v10, %v1413_v34  ;;  %v2225_v27 = vpop.f32.mrb[55].mxu0  ;;  %v1422_v35 = vpop.f32.mrb[55].mxu1 }
 0x181   :  { %2566 = vtanh.f32 %v1846_v12  ;;  %v1847_v38 = vadd.f32 %v3394_v54, %v1645_v16 }
 0x183   :  { %2568 = vtanh.f32 %v1847_v38 }
 0x184   :  { %v1425_v24 = vpop.f32.mrb[56].mxu1  ;;  %v1649_v44 = vpop.f32.mrb[56].mxu0 }
 0x185   :  { %v1426_v18 = vadd.f32 %v1425_v24, %v3213_v30  ;;  %v1650_v11 = vadd.f32 %v1649_v44, %v1418_v55  ;;  %v1427_v45 = vpop.f32.mrb[57].mxu1  ;;  %v2228_v46 = vpop.f32.mrb[57].mxu0 }
 0x186   :  { %v1428_v8 = vpop.f32.mrb[58].mxu1  ;;  %v1652_v62 = vpop.f32.mrb[58].mxu0 }
 0x187   :  { %v1848_v57 = vadd.f32 %v3394_v54, %v1650_v11  ;;  %v1429_v25 = vadd.f32 %v1428_v8, %v3223_v36  ;;  %v1653_v34 = vadd.f32 %v1652_v62, %v1421_v13  ;;  %v2229_v2 = vpop.f32.mrb[59].mxu0  ;;  %v1430_v10 = vpop.f32.mrb[59].mxu1 }
 0x189   :  { %2570 = vtanh.f32 %v1848_v57  ;;  %v1849_v12 = vadd.f32 %v3394_v54, %v1653_v34 }
 0x18b   :  { %v2567_v16 = vpop.eup %2566  ;;  %2572 = vtanh.f32 %v1849_v12 }
 0x18c   :  { %1945 = vst.msk [vmem:[%s3691_s3] sm:$0xff] %vm1944_vm2, %v2567_v16  ;;  %v1433_v30 = vpop.f32.mrb[60].mxu1  ;;  %v1657_v44 = vpop.f32.mrb[60].mxu0 }
 0x18d   :  { %v2569_v24 = vpop.eup %2568  ;;  %v1434_v55 = vadd.f32 %v1433_v30, %v3233_v41  ;;  %v1658_v36 = vadd.f32 %v1657_v44, %v1426_v18  ;;  %v1435_v13 = vpop.f32.mrb[61].mxu1 }
 0x18e   :  { %v2232_v27 = vpop.f32.mrb[61].mxu0  ;;  %1946 = vst.msk [vmem:[%s3691_s3 + $0x8] sm:$0xff] %vm1944_vm2, %v2569_v24  ;;  %v1436_v35 = vpop.f32.mrb[62].mxu1 }
 0x18f   :  { %v1660_v38 = vpop.f32.mrb[62].mxu0  ;;  %v1850_v11 = vadd.f32 %v3394_v54, %v1658_v36  ;;  %v1437_v45 = vadd.f32 %v1436_v35, %v3243_v47  ;;  %v1438_v62 = vpop.f32.mrb[63].mxu1 }
 0x190   :  { %v1661_v46 = vadd.f32 %v1660_v38, %v1429_v25  ;;  %v2233_v8 = vpop.f32.mrb[63].mxu0 }
 0x191   :  { %2574 = vtanh.f32 %v1850_v11 }
 0x192   :  { %v1851_v41 = vadd.f32 %v3394_v54, %v1661_v46 }
 0x193   :  { %v2571_v18 = vpop.eup %2570 }
 0x194   :  { %2576 = vtanh.f32 %v1851_v41  ;;  %1947 = vst.msk [vmem:[%s3691_s3 + $0x10] sm:$0xff] %vm1944_vm2, %v2571_v18  ;;  %v1441_v57 = vpop.f32.mrb[64].mxu1  ;;  %v1665_v34 = vpop.f32.mrb[64].mxu0 }
 0x195   :  { %v2573_v2 = vpop.eup %2572  ;;  %v1442_v10 = vadd.f32 %v1441_v57, %v3253_v52  ;;  %v1666_v12 = vadd.f32 %v1665_v34, %v1434_v55  ;;  %v1443_v47 = vpop.f32.mrb[65].mxu1 }
 0x196   :  { %v2236_v25 = vpop.f32.mrb[65].mxu0  ;;  %1948 = vst.msk [vmem:[%s3691_s3 + $0x18] sm:$0xff] %vm1944_vm2, %v2573_v2  ;;  %v1444_v16 = vpop.f32.mrb[66].mxu1 }
 0x197   :  { %v1668_v30 = vpop.f32.mrb[66].mxu0  ;;  %v1852_v44 = vadd.f32 %v3394_v54, %v1666_v12  ;;  %v1445_v24 = vadd.f32 %v1444_v16, %v3263_v58  ;;  %v1446_v27 = vpop.f32.mrb[67].mxu1 }
 0x198   :  { %v1669_v36 = vadd.f32 %v1668_v30, %v1437_v45  ;;  %v2237_v13 = vpop.f32.mrb[67].mxu0 }
 0x199   :  { %2578 = vtanh.f32 %v1852_v44 }
 0x19a   :  { %v1853_v52 = vadd.f32 %v3394_v54, %v1669_v36 }
 0x19b   :  { %v2575_v55 = vpop.eup %2574 }
 0x19c   :  { %2580 = vtanh.f32 %v1853_v52  ;;  %1949 = vst.msk [vmem:[%s3691_s3 + $0x20] sm:$0xff] %vm1944_vm2, %v2575_v55  ;;  %v1449_v35 = vpop.f32.mrb[68].mxu1  ;;  %v1673_v38 = vpop.f32.mrb[68].mxu0 }
 0x19d   :  { %v1450_v46 = vadd.f32 %v1449_v35, %v3273_v63  ;;  %v1674_v8 = vadd.f32 %v1673_v38, %v1442_v10  ;;  %v1451_v58 = vpop.f32.mrb[69].mxu1  ;;  %v2240_v45 = vpop.f32.mrb[69].mxu0 }
 0x19e   :  { %v2577_v11 = vpop.eup %2576  ;;  %v1452_v62 = vpop.f32.mrb[70].mxu1 }
 0x19f   :  { %1950 = vst.msk [vmem:[%s3691_s3 + $0x28] sm:$0xff] %vm1944_vm2, %v2577_v11  ;;  %v1676_v41 = vpop.f32.mrb[70].mxu0  ;;  %v1854_v18 = vadd.f32 %v3394_v54, %v1674_v8  ;;  %v1453_v57 = vadd.f32 %v1452_v62, %v3283_v6  ;;  %v1454_v12 = vpop.f32.mrb[71].mxu1 }
 0x1a0   :  { %v1677_v34 = vadd.f32 %v1676_v41, %v1445_v24  ;;  %v2241_v2 = vpop.f32.mrb[71].mxu0 }
 0x1a1   :  { %2582 = vtanh.f32 %v1854_v18 }
 0x1a2   :  { %v1855_v63 = vadd.f32 %v3394_v54, %v1677_v34 }
 0x1a3   :  { %v2579_v10 = vpop.eup %2578 }
 0x1a4   :  { %2584 = vtanh.f32 %v1855_v63  ;;  %1951 = vst.msk [vmem:[%s3691_s3 + $0x30] sm:$0xff] %vm1944_vm2, %v2579_v10  ;;  %v1457_v47 = vpop.f32.mrb[72].mxu1  ;;  %v1681_v25 = vpop.f32.mrb[72].mxu0 }
 0x1a5   :  { %v1458_v30 = vadd.f32 %v1457_v47, %v3293_v0  ;;  %v1682_v44 = vadd.f32 %v1681_v25, %v1450_v46  ;;  %v1459_v6 = vpop.f32.mrb[73].mxu1  ;;  %v2244_v24 = vpop.f32.mrb[73].mxu0 }
 0x1a6   :  { %v2581_v16 = vpop.eup %2580  ;;  %v1460_v36 = vpop.f32.mrb[74].mxu1 }
 0x1a7   :  { %1952 = vst.msk [vmem:[%s3691_s3 + $0x38] sm:$0xff] %vm1944_vm2, %v2581_v16  ;;  %v1684_v13 = vpop.f32.mrb[74].mxu0  ;;  %v1856_v27 = vadd.f32 %v3394_v54, %v1682_v44  ;;  %v1461_v52 = vadd.f32 %v1460_v36, %v3303_v22  ;;  %v1462_v38 = vpop.f32.mrb[75].mxu1 }
 0x1a8   :  { %v1685_v55 = vadd.f32 %v1684_v13, %v1453_v57  ;;  %v2245_v35 = vpop.f32.mrb[75].mxu0 }
 0x1a9   :  { %2586 = vtanh.f32 %v1856_v27 }
 0x1aa   :  { %v1857_v0 = vadd.f32 %v3394_v54, %v1685_v55 }
 0x1ab   :  { %v2583_v11 = vpop.eup %2582 }
 0x1ac   :  { %2588 = vtanh.f32 %v1857_v0  ;;  %1953 = vst.msk [vmem:[%s3691_s3 + $0x40] sm:$0xff] %vm1944_vm2, %v2583_v11  ;;  %v1465_v46 = vpop.f32.mrb[76].mxu1  ;;  %v1689_v8 = vpop.f32.mrb[76].mxu0 }
 0x1ad   :  { %v1466_v45 = vadd.f32 %v1465_v46, %v3313_v32  ;;  %v1690_v62 = vadd.f32 %v1689_v8, %v1458_v30  ;;  %v1467_v22 = vpop.f32.mrb[77].mxu1  ;;  %v2248_v41 = vpop.f32.mrb[77].mxu0 }
 0x1ae   :  { %v2585_v58 = vpop.eup %2584  ;;  %v1468_v18 = vpop.f32.mrb[78].mxu1 }
 0x1af   :  { %1954 = vst.msk [vmem:[%s3691_s3 + $0x48] sm:$0xff] %vm1944_vm2, %v2585_v58  ;;  %v1692_v57 = vpop.f32.mrb[78].mxu0  ;;  %v1858_v34 = vadd.f32 %v3394_v54, %v1690_v62  ;;  %v1469_v2 = vadd.f32 %v1468_v18, %v3323_v40  ;;  %v1470_v10 = vpop.f32.mrb[79].mxu1 }
 0x1b0   :  { %v1693_v12 = vadd.f32 %v1692_v57, %v1461_v52  ;;  %v2249_v63 = vpop.f32.mrb[79].mxu0 }
 0x1b1   :  { %2590 = vtanh.f32 %v1858_v34 }
 0x1b2   :  { %v1859_v32 = vadd.f32 %v3394_v54, %v1693_v12 }
 0x1b3   :  { %v2587_v47 = vpop.eup %2586 }
 0x1b4   :  { %2592 = vtanh.f32 %v1859_v32  ;;  %1955 = vst.msk [vmem:[%s3691_s3 + $0x50] sm:$0xff] %vm1944_vm2, %v2587_v47  ;;  %v1473_v25 = vpop.f32.mrb[80].mxu1  ;;  %v1697_v16 = vpop.f32.mrb[80].mxu0 }
 0x1b5   :  { %v1474_v44 = vadd.f32 %v1473_v25, %v3336_v50  ;;  %v1698_v6 = vadd.f32 %v1697_v16, %v1466_v45  ;;  %v1475_v40 = vpop.f32.mrb[81].mxu1  ;;  %v2252_v24 = vpop.f32.mrb[81].mxu0 }
 0x1b6   :  { %v2589_v30 = vpop.eup %2588  ;;  %v1476_v36 = vpop.f32.mrb[82].mxu1 }
 0x1b7   :  { %1956 = vst.msk [vmem:[%s3691_s3 + $0x58] sm:$0xff] %vm1944_vm2, %v2589_v30  ;;  %v1700_v13 = vpop.f32.mrb[82].mxu0  ;;  %v1860_v27 = vadd.f32 %v3394_v54, %v1698_v6  ;;  %v1477_v52 = vadd.f32 %v1476_v36, %v3346_v60  ;;  %v1478_v38 = vpop.f32.mrb[83].mxu1 }
 0x1b8   :  { %v1701_v55 = vadd.f32 %v1700_v13, %v1469_v2  ;;  %v2253_v35 = vpop.f32.mrb[83].mxu0 }
 0x1b9   :  { %2594 = vtanh.f32 %v1860_v27 }
 0x1ba   :  { %v1861_v50 = vadd.f32 %v3394_v54, %v1701_v55 }
 0x1bb   :  { %v2591_v0 = vpop.eup %2590 }
 0x1bc   :  { %2596 = vtanh.f32 %v1861_v50  ;;  %1957 = vst.msk [vmem:[%s3691_s3 + $0x60] sm:$0xff] %vm1944_vm2, %v2591_v0  ;;  %v1481_v11 = vpop.f32.mrb[84].mxu1  ;;  %v1705_v46 = vpop.f32.mrb[84].mxu0 }
 0x1bd   :  { %v1482_v58 = vadd.f32 %v1481_v11, %v3353_v4  ;;  %v1706_v45 = vadd.f32 %v1705_v46, %v1474_v44  ;;  %v1483_v60 = vpop.f32.mrb[85].mxu1  ;;  %v2256_v62 = vpop.f32.mrb[85].mxu0 }
 0x1be   :  { %v2593_v8 = vpop.eup %2592  ;;  %v1484_v22 = vpop.f32.mrb[86].mxu1 }
 0x1bf   :  { %1958 = vst.msk [vmem:[%s3691_s3 + $0x68] sm:$0xff] %vm1944_vm2, %v2593_v8  ;;  %v1708_v41 = vpop.f32.mrb[86].mxu0  ;;  %v1862_v18 = vadd.f32 %v3394_v54, %v1706_v45  ;;  %v1485_v57 = vadd.f32 %v1484_v22, %v3360_v17  ;;  %v1486_v12 = vpop.f32.mrb[87].mxu1 }
 0x1c0   :  { %v1709_v34 = vadd.f32 %v1708_v41, %v1477_v52  ;;  %v2257_v2 = vpop.f32.mrb[87].mxu0 }
 0x1c1   :  { %2598 = vtanh.f32 %v1862_v18 }
 0x1c2   :  { %v1863_v4 = vadd.f32 %v3394_v54, %v1709_v34 }
 0x1c3   :  { %v2595_v63 = vpop.eup %2594 }
 0x1c4   :  { %2600 = vtanh.f32 %v1863_v4  ;;  %1959 = vst.msk [vmem:[%s3691_s3 + $0x70] sm:$0xff] %vm1944_vm2, %v2595_v63  ;;  %v1489_v10 = vpop.f32.mrb[88].mxu1  ;;  %v1713_v32 = vpop.f32.mrb[88].mxu0 }
 0x1c5   :  { %v1490_v25 = vadd.f32 %v1489_v10, %v3367_v28  ;;  %v1714_v16 = vadd.f32 %v1713_v32, %v1482_v58  ;;  %v1491_v17 = vpop.f32.mrb[89].mxu1  ;;  %v2260_v30 = vpop.f32.mrb[89].mxu0 }
 0x1c6   :  { %v2597_v47 = vpop.eup %2596  ;;  %v1492_v44 = vpop.f32.mrb[90].mxu1 }
 0x1c7   :  { %1960 = vst.msk [vmem:[%s3691_s3 + $0x78] sm:$0xff] %vm1944_vm2, %v2597_v47  ;;  %v1716_v6 = vpop.f32.mrb[90].mxu0  ;;  %v1864_v40 = vadd.f32 %v3394_v54, %v1714_v16  ;;  %v1493_v24 = vadd.f32 %v1492_v44, %v3374_v39  ;;  %v1494_v27 = vpop.f32.mrb[91].mxu1 }
 0x1c8   :  { %v1717_v36 = vadd.f32 %v1716_v6, %v1485_v57  ;;  %v2261_v13 = vpop.f32.mrb[91].mxu0 }
 0x1c9   :  { %2602 = vtanh.f32 %v1864_v40 }
 0x1ca   :  { %v1865_v28 = vadd.f32 %v3394_v54, %v1717_v36 }
 0x1cb   :  { %v2599_v52 = vpop.eup %2598 }
 0x1cc   :  { %2604 = vtanh.f32 %v1865_v28  ;;  %1961 = vst.msk [vmem:[%s3691_s3 + $0x80] sm:$0xff] %vm1944_vm2, %v2599_v52  ;;  %v1497_v55 = vpop.f32.mrb[92].mxu1  ;;  %v1721_v35 = vpop.f32.mrb[92].mxu0 }
 0x1cd   :  { %v1498_v50 = vadd.f32 %v1497_v55, %v3379_v49  ;;  %v1722_v0 = vadd.f32 %v1721_v35, %v1490_v25  ;;  %v1499_v39 = vpop.f32.mrb[93].mxu1  ;;  %v2264_v11 = vpop.f32.mrb[93].mxu0 }
 0x1ce   :  { %v2601_v38 = vpop.eup %2600  ;;  %v1500_v46 = vpop.f32.mrb[94].mxu1 }
 0x1cf   :  { %1962 = vst.msk [vmem:[%s3691_s3 + $0x88] sm:$0xff] %vm1944_vm2, %v2601_v38  ;;  %v1724_v8 = vpop.f32.mrb[94].mxu0  ;;  %v1866_v58 = vadd.f32 %v3394_v54, %v1722_v0  ;;  %v1501_v45 = vadd.f32 %v1500_v46, %v3383_v56  ;;  %v1502_v22 = vpop.f32.mrb[95].mxu1 }
 0x1d0   :  { %v1725_v60 = vadd.f32 %v1724_v8, %v1493_v24  ;;  %v2265_v62 = vpop.f32.mrb[95].mxu0 }
 0x1d1   :  { %2606 = vtanh.f32 %v1866_v58 }
 0x1d2   :  { %v1867_v49 = vadd.f32 %v3394_v54, %v1725_v60 }
 0x1d3   :  { %v2603_v41 = vpop.eup %2602 }
 0x1d4   :  { %2608 = vtanh.f32 %v1867_v49  ;;  %1963 = vst.msk [vmem:[%s3691_s3 + $0x90] sm:$0xff] %vm1944_vm2, %v2603_v41  ;;  %v1505_v18 = vpop.f32.mrb[96].mxu1  ;;  %v1729_v57 = vpop.f32.mrb[96].mxu0 }
 0x1d5   :  { %v1506_v2 = vadd.f32 %v1505_v18, %v3385_v3  ;;  %v1730_v12 = vadd.f32 %v1729_v57, %v1498_v50  ;;  %v1507_v56 = vpop.f32.mrb[97].mxu1  ;;  %v2268_v4 = vpop.f32.mrb[97].mxu0 }
 0x1d6   :  { %v2605_v34 = vpop.eup %2604  ;;  %v1508_v63 = vpop.f32.mrb[98].mxu1 }
 0x1d7   :  { %1964 = vst.msk [vmem:[%s3691_s3 + $0x98] sm:$0xff] %vm1944_vm2, %v2605_v34  ;;  %v1732_v10 = vpop.f32.mrb[98].mxu0  ;;  %v1868_v32 = vadd.f32 %v3394_v54, %v1730_v12  ;;  %v1509_v47 = vadd.f32 %v1508_v63, %v3388_v21  ;;  %v1510_v17 = vpop.f32.mrb[99].mxu1 }
 0x1d8   :  { %v1733_v25 = vadd.f32 %v1732_v10, %v1501_v45  ;;  %v2269_v16 = vpop.f32.mrb[99].mxu0 }
 0x1d9   :  { %2610 = vtanh.f32 %v1868_v32 }
 0x1da   :  { %v1869_v3 = vadd.f32 %v3394_v54, %v1733_v25 }
 0x1db   :  { %v2607_v30 = vpop.eup %2606 }
 0x1dc   :  { %2612 = vtanh.f32 %v1869_v3  ;;  %1965 = vst.msk [vmem:[%s3691_s3 + $0xa0] sm:$0xff] %vm1944_vm2, %v2607_v30  ;;  %v1513_v44 = vpop.f32.mrb[100].mxu1  ;;  %v1737_v6 = vpop.f32.mrb[100].mxu0 }
 0x1dd   :  { %v1514_v24 = vadd.f32 %v1513_v44, %v3175_v9  ;;  %v1738_v36 = vadd.f32 %v1737_v6, %v1506_v2  ;;  %v1515_v21 = vpop.f32.mrb[101].mxu1  ;;  %v2272_v13 = vpop.f32.mrb[101].mxu0 }
 0x1de   :  { %v2609_v40 = vpop.eup %2608  ;;  %v1516_v27 = vpop.f32.mrb[102].mxu1 }
 0x1df   :  { %1966 = vst.msk [vmem:[%s3691_s3 + $0xa8] sm:$0xff] %vm1944_vm2, %v2609_v40  ;;  %v1740_v28 = vpop.f32.mrb[102].mxu0  ;;  %v1870_v52 = vadd.f32 %v3394_v54, %v1738_v36  ;;  %v1517_v55 = vadd.f32 %v1516_v27, %v3185_v14  ;;  %v1518_v50 = vpop.f32.mrb[103].mxu1 }
 0x1e0   :  { %v1741_v35 = vadd.f32 %v1740_v28, %v1509_v47  ;;  %v2273_v38 = vpop.f32.mrb[103].mxu0 }
 0x1e1   :  { %2614 = vtanh.f32 %v1870_v52 }
 0x1e2   :  { %v1871_v9 = vadd.f32 %v3394_v54, %v1741_v35 }
 0x1e3   :  { %v2611_v0 = vpop.eup %2610 }
 0x1e4   :  { %2616 = vtanh.f32 %v1871_v9  ;;  %1967 = vst.msk [vmem:[%s3691_s3 + $0xb0] sm:$0xff] %vm1944_vm2, %v2611_v0  ;;  %v1521_v39 = vpop.f32.mrb[104].mxu1  ;;  %v1745_v11 = vpop.f32.mrb[104].mxu0 }
 0x1e5   :  { %v1522_v8 = vadd.f32 %v1521_v39, %v3195_v19  ;;  %v1746_v58 = vadd.f32 %v1745_v11, %v1514_v24  ;;  %v1523_v14 = vpop.f32.mrb[105].mxu1  ;;  %v2276_v45 = vpop.f32.mrb[105].mxu0 }
 0x1e6   :  { %v2613_v46 = vpop.eup %2612  ;;  %v1524_v60 = vpop.f32.mrb[106].mxu1 }
 0x1e7   :  { %1968 = vst.msk [vmem:[%s3691_s3 + $0xb8] sm:$0xff] %vm1944_vm2, %v2613_v46  ;;  %v1748_v62 = vpop.f32.mrb[106].mxu0  ;;  %v1872_v22 = vadd.f32 %v3394_v54, %v1746_v58  ;;  %v1525_v49 = vadd.f32 %v1524_v60, %v3205_v26  ;;  %v1526_v57 = vpop.f32.mrb[107].mxu1 }
 0x1e8   :  { %v1749_v41 = vadd.f32 %v1748_v62, %v1517_v55  ;;  %v2277_v18 = vpop.f32.mrb[107].mxu0 }
 0x1e9   :  { %2618 = vtanh.f32 %v1872_v22 }
 0x1ea   :  { %v1873_v19 = vadd.f32 %v3394_v54, %v1749_v41 }
 0x1eb   :  { %v2615_v34 = vpop.eup %2614 }
 0x1ec   :  { %2620 = vtanh.f32 %v1873_v19  ;;  %1969 = vst.msk [vmem:[%s3691_s3 + $0xc0] sm:$0xff] %vm1944_vm2, %v2615_v34  ;;  %v1529_v2 = vpop.f32.mrb[108].mxu1  ;;  %v1753_v12 = vpop.f32.mrb[108].mxu0 }
 0x1ed   :  { %v1530_v4 = vadd.f32 %v1529_v2, %v3215_v31  ;;  %v1754_v63 = vadd.f32 %v1753_v12, %v1522_v8  ;;  %v1531_v26 = vpop.f32.mrb[109].mxu1  ;;  %v2280_v10 = vpop.f32.mrb[109].mxu0 }
 0x1ee   :  { %v2617_v56 = vpop.eup %2616  ;;  %v1532_v32 = vpop.f32.mrb[110].mxu1 }
 0x1ef   :  { %1970 = vst.msk [vmem:[%s3691_s3 + $0xc8] sm:$0xff] %vm1944_vm2, %v2617_v56  ;;  %v1756_v47 = vpop.f32.mrb[110].mxu0  ;;  %v1874_v25 = vadd.f32 %v3394_v54, %v1754_v63  ;;  %v1533_v16 = vadd.f32 %v1532_v32, %v3225_v37  ;;  %v1534_v30 = vpop.f32.mrb[111].mxu1 }
 0x1f0   :  { %v1757_v17 = vadd.f32 %v1756_v47, %v1525_v49  ;;  %v2281_v3 = vpop.f32.mrb[111].mxu0 }
 0x1f1   :  { %2622 = vtanh.f32 %v1874_v25 }
 0x1f2   :  { %v1875_v31 = vadd.f32 %v3394_v54, %v1757_v17 }
 0x1f3   :  { %v2619_v44 = vpop.eup %2618 }
 0x1f4   :  { %2624 = vtanh.f32 %v1875_v31  ;;  %1971 = vst.msk [vmem:[%s3691_s3 + $0xd0] sm:$0xff] %vm1944_vm2, %v2619_v44  ;;  %v1537_v6 = vpop.f32.mrb[112].mxu1  ;;  %v1761_v40 = vpop.f32.mrb[112].mxu0 }
 0x1f5   :  { %v1538_v36 = vadd.f32 %v1537_v6, %v3235_v42  ;;  %v1762_v21 = vadd.f32 %v1761_v40, %v1530_v4  ;;  %v1539_v37 = vpop.f32.mrb[113].mxu1  ;;  %v2284_v13 = vpop.f32.mrb[113].mxu0 }
 0x1f6   :  { %v2621_v24 = vpop.eup %2620  ;;  %v1540_v27 = vpop.f32.mrb[114].mxu1 }
 0x1f7   :  { %1972 = vst.msk [vmem:[%s3691_s3 + $0xd8] sm:$0xff] %vm1944_vm2, %v2621_v24  ;;  %v1764_v28 = vpop.f32.mrb[114].mxu0  ;;  %v1876_v52 = vadd.f32 %v3394_v54, %v1762_v21  ;;  %v1541_v55 = vadd.f32 %v1540_v27, %v3245_v48  ;;  %v1542_v50 = vpop.f32.mrb[115].mxu1 }
 0x1f8   :  { %v1765_v35 = vadd.f32 %v1764_v28, %v1533_v16  ;;  %v2285_v38 = vpop.f32.mrb[115].mxu0 }
 0x1f9   :  { %2626 = vtanh.f32 %v1876_v52 }
 0x1fa   :  { %v1877_v42 = vadd.f32 %v3394_v54, %v1765_v35 }
 0x1fb   :  { %v2623_v9 = vpop.eup %2622 }
 0x1fc   :  { %2628 = vtanh.f32 %v1877_v42  ;;  %1973 = vst.msk [vmem:[%s3691_s3 + $0xe0] sm:$0xff] %vm1944_vm2, %v2623_v9  ;;  %v1545_v0 = vpop.f32.mrb[116].mxu1  ;;  %v1769_v39 = vpop.f32.mrb[116].mxu0 }
 0x1fd   :  { %v1546_v46 = vadd.f32 %v1545_v0, %v3255_v53  ;;  %v1770_v8 = vadd.f32 %v1769_v39, %v1538_v36  ;;  %v1547_v48 = vpop.f32.mrb[117].mxu1  ;;  %v2288_v58 = vpop.f32.mrb[117].mxu0 }
 0x1fe   :  { %v2625_v11 = vpop.eup %2624  ;;  %v1548_v14 = vpop.f32.mrb[118].mxu1 }
 0x1ff   :  { %1974 = vst.msk [vmem:[%s3691_s3 + $0xe8] sm:$0xff] %vm1944_vm2, %v2625_v11  ;;  %v1772_v45 = vpop.f32.mrb[118].mxu0  ;;  %v1878_v60 = vadd.f32 %v3394_v54, %v1770_v8  ;;  %v1549_v62 = vadd.f32 %v1548_v14, %v3265_v59  ;;  %v1550_v41 = vpop.f32.mrb[119].mxu1 }
 0x200   :  { %v1773_v22 = vadd.f32 %v1772_v45, %v1541_v55  ;;  %v2289_v49 = vpop.f32.mrb[119].mxu0 }
 0x201   :  { %2630 = vtanh.f32 %v1878_v60 }
 0x202   :  { %v1879_v53 = vadd.f32 %v3394_v54, %v1773_v22 }
 0x203   :  { %v2627_v18 = vpop.eup %2626 }
 0x204   :  { %2632 = vtanh.f32 %v1879_v53  ;;  %1975 = vst.msk [vmem:[%s3691_s3 + $0xf0] sm:$0xff] %vm1944_vm2, %v2627_v18  ;;  %v1553_v57 = vpop.f32.mrb[120].mxu1  ;;  %v1777_v19 = vpop.f32.mrb[120].mxu0 }
 0x205   :  { %v1554_v2 = vadd.f32 %v1553_v57, %v3275_v1  ;;  %v1778_v12 = vadd.f32 %v1777_v19, %v1546_v46  ;;  %v1555_v59 = vpop.f32.mrb[121].mxu1  ;;  %v2292_v56 = vpop.f32.mrb[121].mxu0 }
 0x206   :  { %v2629_v34 = vpop.eup %2628  ;;  %v1556_v4 = vpop.f32.mrb[122].mxu1 }
 0x207   :  { %1976 = vst.msk [vmem:[%s3691_s3 + $0xf8] sm:$0xff] %vm1944_vm2, %v2629_v34  ;;  %v1780_v63 = vpop.f32.mrb[122].mxu0  ;;  %v1880_v26 = vadd.f32 %v3394_v54, %v1778_v12  ;;  %v1557_v10 = vadd.f32 %v1556_v4, %v3285_v7  ;;  %v1558_v25 = vpop.f32.mrb[123].mxu1 }
 0x208   :  { %v1781_v32 = vadd.f32 %v1780_v63, %v1549_v62  ;;  %v2293_v47 = vpop.f32.mrb[123].mxu0 }
 0x209   :  { %2634 = vtanh.f32 %v1880_v26 }
 0x20a   :  { %v1881_v1 = vadd.f32 %v3394_v54, %v1781_v32 }
 0x20b   :  { %v2631_v16 = vpop.eup %2630 }
 0x20c   :  { %2636 = vtanh.f32 %v1881_v1  ;;  %1977 = vst.msk [vmem:[%s3691_s3 + $0x100] sm:$0xff] %vm1944_vm2, %v2631_v16  ;;  %v1561_v17 = vpop.f32.mrb[124].mxu1  ;;  %v1785_v3 = vpop.f32.mrb[124].mxu0 }
 0x20d   :  { %v1562_v31 = vadd.f32 %v1561_v17, %v3295_v15  ;;  %v1786_v44 = vadd.f32 %v1785_v3, %v1554_v2  ;;  %v1563_v7 = vpop.f32.mrb[125].mxu1  ;;  %v2296_v6 = vpop.f32.mrb[125].mxu0 }
 0x20e   :  { %v2633_v30 = vpop.eup %2632  ;;  %v1564_v40 = vpop.f32.mrb[126].mxu1 }
 0x20f   :  { %1978 = vst.msk [vmem:[%s3691_s3 + $0x108] sm:$0xff] %vm1944_vm2, %v2633_v30  ;;  %v1788_v24 = vpop.f32.mrb[126].mxu0  ;;  %v1882_v36 = vadd.f32 %v3394_v54, %v1786_v44  ;;  %v1565_v21 = vadd.f32 %v1564_v40, %v3305_v23  ;;  %v1566_v27 = vpop.f32.mrb[127].mxu1 }
 0x210   :  { %v1789_v37 = vadd.f32 %v1788_v24, %v1557_v10  ;;  %v2297_v13 = vpop.f32.mrb[127].mxu0 }
 0x211   :  { %2638 = vtanh.f32 %v1882_v36  ;;  %v3694_v13 = vld [vmem:[#allocation2_spill] sm:$0xff] }
 0x212   :  { %v1883_v15 = vadd.f32 %v3394_v54, %v1789_v37 }
 0x213   :  { %v2635_v28 = vpop.eup %2634 }
 0x214   :  { %2640 = vtanh.f32 %v1883_v15  ;;  %1979 = vst.msk [vmem:[%s3691_s3 + $0x110] sm:$0xff] %vm1944_vm2, %v2635_v28  ;;  %v1569_v52 = vpop.f32.mrb[128].mxu1  ;;  %v1793_v55 = vpop.f32.mrb[128].mxu0 }
 0x215   :  { %v1570_v38 = vadd.f32 %v1569_v52, %v3315_v33  ;;  %v1794_v50 = vadd.f32 %v1793_v55, %v1562_v31  ;;  %v1571_v23 = vpop.f32.mrb[129].mxu1  ;;  %v2300_v42 = vpop.f32.mrb[129].mxu0 }
 0x216   :  { %v2637_v35 = vpop.eup %2636  ;;  %v1572_v9 = vpop.f32.mrb[130].mxu1  ;;  %v3695_v23 = vld [vmem:[#allocation3_spill] sm:$0xff] }
 0x217   :  { %1980 = vst.msk [vmem:[%s3691_s3 + $0x118] sm:$0xff] %vm1944_vm2, %v2637_v35  ;;  %v1796_v0 = vpop.f32.mrb[130].mxu0  ;;  %v1884_v39 = vadd.f32 %v3394_v54, %v1794_v50  ;;  %v1573_v11 = vadd.f32 %v1572_v9, %v3325_v43  ;;  %v1574_v48 = vpop.f32.mrb[131].mxu1 }
 0x218   :  { %v1797_v46 = vadd.f32 %v1796_v0, %v1565_v21  ;;  %v2301_v8 = vpop.f32.mrb[131].mxu0 }
 0x219   :  { %2642 = vtanh.f32 %v1884_v39 }
 0x21a   :  { %v1885_v33 = vadd.f32 %v3394_v54, %v1797_v46 }
 0x21b   :  { %v2639_v58 = vpop.eup %2638 }
 0x21c   :  { %2644 = vtanh.f32 %v1885_v33  ;;  %1981 = vst.msk [vmem:[%s3691_s3 + $0x120] sm:$0xff] %vm1944_vm2, %v2639_v58  ;;  %v1577_v14 = vpop.f32.mrb[132].mxu1  ;;  %v1801_v45 = vpop.f32.mrb[132].mxu0 }
 0x21d   :  { %v1578_v62 = vadd.f32 %v1577_v14, %v3338_v51  ;;  %v1802_v22 = vadd.f32 %v1801_v45, %v1570_v38  ;;  %v1579_v43 = vpop.f32.mrb[133].mxu1  ;;  %v2304_v49 = vpop.f32.mrb[133].mxu0 }
 0x21e   :  { %v2641_v60 = vpop.eup %2640  ;;  %v1580_v41 = vpop.f32.mrb[134].mxu1 }
 0x21f   :  { %1982 = vst.msk [vmem:[%s3691_s3 + $0x128] sm:$0xff] %vm1944_vm2, %v2641_v60  ;;  %v1804_v53 = vpop.f32.mrb[134].mxu0  ;;  %v1886_v18 = vadd.f32 %v3394_v54, %v1802_v22  ;;  %v1581_v57 = vadd.f32 %v1580_v41, %v3348_v61  ;;  %v1582_v2 = vpop.f32.mrb[135].mxu1 }
 0x220   :  { %v1805_v19 = vadd.f32 %v1804_v53, %v1573_v11  ;;  %v2305_v34 = vpop.f32.mrb[135].mxu0 }
 0x221   :  { %2646 = vtanh.f32 %v1886_v18 }
 0x222   :  { %v1887_v51 = vadd.f32 %v3394_v54, %v1805_v19 }
 0x223   :  { %v2643_v12 = vpop.eup %2642 }
 0x224   :  { %2648 = vtanh.f32 %v1887_v51  ;;  %1983 = vst.msk [vmem:[%s3691_s3 + $0x130] sm:$0xff] %vm1944_vm2, %v2643_v12  ;;  %v1585_v59 = vpop.f32.mrb[136].mxu1  ;;  %v1809_v56 = vpop.f32.mrb[136].mxu0 }
 0x225   :  { %v1586_v63 = vadd.f32 %v1585_v59, %v3355_v5  ;;  %v1810_v26 = vadd.f32 %v1809_v56, %v1578_v62  ;;  %v1587_v61 = vpop.f32.mrb[137].mxu1  ;;  %v2308_v10 = vpop.f32.mrb[137].mxu0 }
 0x226   :  { %v2645_v4 = vpop.eup %2644  ;;  %v1588_v32 = vpop.f32.mrb[138].mxu1 }
 0x227   :  { %1984 = vst.msk [vmem:[%s3691_s3 + $0x138] sm:$0xff] %vm1944_vm2, %v2645_v4  ;;  %v1812_v47 = vpop.f32.mrb[138].mxu0  ;;  %v1888_v25 = vadd.f32 %v3394_v54, %v1810_v26  ;;  %v1589_v1 = vadd.f32 %v1588_v32, %v3362_v20  ;;  %v1590_v3 = vpop.f32.mrb[139].mxu1 }
 0x228   :  { %v1813_v16 = vadd.f32 %v1812_v47, %v1581_v57  ;;  %v2309_v17 = vpop.f32.mrb[139].mxu0 }
 0x229   :  { %2650 = vtanh.f32 %v1888_v25 }
 0x22a   :  { %v1889_v5 = vadd.f32 %v3394_v54, %v1813_v16 }
 0x22b   :  { %v2647_v30 = vpop.eup %2646 }
 0x22c   :  { %2652 = vtanh.f32 %v1889_v5  ;;  %1985 = vst.msk [vmem:[%s3691_s3 + $0x140] sm:$0xff] %vm1944_vm2, %v2647_v30  ;;  %v1593_v31 = vpop.f32.mrb[140].mxu1  ;;  %v1817_v44 = vpop.f32.mrb[140].mxu0 }
 0x22d   :  { %v1594_v6 = vadd.f32 %v1593_v31, %v3369_v29  ;;  %v1818_v40 = vadd.f32 %v1817_v44, %v1586_v63  ;;  %v1595_v20 = vpop.f32.mrb[141].mxu1  ;;  %v2312_v24 = vpop.f32.mrb[141].mxu0 }
 0x22e   :  { %v2649_v7 = vpop.eup %2648  ;;  %v1596_v36 = vpop.f32.mrb[142].mxu1 }
 0x22f   :  { %1986 = vst.msk [vmem:[%s3691_s3 + $0x148] sm:$0xff] %vm1944_vm2, %v2649_v7  ;;  %v1820_v21 = vpop.f32.mrb[142].mxu0  ;;  %v1890_v37 = vadd.f32 %v3394_v54, %v1818_v40  ;;  %v1597_v27 = vadd.f32 %v1596_v36, %v3694_v13  ;;  %v1598_v52 = vpop.f32.mrb[143].mxu1 }
 0x230   :  { %v1821_v15 = vadd.f32 %v1820_v21, %v1589_v1  ;;  %v2313_v28 = vpop.f32.mrb[143].mxu0 }
 0x231   :  { %2654 = vtanh.f32 %v1890_v37 }
 0x232   :  { %v1891_v29 = vadd.f32 %v3394_v54, %v1821_v15 }
 0x233   :  { %v2651_v55 = vpop.eup %2650 }
 0x234   :  { %2656 = vtanh.f32 %v1891_v29  ;;  %1987 = vst.msk [vmem:[%s3691_s3 + $0x150] sm:$0xff] %vm1944_vm2, %v2651_v55  ;;  %v1601_v35 = vpop.f32.mrb[144].mxu1  ;;  %v1825_v38 = vpop.f32.mrb[144].mxu0 }
 0x235   :  { %v1602_v42 = vadd.f32 %v1601_v35, %v3695_v23  ;;  %v1826_v9 = vadd.f32 %v1825_v38, %v1594_v6  ;;  %v2316_v0 = vpop.f32.mrb[145].mxu0  ;;  %v1603_v39 = vpop.f32.mrb[145].mxu1 }
 0x236   :  { %v2653_v50 = vpop.eup %2652  ;;  %v1828_v11 = vpop.f32.mrb[146].mxu0 }
 0x237   :  { %1988 = vst.msk [vmem:[%s3691_s3 + $0x158] sm:$0xff] %vm1944_vm2, %v2653_v50  ;;  %v1604_v46 = vpop.f32.mrb[146].mxu1  ;;  %v1892_v8 = vadd.f32 %v3394_v54, %v1826_v9  ;;  %v1829_v48 = vadd.f32 %v1828_v11, %v1597_v27  ;;  %v2317_v33 = vpop.f32.mrb[147].mxu0 }
 0x238   :  { %v1605_v58 = vpop.f32.mrb[147].mxu1 }
 0x239   :  { %2658 = vtanh.f32 %v1892_v8  ;;  %v1893_v14 = vadd.f32 %v3394_v54, %v1829_v48 }
 0x23b   :  { %v2655_v45 = vpop.eup %2654  ;;  %2660 = vtanh.f32 %v1893_v14 }
 0x23c   :  { %1989 = vst.msk [vmem:[%s3691_s3 + $0x160] sm:$0xff] %vm1944_vm2, %v2655_v45  ;;  %v1833_v60 = vpop.f32.mrb[148].mxu0 }
 0x23d   :  { %v1834_v22 = vadd.f32 %v1833_v60, %v1602_v42  ;;  %v2320_v43 = vpop.f32.mrb[149].mxu0 }
 0x23e   :  { %v2657_v62 = vpop.eup %2656  ;;  %v1836_v49 = vpop.f32.mrb[150].mxu0 }
 0x23f   :  { %1990 = vst.msk [vmem:[%s3691_s3 + $0x168] sm:$0xff] %vm1944_vm2, %v2657_v62  ;;  %v1894_v41 = vadd.f32 %v3394_v54, %v1834_v22  ;;  %v2321_v53 = vpop.f32.mrb[151].mxu0 }
 0x241   :  { %2662 = vtanh.f32 %v1894_v41 }
 0x243   :  { %v2659_v18 = vpop.eup %2658 }
 0x244   :  { %1991 = vst.msk [vmem:[%s3691_s3 + $0x170] sm:$0xff] %vm1944_vm2, %v2659_v18 }
 0x245   :  { %v2661_v57 = vpop.eup %2660 }
 0x246   :  { %1992 = vst.msk [vmem:[%s3691_s3 + $0x178] sm:$0xff] %vm1944_vm2, %v2661_v57 }
 0x24b   :  { %v2663_v19 = vpop.eup %2662 }
 0x24c   :  { %1993 = vst.msk [vmem:[%s3691_s3 + $0x180] sm:$0xff] %vm1944_vm2, %v2663_v19 }

</bundles_post_ra>
